<compile_context>
chip_gen: v6e
topology: v6e:2x2x1
jax: 0.10.0
libtpu: 0.0.40
codegen_flags: <defaults>
</compile_context>

<pallas_src>
import functools

import jax
import jax.numpy as jnp
from jax.experimental import pallas as pl
from jax.experimental.pallas import tpu as pltpu


# ----------------------------------------------------------------------------
# Pallas kernel: out = relu(A @ B + bias)  (bf16 operands, f32 accumulate)
# ----------------------------------------------------------------------------
def _matmul_bias_relu_kernel(a_ref, b_ref, bias_ref, o_ref):
    acc = jnp.dot(a_ref[...], b_ref[...], preferred_element_type=jnp.float32)
    acc = acc + bias_ref[...]            # (1, tn) f32 broadcasts over rows
    acc = jnp.maximum(acc, 0.0)
    o_ref[...] = acc.astype(o_ref.dtype)


def _pick_tiles(M, N):
    """Pick (tm, tn) so every layer gets >= 2 grid steps (pipelining + megacore)
    while tiles stay (8,128)-aligned or full-dim."""
    if N > 128 and N % 256 == 0:
        tn = N // 2                      # conv3: 256 -> 128, conv4: 512 -> 256
    else:
        tn = N
    n_blocks = N // tn
    tm = M
    for cand in (512, 256, 128, 64, 32, 16, 8):
        if M % cand == 0 and (M // cand) * n_blocks >= 2:
            tm = cand
            break
    return tm, tn


def matmul_bias_relu(a, b, bias, out_dtype=jnp.bfloat16):
    """a: [M, K] bf16, b: [K, N] bf16, bias: [1, N] f32 -> relu(a @ b + bias)."""
    M, K = a.shape
    _, N = b.shape
    tm, tn = _pick_tiles(M, N)
    grid = (M // tm, N // tn)
    return pl.pallas_call(
        _matmul_bias_relu_kernel,
        out_shape=jax.ShapeDtypeStruct((M, N), out_dtype),
        grid=grid,
        in_specs=[
            pl.BlockSpec((tm, K), lambda i, j: (i, 0)),
            pl.BlockSpec((K, tn), lambda i, j: (0, j)),
            pl.BlockSpec((1, tn), lambda i, j: (0, j)),
        ],
        out_specs=pl.BlockSpec((tm, tn), lambda i, j: (i, j)),
        compiler_params=pltpu.CompilerParams(
            dimension_semantics=("parallel", "parallel"),
            vmem_limit_bytes=32 * 1024 * 1024,
        ),
    )(a, b, bias)


# ----------------------------------------------------------------------------
# Pallas kernel: FC (N=1) + sigmoid — mul + lane reduction, no padded matmul.
# ----------------------------------------------------------------------------
def _fc_sigmoid_kernel(a_ref, w_ref, bias_ref, o_ref):
    a = a_ref[...].astype(jnp.float32)   # [B, K]
    w = w_ref[...].astype(jnp.float32)   # [1, K]
    s = jnp.sum(a * w, axis=1, keepdims=True) + bias_ref[...]
    o_ref[...] = jax.nn.sigmoid(s)


def fc_sigmoid(x_flat, w_row, bias):
    B, _ = x_flat.shape
    # Whole arrays fit trivially in VMEM -> single-invocation pallas_call.
    return pl.pallas_call(
        _fc_sigmoid_kernel,
        out_shape=jax.ShapeDtypeStruct((B, 1), jnp.float32),
    )(x_flat, w_row, bias)


# ----------------------------------------------------------------------------
# Glue: NHWC im2col (pad + 16 strided slices + stack); no transposes.
# Patch K-axis ordering is (kh, kw, C), matching the prepared weight layout.
# ----------------------------------------------------------------------------
def _im2col_nhwc(x, k=4, stride=2, pad=1):
    B, H, W, C = x.shape
    Ho = (H + 2 * pad - k) // stride + 1
    Wo = (W + 2 * pad - k) // stride + 1
    xp = jnp.pad(x, ((0, 0), (pad, pad), (pad, pad), (0, 0)))
    slabs = []
    for kh in range(k):
        for kw in range(k):
            slabs.append(
                xp[:, kh:kh + stride * Ho:stride, kw:kw + stride * Wo:stride, :])
    p = jnp.stack(slabs, axis=3)                       # [B, Ho, Wo, 16, C]
    return p.reshape(B * Ho * Wo, k * k * C), Ho, Wo


# ----------------------------------------------------------------------------
# Parameter preparation (done ONCE, outside the per-forward path)
# ----------------------------------------------------------------------------
def prepare_params(params):
    """PyTorch-layout params -> matmul-ready bf16 weights / (1,N) f32 biases."""
    prepped = {}
    for idx in range(1, 5):
        w = params[f"w{idx}"]                          # [C_out, C_in, 4, 4]
        c_out = w.shape[0]
        # K-axis order (kh, kw, C_in) to match the NHWC im2col patches.
        w_mat = w.transpose(2, 3, 1, 0).reshape(-1, c_out)
        prepped[f"w{idx}"] = w_mat.astype(jnp.bfloat16)
        prepped[f"b{idx}"] = params[f"b{idx}"].reshape(1, c_out).astype(jnp.float32)
    # PyTorch flattens NCHW (c, h, w); we keep NHWC, so permute the FC weight's
    # K axis once to (h, w, c) order.
    w_fc = params["w_fc"].reshape(1, 512, 4, 4).transpose(0, 2, 3, 1).reshape(1, -1)
    prepped["w_fc"] = w_fc.astype(jnp.bfloat16)
    prepped["b_fc"] = params["b_fc"].reshape(1, 1).astype(jnp.float32)
    return prepped


# ----------------------------------------------------------------------------
# Full Discriminator forward (input NCHW like PyTorch; NHWC internally)
# ----------------------------------------------------------------------------
def discriminator_forward(x_nchw, prepped):
    x = jnp.transpose(x_nchw, (0, 2, 3, 1)).astype(jnp.bfloat16)  # NHWC once
    B = x.shape[0]
    for idx in range(1, 5):
        patches, h_out, w_out = _im2col_nhwc(x, k=4, stride=2, pad=1)
        w_mat = prepped[f"w{idx}"]
        y = matmul_bias_relu(patches, w_mat, prepped[f"b{idx}"])
        x = y.reshape(B, h_out, w_out, w_mat.shape[1])            # stay NHWC
    x_flat = x.reshape(B, -1)                                      # NHWC flatten
    return fc_sigmoid(x_flat, prepped["w_fc"], prepped["b_fc"])    # [B, 1] f32


def init_params(key):
    ks = jax.random.split(key, 10)
    scale = 0.05
    return {
        "w1": scale * jax.random.normal(ks[0], (64, 3, 4, 4), jnp.float32),
        "b1": scale * jax.random.normal(ks[1], (64,), jnp.float32),
        "w2": scale * jax.random.normal(ks[2], (128, 64, 4, 4), jnp.float32),
        "b2": scale * jax.random.normal(ks[3], (128,), jnp.float32),
        "w3": scale * jax.random.normal(ks[4], (256, 128, 4, 4), jnp.float32),
        "b3": scale * jax.random.normal(ks[5], (256,), jnp.float32),
        "w4": scale * jax.random.normal(ks[6], (512, 256, 4, 4), jnp.float32),
        "b4": scale * jax.random.normal(ks[7], (512,), jnp.float32),
        "w_fc": scale * jax.random.normal(ks[8], (1, 512 * 4 * 4), jnp.float32),
        "b_fc": scale * jax.random.normal(ks[9], (1,), jnp.float32),
    }


if __name__ == "__main__":
    key = jax.random.PRNGKey(0)
    k_x, k_p = jax.random.split(key)
    # The fc layer (512*4*4) fixes the spatial size to 64x64; batch kept small.
    x = jax.random.normal(k_x, (2, 3, 64, 64), jnp.float32)   # NCHW, like PyTorch
    params = init_params(k_p)
    prepped = prepare_params(params)                          # one-time prep

    fwd = jax.jit(discriminator_forward)
    out = jax.block_until_ready(fwd(x, prepped))

    assert out.shape == (2, 1)
    assert bool(jnp.all((out >= 0.0) & (out <= 1.0)))
    print("KERNEL_OK")
</pallas_src>

<mosaic_0001>
module attributes {stable_mosaic.version = 11 : i64} {
  func.func @_matmul_bias_relu_kernel(%arg0: i32, %arg1: i32, %arg2: memref<512x48xbf16, #tpu.memory_space<vmem>>, %arg3: memref<48x64xbf16, #tpu.memory_space<vmem>>, %arg4: memref<1x64xf32, #tpu.memory_space<vmem>>, %arg5: memref<512x64xbf16, #tpu.memory_space<vmem>>) attributes {dimension_semantics = [#tpu.dimension_semantics<parallel>, #tpu.dimension_semantics<parallel>], iteration_bounds = array<i64: 4, 1>, scalar_prefetch = 0 : i64, scratch_operands = 0 : i64, tpu.core_type = #tpu.core_type<tc>, window_params = [{transform_indices = @transform_0, window_bounds = array<i64: 512, 48>}, {transform_indices = @transform_1, window_bounds = array<i64: 48, 64>}, {transform_indices = @transform_2, window_bounds = array<i64: 1, 64>}, {transform_indices = @transform_3, window_bounds = array<i64: 512, 64>}]} {
    %c0 = arith.constant 0 : index
    %c0_0 = arith.constant 0 : index
    %0 = vector.load %arg2[%c0, %c0_0] : memref<512x48xbf16, #tpu.memory_space<vmem>>, vector<512x48xbf16>
    %c0_1 = arith.constant 0 : index
    %c0_2 = arith.constant 0 : index
    %1 = vector.load %arg3[%c0_1, %c0_2] : memref<48x64xbf16, #tpu.memory_space<vmem>>, vector<48x64xbf16>
    %cst = arith.constant dense<0.000000e+00> : vector<512x64xf32>
    %2 = tpu.matmul %0, %1, %cst {dimension_numbers = #tpu.dot_dimension_numbers<[1], [0], [0], [1], [0, 0, 1, 1], [], []>} : vector<512x48xbf16>, vector<48x64xbf16>, vector<512x64xf32> -> vector<512x64xf32>
    %c0_3 = arith.constant 0 : index
    %c0_4 = arith.constant 0 : index
    %3 = vector.load %arg4[%c0_3, %c0_4] : memref<1x64xf32, #tpu.memory_space<vmem>>, vector<1x64xf32>
    %4 = vector.broadcast %3 : vector<1x64xf32> to vector<512x64xf32>
    %5 = arith.addf %2, %4 : vector<512x64xf32>
    %cst_5 = arith.constant 0.000000e+00 : f32
    %6 = vector.broadcast %cst_5 : f32 to vector<512x64xf32>
    %7 = arith.maximumf %5, %6 : vector<512x64xf32>
    %8 = arith.truncf %7 : vector<512x64xf32> to vector<512x64xbf16>
    %c0_6 = arith.constant 0 : index
    %c0_7 = arith.constant 0 : index
    %9 = vector.load %arg5[%c0_6, %c0_7] : memref<512x64xbf16, #tpu.memory_space<vmem>>, vector<512x64xbf16>
    tpu.vector_store %arg5[%c0_6, %c0_7], %8 {strides = array<i32>} : memref<512x64xbf16, #tpu.memory_space<vmem>>, vector<512x64xbf16>,
    return
  }
  func.func @transform_0(%arg0: i32, %arg1: i32) -> (i32, i32) {
    %c0_i32 = arith.constant 0 : i32
    %c0_i32_0 = arith.constant 0 : i32
    return %arg0, %c0_i32 : i32, i32
  }
  func.func @transform_1(%arg0: i32, %arg1: i32) -> (i32, i32) {
    %c0_i32 = arith.constant 0 : i32
    %c0_i32_0 = arith.constant 0 : i32
    return %c0_i32, %arg1 : i32, i32
  }
  func.func @transform_2(%arg0: i32, %arg1: i32) -> (i32, i32) {
    %c0_i32 = arith.constant 0 : i32
    %c0_i32_0 = arith.constant 0 : i32
    return %c0_i32, %arg1 : i32, i32
  }
  func.func @transform_3(%arg0: i32, %arg1: i32) -> (i32, i32) {
    %c0_i32 = arith.constant 0 : i32
    return %arg0, %arg1 : i32, i32
  }
}

module attributes {stable_mosaic.version = 11 : i64} {
  func.func @_matmul_bias_relu_kernel(%arg0: i32, %arg1: i32, %arg2: memref<256x1024xbf16, #tpu.memory_space<vmem>>, %arg3: memref<1024x128xbf16, #tpu.memory_space<vmem>>, %arg4: memref<1x128xf32, #tpu.memory_space<vmem>>, %arg5: memref<256x128xbf16, #tpu.memory_space<vmem>>) attributes {dimension_semantics = [#tpu.dimension_semantics<parallel>, #tpu.dimension_semantics<parallel>], iteration_bounds = array<i64: 2, 1>, scalar_prefetch = 0 : i64, scratch_operands = 0 : i64, tpu.core_type = #tpu.core_type<tc>, window_params = [{transform_indices = @transform_0, window_bounds = array<i64: 256, 1024>}, {transform_indices = @transform_1, window_bounds = array<i64: 1024, 128>}, {transform_indices = @transform_2, window_bounds = array<i64: 1, 128>}, {transform_indices = @transform_3, window_bounds = array<i64: 256, 128>}]} {
    %c0 = arith.constant 0 : index
    %c0_0 = arith.constant 0 : index
    %0 = vector.load %arg2[%c0, %c0_0] : memref<256x1024xbf16, #tpu.memory_space<vmem>>, vector<256x1024xbf16>
    %c0_1 = arith.constant 0 : index
    %c0_2 = arith.constant 0 : index
    %1 = vector.load %arg3[%c0_1, %c0_2] : memref<1024x128xbf16, #tpu.memory_space<vmem>>, vector<1024x128xbf16>
    %cst = arith.constant dense<0.000000e+00> : vector<256x128xf32>
    %2 = tpu.matmul %0, %1, %cst {dimension_numbers = #tpu.dot_dimension_numbers<[1], [0], [0], [1], [0, 0, 1, 1], [], []>} : vector<256x1024xbf16>, vector<1024x128xbf16>, vector<256x128xf32> -> vector<256x128xf32>
    %c0_3 = arith.constant 0 : index
    %c0_4 = arith.constant 0 : index
    %3 = vector.load %arg4[%c0_3, %c0_4] : memref<1x128xf32, #tpu.memory_space<vmem>>, vector<1x128xf32>
    %4 = vector.broadcast %3 : vector<1x128xf32> to vector<256x128xf32>
    %5 = arith.addf %2, %4 : vector<256x128xf32>
    %cst_5 = arith.constant 0.000000e+00 : f32
    %6 = vector.broadcast %cst_5 : f32 to vector<256x128xf32>
    %7 = arith.maximumf %5, %6 : vector<256x128xf32>
    %8 = arith.truncf %7 : vector<256x128xf32> to vector<256x128xbf16>
    %c0_6 = arith.constant 0 : index
    %c0_7 = arith.constant 0 : index
    %9 = vector.load %arg5[%c0_6, %c0_7] : memref<256x128xbf16, #tpu.memory_space<vmem>>, vector<256x128xbf16>
    tpu.vector_store %arg5[%c0_6, %c0_7], %8 {strides = array<i32>} : memref<256x128xbf16, #tpu.memory_space<vmem>>, vector<256x128xbf16>,
    return
  }
  func.func @transform_0(%arg0: i32, %arg1: i32) -> (i32, i32) {
    %c0_i32 = arith.constant 0 : i32
    %c0_i32_0 = arith.constant 0 : i32
    return %arg0, %c0_i32 : i32, i32
  }
  func.func @transform_1(%arg0: i32, %arg1: i32) -> (i32, i32) {
    %c0_i32 = arith.constant 0 : i32
    %c0_i32_0 = arith.constant 0 : i32
    return %c0_i32, %arg1 : i32, i32
  }
  func.func @transform_2(%arg0: i32, %arg1: i32) -> (i32, i32) {
    %c0_i32 = arith.constant 0 : i32
    %c0_i32_0 = arith.constant 0 : i32
    return %c0_i32, %arg1 : i32, i32
  }
  func.func @transform_3(%arg0: i32, %arg1: i32) -> (i32, i32) {
    %c0_i32 = arith.constant 0 : i32
    return %arg0, %arg1 : i32, i32
  }
}

module attributes {stable_mosaic.version = 11 : i64} {
  func.func @_matmul_bias_relu_kernel(%arg0: i32, %arg1: i32, %arg2: memref<128x2048xbf16, #tpu.memory_space<vmem>>, %arg3: memref<2048x128xbf16, #tpu.memory_space<vmem>>, %arg4: memref<1x128xf32, #tpu.memory_space<vmem>>, %arg5: memref<128x128xbf16, #tpu.memory_space<vmem>>) attributes {dimension_semantics = [#tpu.dimension_semantics<parallel>, #tpu.dimension_semantics<parallel>], iteration_bounds = array<i64: 1, 2>, scalar_prefetch = 0 : i64, scratch_operands = 0 : i64, tpu.core_type = #tpu.core_type<tc>, window_params = [{transform_indices = @transform_0, window_bounds = array<i64: 128, 2048>}, {transform_indices = @transform_1, window_bounds = array<i64: 2048, 128>}, {transform_indices = @transform_2, window_bounds = array<i64: 1, 128>}, {transform_indices = @transform_3, window_bounds = array<i64: 128, 128>}]} {
    %c0 = arith.constant 0 : index
    %c0_0 = arith.constant 0 : index
    %0 = vector.load %arg2[%c0, %c0_0] : memref<128x2048xbf16, #tpu.memory_space<vmem>>, vector<128x2048xbf16>
    %c0_1 = arith.constant 0 : index
    %c0_2 = arith.constant 0 : index
    %1 = vector.load %arg3[%c0_1, %c0_2] : memref<2048x128xbf16, #tpu.memory_space<vmem>>, vector<2048x128xbf16>
    %cst = arith.constant dense<0.000000e+00> : vector<128x128xf32>
    %2 = tpu.matmul %0, %1, %cst {dimension_numbers = #tpu.dot_dimension_numbers<[1], [0], [0], [1], [0, 0, 1, 1], [], []>} : vector<128x2048xbf16>, vector<2048x128xbf16>, vector<128x128xf32> -> vector<128x128xf32>
    %c0_3 = arith.constant 0 : index
    %c0_4 = arith.constant 0 : index
    %3 = vector.load %arg4[%c0_3, %c0_4] : memref<1x128xf32, #tpu.memory_space<vmem>>, vector<1x128xf32>
    %4 = vector.broadcast %3 : vector<1x128xf32> to vector<128x128xf32>
    %5 = arith.addf %2, %4 : vector<128x128xf32>
    %cst_5 = arith.constant 0.000000e+00 : f32
    %6 = vector.broadcast %cst_5 : f32 to vector<128x128xf32>
    %7 = arith.maximumf %5, %6 : vector<128x128xf32>
    %8 = arith.truncf %7 : vector<128x128xf32> to vector<128x128xbf16>
    %c0_6 = arith.constant 0 : index
    %c0_7 = arith.constant 0 : index
    %9 = vector.load %arg5[%c0_6, %c0_7] : memref<128x128xbf16, #tpu.memory_space<vmem>>, vector<128x128xbf16>
    tpu.vector_store %arg5[%c0_6, %c0_7], %8 {strides = array<i32>} : memref<128x128xbf16, #tpu.memory_space<vmem>>, vector<128x128xbf16>,
    return
  }
  func.func @transform_0(%arg0: i32, %arg1: i32) -> (i32, i32) {
    %c0_i32 = arith.constant 0 : i32
    %c0_i32_0 = arith.constant 0 : i32
    return %arg0, %c0_i32 : i32, i32
  }
  func.func @transform_1(%arg0: i32, %arg1: i32) -> (i32, i32) {
    %c0_i32 = arith.constant 0 : i32
    %c0_i32_0 = arith.constant 0 : i32
    return %c0_i32, %arg1 : i32, i32
  }
  func.func @transform_2(%arg0: i32, %arg1: i32) -> (i32, i32) {
    %c0_i32 = arith.constant 0 : i32
    %c0_i32_0 = arith.constant 0 : i32
    return %c0_i32, %arg1 : i32, i32
  }
  func.func @transform_3(%arg0: i32, %arg1: i32) -> (i32, i32) {
    %c0_i32 = arith.constant 0 : i32
    return %arg0, %arg1 : i32, i32
  }
}

module attributes {stable_mosaic.version = 11 : i64} {
  func.func @_matmul_bias_relu_kernel(%arg0: i32, %arg1: i32, %arg2: memref<32x4096xbf16, #tpu.memory_space<vmem>>, %arg3: memref<4096x256xbf16, #tpu.memory_space<vmem>>, %arg4: memref<1x256xf32, #tpu.memory_space<vmem>>, %arg5: memref<32x256xbf16, #tpu.memory_space<vmem>>) attributes {dimension_semantics = [#tpu.dimension_semantics<parallel>, #tpu.dimension_semantics<parallel>], iteration_bounds = array<i64: 1, 2>, scalar_prefetch = 0 : i64, scratch_operands = 0 : i64, tpu.core_type = #tpu.core_type<tc>, window_params = [{transform_indices = @transform_0, window_bounds = array<i64: 32, 4096>}, {transform_indices = @transform_1, window_bounds = array<i64: 4096, 256>}, {transform_indices = @transform_2, window_bounds = array<i64: 1, 256>}, {transform_indices = @transform_3, window_bounds = array<i64: 32, 256>}]} {
    %c0 = arith.constant 0 : index
    %c0_0 = arith.constant 0 : index
    %0 = vector.load %arg2[%c0, %c0_0] : memref<32x4096xbf16, #tpu.memory_space<vmem>>, vector<32x4096xbf16>
    %c0_1 = arith.constant 0 : index
    %c0_2 = arith.constant 0 : index
    %1 = vector.load %arg3[%c0_1, %c0_2] : memref<4096x256xbf16, #tpu.memory_space<vmem>>, vector<4096x256xbf16>
    %cst = arith.constant dense<0.000000e+00> : vector<32x256xf32>
    %2 = tpu.matmul %0, %1, %cst {dimension_numbers = #tpu.dot_dimension_numbers<[1], [0], [0], [1], [0, 0, 1, 1], [], []>} : vector<32x4096xbf16>, vector<4096x256xbf16>, vector<32x256xf32> -> vector<32x256xf32>
    %c0_3 = arith.constant 0 : index
    %c0_4 = arith.constant 0 : index
    %3 = vector.load %arg4[%c0_3, %c0_4] : memref<1x256xf32, #tpu.memory_space<vmem>>, vector<1x256xf32>
    %4 = vector.broadcast %3 : vector<1x256xf32> to vector<32x256xf32>
    %5 = arith.addf %2, %4 : vector<32x256xf32>
    %cst_5 = arith.constant 0.000000e+00 : f32
    %6 = vector.broadcast %cst_5 : f32 to vector<32x256xf32>
    %7 = arith.maximumf %5, %6 : vector<32x256xf32>
    %8 = arith.truncf %7 : vector<32x256xf32> to vector<32x256xbf16>
    %c0_6 = arith.constant 0 : index
    %c0_7 = arith.constant 0 : index
    %9 = vector.load %arg5[%c0_6, %c0_7] : memref<32x256xbf16, #tpu.memory_space<vmem>>, vector<32x256xbf16>
    tpu.vector_store %arg5[%c0_6, %c0_7], %8 {strides = array<i32>} : memref<32x256xbf16, #tpu.memory_space<vmem>>, vector<32x256xbf16>,
    return
  }
  func.func @transform_0(%arg0: i32, %arg1: i32) -> (i32, i32) {
    %c0_i32 = arith.constant 0 : i32
    %c0_i32_0 = arith.constant 0 : i32
    return %arg0, %c0_i32 : i32, i32
  }
  func.func @transform_1(%arg0: i32, %arg1: i32) -> (i32, i32) {
    %c0_i32 = arith.constant 0 : i32
    %c0_i32_0 = arith.constant 0 : i32
    return %c0_i32, %arg1 : i32, i32
  }
  func.func @transform_2(%arg0: i32, %arg1: i32) -> (i32, i32) {
    %c0_i32 = arith.constant 0 : i32
    %c0_i32_0 = arith.constant 0 : i32
    return %c0_i32, %arg1 : i32, i32
  }
  func.func @transform_3(%arg0: i32, %arg1: i32) -> (i32, i32) {
    %c0_i32 = arith.constant 0 : i32
    return %arg0, %arg1 : i32, i32
  }
}

module attributes {stable_mosaic.version = 11 : i64} {
  func.func @_fc_sigmoid_kernel(%arg0: memref<2x8192xbf16, #tpu.memory_space<vmem>>, %arg1: memref<1x8192xbf16, #tpu.memory_space<vmem>>, %arg2: memref<1x1xf32, #tpu.memory_space<vmem>>, %arg3: memref<2x1xf32, #tpu.memory_space<vmem>>) attributes {dimension_semantics = [], scalar_prefetch = 0 : i64, scratch_operands = 0 : i64, tpu.core_type = #tpu.core_type<tc>} {
    %c0 = arith.constant 0 : index
    %c0_0 = arith.constant 0 : index
    %0 = vector.load %arg0[%c0, %c0_0] : memref<2x8192xbf16, #tpu.memory_space<vmem>>, vector<2x8192xbf16>
    %1 = arith.extf %0 : vector<2x8192xbf16> to vector<2x8192xf32>
    %c0_1 = arith.constant 0 : index
    %c0_2 = arith.constant 0 : index
    %2 = vector.load %arg1[%c0_1, %c0_2] : memref<1x8192xbf16, #tpu.memory_space<vmem>>, vector<1x8192xbf16>
    %3 = arith.extf %2 : vector<1x8192xbf16> to vector<1x8192xf32>
    %4 = vector.broadcast %3 : vector<1x8192xf32> to vector<2x8192xf32>
    %5 = arith.mulf %1, %4 : vector<2x8192xf32>
    %cst = arith.constant dense<0.000000e+00> : vector<2xf32>
    %6 = vector.multi_reduction <add>, %5, %cst [1] : vector<2x8192xf32> to vector<2xf32>
    %7 = vector.shape_cast %6 : vector<2xf32> to vector<2x1xf32>
    %c0_3 = arith.constant 0 : index
    %c0_4 = arith.constant 0 : index
    %8 = vector.load %arg2[%c0_3, %c0_4] : memref<1x1xf32, #tpu.memory_space<vmem>>, vector<1x1xf32>
    %9 = vector.broadcast %8 : vector<1x1xf32> to vector<2x1xf32>
    %10 = arith.addf %7, %9 : vector<2x1xf32>
    %11 = arith.negf %10 : vector<2x1xf32>
    %12 = math.exp %11 : vector<2x1xf32>
    %cst_5 = arith.constant 1.000000e+00 : f32
    %13 = vector.broadcast %cst_5 : f32 to vector<2x1xf32>
    %14 = arith.addf %13, %12 : vector<2x1xf32>
    %15 = arith.divf %13, %14 : vector<2x1xf32>
    %c0_6 = arith.constant 0 : index
    %c0_7 = arith.constant 0 : index
    %16 = vector.load %arg3[%c0_6, %c0_7] : memref<2x1xf32, #tpu.memory_space<vmem>>, vector<2x1xf32>
    tpu.vector_store %arg3[%c0_6, %c0_7], %15 {strides = array<i32>} : memref<2x1xf32, #tpu.memory_space<vmem>>, vector<2x1xf32>,
    return
  }
}

</mosaic_0001>

<bundles_post_ra>
// kernel: discriminator_forward.5
= control target key start
LH: loop header
LB: loop body
LE: loop exit
PB: predicated region body
PF: predicated region fallthrough
CT: control target
= control target key end

     0   :  { %s1777_s12 = smov 0   ;;  %s1779_s13 = smov 0   ;;  %s2091_s0 = inlined_call_operand.vmem [shape: bf16[2048,48], index: 0, kind: input, shape index: {}]   ;;  %s2092_s1 = inlined_call_operand.vmem [shape: bf16[48,64], index: 1, kind: input, shape index: {}]   ;;  %s2093_s2 = inlined_call_operand.vmem [shape: f32[1,64], index: 2, kind: input, shape index: {}]   ;;  %s2094_s3 = inlined_call_operand.vmem [shape: bf16[2048,64], index: 3, kind: output, shape index: {}]  }
   0x1   :  { %s1781_s14 = smov 0  }
   0x2 LB: > { %s25_s15 = sadd.s32 1, %s1751_s13  ;;  %p1360_p0 = scmp.ge.s32.totalorder %s1755_s14, 1  ;;  %s1755_s14 = sphi %s1781_s14, %s13_s14   ;;  %s1751_s13 = sphi %s1779_s13, %s2096_s13   ;;  %s1747_s12 = sphi %s1777_s12, %s2095_s12  }
   0x3   : > { %p27_p1 = scmp.ge.s32.totalorder %s25_s15, 4  ;;  %p169_p2 = scmp.lt.s32.totalorder %s1755_s14, 5 }
   0x5   : > { %s2098_s15 = smov (%p27_p1, %s25_s15), 0  ;;  %p170_p3 = pnand %p1360_p0, %p169_p2 }
   0x6   : > { %s1361_s18 = sshll.u32 (!%p170_p3), %s1747_s12, 6 }
   0x7   : > { %173 = sbr.rel (%p170_p3) target bundleno = 287 (0x11f), region = 32  ;;  %p204_p4 = scmp.lt.s32.totalorder (!%p170_p3), %s1361_s18, 255 }
   0xc   : > { %v1698_v0 = vld [vmem:[%s2092_s1 + $0x10] sm:$0xff]   ;;  %v1699_v1 = vld [vmem:[%s2092_s1 + $0x8] sm:$0xff]   ;;  %s2100_s18 = smov (!%p204_p4, %s1361_s18), 255  ;;  %v1700_v2 = vld [vmem:[%s2092_s1] sm:$0xff]   ;;  %vm481_vm0 = vcmask 392192   ;;  %vm1187_vm1 = vcmask 519168  }
   0xd   : > { %1598 = vmatprep.subr.bf16.mxu0 %v1698_v0  ;;  %1668 = vmatprep.subr.bf16.mxu1 %v1698_v0  ;;  %s1362_s23 = sshll.u32 %s2100_s18, 2  ;;  %v1881_v35 = vld [vmem:[%s2093_s2] ss:$0 sm:$0xff] }
   0xe   : > { %1599 = vmatpush3.bf16.msra.mxu0 %v1698_v0  ;;  %1671 = vmatpush3.bf16.msra.mxu1 %v1698_v0  ;;  %s1812_s26 = scalar_lea.vmem %s2091_s0, %s1362_s23  ;;  %s1892_s4 = scalar_lea.vmem %s2094_s3, %s1362_s23 }
   0xf   : > { %1600 = vmatprep.subr.bf16.mxu0 %v1699_v1  ;;  %1669 = vmatprep.subr.bf16.mxu1 %v1699_v1  ;;  %v1701_v3 = vld [vmem:[%s1812_s26] sm:$0xff]   ;;  %v1703_v5 = vld [vmem:[%s1812_s26 + $0x8] sm:$0xff]   ;;  %v1705_v7 = vld [vmem:[%s1812_s26 + $0x10] sm:$0xff]  }
  0x10   : > { %v1702_v4 = vld [vmem:[%s1812_s26 + $0x80] sm:$0xff]   ;;  %1604 = vmatprep.mubr.msk.bf16.mxu0 %vm481_vm0, %v1701_v3  ;;  %v1704_v6 = vld [vmem:[%s1812_s26 + $0x88] sm:$0xff]   ;;  %v1706_v8 = vld [vmem:[%s1812_s26 + $0x90] sm:$0xff]  }
  0x11   : > { %1636 = vmatprep.mubr.msk.bf16.mxu1 %vm481_vm0, %v1702_v4  ;;  %v1707_v9 = vld [vmem:[%s1812_s26 + $0x18] sm:$0xff]   ;;  %v1709_v11 = vld [vmem:[%s1812_s26 + $0x20] sm:$0xff]   ;;  %v1711_v13 = vld [vmem:[%s1812_s26 + $0x28] sm:$0xff]  }
  0x12   : > { %1601 = vmatpush3.bf16.msra.mxu0 %v1699_v1  ;;  %1672 = vmatpush3.bf16.msra.mxu1 %v1699_v1  ;;  %v1708_v10 = vld [vmem:[%s1812_s26 + $0x98] sm:$0xff]   ;;  %v1710_v12 = vld [vmem:[%s1812_s26 + $0xa0] sm:$0xff]   ;;  %v1712_v14 = vld [vmem:[%s1812_s26 + $0xa8] sm:$0xff]  }
  0x13   : > { %1602 = vmatprep.subr.bf16.mxu0 %v1700_v2  ;;  %1670 = vmatprep.subr.bf16.mxu1 %v1700_v2  ;;  %v1713_v15 = vld [vmem:[%s1812_s26 + $0x30] sm:$0xff]   ;;  %v1715_v17 = vld [vmem:[%s1812_s26 + $0x38] sm:$0xff]   ;;  %v1717_v19 = vld [vmem:[%s1812_s26 + $0x40] sm:$0xff]  }
  0x14   : > { %v1714_v16 = vld [vmem:[%s1812_s26 + $0xb0] sm:$0xff]   ;;  %v1716_v18 = vld [vmem:[%s1812_s26 + $0xb8] sm:$0xff]   ;;  %v1718_v20 = vld [vmem:[%s1812_s26 + $0xc0] sm:$0xff]  }
  0x15   : > { %v1719_v21 = vld [vmem:[%s1812_s26 + $0x48] sm:$0xff]   ;;  %v1721_v23 = vld [vmem:[%s1812_s26 + $0x50] sm:$0xff]   ;;  %v1723_v25 = vld [vmem:[%s1812_s26 + $0x58] sm:$0xff]  }
  0x16   : > { %1603 = vmatpush3.bf16.msra.mxu0 %v1700_v2  ;;  %1673 = vmatpush3.bf16.msra.mxu1 %v1700_v2  ;;  %v1720_v22 = vld [vmem:[%s1812_s26 + $0xc8] sm:$0xff]   ;;  %v1722_v24 = vld [vmem:[%s1812_s26 + $0xd0] sm:$0xff]   ;;  %v1724_v26 = vld [vmem:[%s1812_s26 + $0xd8] sm:$0xff]  }
  0x17   : > { %v1725_v27 = vld [vmem:[%s1812_s26 + $0x60] sm:$0xff]   ;;  %v1727_v29 = vld [vmem:[%s1812_s26 + $0x68] sm:$0xff]   ;;  %v1729_v31 = vld [vmem:[%s1812_s26 + $0x70] sm:$0xff]  }
  0x18   : > { %v1726_v28 = vld [vmem:[%s1812_s26 + $0xe0] sm:$0xff]   ;;  %v1728_v30 = vld [vmem:[%s1812_s26 + $0xe8] sm:$0xff]   ;;  %v1730_v32 = vld [vmem:[%s1812_s26 + $0xf0] sm:$0xff]  }
  0x19   : > { %1605 = vmatmul.mubr.msk.bf16.vlgmr.msra.gmra.mxu0 %vm481_vm0, %v1703_v5  ;;  %1637 = vmatmul.mubr.msk.bf16.vlgmr.msra.gmra.mxu1 %vm481_vm0, %v1704_v6  ;;  %v1731_v33 = vld [vmem:[%s1812_s26 + $0x78] sm:$0xff]  }
  0x1a   : > { %1608 = vmatprep.mubr.msk.bf16.mxu0 %vm481_vm0, %v1705_v7  ;;  %1640 = vmatprep.mubr.msk.bf16.mxu1 %vm481_vm0, %v1706_v8  ;;  %v1732_v34 = vld [vmem:[%s1812_s26 + $0xf8] sm:$0xff]  }
  0x21   : > { %1609 = vmatmul.mubr.msk.bf16.gmra.mxu0 %vm481_vm0, %v1707_v9  ;;  %1641 = vmatmul.mubr.msk.bf16.gmra.mxu1 %vm481_vm0, %v1708_v10 }
  0x22   : > { %1612 = vmatprep.mubr.msk.bf16.mxu0 %vm481_vm0, %v1709_v11  ;;  %1644 = vmatprep.mubr.msk.bf16.mxu1 %vm481_vm0, %v1710_v12 }
  0x29   : > { %1613 = vmatmul.mubr.msk.bf16.gmra.mxu0 %vm481_vm0, %v1711_v13  ;;  %1645 = vmatmul.mubr.msk.bf16.gmra.mxu1 %vm481_vm0, %v1712_v14 }
  0x2a   : > { %1616 = vmatprep.mubr.msk.bf16.mxu0 %vm481_vm0, %v1713_v15  ;;  %1648 = vmatprep.mubr.msk.bf16.mxu1 %vm481_vm0, %v1714_v16 }
  0x31   : > { %1617 = vmatmul.mubr.msk.bf16.gmra.mxu0 %vm481_vm0, %v1715_v17  ;;  %1649 = vmatmul.mubr.msk.bf16.gmra.mxu1 %vm481_vm0, %v1716_v18 }
  0x32   : > { %1620 = vmatprep.mubr.msk.bf16.mxu0 %vm481_vm0, %v1717_v19  ;;  %1652 = vmatprep.mubr.msk.bf16.mxu1 %vm481_vm0, %v1718_v20 }
  0x39   : > { %1621 = vmatmul.mubr.msk.bf16.gmra.mxu0 %vm481_vm0, %v1719_v21  ;;  %1653 = vmatmul.mubr.msk.bf16.gmra.mxu1 %vm481_vm0, %v1720_v22 }
  0x3a   : > { %1624 = vmatprep.mubr.msk.bf16.mxu0 %vm481_vm0, %v1721_v23  ;;  %1656 = vmatprep.mubr.msk.bf16.mxu1 %vm481_vm0, %v1722_v24 }
  0x41   : > { %1625 = vmatmul.mubr.msk.bf16.gmra.mxu0 %vm481_vm0, %v1723_v25  ;;  %1657 = vmatmul.mubr.msk.bf16.gmra.mxu1 %vm481_vm0, %v1724_v26 }
  0x42   : > { %1628 = vmatprep.mubr.msk.bf16.mxu0 %vm481_vm0, %v1725_v27  ;;  %1660 = vmatprep.mubr.msk.bf16.mxu1 %vm481_vm0, %v1726_v28 }
  0x49   : > { %1629 = vmatmul.mubr.msk.bf16.gmra.mxu0 %vm481_vm0, %v1727_v29  ;;  %1661 = vmatmul.mubr.msk.bf16.gmra.mxu1 %vm481_vm0, %v1728_v30 }
  0x4a   : > { %1632 = vmatprep.mubr.msk.bf16.mxu0 %vm481_vm0, %v1729_v31  ;;  %1664 = vmatprep.mubr.msk.bf16.mxu1 %vm481_vm0, %v1730_v32 }
  0x51   : > { %1633 = vmatmul.mubr.msk.bf16.gmra.mxu0 %vm481_vm0, %v1731_v33  ;;  %1665 = vmatmul.mubr.msk.bf16.gmra.mxu1 %vm481_vm0, %v1732_v34 }
  0xd9   : > { %v1606_v36 = vpop.f32.mrf.mxu0  ;;  %v1638_v37 = vpop.f32.mrf.mxu1 }
  0xda   : > { %v621_v38 = vadd.f32 %v1606_v36, %v1881_v35  ;;  %v749_v39 = vadd.f32 %v1638_v37, %v1881_v35 }
  0xdb   : > { %v612_v40 = vpop.f32.mrf.mxu0  ;;  %v740_v41 = vpop.f32.mrf.mxu1 }
  0xdc   : > { %v869_v42 = vmax.f32 %v621_v38, 0.0  ;;  %v901_v43 = vmax.f32 %v749_v39, 0.0  ;;  %v613_v44 = vadd.f32 %v1881_v35, %v612_v40  ;;  %v741_v45 = vadd.f32 %v1881_v35, %v740_v41 }
  0xdd   : > { %v1607_v46 = vpop.f32.mrf.mxu0  ;;  %v1639_v47 = vpop.f32.mrf.mxu1 }
  0xde   : > { %v1501_v48 = vpack.c.bf16 %v869_v42, %v869_v42  ;;  %v1533_v49 = vpack.c.bf16 %v901_v43, %v901_v43  ;;  %v867_v50 = vmax.f32 %v613_v44, 0.0  ;;  %v899_v51 = vmax.f32 %v741_v45, 0.0 }
  0xdf   : > { %v624_v52 = vadd.f32 %v1607_v46, %v1881_v35  ;;  %v752_v53 = vadd.f32 %v1639_v47, %v1881_v35  ;;  %v615_v54 = vpop.f32.mrf.mxu0  ;;  %v743_v55 = vpop.f32.mrf.mxu1 }
  0xe0   : > { %1190 = vst.msk [vmem:[%s1892_s4 + $0x8] sm:$0xf] %vm1187_vm1, %v1501_v48  ;;  %1222 = vst.msk [vmem:[%s1892_s4 + $0x88] sm:$0xf] %vm1187_vm1, %v1533_v49  ;;  %v1499_v56 = vpack.c.bf16 %v867_v50, %v867_v50  ;;  %v1531_v57 = vpack.c.bf16 %v899_v51, %v899_v51  ;;  %v616_v58 = vadd.f32 %v1881_v35, %v615_v54 }
  0xe1   : > { %v744_v59 = vadd.f32 %v1881_v35, %v743_v55  ;;  %v870_v60 = vmax.f32 %v624_v52, 0.0  ;;  %v902_v61 = vmax.f32 %v752_v53, 0.0  ;;  %v1610_v62 = vpop.f32.mrf.mxu0  ;;  %v1642_v63 = vpop.f32.mrf.mxu1 }
  0xe2   : > { %1188 = vst.msk [vmem:[%s1892_s4] sm:$0xf] %vm1187_vm1, %v1499_v56  ;;  %1220 = vst.msk [vmem:[%s1892_s4 + $0x80] sm:$0xf] %vm1187_vm1, %v1531_v57  ;;  %v868_v0 = vmax.f32 %v616_v58, 0.0  ;;  %v637_v2 = vadd.f32 %v1610_v62, %v1881_v35  ;;  %v765_v3 = vadd.f32 %v1642_v63, %v1881_v35 }
  0xe3   : > { %v900_v1 = vmax.f32 %v744_v59, 0.0  ;;  %v1502_v4 = vpack.c.bf16 %v870_v60, %v870_v60  ;;  %v1534_v5 = vpack.c.bf16 %v902_v61, %v902_v61  ;;  %v628_v6 = vpop.f32.mrf.mxu0  ;;  %v756_v7 = vpop.f32.mrf.mxu1 }
  0xe4   : > { %v1500_v8 = vpack.c.bf16 %v868_v0, %v868_v0  ;;  %v873_v10 = vmax.f32 %v637_v2, 0.0  ;;  %v905_v11 = vmax.f32 %v765_v3, 0.0  ;;  %v629_v12 = vadd.f32 %v1881_v35, %v628_v6 }
  0xe5   : > { %v1532_v9 = vpack.c.bf16 %v900_v1, %v900_v1  ;;  %1191 = vst.msk [vmem:[%s1892_s4 + $0xc] sm:$0xf] %vm1187_vm1, %v1502_v4  ;;  %1223 = vst.msk [vmem:[%s1892_s4 + $0x8c] sm:$0xf] %vm1187_vm1, %v1534_v5  ;;  %v757_v13 = vadd.f32 %v1881_v35, %v756_v7  ;;  %v1611_v14 = vpop.f32.mrf.mxu0  ;;  %v1643_v15 = vpop.f32.mrf.mxu1 }
  0xe6   : > { %1189 = vst.msk [vmem:[%s1892_s4 + $0x4] sm:$0xf] %vm1187_vm1, %v1500_v8  ;;  %v1505_v16 = vpack.c.bf16 %v873_v10, %v873_v10  ;;  %v1537_v17 = vpack.c.bf16 %v905_v11, %v905_v11  ;;  %v640_v18 = vadd.f32 %v1611_v14, %v1881_v35  ;;  %v768_v19 = vadd.f32 %v1643_v15, %v1881_v35 }
  0xe7   : > { %1221 = vst.msk [vmem:[%s1892_s4 + $0x84] sm:$0xf] %vm1187_vm1, %v1532_v9  ;;  %v871_v20 = vmax.f32 %v629_v12, 0.0  ;;  %v903_v21 = vmax.f32 %v757_v13, 0.0  ;;  %v631_v22 = vpop.f32.mrf.mxu0  ;;  %v759_v23 = vpop.f32.mrf.mxu1 }
  0xe8   : > { %1194 = vst.msk [vmem:[%s1892_s4 + $0x18] sm:$0xf] %vm1187_vm1, %v1505_v16  ;;  %1226 = vst.msk [vmem:[%s1892_s4 + $0x98] sm:$0xf] %vm1187_vm1, %v1537_v17  ;;  %v874_v24 = vmax.f32 %v640_v18, 0.0  ;;  %v906_v25 = vmax.f32 %v768_v19, 0.0  ;;  %v632_v26 = vadd.f32 %v1881_v35, %v631_v22  ;;  %v760_v27 = vadd.f32 %v1881_v35, %v759_v23 }
  0xe9   : > { %v1503_v28 = vpack.c.bf16 %v871_v20, %v871_v20  ;;  %v1535_v29 = vpack.c.bf16 %v903_v21, %v903_v21  ;;  %v1614_v30 = vpop.f32.mrf.mxu0  ;;  %v1646_v31 = vpop.f32.mrf.mxu1 }
  0xea   : > { %v1506_v32 = vpack.c.bf16 %v874_v24, %v874_v24  ;;  %v1538_v33 = vpack.c.bf16 %v906_v25, %v906_v25  ;;  %v872_v34 = vmax.f32 %v632_v26, 0.0  ;;  %v904_v36 = vmax.f32 %v760_v27, 0.0 }
  0xeb   : > { %1192 = vst.msk [vmem:[%s1892_s4 + $0x10] sm:$0xf] %vm1187_vm1, %v1503_v28  ;;  %1224 = vst.msk [vmem:[%s1892_s4 + $0x90] sm:$0xf] %vm1187_vm1, %v1535_v29  ;;  %v653_v37 = vadd.f32 %v1614_v30, %v1881_v35  ;;  %v781_v38 = vadd.f32 %v1646_v31, %v1881_v35  ;;  %v644_v39 = vpop.f32.mrf.mxu0  ;;  %v772_v40 = vpop.f32.mrf.mxu1 }
  0xec   : > { %1195 = vst.msk [vmem:[%s1892_s4 + $0x1c] sm:$0xf] %vm1187_vm1, %v1506_v32  ;;  %1227 = vst.msk [vmem:[%s1892_s4 + $0x9c] sm:$0xf] %vm1187_vm1, %v1538_v33  ;;  %v1504_v41 = vpack.c.bf16 %v872_v34, %v872_v34  ;;  %v1536_v42 = vpack.c.bf16 %v904_v36, %v904_v36  ;;  %v645_v43 = vadd.f32 %v1881_v35, %v644_v39 }
  0xed   : > { %v773_v44 = vadd.f32 %v1881_v35, %v772_v40  ;;  %v877_v45 = vmax.f32 %v653_v37, 0.0  ;;  %v909_v46 = vmax.f32 %v781_v38, 0.0  ;;  %v1615_v47 = vpop.f32.mrf.mxu0  ;;  %v1647_v48 = vpop.f32.mrf.mxu1 }
  0xee   : > { %1193 = vst.msk [vmem:[%s1892_s4 + $0x14] sm:$0xf] %vm1187_vm1, %v1504_v41  ;;  %1225 = vst.msk [vmem:[%s1892_s4 + $0x94] sm:$0xf] %vm1187_vm1, %v1536_v42  ;;  %v875_v49 = vmax.f32 %v645_v43, 0.0  ;;  %v656_v51 = vadd.f32 %v1615_v47, %v1881_v35  ;;  %v784_v52 = vadd.f32 %v1647_v48, %v1881_v35 }
  0xef   : > { %v907_v50 = vmax.f32 %v773_v44, 0.0  ;;  %v1509_v53 = vpack.c.bf16 %v877_v45, %v877_v45  ;;  %v1541_v54 = vpack.c.bf16 %v909_v46, %v909_v46  ;;  %v647_v55 = vpop.f32.mrf.mxu0  ;;  %v775_v56 = vpop.f32.mrf.mxu1 }
  0xf0   : > { %v1507_v57 = vpack.c.bf16 %v875_v49, %v875_v49  ;;  %v878_v59 = vmax.f32 %v656_v51, 0.0  ;;  %v910_v60 = vmax.f32 %v784_v52, 0.0  ;;  %v648_v61 = vadd.f32 %v1881_v35, %v647_v55 }
  0xf1   : > { %v1539_v58 = vpack.c.bf16 %v907_v50, %v907_v50  ;;  %1198 = vst.msk [vmem:[%s1892_s4 + $0x28] sm:$0xf] %vm1187_vm1, %v1509_v53  ;;  %1230 = vst.msk [vmem:[%s1892_s4 + $0xa8] sm:$0xf] %vm1187_vm1, %v1541_v54  ;;  %v776_v62 = vadd.f32 %v1881_v35, %v775_v56  ;;  %v1618_v63 = vpop.f32.mrf.mxu0  ;;  %v1650_v0 = vpop.f32.mrf.mxu1 }
  0xf2   : > { %1196 = vst.msk [vmem:[%s1892_s4 + $0x20] sm:$0xf] %vm1187_vm1, %v1507_v57  ;;  %v1510_v1 = vpack.c.bf16 %v878_v59, %v878_v59  ;;  %v1542_v2 = vpack.c.bf16 %v910_v60, %v910_v60  ;;  %v669_v3 = vadd.f32 %v1618_v63, %v1881_v35  ;;  %v797_v4 = vadd.f32 %v1650_v0, %v1881_v35 }
  0xf3   : > { %1228 = vst.msk [vmem:[%s1892_s4 + $0xa0] sm:$0xf] %vm1187_vm1, %v1539_v58  ;;  %v876_v5 = vmax.f32 %v648_v61, 0.0  ;;  %v908_v6 = vmax.f32 %v776_v62, 0.0  ;;  %v660_v7 = vpop.f32.mrf.mxu0  ;;  %v788_v8 = vpop.f32.mrf.mxu1 }
  0xf4   : > { %1199 = vst.msk [vmem:[%s1892_s4 + $0x2c] sm:$0xf] %vm1187_vm1, %v1510_v1  ;;  %1231 = vst.msk [vmem:[%s1892_s4 + $0xac] sm:$0xf] %vm1187_vm1, %v1542_v2  ;;  %v881_v9 = vmax.f32 %v669_v3, 0.0  ;;  %v913_v10 = vmax.f32 %v797_v4, 0.0  ;;  %v661_v11 = vadd.f32 %v1881_v35, %v660_v7  ;;  %v789_v12 = vadd.f32 %v1881_v35, %v788_v8 }
  0xf5   : > { %v1508_v13 = vpack.c.bf16 %v876_v5, %v876_v5  ;;  %v1540_v14 = vpack.c.bf16 %v908_v6, %v908_v6  ;;  %v1619_v15 = vpop.f32.mrf.mxu0  ;;  %v1651_v16 = vpop.f32.mrf.mxu1 }
  0xf6   : > { %v1513_v17 = vpack.c.bf16 %v881_v9, %v881_v9  ;;  %v1545_v18 = vpack.c.bf16 %v913_v10, %v913_v10  ;;  %v879_v19 = vmax.f32 %v661_v11, 0.0  ;;  %v911_v20 = vmax.f32 %v789_v12, 0.0 }
  0xf7   : > { %1197 = vst.msk [vmem:[%s1892_s4 + $0x24] sm:$0xf] %vm1187_vm1, %v1508_v13  ;;  %1229 = vst.msk [vmem:[%s1892_s4 + $0xa4] sm:$0xf] %vm1187_vm1, %v1540_v14  ;;  %v672_v21 = vadd.f32 %v1619_v15, %v1881_v35  ;;  %v800_v22 = vadd.f32 %v1651_v16, %v1881_v35  ;;  %v663_v23 = vpop.f32.mrf.mxu0  ;;  %v791_v24 = vpop.f32.mrf.mxu1 }
  0xf8   : > { %1202 = vst.msk [vmem:[%s1892_s4 + $0x38] sm:$0xf] %vm1187_vm1, %v1513_v17  ;;  %1234 = vst.msk [vmem:[%s1892_s4 + $0xb8] sm:$0xf] %vm1187_vm1, %v1545_v18  ;;  %v1511_v25 = vpack.c.bf16 %v879_v19, %v879_v19  ;;  %v1543_v26 = vpack.c.bf16 %v911_v20, %v911_v20  ;;  %v664_v27 = vadd.f32 %v1881_v35, %v663_v23 }
  0xf9   : > { %v792_v28 = vadd.f32 %v1881_v35, %v791_v24  ;;  %v882_v29 = vmax.f32 %v672_v21, 0.0  ;;  %v914_v30 = vmax.f32 %v800_v22, 0.0  ;;  %v1622_v31 = vpop.f32.mrf.mxu0  ;;  %v1654_v32 = vpop.f32.mrf.mxu1 }
  0xfa   : > { %1200 = vst.msk [vmem:[%s1892_s4 + $0x30] sm:$0xf] %vm1187_vm1, %v1511_v25  ;;  %1232 = vst.msk [vmem:[%s1892_s4 + $0xb0] sm:$0xf] %vm1187_vm1, %v1543_v26  ;;  %v880_v33 = vmax.f32 %v664_v27, 0.0  ;;  %v685_v36 = vadd.f32 %v1622_v31, %v1881_v35  ;;  %v813_v37 = vadd.f32 %v1654_v32, %v1881_v35 }
  0xfb   : > { %v912_v34 = vmax.f32 %v792_v28, 0.0  ;;  %v1514_v38 = vpack.c.bf16 %v882_v29, %v882_v29  ;;  %v1546_v39 = vpack.c.bf16 %v914_v30, %v914_v30  ;;  %v676_v40 = vpop.f32.mrf.mxu0  ;;  %v804_v41 = vpop.f32.mrf.mxu1 }
  0xfc   : > { %v1512_v42 = vpack.c.bf16 %v880_v33, %v880_v33  ;;  %v885_v44 = vmax.f32 %v685_v36, 0.0  ;;  %v917_v45 = vmax.f32 %v813_v37, 0.0  ;;  %v677_v46 = vadd.f32 %v1881_v35, %v676_v40 }
  0xfd   : > { %v1544_v43 = vpack.c.bf16 %v912_v34, %v912_v34  ;;  %1203 = vst.msk [vmem:[%s1892_s4 + $0x3c] sm:$0xf] %vm1187_vm1, %v1514_v38  ;;  %1235 = vst.msk [vmem:[%s1892_s4 + $0xbc] sm:$0xf] %vm1187_vm1, %v1546_v39  ;;  %v805_v47 = vadd.f32 %v1881_v35, %v804_v41  ;;  %v1623_v48 = vpop.f32.mrf.mxu0  ;;  %v1655_v49 = vpop.f32.mrf.mxu1 }
  0xfe   : > { %1201 = vst.msk [vmem:[%s1892_s4 + $0x34] sm:$0xf] %vm1187_vm1, %v1512_v42  ;;  %v1517_v50 = vpack.c.bf16 %v885_v44, %v885_v44  ;;  %v1549_v51 = vpack.c.bf16 %v917_v45, %v917_v45  ;;  %v688_v52 = vadd.f32 %v1623_v48, %v1881_v35  ;;  %v816_v53 = vadd.f32 %v1655_v49, %v1881_v35 }
  0xff   : > { %1233 = vst.msk [vmem:[%s1892_s4 + $0xb4] sm:$0xf] %vm1187_vm1, %v1544_v43  ;;  %v883_v54 = vmax.f32 %v677_v46, 0.0  ;;  %v915_v55 = vmax.f32 %v805_v47, 0.0  ;;  %v679_v56 = vpop.f32.mrf.mxu0  ;;  %v807_v57 = vpop.f32.mrf.mxu1 }
 0x100   : > { %1206 = vst.msk [vmem:[%s1892_s4 + $0x48] sm:$0xf] %vm1187_vm1, %v1517_v50  ;;  %1238 = vst.msk [vmem:[%s1892_s4 + $0xc8] sm:$0xf] %vm1187_vm1, %v1549_v51  ;;  %v886_v58 = vmax.f32 %v688_v52, 0.0  ;;  %v918_v59 = vmax.f32 %v816_v53, 0.0  ;;  %v680_v60 = vadd.f32 %v1881_v35, %v679_v56  ;;  %v808_v61 = vadd.f32 %v1881_v35, %v807_v57 }
 0x101   : > { %v1515_v62 = vpack.c.bf16 %v883_v54, %v883_v54  ;;  %v1547_v63 = vpack.c.bf16 %v915_v55, %v915_v55  ;;  %v1626_v0 = vpop.f32.mrf.mxu0  ;;  %v1658_v1 = vpop.f32.mrf.mxu1 }
 0x102   : > { %v1518_v2 = vpack.c.bf16 %v886_v58, %v886_v58  ;;  %v1550_v3 = vpack.c.bf16 %v918_v59, %v918_v59  ;;  %v884_v4 = vmax.f32 %v680_v60, 0.0  ;;  %v916_v5 = vmax.f32 %v808_v61, 0.0 }
 0x103   : > { %1204 = vst.msk [vmem:[%s1892_s4 + $0x40] sm:$0xf] %vm1187_vm1, %v1515_v62  ;;  %1236 = vst.msk [vmem:[%s1892_s4 + $0xc0] sm:$0xf] %vm1187_vm1, %v1547_v63  ;;  %v701_v6 = vadd.f32 %v1626_v0, %v1881_v35  ;;  %v829_v7 = vadd.f32 %v1658_v1, %v1881_v35  ;;  %v692_v8 = vpop.f32.mrf.mxu0  ;;  %v820_v9 = vpop.f32.mrf.mxu1 }
 0x104   : > { %1207 = vst.msk [vmem:[%s1892_s4 + $0x4c] sm:$0xf] %vm1187_vm1, %v1518_v2  ;;  %1239 = vst.msk [vmem:[%s1892_s4 + $0xcc] sm:$0xf] %vm1187_vm1, %v1550_v3  ;;  %v1516_v10 = vpack.c.bf16 %v884_v4, %v884_v4  ;;  %v1548_v11 = vpack.c.bf16 %v916_v5, %v916_v5  ;;  %v693_v12 = vadd.f32 %v1881_v35, %v692_v8 }
 0x105   : > { %v821_v13 = vadd.f32 %v1881_v35, %v820_v9  ;;  %v889_v14 = vmax.f32 %v701_v6, 0.0  ;;  %v921_v15 = vmax.f32 %v829_v7, 0.0  ;;  %v1627_v16 = vpop.f32.mrf.mxu0  ;;  %v1659_v17 = vpop.f32.mrf.mxu1 }
 0x106   : > { %1205 = vst.msk [vmem:[%s1892_s4 + $0x44] sm:$0xf] %vm1187_vm1, %v1516_v10  ;;  %1237 = vst.msk [vmem:[%s1892_s4 + $0xc4] sm:$0xf] %vm1187_vm1, %v1548_v11  ;;  %v887_v18 = vmax.f32 %v693_v12, 0.0  ;;  %v704_v20 = vadd.f32 %v1627_v16, %v1881_v35  ;;  %v832_v21 = vadd.f32 %v1659_v17, %v1881_v35 }
 0x107   : > { %v919_v19 = vmax.f32 %v821_v13, 0.0  ;;  %v1521_v22 = vpack.c.bf16 %v889_v14, %v889_v14  ;;  %v1553_v23 = vpack.c.bf16 %v921_v15, %v921_v15  ;;  %v695_v24 = vpop.f32.mrf.mxu0  ;;  %v823_v25 = vpop.f32.mrf.mxu1 }
 0x108   : > { %v1519_v26 = vpack.c.bf16 %v887_v18, %v887_v18  ;;  %v890_v28 = vmax.f32 %v704_v20, 0.0  ;;  %v922_v29 = vmax.f32 %v832_v21, 0.0  ;;  %v696_v30 = vadd.f32 %v1881_v35, %v695_v24 }
 0x109   : > { %v1551_v27 = vpack.c.bf16 %v919_v19, %v919_v19  ;;  %1210 = vst.msk [vmem:[%s1892_s4 + $0x58] sm:$0xf] %vm1187_vm1, %v1521_v22  ;;  %1242 = vst.msk [vmem:[%s1892_s4 + $0xd8] sm:$0xf] %vm1187_vm1, %v1553_v23  ;;  %v824_v31 = vadd.f32 %v1881_v35, %v823_v25  ;;  %v1630_v32 = vpop.f32.mrf.mxu0  ;;  %v1662_v33 = vpop.f32.mrf.mxu1 }
 0x10a   : > { %1208 = vst.msk [vmem:[%s1892_s4 + $0x50] sm:$0xf] %vm1187_vm1, %v1519_v26  ;;  %v1522_v34 = vpack.c.bf16 %v890_v28, %v890_v28  ;;  %v1554_v36 = vpack.c.bf16 %v922_v29, %v922_v29  ;;  %v717_v37 = vadd.f32 %v1630_v32, %v1881_v35  ;;  %v845_v38 = vadd.f32 %v1662_v33, %v1881_v35 }
 0x10b   : > { %1240 = vst.msk [vmem:[%s1892_s4 + $0xd0] sm:$0xf] %vm1187_vm1, %v1551_v27  ;;  %v888_v39 = vmax.f32 %v696_v30, 0.0  ;;  %v920_v40 = vmax.f32 %v824_v31, 0.0  ;;  %v708_v41 = vpop.f32.mrf.mxu0  ;;  %v836_v42 = vpop.f32.mrf.mxu1 }
 0x10c   : > { %1211 = vst.msk [vmem:[%s1892_s4 + $0x5c] sm:$0xf] %vm1187_vm1, %v1522_v34  ;;  %1243 = vst.msk [vmem:[%s1892_s4 + $0xdc] sm:$0xf] %vm1187_vm1, %v1554_v36  ;;  %v893_v43 = vmax.f32 %v717_v37, 0.0  ;;  %v925_v44 = vmax.f32 %v845_v38, 0.0  ;;  %v709_v45 = vadd.f32 %v1881_v35, %v708_v41  ;;  %v837_v46 = vadd.f32 %v1881_v35, %v836_v42 }
 0x10d   : > { %v1520_v47 = vpack.c.bf16 %v888_v39, %v888_v39  ;;  %v1552_v48 = vpack.c.bf16 %v920_v40, %v920_v40  ;;  %v1631_v49 = vpop.f32.mrf.mxu0  ;;  %v1663_v50 = vpop.f32.mrf.mxu1 }
 0x10e   : > { %v1525_v51 = vpack.c.bf16 %v893_v43, %v893_v43  ;;  %v1557_v52 = vpack.c.bf16 %v925_v44, %v925_v44  ;;  %v891_v53 = vmax.f32 %v709_v45, 0.0  ;;  %v923_v54 = vmax.f32 %v837_v46, 0.0 }
 0x10f   : > { %1209 = vst.msk [vmem:[%s1892_s4 + $0x54] sm:$0xf] %vm1187_vm1, %v1520_v47  ;;  %1241 = vst.msk [vmem:[%s1892_s4 + $0xd4] sm:$0xf] %vm1187_vm1, %v1552_v48  ;;  %v720_v55 = vadd.f32 %v1631_v49, %v1881_v35  ;;  %v848_v56 = vadd.f32 %v1663_v50, %v1881_v35  ;;  %v711_v57 = vpop.f32.mrf.mxu0  ;;  %v839_v58 = vpop.f32.mrf.mxu1 }
 0x110   : > { %1214 = vst.msk [vmem:[%s1892_s4 + $0x68] sm:$0xf] %vm1187_vm1, %v1525_v51  ;;  %1246 = vst.msk [vmem:[%s1892_s4 + $0xe8] sm:$0xf] %vm1187_vm1, %v1557_v52  ;;  %v1523_v59 = vpack.c.bf16 %v891_v53, %v891_v53  ;;  %v1555_v60 = vpack.c.bf16 %v923_v54, %v923_v54  ;;  %v712_v61 = vadd.f32 %v1881_v35, %v711_v57 }
 0x111   : > { %v840_v62 = vadd.f32 %v1881_v35, %v839_v58  ;;  %v894_v63 = vmax.f32 %v720_v55, 0.0  ;;  %v926_v0 = vmax.f32 %v848_v56, 0.0  ;;  %v1634_v1 = vpop.f32.mrf.mxu0  ;;  %v1666_v2 = vpop.f32.mrf.mxu1 }
 0x112   : > { %1212 = vst.msk [vmem:[%s1892_s4 + $0x60] sm:$0xf] %vm1187_vm1, %v1523_v59  ;;  %1244 = vst.msk [vmem:[%s1892_s4 + $0xe0] sm:$0xf] %vm1187_vm1, %v1555_v60  ;;  %v892_v3 = vmax.f32 %v712_v61, 0.0  ;;  %v733_v5 = vadd.f32 %v1634_v1, %v1881_v35  ;;  %v861_v6 = vadd.f32 %v1666_v2, %v1881_v35 }
 0x113   : > { %v924_v4 = vmax.f32 %v840_v62, 0.0  ;;  %v1526_v7 = vpack.c.bf16 %v894_v63, %v894_v63  ;;  %v1558_v8 = vpack.c.bf16 %v926_v0, %v926_v0  ;;  %v724_v9 = vpop.f32.mrf.mxu0  ;;  %v852_v10 = vpop.f32.mrf.mxu1 }
 0x114   : > { %v1524_v11 = vpack.c.bf16 %v892_v3, %v892_v3  ;;  %v897_v13 = vmax.f32 %v733_v5, 0.0  ;;  %v929_v14 = vmax.f32 %v861_v6, 0.0  ;;  %v725_v15 = vadd.f32 %v1881_v35, %v724_v9 }
 0x115   : > { %v1556_v12 = vpack.c.bf16 %v924_v4, %v924_v4  ;;  %1215 = vst.msk [vmem:[%s1892_s4 + $0x6c] sm:$0xf] %vm1187_vm1, %v1526_v7  ;;  %1247 = vst.msk [vmem:[%s1892_s4 + $0xec] sm:$0xf] %vm1187_vm1, %v1558_v8  ;;  %v853_v16 = vadd.f32 %v1881_v35, %v852_v10  ;;  %v1635_v17 = vpop.f32.mrf.mxu0  ;;  %v1667_v18 = vpop.f32.mrf.mxu1 }
 0x116   : > { %1213 = vst.msk [vmem:[%s1892_s4 + $0x64] sm:$0xf] %vm1187_vm1, %v1524_v11  ;;  %v1529_v19 = vpack.c.bf16 %v897_v13, %v897_v13  ;;  %v1561_v20 = vpack.c.bf16 %v929_v14, %v929_v14  ;;  %v736_v21 = vadd.f32 %v1635_v17, %v1881_v35  ;;  %v864_v22 = vadd.f32 %v1667_v18, %v1881_v35 }
 0x117   : > { %1245 = vst.msk [vmem:[%s1892_s4 + $0xe4] sm:$0xf] %vm1187_vm1, %v1556_v12  ;;  %v895_v23 = vmax.f32 %v725_v15, 0.0  ;;  %v927_v24 = vmax.f32 %v853_v16, 0.0  ;;  %v727_v25 = vpop.f32.mrf.mxu0  ;;  %v855_v26 = vpop.f32.mrf.mxu1 }
 0x118   : > { %1218 = vst.msk [vmem:[%s1892_s4 + $0x78] sm:$0xf] %vm1187_vm1, %v1529_v19  ;;  %1250 = vst.msk [vmem:[%s1892_s4 + $0xf8] sm:$0xf] %vm1187_vm1, %v1561_v20  ;;  %v898_v27 = vmax.f32 %v736_v21, 0.0  ;;  %v930_v28 = vmax.f32 %v864_v22, 0.0  ;;  %v728_v29 = vadd.f32 %v1881_v35, %v727_v25  ;;  %v856_v30 = vadd.f32 %v1881_v35, %v855_v26 }
 0x119   : > { %v1527_v31 = vpack.c.bf16 %v895_v23, %v895_v23  ;;  %v1559_v32 = vpack.c.bf16 %v927_v24, %v927_v24 }
 0x11a   : > { %v1530_v33 = vpack.c.bf16 %v898_v27, %v898_v27  ;;  %v1562_v34 = vpack.c.bf16 %v930_v28, %v930_v28  ;;  %v896_v36 = vmax.f32 %v728_v29, 0.0  ;;  %v928_v37 = vmax.f32 %v856_v30, 0.0 }
 0x11b   : > { %1216 = vst.msk [vmem:[%s1892_s4 + $0x70] sm:$0xf] %vm1187_vm1, %v1527_v31  ;;  %1248 = vst.msk [vmem:[%s1892_s4 + $0xf0] sm:$0xf] %vm1187_vm1, %v1559_v32 }
 0x11c   : > { %1219 = vst.msk [vmem:[%s1892_s4 + $0x7c] sm:$0xf] %vm1187_vm1, %v1530_v33  ;;  %1251 = vst.msk [vmem:[%s1892_s4 + $0xfc] sm:$0xf] %vm1187_vm1, %v1562_v34  ;;  %v1528_v38 = vpack.c.bf16 %v896_v36, %v896_v36  ;;  %v1560_v39 = vpack.c.bf16 %v928_v37, %v928_v37 }
 0x11e   : > { %1217 = vst.msk [vmem:[%s1892_s4 + $0x74] sm:$0xf] %vm1187_vm1, %v1528_v38  ;;  %1249 = vst.msk [vmem:[%s1892_s4 + $0xf4] sm:$0xf] %vm1187_vm1, %v1560_v39 }
 0x11f PF: > { %s13_s14 = sadd.s32 1, %s1755_s14   ;;  %s2095_s12 = smov %s1751_s13 }
 0x120   : > { %p10_p5 = scmp.ge.s32.totalorder %s13_s14, 6   ;;  %s2096_s13 = smov %s2098_s15 }
 0x122   :  { %12 = sbr.rel (!%p10_p5) target bundleno = 2 (0x2), region = 68 }

// kernel: discriminator_forward.6
= control target key start
LH: loop header
LB: loop body
LE: loop exit
PB: predicated region body
PF: predicated region fallthrough
CT: control target
= control target key end

     0   :  { %s3401_s12 = smov 0   ;;  %s3403_s13 = smov 0   ;;  %s3914_s0 = inlined_call_operand.vmem [shape: bf16[512,1024], index: 0, kind: input, shape index: {}]   ;;  %s3915_s1 = inlined_call_operand.vmem [shape: bf16[1024,128], index: 1, kind: input, shape index: {}]   ;;  %s3916_s2 = inlined_call_operand.vmem [shape: f32[1,128], index: 2, kind: input, shape index: {}]   ;;  %s3917_s3 = inlined_call_operand.vmem [shape: bf16[512,128], index: 3, kind: output, shape index: {}]  }
   0x1   :  { %s3405_s14 = smov 0  }
   0x2 LB: > { %s25_s15 = sadd.s32 1, %s3375_s13  ;;  %p2460_p0 = scmp.ge.s32.totalorder %s3379_s14, 1  ;;  %s3379_s14 = sphi %s3405_s14, %s13_s14   ;;  %s3375_s13 = sphi %s3403_s13, %s3919_s13   ;;  %s3371_s12 = sphi %s3401_s12, %s3918_s12  }
   0x3   : > { %p27_p1 = scmp.ge.s32.totalorder %s25_s15, 2  ;;  %p170_p2 = scmp.lt.s32.totalorder %s3379_s14, 3 }
   0x5   : > { %s3921_s15 = smov (%p27_p1, %s25_s15), 0  ;;  %p171_p3 = pnand %p2460_p0, %p170_p2 }
   0x6   : > { %s2461_s25 = sshll.u32 (!%p171_p3), %s3371_s12, 5 }
   0x7   : > { %174 = sbr.rel (%p171_p3) target bundleno = 504 (0x1f8), region = 32  ;;  %p206_p4 = scmp.lt.s32.totalorder (!%p171_p3), %s2461_s25, 63 }
   0xc   : > { %v3293_v0 = vld [vmem:[%s3915_s1 + $0x78] sm:$0xff]   ;;  %v3297_v4 = vld [vmem:[%s3915_s1 + $0x70] sm:$0xff]   ;;  %v3301_v8 = vld [vmem:[%s3915_s1 + $0x68] sm:$0xff]   ;;  %s3923_s25 = smov (!%p206_p4, %s2461_s25), 63 }
   0xd   : > { %v3294_v1 = vld [vmem:[%s3915_s1 + $0xf8] sm:$0xff]   ;;  %2821 = vmatprep.subr.bf16.mxu0 %v3293_v0  ;;  %v3298_v5 = vld [vmem:[%s3915_s1 + $0xf0] sm:$0xff]   ;;  %v3302_v9 = vld [vmem:[%s3915_s1 + $0xe8] sm:$0xff]   ;;  %s2693_s24 = sshll.u32 %s3923_s25, 5 }
   0xe   : > { %v3295_v2 = vld [vmem:[%s3915_s1 + $0x38] sm:$0xff]   ;;  %2933 = vmatprep.subr.bf16.mxu1 %v3294_v1  ;;  %v3299_v6 = vld [vmem:[%s3915_s1 + $0x30] sm:$0xff]   ;;  %v3303_v10 = vld [vmem:[%s3915_s1 + $0x28] sm:$0xff]   ;;  %s3518_s12 = scalar_lea.vmem %s3914_s0, %s2693_s24 }
   0xf   : > { %v3296_v3 = vld [vmem:[%s3915_s1 + $0xb8] sm:$0xff]   ;;  %2822 = vmatpush3.bf16.msra.mxu0 %v3295_v2  ;;  %v3300_v7 = vld [vmem:[%s3915_s1 + $0xb0] sm:$0xff]   ;;  %v3304_v11 = vld [vmem:[%s3915_s1 + $0xa8] sm:$0xff]  }
  0x10   : > { %2934 = vmatpush3.bf16.msra.mxu1 %v3296_v3  ;;  %2823 = vmatprep.subr.bf16.mxu0 %v3297_v4  ;;  %v3305_v12 = vld [vmem:[%s3915_s1 + $0x60] sm:$0xff]   ;;  %v3309_v16 = vld [vmem:[%s3915_s1 + $0x58] sm:$0xff]   ;;  %v3313_v20 = vld [vmem:[%s3915_s1 + $0x50] sm:$0xff]  }
  0x11   : > { %2935 = vmatprep.subr.bf16.mxu1 %v3298_v5  ;;  %v3306_v13 = vld [vmem:[%s3915_s1 + $0xe0] sm:$0xff]   ;;  %v3310_v17 = vld [vmem:[%s3915_s1 + $0xd8] sm:$0xff]   ;;  %v3314_v21 = vld [vmem:[%s3915_s1 + $0xd0] sm:$0xff]  }
  0x12   : > { %v3307_v14 = vld [vmem:[%s3915_s1 + $0x20] sm:$0xff]   ;;  %v3311_v18 = vld [vmem:[%s3915_s1 + $0x18] sm:$0xff]   ;;  %v3315_v22 = vld [vmem:[%s3915_s1 + $0x10] sm:$0xff]  }
  0x13   : > { %2824 = vmatpush3.bf16.msra.mxu0 %v3299_v6  ;;  %v3308_v15 = vld [vmem:[%s3915_s1 + $0xa0] sm:$0xff]   ;;  %v3312_v19 = vld [vmem:[%s3915_s1 + $0x98] sm:$0xff]   ;;  %v3316_v23 = vld [vmem:[%s3915_s1 + $0x90] sm:$0xff]  }
  0x14   : > { %2936 = vmatpush3.bf16.msra.mxu1 %v3300_v7  ;;  %2825 = vmatprep.subr.bf16.mxu0 %v3301_v8  ;;  %v3317_v24 = vld [vmem:[%s3915_s1 + $0x48] sm:$0xff]   ;;  %v3321_v28 = vld [vmem:[%s3915_s1 + $0x40] sm:$0xff]   ;;  %v3325_v40 = vld [vmem:[%s3915_s1 + $0x178] sm:$0xff]  }
  0x15   : > { %2937 = vmatprep.subr.bf16.mxu1 %v3302_v9  ;;  %v3318_v25 = vld [vmem:[%s3915_s1 + $0xc8] sm:$0xff]   ;;  %v3322_v29 = vld [vmem:[%s3915_s1 + $0xc0] sm:$0xff]   ;;  %v3326_v41 = vld [vmem:[%s3915_s1 + $0x138] sm:$0xff]  }
  0x16   : > { %v3319_v26 = vld [vmem:[%s3915_s1 + $0x8] sm:$0xff]   ;;  %v3323_v30 = vld [vmem:[%s3915_s1] sm:$0xff]   ;;  %v3327_v42 = vld [vmem:[%s3915_s1 + $0x1f8] sm:$0xff]  }
  0x17   : > { %2826 = vmatpush3.bf16.msra.mxu0 %v3303_v10  ;;  %v3320_v27 = vld [vmem:[%s3915_s1 + $0x88] sm:$0xff]   ;;  %v3324_v31 = vld [vmem:[%s3915_s1 + $0x80] sm:$0xff]   ;;  %v3328_v43 = vld [vmem:[%s3915_s1 + $0x1b8] sm:$0xff]  }
  0x18   : > { %2938 = vmatpush3.bf16.msra.mxu1 %v3304_v11  ;;  %2827 = vmatprep.subr.bf16.mxu0 %v3305_v12  ;;  %v229_v32 = vld [vmem:[%s3518_s12] sm:$0xff]  ;;  %v230_v34 = vld [vmem:[%s3518_s12 + $0x8] sm:$0xff]  ;;  %v3329_v55 = vld [vmem:[%s3915_s1 + $0x170] sm:$0xff]  }
  0x19   : > { %2939 = vmatprep.subr.bf16.mxu1 %v3306_v13  ;;  %v233_v33 = vld [vmem:[%s3518_s12 + $0x20] sm:$0xff]  ;;  %v234_v37 = vld [vmem:[%s3518_s12 + $0x28] sm:$0xff]  ;;  %v3330_v58 = vld [vmem:[%s3915_s1 + $0x130] sm:$0xff]  }
  0x1a   : > { %v2467_v35 = vcombine.low %v229_v32, %v233_v33  ;;  %v2468_v36 = vcombine.high %v229_v32, %v233_v33  ;;  %v2469_v38 = vcombine.low %v230_v34, %v234_v37  ;;  %v2470_v39 = vcombine.high %v230_v34, %v234_v37  ;;  %v237_v44 = vld [vmem:[%s3518_s12 + $0x40] sm:$0xff]  ;;  %v238_v47 = vld [vmem:[%s3518_s12 + $0x48] sm:$0xff]  ;;  %v3331_v60 = vld [vmem:[%s3915_s1 + $0x1f0] sm:$0xff]  }
  0x1b   : > { %2828 = vmatpush3.bf16.msra.mxu0 %v3307_v14  ;;  %v241_v45 = vld [vmem:[%s3518_s12 + $0x60] sm:$0xff]  ;;  %v242_v48 = vld [vmem:[%s3518_s12 + $0x68] sm:$0xff]  ;;  %v3332_v61 = vld [vmem:[%s3915_s1 + $0x1b0] sm:$0xff]  }
  0x1c   : > { %2940 = vmatpush3.bf16.msra.mxu1 %v3308_v15  ;;  %2829 = vmatprep.subr.bf16.mxu0 %v3309_v16  ;;  %v2476_v46 = vcombine.high %v237_v44, %v241_v45  ;;  %v245_v49 = vld [vmem:[%s3518_s12 + $0x80] sm:$0xff]  ;;  %v2478_v50 = vcombine.high %v238_v47, %v242_v48  ;;  %v246_v52 = vld [vmem:[%s3518_s12 + $0x88] sm:$0xff]  ;;  %v2475_v54 = vcombine.low %v237_v44, %v241_v45  ;;  %v3345_v34 = vld [vmem:[%s3915_s1 + $0x150] sm:$0xff]  }
  0x1d   : > { %2941 = vmatprep.subr.bf16.mxu1 %v3310_v17  ;;  %1548 = vmatprep.mubr.bf16.mxu0 %v2468_v36  ;;  %v249_v51 = vld [vmem:[%s3518_s12 + $0xa0] sm:$0xff]  ;;  %v250_v53 = vld [vmem:[%s3518_s12 + $0xa8] sm:$0xff]  ;;  %v2477_v56 = vcombine.low %v238_v47, %v242_v48  ;;  %v3346_v36 = vld [vmem:[%s3915_s1 + $0x110] sm:$0xff]  }
  0x1e   : > { %1709 = vmatprep.mubr.bf16.mxu1 %v2470_v39  ;;  %v2484_v57 = vcombine.high %v245_v49, %v249_v51  ;;  %v2486_v59 = vcombine.high %v246_v52, %v250_v53  ;;  %v253_v62 = vld [vmem:[%s3518_s12 + $0xc0] sm:$0xff]  ;;  %v254_v0 = vld [vmem:[%s3518_s12 + $0xc8] sm:$0xff]  ;;  %v2483_v3 = vcombine.low %v245_v49, %v249_v51  ;;  %v2485_v5 = vcombine.low %v246_v52, %v250_v53  ;;  %v3347_v37 = vld [vmem:[%s3915_s1 + $0x1d0] sm:$0xff]  }
  0x1f   : > { %2830 = vmatpush3.bf16.msra.mxu0 %v3311_v18  ;;  %v257_v63 = vld [vmem:[%s3518_s12 + $0xe0] sm:$0xff]  ;;  %v258_v1 = vld [vmem:[%s3518_s12 + $0xe8] sm:$0xff]  ;;  %v3348_v39 = vld [vmem:[%s3915_s1 + $0x190] sm:$0xff]  }
  0x20   : > { %2942 = vmatpush3.bf16.msra.mxu1 %v3312_v19  ;;  %2831 = vmatprep.subr.bf16.mxu0 %v3313_v20  ;;  %v3333_v2 = vld [vmem:[%s3915_s1 + $0x168] sm:$0xff]   ;;  %v2492_v6 = vcombine.high %v253_v62, %v257_v63  ;;  %v2494_v8 = vcombine.high %v254_v0, %v258_v1  ;;  %v261_v10 = vld [vmem:[%s3518_s12 + $0x100] sm:$0xff]  ;;  %v2491_v16 = vcombine.low %v253_v62, %v257_v63 }
  0x21   : > { %2943 = vmatprep.subr.bf16.mxu1 %v3314_v21  ;;  %v3334_v4 = vld [vmem:[%s3915_s1 + $0x128] sm:$0xff]   ;;  %v265_v11 = vld [vmem:[%s3518_s12 + $0x120] sm:$0xff]  ;;  %v2493_v18 = vcombine.low %v254_v0, %v258_v1 }
  0x22   : > { %v3335_v7 = vld [vmem:[%s3915_s1 + $0x1e8] sm:$0xff]   ;;  %v3337_v14 = vld [vmem:[%s3915_s1 + $0x160] sm:$0xff]   ;;  %v2500_v19 = vcombine.high %v261_v10, %v265_v11 }
  0x23   : > { %2832 = vmatpush3.bf16.msra.mxu0 %v3315_v22  ;;  %v3336_v9 = vld [vmem:[%s3915_s1 + $0x1a8] sm:$0xff]   ;;  %v3338_v15 = vld [vmem:[%s3915_s1 + $0x120] sm:$0xff]  }
  0x24   : > { %2944 = vmatpush3.bf16.msra.mxu1 %v3316_v23  ;;  %2833 = vmatprep.subr.bf16.mxu0 %v3317_v24  ;;  %v262_v12 = vld [vmem:[%s3518_s12 + $0x108] sm:$0xff]  ;;  %v3339_v17 = vld [vmem:[%s3915_s1 + $0x1e0] sm:$0xff]   ;;  %v3341_v24 = vld [vmem:[%s3915_s1 + $0x158] sm:$0xff]  }
  0x25   : > { %2945 = vmatprep.subr.bf16.mxu1 %v3318_v25  ;;  %v266_v13 = vld [vmem:[%s3518_s12 + $0x128] sm:$0xff]  ;;  %v3340_v20 = vld [vmem:[%s3915_s1 + $0x1a0] sm:$0xff]  }
  0x26   : > { %v2502_v21 = vcombine.high %v262_v12, %v266_v13  ;;  %v269_v22 = vld [vmem:[%s3518_s12 + $0x140] sm:$0xff]  ;;  %v270_v25 = vld [vmem:[%s3518_s12 + $0x148] sm:$0xff] }
  0x27   : > { %2834 = vmatpush3.bf16.msra.mxu0 %v3319_v26  ;;  %v273_v23 = vld [vmem:[%s3518_s12 + $0x160] sm:$0xff]  ;;  %v274_v26 = vld [vmem:[%s3518_s12 + $0x168] sm:$0xff] }
  0x28   : > { %2946 = vmatpush3.bf16.msra.mxu1 %v3320_v27  ;;  %2835 = vmatprep.subr.bf16.mxu0 %v3321_v28  ;;  %v3342_v27 = vld [vmem:[%s3915_s1 + $0x118] sm:$0xff]   ;;  %v2508_v32 = vcombine.high %v269_v22, %v273_v23  ;;  %v2510_v33 = vcombine.high %v270_v25, %v274_v26  ;;  %v3350_v47 = vld [vmem:[%s3915_s1 + $0x108] sm:$0xff]   ;;  %v289_v51 = vld [vmem:[%s3518_s12 + $0x1e0] sm:$0xff] }
  0x29   : > { %2947 = vmatprep.subr.bf16.mxu1 %v3322_v29  ;;  %v3343_v28 = vld [vmem:[%s3915_s1 + $0x1d8] sm:$0xff]   ;;  %v3351_v48 = vld [vmem:[%s3915_s1 + $0x1c8] sm:$0xff]   ;;  %v293_v62 = vld [vmem:[%s3518_s12 + $0x200] sm:$0xff] }
  0x2a   : > { %v3344_v29 = vld [vmem:[%s3915_s1 + $0x198] sm:$0xff]   ;;  %v3352_v49 = vld [vmem:[%s3915_s1 + $0x188] sm:$0xff]   ;;  %v297_v63 = vld [vmem:[%s3518_s12 + $0x220] sm:$0xff] }
  0x2b   : > { %2836 = vmatpush3.bf16.msra.mxu0 %v3323_v30  ;;  %v2499_v30 = vcombine.low %v261_v10, %v265_v11  ;;  %v286_v52 = vld [vmem:[%s3518_s12 + $0x1c8] sm:$0xff]  ;;  %v2531_v10 = vcombine.low %v293_v62, %v297_v63 }
  0x2c   : > { %2948 = vmatpush3.bf16.msra.mxu1 %v3324_v31  ;;  %3045 = vmatprep.subr.bf16.mxu0 %v3325_v40  ;;  %v2501_v31 = vcombine.low %v262_v12, %v266_v13  ;;  %v278_v40 = vld [vmem:[%s3518_s12 + $0x188] sm:$0xff] }
  0x2d   : > { %3157 = vmatprep.subr.bf16.mxu1 %v3327_v42  ;;  %v2507_v42 = vcombine.low %v269_v22, %v273_v23  ;;  %v290_v53 = vld [vmem:[%s3518_s12 + $0x1e8] sm:$0xff]  ;;  %v317_v22 = vld [vmem:[%s3518_s12 + $0x2c0] sm:$0xff] }
  0x2e   : > { %1549 = vmatmul.mubr.bf16.vlgmr.msra.gmra.mxu0 %v2467_v35  ;;  %v277_v35 = vld [vmem:[%s3518_s12 + $0x180] sm:$0xff]  ;;  %v294_v0 = vld [vmem:[%s3518_s12 + $0x208] sm:$0xff] }
  0x2f   : > { %1710 = vmatmul.mubr.bf16.vlgmr.msra.gmra.mxu1 %v2469_v38  ;;  %3046 = vmatpush3.bf16.msra.mxu0 %v3326_v41  ;;  %v281_v38 = vld [vmem:[%s3518_s12 + $0x1a0] sm:$0xff]  ;;  %v282_v41 = vld [vmem:[%s3518_s12 + $0x1a8] sm:$0xff] }
  0x30   : > { %3158 = vmatpush3.bf16.msra.mxu1 %v3328_v43  ;;  %1556 = vmatprep.mubr.bf16.mxu0 %v2476_v46  ;;  %v2509_v43 = vcombine.low %v270_v25, %v274_v26  ;;  %v2516_v44 = vcombine.high %v277_v35, %v281_v38  ;;  %v2518_v45 = vcombine.high %v278_v40, %v282_v41  ;;  %v3349_v46 = vld [vmem:[%s3915_s1 + $0x148] sm:$0xff]   ;;  %v321_v23 = vld [vmem:[%s3518_s12 + $0x2e0] sm:$0xff] }
  0x31   : > { %1717 = vmatprep.mubr.bf16.mxu1 %v2478_v50  ;;  %3047 = vmatprep.subr.bf16.mxu0 %v3329_v55  ;;  %v285_v50 = vld [vmem:[%s3518_s12 + $0x1c0] sm:$0xff]  ;;  %v298_v1 = vld [vmem:[%s3518_s12 + $0x228] sm:$0xff] }
  0x32   : > { %3159 = vmatprep.subr.bf16.mxu1 %v3331_v60  ;;  %v3353_v55 = vld [vmem:[%s3915_s1 + $0x140] sm:$0xff]   ;;  %v2533_v11 = vcombine.low %v294_v0, %v298_v1  ;;  %v322_v25 = vld [vmem:[%s3518_s12 + $0x2e8] sm:$0xff] }
  0x33   : > { %3048 = vmatpush3.bf16.msra.mxu0 %v3330_v58  ;;  %v3354_v58 = vld [vmem:[%s3915_s1 + $0x100] sm:$0xff]  }
  0x34   : > { %3160 = vmatpush3.bf16.msra.mxu1 %v3332_v61  ;;  %3049 = vmatprep.subr.bf16.mxu0 %v3333_v2  ;;  %v3355_v60 = vld [vmem:[%s3915_s1 + $0x1c0] sm:$0xff]   ;;  %v2523_v2 = vcombine.low %v285_v50, %v289_v51 }
  0x35   : > { %3161 = vmatprep.subr.bf16.mxu1 %v3335_v7  ;;  %v3356_v61 = vld [vmem:[%s3915_s1 + $0x180] sm:$0xff]  }
  0x36   : > { %1557 = vmatmul.mubr.bf16.gmra.mxu0 %v2475_v54  ;;  %v2515_v54 = vcombine.low %v277_v35, %v281_v38  ;;  %v305_v7 = vld [vmem:[%s3518_s12 + $0x260] sm:$0xff] }
  0x37   : > { %1718 = vmatmul.mubr.bf16.gmra.mxu1 %v2477_v56  ;;  %1564 = vmatprep.mubr.bf16.mxu0 %v2484_v57  ;;  %v2517_v56 = vcombine.low %v278_v40, %v282_v41  ;;  %v2524_v57 = vcombine.high %v285_v50, %v289_v51  ;;  %v333_v38 = vld [vmem:[%s3518_s12 + $0x340] sm:$0xff]  ;;  %v334_v40 = vld [vmem:[%s3518_s12 + $0x348] sm:$0xff] }
  0x38   : > { %1725 = vmatprep.mubr.bf16.mxu1 %v2486_v59  ;;  %3050 = vmatpush3.bf16.msra.mxu0 %v3334_v4  ;;  %v2526_v59 = vcombine.high %v286_v52, %v290_v53  ;;  %v2532_v4 = vcombine.high %v293_v62, %v297_v63  ;;  %v338_v41 = vld [vmem:[%s3518_s12 + $0x368] sm:$0xff]  ;;  %v231_v62 = vld [vmem:[%s3518_s12 + $0x10] sm:$0xff] }
  0x39   : > { %3162 = vmatpush3.bf16.msra.mxu1 %v3336_v9  ;;  %3051 = vmatprep.subr.bf16.mxu0 %v3337_v14  ;;  %v306_v9 = vld [vmem:[%s3518_s12 + $0x268] sm:$0xff]  ;;  %v309_v14 = vld [vmem:[%s3518_s12 + $0x280] sm:$0xff]  ;;  %v2573_v51 = vcombine.low %v334_v40, %v338_v41  ;;  %v235_v63 = vld [vmem:[%s3518_s12 + $0x30] sm:$0xff] }
  0x3a   : > { %3163 = vmatprep.subr.bf16.mxu1 %v3339_v17  ;;  %v314_v17 = vld [vmem:[%s3518_s12 + $0x2a8] sm:$0xff] }
  0x3c   : > { %3052 = vmatpush3.bf16.msra.mxu0 %v3338_v15  ;;  %v313_v15 = vld [vmem:[%s3518_s12 + $0x2a0] sm:$0xff] }
  0x3d   : > { %3164 = vmatpush3.bf16.msra.mxu1 %v3340_v20  ;;  %3053 = vmatprep.subr.bf16.mxu0 %v3341_v24  ;;  %v2548_v20 = vcombine.high %v309_v14, %v313_v15  ;;  %v318_v24 = vld [vmem:[%s3518_s12 + $0x2c8] sm:$0xff]  ;;  %v2547_v26 = vcombine.low %v309_v14, %v313_v15  ;;  %v247_v14 = vld [vmem:[%s3518_s12 + $0x90] sm:$0xff] }
  0x3e   : > { %1565 = vmatmul.mubr.bf16.gmra.mxu0 %v2483_v3  ;;  %3165 = vmatprep.subr.bf16.mxu1 %v3343_v28  ;;  %v2525_v3 = vcombine.low %v286_v52, %v290_v53  ;;  %v2556_v28 = vcombine.high %v317_v22, %v321_v23  ;;  %v2557_v35 = vcombine.low %v318_v24, %v322_v25  ;;  %v251_v15 = vld [vmem:[%s3518_s12 + $0xb0] sm:$0xff] }
  0x3f   : > { %1726 = vmatmul.mubr.bf16.gmra.mxu1 %v2485_v5  ;;  %1572 = vmatprep.mubr.bf16.mxu0 %v2492_v6  ;;  %v2534_v5 = vcombine.high %v294_v0, %v298_v1  ;;  %v301_v6 = vld [vmem:[%s3518_s12 + $0x240] sm:$0xff]  ;;  %v232_v0 = vld [vmem:[%s3518_s12 + $0x18] sm:$0xff] }
  0x40   : > { %1733 = vmatprep.mubr.bf16.mxu1 %v2494_v8  ;;  %3054 = vmatpush3.bf16.msra.mxu0 %v3342_v27  ;;  %v302_v8 = vld [vmem:[%s3518_s12 + $0x248] sm:$0xff]  ;;  %v2540_v12 = vcombine.high %v301_v6, %v305_v7  ;;  %v236_v1 = vld [vmem:[%s3518_s12 + $0x38] sm:$0xff] }
  0x41   : > { %3166 = vmatpush3.bf16.msra.mxu1 %v3344_v29  ;;  %3055 = vmatprep.subr.bf16.mxu0 %v3345_v34  ;;  %v2542_v13 = vcombine.high %v302_v8, %v306_v9  ;;  %v2558_v29 = vcombine.high %v318_v24, %v322_v25  ;;  %v2555_v34 = vcombine.low %v317_v22, %v321_v23  ;;  %v255_v22 = vld [vmem:[%s3518_s12 + $0xd0] sm:$0xff]  ;;  %v256_v24 = vld [vmem:[%s3518_s12 + $0xd8] sm:$0xff] }
  0x42   : > { %3167 = vmatprep.subr.bf16.mxu1 %v3347_v37  ;;  %v259_v23 = vld [vmem:[%s3518_s12 + $0xf0] sm:$0xff]  ;;  %v260_v25 = vld [vmem:[%s3518_s12 + $0xf8] sm:$0xff] }
  0x44   : > { %3056 = vmatpush3.bf16.msra.mxu0 %v3346_v36 }
  0x45   : > { %3168 = vmatpush3.bf16.msra.mxu1 %v3348_v39  ;;  %3057 = vmatprep.subr.bf16.mxu0 %v3349_v46  ;;  %v337_v39 = vld [vmem:[%s3518_s12 + $0x360] sm:$0xff] }
  0x46   : > { %1573 = vmatmul.mubr.bf16.gmra.mxu0 %v2491_v16  ;;  %3169 = vmatprep.subr.bf16.mxu1 %v3351_v48  ;;  %v310_v16 = vld [vmem:[%s3518_s12 + $0x288] sm:$0xff]  ;;  %v341_v46 = vld [vmem:[%s3518_s12 + $0x380] sm:$0xff]  ;;  %v2571_v50 = vcombine.low %v333_v38, %v337_v39 }
  0x47   : > { %1734 = vmatmul.mubr.bf16.gmra.mxu1 %v2493_v18  ;;  %1580 = vmatprep.mubr.bf16.mxu0 %v2500_v19  ;;  %v2539_v18 = vcombine.low %v301_v6, %v305_v7  ;;  %v2541_v19 = vcombine.low %v302_v8, %v306_v9  ;;  %v2549_v27 = vcombine.low %v310_v16, %v314_v17  ;;  %v342_v48 = vld [vmem:[%s3518_s12 + $0x388] sm:$0xff]  ;;  %v239_v6 = vld [vmem:[%s3518_s12 + $0x50] sm:$0xff]  ;;  %v240_v8 = vld [vmem:[%s3518_s12 + $0x58] sm:$0xff] }
  0x48   : > { %1741 = vmatprep.mubr.bf16.mxu1 %v2502_v21  ;;  %3058 = vmatpush3.bf16.msra.mxu0 %v3350_v47  ;;  %v2550_v21 = vcombine.high %v310_v16, %v314_v17  ;;  %v345_v47 = vld [vmem:[%s3518_s12 + $0x3a0] sm:$0xff]  ;;  %v243_v7 = vld [vmem:[%s3518_s12 + $0x70] sm:$0xff]  ;;  %v244_v9 = vld [vmem:[%s3518_s12 + $0x78] sm:$0xff] }
  0x49   : > { %3170 = vmatpush3.bf16.msra.mxu1 %v3352_v49  ;;  %3059 = vmatprep.subr.bf16.mxu0 %v3353_v55  ;;  %v346_v49 = vld [vmem:[%s3518_s12 + $0x3a8] sm:$0xff]  ;;  %v2580_v52 = vcombine.high %v341_v46, %v345_v47  ;;  %v353_v55 = vld [vmem:[%s3518_s12 + $0x3e0] sm:$0xff]  ;;  %v248_v16 = vld [vmem:[%s3518_s12 + $0x98] sm:$0xff] }
  0x4a   : > { %3171 = vmatprep.subr.bf16.mxu1 %v3355_v60  ;;  %v2582_v53 = vcombine.high %v342_v48, %v346_v49  ;;  %v252_v17 = vld [vmem:[%s3518_s12 + $0xb8] sm:$0xff] }
  0x4c   : > { %3060 = vmatpush3.bf16.msra.mxu0 %v3354_v58  ;;  %v2579_v58 = vcombine.low %v341_v46, %v345_v47  ;;  %v279_v46 = vld [vmem:[%s3518_s12 + $0x190] sm:$0xff] }
  0x4d   : > { %3172 = vmatpush3.bf16.msra.mxu1 %v3356_v61  ;;  %v283_v47 = vld [vmem:[%s3518_s12 + $0x1b0] sm:$0xff] }
  0x4e   : > { %1581 = vmatmul.mubr.bf16.gmra.mxu0 %v2499_v30  ;;  %v325_v30 = vld [vmem:[%s3518_s12 + $0x300] sm:$0xff] }
  0x4f   : > { %1742 = vmatmul.mubr.bf16.gmra.mxu1 %v2501_v31  ;;  %1588 = vmatprep.mubr.bf16.mxu0 %v2508_v32  ;;  %v329_v31 = vld [vmem:[%s3518_s12 + $0x320] sm:$0xff]  ;;  %v326_v32 = vld [vmem:[%s3518_s12 + $0x308] sm:$0xff] }
  0x50   : > { %1749 = vmatprep.mubr.bf16.mxu1 %v2510_v33  ;;  %v330_v33 = vld [vmem:[%s3518_s12 + $0x328] sm:$0xff]  ;;  %v2564_v36 = vcombine.high %v325_v30, %v329_v31 }
  0x51   : > { %v2566_v37 = vcombine.high %v326_v32, %v330_v33 }
  0x56   : > { %1589 = vmatmul.mubr.bf16.gmra.mxu0 %v2507_v42  ;;  %v2563_v42 = vcombine.low %v325_v30, %v329_v31  ;;  %v263_v30 = vld [vmem:[%s3518_s12 + $0x110] sm:$0xff] }
  0x57   : > { %1750 = vmatmul.mubr.bf16.gmra.mxu1 %v2509_v43  ;;  %1596 = vmatprep.mubr.bf16.mxu0 %v2516_v44  ;;  %v2565_v43 = vcombine.low %v326_v32, %v330_v33  ;;  %v2572_v44 = vcombine.high %v333_v38, %v337_v39  ;;  %v267_v31 = vld [vmem:[%s3518_s12 + $0x130] sm:$0xff]  ;;  %v264_v32 = vld [vmem:[%s3518_s12 + $0x118] sm:$0xff] }
  0x58   : > { %1757 = vmatprep.mubr.bf16.mxu1 %v2518_v45  ;;  %v2574_v45 = vcombine.high %v334_v40, %v338_v41  ;;  %v268_v33 = vld [vmem:[%s3518_s12 + $0x138] sm:$0xff]  ;;  %v271_v38 = vld [vmem:[%s3518_s12 + $0x150] sm:$0xff] }
  0x59   : > { %v275_v39 = vld [vmem:[%s3518_s12 + $0x170] sm:$0xff]  ;;  %v272_v40 = vld [vmem:[%s3518_s12 + $0x158] sm:$0xff] }
  0x5a   : > { %v276_v41 = vld [vmem:[%s3518_s12 + $0x178] sm:$0xff] }
  0x5e   : > { %1597 = vmatmul.mubr.bf16.gmra.mxu0 %v2515_v54  ;;  %v349_v54 = vld [vmem:[%s3518_s12 + $0x3c0] sm:$0xff] }
  0x5f   : > { %1758 = vmatmul.mubr.bf16.gmra.mxu1 %v2517_v56  ;;  %1604 = vmatprep.mubr.bf16.mxu0 %v2524_v57  ;;  %v350_v56 = vld [vmem:[%s3518_s12 + $0x3c8] sm:$0xff]  ;;  %v2588_v60 = vcombine.high %v349_v54, %v353_v55 }
  0x60   : > { %1765 = vmatprep.mubr.bf16.mxu1 %v2526_v59  ;;  %v354_v57 = vld [vmem:[%s3518_s12 + $0x3e8] sm:$0xff]  ;;  %v2581_v59 = vcombine.low %v342_v48, %v346_v49  ;;  %v280_v48 = vld [vmem:[%s3518_s12 + $0x198] sm:$0xff] }
  0x61   : > { %v2590_v61 = vcombine.high %v350_v56, %v354_v57  ;;  %v284_v49 = vld [vmem:[%s3518_s12 + $0x1b8] sm:$0xff] }
  0x66   : > { %1605 = vmatmul.mubr.bf16.gmra.mxu0 %v2523_v2  ;;  %v2587_v2 = vcombine.low %v349_v54, %v353_v55  ;;  %v287_v54 = vld [vmem:[%s3518_s12 + $0x1d0] sm:$0xff] }
  0x67   : > { %1766 = vmatmul.mubr.bf16.gmra.mxu1 %v2525_v3  ;;  %1612 = vmatprep.mubr.bf16.mxu0 %v2532_v4  ;;  %v2589_v3 = vcombine.low %v350_v56, %v354_v57  ;;  %v2472_v4 = vcombine.high %v231_v62, %v235_v63  ;;  %v291_v55 = vld [vmem:[%s3518_s12 + $0x1f0] sm:$0xff]  ;;  %v288_v56 = vld [vmem:[%s3518_s12 + $0x1d8] sm:$0xff] }
  0x68   : > { %1773 = vmatprep.mubr.bf16.mxu1 %v2534_v5  ;;  %v2474_v5 = vcombine.high %v232_v0, %v236_v1  ;;  %v292_v57 = vld [vmem:[%s3518_s12 + $0x1f8] sm:$0xff] }
  0x6e   : > { %1613 = vmatmul.mubr.bf16.gmra.mxu0 %v2531_v10  ;;  %v2471_v10 = vcombine.low %v231_v62, %v235_v63  ;;  %v295_v62 = vld [vmem:[%s3518_s12 + $0x210] sm:$0xff] }
  0x6f   : > { %1774 = vmatmul.mubr.bf16.gmra.mxu1 %v2533_v11  ;;  %1620 = vmatprep.mubr.bf16.mxu0 %v2540_v12  ;;  %v2473_v11 = vcombine.low %v232_v0, %v236_v1  ;;  %v2480_v12 = vcombine.high %v239_v6, %v243_v7  ;;  %v299_v63 = vld [vmem:[%s3518_s12 + $0x230] sm:$0xff]  ;;  %v296_v0 = vld [vmem:[%s3518_s12 + $0x218] sm:$0xff] }
  0x70   : > { %1781 = vmatprep.mubr.bf16.mxu1 %v2542_v13  ;;  %v2482_v13 = vcombine.high %v240_v8, %v244_v9  ;;  %v300_v1 = vld [vmem:[%s3518_s12 + $0x238] sm:$0xff] }
  0x76   : > { %1621 = vmatmul.mubr.bf16.gmra.mxu0 %v2539_v18  ;;  %v2479_v18 = vcombine.low %v239_v6, %v243_v7  ;;  %v303_v6 = vld [vmem:[%s3518_s12 + $0x250] sm:$0xff] }
  0x77   : > { %1782 = vmatmul.mubr.bf16.gmra.mxu1 %v2541_v19  ;;  %1628 = vmatprep.mubr.bf16.mxu0 %v2548_v20  ;;  %v2481_v19 = vcombine.low %v240_v8, %v244_v9  ;;  %v2488_v20 = vcombine.high %v247_v14, %v251_v15  ;;  %v307_v7 = vld [vmem:[%s3518_s12 + $0x270] sm:$0xff]  ;;  %v304_v8 = vld [vmem:[%s3518_s12 + $0x258] sm:$0xff] }
  0x78   : > { %1789 = vmatprep.mubr.bf16.mxu1 %v2550_v21  ;;  %v2490_v21 = vcombine.high %v248_v16, %v252_v17  ;;  %v308_v9 = vld [vmem:[%s3518_s12 + $0x278] sm:$0xff] }
  0x7e   : > { %1629 = vmatmul.mubr.bf16.gmra.mxu0 %v2547_v26  ;;  %v2487_v26 = vcombine.low %v247_v14, %v251_v15 }
  0x7f   : > { %1790 = vmatmul.mubr.bf16.gmra.mxu1 %v2549_v27  ;;  %1636 = vmatprep.mubr.bf16.mxu0 %v2556_v28  ;;  %v2489_v27 = vcombine.low %v248_v16, %v252_v17  ;;  %v2496_v28 = vcombine.high %v255_v22, %v259_v23  ;;  %v3729_v16 = vld [vmem:[%s3916_s2] ss:$0 sm:$0xff] }
  0x80   : > { %1797 = vmatprep.mubr.bf16.mxu1 %v2558_v29  ;;  %v2498_v29 = vcombine.high %v256_v24, %v260_v25 }
  0x86   : > { %1637 = vmatmul.mubr.bf16.gmra.mxu0 %v2555_v34  ;;  %v2495_v34 = vcombine.low %v255_v22, %v259_v23  ;;  %v312_v22 = vld [vmem:[%s3518_s12 + $0x298] sm:$0xff] }
  0x87   : > { %1798 = vmatmul.mubr.bf16.gmra.mxu1 %v2557_v35  ;;  %1644 = vmatprep.mubr.bf16.mxu0 %v2564_v36  ;;  %v2497_v35 = vcombine.low %v256_v24, %v260_v25  ;;  %v2504_v36 = vcombine.high %v263_v30, %v267_v31  ;;  %v316_v23 = vld [vmem:[%s3518_s12 + $0x2b8] sm:$0xff] }
  0x88   : > { %1805 = vmatprep.mubr.bf16.mxu1 %v2566_v37  ;;  %v2506_v37 = vcombine.high %v264_v32, %v268_v33 }
  0x8e   : > { %1645 = vmatmul.mubr.bf16.gmra.mxu0 %v2563_v42  ;;  %v2503_v42 = vcombine.low %v263_v30, %v267_v31 }
  0x8f   : > { %1806 = vmatmul.mubr.bf16.gmra.mxu1 %v2565_v43  ;;  %1652 = vmatprep.mubr.bf16.mxu0 %v2572_v44  ;;  %v2505_v43 = vcombine.low %v264_v32, %v268_v33  ;;  %v2512_v44 = vcombine.high %v271_v38, %v275_v39  ;;  %v2554_v32 = vcombine.high %v312_v22, %v316_v23 }
  0x90   : > { %1813 = vmatprep.mubr.bf16.mxu1 %v2574_v45  ;;  %v2514_v45 = vcombine.high %v272_v40, %v276_v41 }
  0x96   : > { %1653 = vmatmul.mubr.bf16.gmra.mxu0 %v2571_v50  ;;  %v2511_v50 = vcombine.low %v271_v38, %v275_v39 }
  0x97   : > { %1814 = vmatmul.mubr.bf16.gmra.mxu1 %v2573_v51  ;;  %1660 = vmatprep.mubr.bf16.mxu0 %v2580_v52  ;;  %v2513_v51 = vcombine.low %v272_v40, %v276_v41  ;;  %v2520_v52 = vcombine.high %v279_v46, %v283_v47  ;;  %v319_v41 = vld [vmem:[%s3518_s12 + $0x2d0] sm:$0xff] }
  0x98   : > { %1821 = vmatprep.mubr.bf16.mxu1 %v2582_v53  ;;  %v2522_v53 = vcombine.high %v280_v48, %v284_v49 }
  0x9e   : > { %1661 = vmatmul.mubr.bf16.gmra.mxu0 %v2579_v58  ;;  %v2519_v58 = vcombine.low %v279_v46, %v283_v47  ;;  %v320_v46 = vld [vmem:[%s3518_s12 + $0x2d8] sm:$0xff] }
  0x9f   : > { %1822 = vmatmul.mubr.bf16.gmra.mxu1 %v2581_v59  ;;  %1668 = vmatprep.mubr.bf16.mxu0 %v2588_v60  ;;  %v2521_v59 = vcombine.low %v280_v48, %v284_v49  ;;  %v2528_v60 = vcombine.high %v287_v54, %v291_v55  ;;  %v324_v47 = vld [vmem:[%s3518_s12 + $0x2f8] sm:$0xff] }
  0xa0   : > { %1829 = vmatprep.mubr.bf16.mxu1 %v2590_v61  ;;  %v2530_v61 = vcombine.high %v288_v56, %v292_v57 }
  0xa6   : > { %1669 = vmatmul.mubr.bf16.gmra.mxu0 %v2587_v2  ;;  %v2527_v2 = vcombine.low %v287_v54, %v291_v55 }
  0xa7   : > { %1830 = vmatmul.mubr.bf16.gmra.mxu1 %v2589_v3  ;;  %1870 = vmatprep.mubr.bf16.mxu0 %v2472_v4  ;;  %v2529_v3 = vcombine.low %v288_v56, %v292_v57  ;;  %v2536_v4 = vcombine.high %v295_v62, %v299_v63  ;;  %v2562_v56 = vcombine.high %v320_v46, %v324_v47 }
  0xa8   : > { %2031 = vmatprep.mubr.bf16.mxu1 %v2474_v5  ;;  %v2538_v5 = vcombine.high %v296_v0, %v300_v1 }
  0xae   : > { %1871 = vmatmul.mubr.bf16.vlgmr.msra.gmra.mxu0 %v2471_v10  ;;  %v2535_v10 = vcombine.low %v295_v62, %v299_v63 }
  0xaf   : > { %2032 = vmatmul.mubr.bf16.vlgmr.msra.gmra.mxu1 %v2473_v11  ;;  %1878 = vmatprep.mubr.bf16.mxu0 %v2480_v12  ;;  %v2537_v11 = vcombine.low %v296_v0, %v300_v1  ;;  %v2544_v12 = vcombine.high %v303_v6, %v307_v7  ;;  %v327_v1 = vld [vmem:[%s3518_s12 + $0x310] sm:$0xff] }
  0xb0   : > { %2039 = vmatprep.mubr.bf16.mxu1 %v2482_v13  ;;  %v2546_v13 = vcombine.high %v304_v8, %v308_v9 }
  0xb6   : > { %1879 = vmatmul.mubr.bf16.gmra.mxu0 %v2479_v18  ;;  %v311_v18 = vld [vmem:[%s3518_s12 + $0x290] sm:$0xff] }
  0xb7   : > { %2040 = vmatmul.mubr.bf16.gmra.mxu1 %v2481_v19  ;;  %1886 = vmatprep.mubr.bf16.mxu0 %v2488_v20  ;;  %v315_v19 = vld [vmem:[%s3518_s12 + $0x2b0] sm:$0xff] }
  0xb8   : > { %2047 = vmatprep.mubr.bf16.mxu1 %v2490_v21  ;;  %v2552_v30 = vcombine.high %v311_v18, %v315_v19 }
  0xbe   : > { %1887 = vmatmul.mubr.bf16.gmra.mxu0 %v2487_v26  ;;  %v2543_v26 = vcombine.low %v303_v6, %v307_v7  ;;  %v328_v6 = vld [vmem:[%s3518_s12 + $0x318] sm:$0xff] }
  0xbf   : > { %2048 = vmatmul.mubr.bf16.gmra.mxu1 %v2489_v27  ;;  %1894 = vmatprep.mubr.bf16.mxu0 %v2496_v28  ;;  %v332_v7 = vld [vmem:[%s3518_s12 + $0x338] sm:$0xff] }
  0xc0   : > { %2055 = vmatprep.mubr.bf16.mxu1 %v2498_v29  ;;  %v2545_v29 = vcombine.low %v304_v8, %v308_v9 }
  0xc6   : > { %1895 = vmatmul.mubr.bf16.gmra.mxu0 %v2495_v34 }
  0xc7   : > { %2056 = vmatmul.mubr.bf16.gmra.mxu1 %v2497_v35  ;;  %1902 = vmatprep.mubr.bf16.mxu0 %v2504_v36 }
  0xc8   : > { %2063 = vmatprep.mubr.bf16.mxu1 %v2506_v37 }
  0xce   : > { %1903 = vmatmul.mubr.bf16.gmra.mxu0 %v2503_v42  ;;  %v323_v42 = vld [vmem:[%s3518_s12 + $0x2f0] sm:$0xff] }
  0xcf   : > { %2064 = vmatmul.mubr.bf16.gmra.mxu1 %v2505_v43  ;;  %1910 = vmatprep.mubr.bf16.mxu0 %v2512_v44  ;;  %v2560_v54 = vcombine.high %v319_v41, %v323_v42 }
  0xd0   : > { %2071 = vmatprep.mubr.bf16.mxu1 %v2514_v45 }
  0xd6   : > { %1911 = vmatmul.mubr.bf16.gmra.mxu0 %v2511_v50  ;;  %v2551_v50 = vcombine.low %v311_v18, %v315_v19 }
  0xd7   : > { %2072 = vmatmul.mubr.bf16.gmra.mxu1 %v2513_v51  ;;  %1918 = vmatprep.mubr.bf16.mxu0 %v2520_v52 }
  0xd8   : > { %2079 = vmatprep.mubr.bf16.mxu1 %v2522_v53  ;;  %v2553_v53 = vcombine.low %v312_v22, %v316_v23 }
  0xde   : > { %1919 = vmatmul.mubr.bf16.gmra.mxu0 %v2519_v58 }
  0xdf   : > { %2080 = vmatmul.mubr.bf16.gmra.mxu1 %v2521_v59  ;;  %1926 = vmatprep.mubr.bf16.mxu0 %v2528_v60 }
  0xe0   : > { %2087 = vmatprep.mubr.bf16.mxu1 %v2530_v61 }
  0xe6   : > { %1927 = vmatmul.mubr.bf16.gmra.mxu0 %v2527_v2  ;;  %v331_v2 = vld [vmem:[%s3518_s12 + $0x330] sm:$0xff] }
  0xe7   : > { %2088 = vmatmul.mubr.bf16.gmra.mxu1 %v2529_v3  ;;  %1934 = vmatprep.mubr.bf16.mxu0 %v2536_v4 }
  0xe8   : > { %2095 = vmatprep.mubr.bf16.mxu1 %v2538_v5 }
  0xee   : > { %v2837_v14 = vpop.f32.mrf.mxu0  ;;  %1935 = vmatmul.mubr.bf16.gmra.mxu0 %v2535_v10  ;;  %v2559_v10 = vcombine.low %v319_v41, %v323_v42 }
  0xef   : > { %v2949_v15 = vpop.f32.mrf.mxu1  ;;  %2096 = vmatmul.mubr.bf16.gmra.mxu1 %v2537_v11  ;;  %1942 = vmatprep.mubr.bf16.mxu0 %v2544_v12 }
  0xf0   : > { %v2838_v17 = vpop.f32.mrf.mxu0  ;;  %2103 = vmatprep.mubr.bf16.mxu1 %v2546_v13  ;;  %v2561_v13 = vcombine.low %v320_v46, %v324_v47 }
  0xf1   : > { %v2839_v20 = vadd.f32 %v2838_v17, %v2837_v14  ;;  %v2950_v21 = vpop.f32.mrf.mxu1  ;;  %v2568_v14 = vcombine.high %v327_v1, %v331_v2  ;;  %v2570_v17 = vcombine.high %v328_v6, %v332_v7 }
  0xf2   : > { %v2951_v24 = vadd.f32 %v2950_v21, %v2949_v15  ;;  %v2840_v25 = vpop.f32.mrf.mxu0 }
  0xf3   : > { %v1551_v27 = vadd.f32 %v2839_v20, %v3729_v16  ;;  %v2952_v28 = vpop.f32.mrf.mxu1 }
  0xf4   : > { %v2841_v31 = vpop.f32.mrf.mxu0 }
  0xf5   : > { %v3736_v33 = vadd.f32 %v2951_v24, %v1551_v27  ;;  %v2842_v34 = vadd.f32 %v2841_v31, %v2840_v25  ;;  %v2953_v35 = vpop.f32.mrf.mxu1  ;;  %v339_v27 = vld [vmem:[%s3518_s12 + $0x370] sm:$0xff]  ;;  %v336_v31 = vld [vmem:[%s3518_s12 + $0x358] sm:$0xff] }
  0xf6   : > { %v2954_v36 = vadd.f32 %v2953_v35, %v2952_v28  ;;  %v2843_v37 = vpop.f32.mrf.mxu0  ;;  %1943 = vmatmul.mubr.bf16.gmra.mxu0 %v2543_v26  ;;  %v335_v26 = vld [vmem:[%s3518_s12 + $0x350] sm:$0xff] }
  0xf7   : > { %v1554_v38 = vadd.f32 %v2842_v34, %v3729_v16  ;;  %v2955_v39 = vpop.f32.mrf.mxu1  ;;  %2104 = vmatmul.mubr.bf16.gmra.mxu1 %v2545_v29  ;;  %1950 = vmatprep.mubr.bf16.mxu0 %v2552_v30 }
  0xf8   : > { %v2844_v40 = vpop.f32.mrf.mxu0  ;;  %2111 = vmatprep.mubr.bf16.mxu1 %v2554_v32  ;;  %v340_v32 = vld [vmem:[%s3518_s12 + $0x378] sm:$0xff] }
  0xf9   : > { %v3741_v43 = vadd.f32 %v2954_v36, %v1554_v38  ;;  %v2845_v44 = vadd.f32 %v2844_v40, %v2843_v37  ;;  %v2956_v45 = vpop.f32.mrf.mxu1  ;;  %v2567_v36 = vcombine.low %v327_v1, %v331_v2  ;;  %v2576_v40 = vcombine.high %v335_v26, %v339_v27 }
  0xfa   : > { %v2957_v48 = vadd.f32 %v2956_v45, %v2955_v39  ;;  %v2846_v49 = vpop.f32.mrf.mxu0  ;;  %v2569_v39 = vcombine.low %v328_v6, %v332_v7  ;;  %v2578_v42 = vcombine.high %v336_v31, %v340_v32  ;;  %v2577_v1 = vcombine.low %v336_v31, %v340_v32 }
  0xfb   : > { %v1559_v51 = vadd.f32 %v2845_v44, %v3729_v16  ;;  %v2958_v52 = vpop.f32.mrf.mxu1 }
  0xfc   : > { %v2847_v55 = vpop.f32.mrf.mxu0 }
  0xfd   : > { %v3746_v57 = vadd.f32 %v2957_v48, %v1559_v51  ;;  %v2848_v58 = vadd.f32 %v2847_v55, %v2846_v49  ;;  %v2959_v59 = vpop.f32.mrf.mxu1 }
  0xfe   : > { %v2960_v60 = vadd.f32 %v2959_v59, %v2958_v52  ;;  %v2849_v61 = vpop.f32.mrf.mxu0  ;;  %1951 = vmatmul.mubr.bf16.gmra.mxu0 %v2551_v50  ;;  %v343_v52 = vld [vmem:[%s3518_s12 + $0x390] sm:$0xff]  ;;  %v348_v59 = vld [vmem:[%s3518_s12 + $0x3b8] sm:$0xff] }
  0xff   : > { %v1562_v62 = vadd.f32 %v2848_v58, %v3729_v16  ;;  %v2961_v63 = vpop.f32.mrf.mxu1  ;;  %2112 = vmatmul.mubr.bf16.gmra.mxu1 %v2553_v53  ;;  %1958 = vmatprep.mubr.bf16.mxu0 %v2560_v54  ;;  %v347_v53 = vld [vmem:[%s3518_s12 + $0x3b0] sm:$0xff]  ;;  %v344_v58 = vld [vmem:[%s3518_s12 + $0x398] sm:$0xff] }
 0x100   : > { %v2850_v0 = vpop.f32.mrf.mxu0  ;;  %2119 = vmatprep.mubr.bf16.mxu1 %v2562_v56  ;;  %v2584_v2 = vcombine.high %v343_v52, %v347_v53 }
 0x101   : > { %v3751_v3 = vadd.f32 %v2960_v60, %v1562_v62  ;;  %v2851_v4 = vadd.f32 %v2850_v0, %v2849_v61  ;;  %v2962_v5 = vpop.f32.mrf.mxu1  ;;  %v2575_v62 = vcombine.low %v335_v26, %v339_v27 }
 0x102   : > { %v2963_v8 = vadd.f32 %v2962_v5, %v2961_v63  ;;  %v2852_v9 = vpop.f32.mrf.mxu0  ;;  %v2586_v5 = vcombine.high %v344_v58, %v348_v59 }
 0x103   : > { %v1567_v11 = vadd.f32 %v2851_v4, %v3729_v16  ;;  %v2964_v12 = vpop.f32.mrf.mxu1 }
 0x104   : > { %v2853_v15 = vpop.f32.mrf.mxu0 }
 0x105   : > { %v3756_v18 = vadd.f32 %v2963_v8, %v1567_v11  ;;  %v2854_v19 = vadd.f32 %v2853_v15, %v2852_v9  ;;  %v2965_v20 = vpop.f32.mrf.mxu1  ;;  %v355_v15 = vld [vmem:[%s3518_s12 + $0x3f0] sm:$0xff] }
 0x106   : > { %v2966_v21 = vadd.f32 %v2965_v20, %v2964_v12  ;;  %v2855_v22 = vpop.f32.mrf.mxu0  ;;  %1959 = vmatmul.mubr.bf16.gmra.mxu0 %v2559_v10 }
 0x107   : > { %v1570_v23 = vadd.f32 %v2854_v19, %v3729_v16  ;;  %v2967_v24 = vpop.f32.mrf.mxu1  ;;  %2120 = vmatmul.mubr.bf16.gmra.mxu1 %v2561_v13  ;;  %1966 = vmatprep.mubr.bf16.mxu0 %v2568_v14  ;;  %v351_v14 = vld [vmem:[%s3518_s12 + $0x3d0] sm:$0xff] }
 0x108   : > { %v2856_v25 = vpop.f32.mrf.mxu0  ;;  %2127 = vmatprep.mubr.bf16.mxu1 %v2570_v17 }
 0x109   : > { %v3761_v28 = vadd.f32 %v2966_v21, %v1570_v23  ;;  %v2857_v29 = vadd.f32 %v2856_v25, %v2855_v22  ;;  %v2968_v30 = vpop.f32.mrf.mxu1  ;;  %v352_v21 = vld [vmem:[%s3518_s12 + $0x3d8] sm:$0xff]  ;;  %v2583_v25 = vcombine.low %v343_v52, %v347_v53 }
 0x10a   : > { %v2969_v34 = vadd.f32 %v2968_v30, %v2967_v24  ;;  %v2858_v35 = vpop.f32.mrf.mxu0  ;;  %v356_v22 = vld [vmem:[%s3518_s12 + $0x3f8] sm:$0xff]  ;;  %v2592_v30 = vcombine.high %v351_v14, %v355_v15  ;;  %s2465_s12 = sshll.u32 %s3923_s25, 2 }
 0x10b   : > { %v1575_v37 = vadd.f32 %v2857_v29, %v3729_v16  ;;  %v2970_v38 = vpop.f32.mrf.mxu1  ;;  %v2585_v29 = vcombine.low %v344_v58, %v348_v59  ;;  %v2594_v32 = vcombine.high %v352_v21, %v356_v22  ;;  %v2593_v52 = vcombine.low %v352_v21, %v356_v22  ;;  %s3858_s17 = scalar_lea.vmem %s3917_s3, %s2465_s12 }
 0x10c   : > { %v2859_v41 = vpop.f32.mrf.mxu0 }
 0x10d   : > { %v3766_v44 = vadd.f32 %v2969_v34, %v1575_v37  ;;  %v2860_v45 = vadd.f32 %v2859_v41, %v2858_v35  ;;  %v2971_v46 = vpop.f32.mrf.mxu1 }
 0x10e   : > { %v2972_v47 = vadd.f32 %v2971_v46, %v2970_v38  ;;  %v2861_v48 = vpop.f32.mrf.mxu0  ;;  %1967 = vmatmul.mubr.bf16.gmra.mxu0 %v2567_v36 }
 0x10f   : > { %v1578_v49 = vadd.f32 %v2860_v45, %v3729_v16  ;;  %v2973_v50 = vpop.f32.mrf.mxu1  ;;  %2128 = vmatmul.mubr.bf16.gmra.mxu1 %v2569_v39  ;;  %1974 = vmatprep.mubr.bf16.mxu0 %v2576_v40 }
 0x110   : > { %v2862_v51 = vpop.f32.mrf.mxu0  ;;  %2135 = vmatprep.mubr.bf16.mxu1 %v2578_v42 }
 0x111   : > { %v3771_v54 = vadd.f32 %v2972_v47, %v1578_v49  ;;  %v2863_v55 = vadd.f32 %v2862_v51, %v2861_v48  ;;  %v2974_v56 = vpop.f32.mrf.mxu1  ;;  %v2591_v49 = vcombine.low %v351_v14, %v355_v15 }
 0x112   : > { %v2975_v60 = vadd.f32 %v2974_v56, %v2973_v50  ;;  %v2864_v61 = vpop.f32.mrf.mxu0 }
 0x113   : > { %v1583_v63 = vadd.f32 %v2863_v55, %v3729_v16  ;;  %v2976_v0 = vpop.f32.mrf.mxu1 }
 0x114   : > { %v2865_v4 = vpop.f32.mrf.mxu0 }
 0x115   : > { %v3776_v6 = vadd.f32 %v2975_v60, %v1583_v63  ;;  %v2866_v7 = vadd.f32 %v2865_v4, %v2864_v61  ;;  %v2977_v8 = vpop.f32.mrf.mxu1 }
 0x116   : > { %v2978_v9 = vadd.f32 %v2977_v8, %v2976_v0  ;;  %v2867_v10 = vpop.f32.mrf.mxu0  ;;  %1975 = vmatmul.mubr.bf16.gmra.mxu0 %v2575_v62 }
 0x117   : > { %v1586_v11 = vadd.f32 %v2866_v7, %v3729_v16  ;;  %v2979_v12 = vpop.f32.mrf.mxu1  ;;  %2136 = vmatmul.mubr.bf16.gmra.mxu1 %v2577_v1  ;;  %1982 = vmatprep.mubr.bf16.mxu0 %v2584_v2 }
 0x118   : > { %v2868_v13 = vpop.f32.mrf.mxu0  ;;  %2143 = vmatprep.mubr.bf16.mxu1 %v2586_v5 }
 0x119   : > { %v3781_v17 = vadd.f32 %v2978_v9, %v1586_v11  ;;  %v2869_v19 = vadd.f32 %v2868_v13, %v2867_v10  ;;  %v2980_v20 = vpop.f32.mrf.mxu1 }
 0x11a   : > { %v2981_v23 = vadd.f32 %v2980_v20, %v2979_v12  ;;  %v2870_v24 = vpop.f32.mrf.mxu0 }
 0x11b   : > { %v1591_v26 = vadd.f32 %v2869_v19, %v3729_v16  ;;  %v2982_v27 = vpop.f32.mrf.mxu1 }
 0x11c   : > { %v2871_v31 = vpop.f32.mrf.mxu0 }
 0x11d   : > { %v3786_v34 = vadd.f32 %v2981_v23, %v1591_v26  ;;  %v2872_v35 = vadd.f32 %v2871_v31, %v2870_v24  ;;  %v2983_v36 = vpop.f32.mrf.mxu1 }
 0x11e   : > { %v2984_v37 = vadd.f32 %v2983_v36, %v2982_v27  ;;  %v2873_v38 = vpop.f32.mrf.mxu0  ;;  %1983 = vmatmul.mubr.bf16.gmra.mxu0 %v2583_v25 }
 0x11f   : > { %v1594_v39 = vadd.f32 %v2872_v35, %v3729_v16  ;;  %v2985_v40 = vpop.f32.mrf.mxu1  ;;  %2144 = vmatmul.mubr.bf16.gmra.mxu1 %v2585_v29  ;;  %1990 = vmatprep.mubr.bf16.mxu0 %v2592_v30 }
 0x120   : > { %v2874_v41 = vpop.f32.mrf.mxu0  ;;  %2151 = vmatprep.mubr.bf16.mxu1 %v2594_v32 }
 0x121   : > { %v3789_v42 = vadd.f32 %v2984_v37, %v1594_v39  ;;  %v2875_v45 = vadd.f32 %v2874_v41, %v2873_v38  ;;  %v2986_v46 = vpop.f32.mrf.mxu1 }
 0x122   : > { %v2987_v47 = vadd.f32 %v2986_v46, %v2985_v40  ;;  %v2876_v48 = vpop.f32.mrf.mxu0 }
 0x123   : > { %v1599_v50 = vadd.f32 %v2875_v45, %v3729_v16  ;;  %v2988_v51 = vpop.f32.mrf.mxu1 }
 0x124   : > { %v2877_v53 = vpop.f32.mrf.mxu0 }
 0x125   : > { %v3792_v55 = vadd.f32 %v2987_v47, %v1599_v50  ;;  %v2878_v56 = vadd.f32 %v2877_v53, %v2876_v48  ;;  %v2989_v58 = vpop.f32.mrf.mxu1 }
 0x126   : > { %v2990_v59 = vadd.f32 %v2989_v58, %v2988_v51  ;;  %v2879_v60 = vpop.f32.mrf.mxu0  ;;  %1991 = vmatmul.mubr.bf16.gmra.mxu0 %v2591_v49 }
 0x127   : > { %v1602_v61 = vadd.f32 %v2878_v56, %v3729_v16  ;;  %v2991_v62 = vpop.f32.mrf.mxu1  ;;  %2152 = vmatmul.mubr.bf16.gmra.mxu1 %v2593_v52 }
 0x128   : > { %v2880_v63 = vpop.f32.mrf.mxu0 }
 0x129   : > { %v3795_v0 = vadd.f32 %v2990_v59, %v1602_v61  ;;  %v2881_v1 = vadd.f32 %v2880_v63, %v2879_v60  ;;  %v2992_v2 = vpop.f32.mrf.mxu1 }
 0x12a   : > { %v2993_v4 = vadd.f32 %v2992_v2, %v2991_v62  ;;  %v2882_v5 = vpop.f32.mrf.mxu0 }
 0x12b   : > { %v1607_v7 = vadd.f32 %v2881_v1, %v3729_v16  ;;  %v2994_v8 = vpop.f32.mrf.mxu1 }
 0x12c   : > { %v2883_v9 = vpop.f32.mrf.mxu0 }
 0x12d   : > { %v3798_v10 = vadd.f32 %v2993_v4, %v1607_v7  ;;  %v2884_v11 = vadd.f32 %v2883_v9, %v2882_v5  ;;  %v2995_v12 = vpop.f32.mrf.mxu1 }
 0x12e   : > { %v2996_v13 = vadd.f32 %v2995_v12, %v2994_v8  ;;  %v2885_v14 = vpop.f32.mrf.mxu0 }
 0x12f   : > { %v1610_v15 = vadd.f32 %v2884_v11, %v3729_v16  ;;  %v2997_v19 = vpop.f32.mrf.mxu1 }
 0x130   : > { %v2886_v20 = vpop.f32.mrf.mxu0 }
 0x131   : > { %v3801_v21 = vadd.f32 %v2996_v13, %v1610_v15  ;;  %v2887_v22 = vadd.f32 %v2886_v20, %v2885_v14  ;;  %v2998_v23 = vpop.f32.mrf.mxu1 }
 0x132   : > { %v2999_v24 = vadd.f32 %v2998_v23, %v2997_v19  ;;  %v2888_v25 = vpop.f32.mrf.mxu0 }
 0x133   : > { %v1615_v26 = vadd.f32 %v2887_v22, %v3729_v16  ;;  %v3000_v27 = vpop.f32.mrf.mxu1 }
 0x134   : > { %v2889_v29 = vpop.f32.mrf.mxu0 }
 0x135   : > { %v3804_v30 = vadd.f32 %v2999_v24, %v1615_v26  ;;  %v2890_v31 = vadd.f32 %v2889_v29, %v2888_v25  ;;  %v3001_v32 = vpop.f32.mrf.mxu1 }
 0x136   : > { %v3002_v35 = vadd.f32 %v3001_v32, %v3000_v27  ;;  %v2891_v36 = vpop.f32.mrf.mxu0 }
 0x137   : > { %v1618_v37 = vadd.f32 %v2890_v31, %v3729_v16  ;;  %v3003_v38 = vpop.f32.mrf.mxu1 }
 0x138   : > { %v2892_v39 = vpop.f32.mrf.mxu0 }
 0x139   : > { %v3807_v40 = vadd.f32 %v3002_v35, %v1618_v37  ;;  %v2893_v41 = vadd.f32 %v2892_v39, %v2891_v36  ;;  %v3004_v45 = vpop.f32.mrf.mxu1 }
 0x13a   : > { %v3005_v46 = vadd.f32 %v3004_v45, %v3003_v38  ;;  %v2894_v47 = vpop.f32.mrf.mxu0 }
 0x13b   : > { %v1623_v48 = vadd.f32 %v2893_v41, %v3729_v16  ;;  %v3006_v49 = vpop.f32.mrf.mxu1 }
 0x13c   : > { %v2895_v50 = vpop.f32.mrf.mxu0 }
 0x13d   : > { %v3810_v51 = vadd.f32 %v3005_v46, %v1623_v48  ;;  %v2896_v52 = vadd.f32 %v2895_v50, %v2894_v47  ;;  %v3007_v53 = vpop.f32.mrf.mxu1 }
 0x13e   : > { %v3008_v56 = vadd.f32 %v3007_v53, %v3006_v49  ;;  %v2897_v58 = vpop.f32.mrf.mxu0 }
 0x13f   : > { %v1626_v59 = vadd.f32 %v2896_v52, %v3729_v16  ;;  %v3009_v60 = vpop.f32.mrf.mxu1 }
 0x140   : > { %v2898_v61 = vpop.f32.mrf.mxu0 }
 0x141   : > { %v3813_v62 = vadd.f32 %v3008_v56, %v1626_v59  ;;  %v2899_v63 = vadd.f32 %v2898_v61, %v2897_v58  ;;  %v3010_v1 = vpop.f32.mrf.mxu1 }
 0x142   : > { %v3011_v2 = vadd.f32 %v3010_v1, %v3009_v60  ;;  %v2900_v4 = vpop.f32.mrf.mxu0 }
 0x143   : > { %v1631_v5 = vadd.f32 %v2899_v63, %v3729_v16  ;;  %v3012_v7 = vpop.f32.mrf.mxu1 }
 0x144   : > { %v2901_v8 = vpop.f32.mrf.mxu0 }
 0x145   : > { %v3816_v9 = vadd.f32 %v3011_v2, %v1631_v5  ;;  %v2902_v11 = vadd.f32 %v2901_v8, %v2900_v4  ;;  %v3013_v12 = vpop.f32.mrf.mxu1 }
 0x146   : > { %v3014_v13 = vadd.f32 %v3013_v12, %v3012_v7  ;;  %v2903_v14 = vpop.f32.mrf.mxu0 }
 0x147   : > { %v1634_v15 = vadd.f32 %v2902_v11, %v3729_v16  ;;  %v3015_v19 = vpop.f32.mrf.mxu1 }
 0x148   : > { %v2904_v20 = vpop.f32.mrf.mxu0 }
 0x149   : > { %v3819_v22 = vadd.f32 %v3014_v13, %v1634_v15  ;;  %v2905_v23 = vadd.f32 %v2904_v20, %v2903_v14  ;;  %v3016_v24 = vpop.f32.mrf.mxu1 }
 0x14a   : > { %v3017_v25 = vadd.f32 %v3016_v24, %v3015_v19  ;;  %v2906_v26 = vpop.f32.mrf.mxu0 }
 0x14b   : > { %v1639_v27 = vadd.f32 %v2905_v23, %v3729_v16  ;;  %v3018_v29 = vpop.f32.mrf.mxu1 }
 0x14c   : > { %v2907_v31 = vpop.f32.mrf.mxu0 }
 0x14d   : > { %v3822_v32 = vadd.f32 %v3017_v25, %v1639_v27  ;;  %v2908_v35 = vadd.f32 %v2907_v31, %v2906_v26  ;;  %v3019_v36 = vpop.f32.mrf.mxu1 }
 0x14e   : > { %v3020_v37 = vadd.f32 %v3019_v36, %v3018_v29  ;;  %v2909_v38 = vpop.f32.mrf.mxu0 }
 0x14f   : > { %v1642_v39 = vadd.f32 %v2908_v35, %v3729_v16  ;;  %v3021_v41 = vpop.f32.mrf.mxu1 }
 0x150   : > { %v2910_v45 = vpop.f32.mrf.mxu0 }
 0x151   : > { %v3825_v46 = vadd.f32 %v3020_v37, %v1642_v39  ;;  %v2911_v47 = vadd.f32 %v2910_v45, %v2909_v38  ;;  %v3022_v48 = vpop.f32.mrf.mxu1 }
 0x152   : > { %v3023_v49 = vadd.f32 %v3022_v48, %v3021_v41  ;;  %v2912_v50 = vpop.f32.mrf.mxu0 }
 0x153   : > { %v1647_v52 = vadd.f32 %v2911_v47, %v3729_v16  ;;  %v3024_v53 = vpop.f32.mrf.mxu1 }
 0x154   : > { %v2913_v56 = vpop.f32.mrf.mxu0 }
 0x155   : > { %v3828_v58 = vadd.f32 %v3023_v49, %v1647_v52  ;;  %v2914_v59 = vadd.f32 %v2913_v56, %v2912_v50  ;;  %v3025_v60 = vpop.f32.mrf.mxu1 }
 0x156   : > { %v3026_v61 = vadd.f32 %v3025_v60, %v3024_v53  ;;  %v2915_v63 = vpop.f32.mrf.mxu0 }
 0x157   : > { %v1650_v1 = vadd.f32 %v2914_v59, %v3729_v16  ;;  %v3027_v2 = vpop.f32.mrf.mxu1 }
 0x158   : > { %v2916_v4 = vpop.f32.mrf.mxu0 }
 0x159   : > { %v3831_v5 = vadd.f32 %v3026_v61, %v1650_v1  ;;  %v2917_v7 = vadd.f32 %v2916_v4, %v2915_v63  ;;  %v3028_v8 = vpop.f32.mrf.mxu1 }
 0x15a   : > { %v3029_v11 = vadd.f32 %v3028_v8, %v3027_v2  ;;  %v2918_v12 = vpop.f32.mrf.mxu0 }
 0x15b   : > { %v1655_v13 = vadd.f32 %v2917_v7, %v3729_v16  ;;  %v3030_v14 = vpop.f32.mrf.mxu1 }
 0x15c   : > { %v2919_v15 = vpop.f32.mrf.mxu0 }
 0x15d   : > { %v3834_v19 = vadd.f32 %v3029_v11, %v1655_v13  ;;  %v2920_v20 = vadd.f32 %v2919_v15, %v2918_v12  ;;  %v3031_v23 = vpop.f32.mrf.mxu1 }
 0x15e   : > { %v3032_v24 = vadd.f32 %v3031_v23, %v3030_v14  ;;  %v2921_v25 = vpop.f32.mrf.mxu0 }
 0x15f   : > { %v1658_v26 = vadd.f32 %v2920_v20, %v3729_v16  ;;  %v3033_v27 = vpop.f32.mrf.mxu1 }
 0x160   : > { %v2922_v29 = vpop.f32.mrf.mxu0 }
 0x161   : > { %v3837_v31 = vadd.f32 %v3032_v24, %v1658_v26  ;;  %v2923_v35 = vadd.f32 %v2922_v29, %v2921_v25  ;;  %v3034_v36 = vpop.f32.mrf.mxu1 }
 0x162   : > { %v3035_v37 = vadd.f32 %v3034_v36, %v3033_v27  ;;  %v2924_v38 = vpop.f32.mrf.mxu0 }
 0x163   : > { %v1663_v39 = vadd.f32 %v2923_v35, %v3729_v16  ;;  %v3036_v41 = vpop.f32.mrf.mxu1 }
 0x164   : > { %v2925_v45 = vpop.f32.mrf.mxu0 }
 0x165   : > { %v3840_v47 = vadd.f32 %v3035_v37, %v1663_v39  ;;  %v2926_v48 = vadd.f32 %v2925_v45, %v2924_v38  ;;  %v3037_v49 = vpop.f32.mrf.mxu1 }
 0x166   : > { %v3038_v50 = vadd.f32 %v3037_v49, %v3036_v41  ;;  %v2927_v52 = vpop.f32.mrf.mxu0 }
 0x167   : > { %v1666_v53 = vadd.f32 %v2926_v48, %v3729_v16  ;;  %v3039_v56 = vpop.f32.mrf.mxu1 }
 0x168   : > { %v2928_v59 = vpop.f32.mrf.mxu0 }
 0x169   : > { %v3843_v60 = vadd.f32 %v3038_v50, %v1666_v53  ;;  %v2929_v61 = vadd.f32 %v2928_v59, %v2927_v52  ;;  %v3040_v63 = vpop.f32.mrf.mxu1 }
 0x16a   : > { %v3041_v1 = vadd.f32 %v3040_v63, %v3039_v56  ;;  %v2930_v2 = vpop.f32.mrf.mxu0 }
 0x16b   : > { %v1671_v4 = vadd.f32 %v2929_v61, %v3729_v16  ;;  %v3042_v7 = vpop.f32.mrf.mxu1 }
 0x16c   : > { %v2931_v8 = vpop.f32.mrf.mxu0 }
 0x16d   : > { %v3846_v11 = vadd.f32 %v3041_v1, %v1671_v4  ;;  %v2932_v12 = vadd.f32 %v2931_v8, %v2930_v2  ;;  %v3043_v13 = vpop.f32.mrf.mxu1 }
 0x16e   : > { %v3044_v14 = vadd.f32 %v3043_v13, %v3042_v7  ;;  %v3061_v15 = vpop.f32.mrf.mxu0 }
 0x16f   : > { %v1674_v20 = vadd.f32 %v2932_v12, %v3729_v16  ;;  %v3173_v23 = vpop.f32.mrf.mxu1 }
 0x170   : > { %v3062_v24 = vpop.f32.mrf.mxu0 }
 0x171   : > { %v3849_v25 = vadd.f32 %v3044_v14, %v1674_v20  ;;  %v3063_v26 = vadd.f32 %v3062_v24, %v3061_v15  ;;  %v3174_v27 = vpop.f32.mrf.mxu1 }
 0x172   : > { %v3064_v29 = vpop.f32.mrf.mxu0  ;;  %v3175_v38 = vadd.f32 %v3174_v27, %v3173_v23 }
 0x173   : > { %v1873_v35 = vadd.f32 %v3063_v26, %v3736_v33  ;;  %v3176_v36 = vpop.f32.mrf.mxu1 }
 0x174   : > { %v3065_v37 = vpop.f32.mrf.mxu0 }
 0x175   : > { %v3066_v39 = vadd.f32 %v3065_v37, %v3064_v29  ;;  %v3177_v41 = vpop.f32.mrf.mxu1  ;;  %v2034_v48 = vadd.f32 %v3175_v38, %v1873_v35 }
 0x176   : > { %v3067_v45 = vpop.f32.mrf.mxu0  ;;  %v3178_v16 = vadd.f32 %v3177_v41, %v3176_v36 }
 0x177   : > { %v1876_v49 = vadd.f32 %v3066_v39, %v3741_v43  ;;  %v3179_v50 = vpop.f32.mrf.mxu1  ;;  %v2160_v63 = vmax.f32 %v2034_v48, 0.0 }
 0x178   : > { %v3068_v52 = vpop.f32.mrf.mxu0 }
 0x179   : > { %v2037_v53 = vadd.f32 %v3178_v16, %v1876_v49  ;;  %v3069_v56 = vadd.f32 %v3068_v52, %v3067_v45  ;;  %v3180_v59 = vpop.f32.mrf.mxu1 }
 0x17a   : > { %v3070_v61 = vpop.f32.mrf.mxu0  ;;  %v3181_v7 = vadd.f32 %v3180_v59, %v3179_v50 }
 0x17b   : > { %v2161_v1 = vmax.f32 %v2037_v53, 0.0  ;;  %v1881_v33 = vadd.f32 %v3069_v56, %v3746_v57  ;;  %v3182_v2 = vpop.f32.mrf.mxu1 }
 0x17c   : > { %v3071_v43 = vpop.f32.mrf.mxu0 }
 0x17d   : > { %v2729_v4 = vpack.c.bf16 %v2161_v1, %v2160_v63  ;;  %v3072_v8 = vadd.f32 %v3071_v43, %v3070_v61  ;;  %v3183_v12 = vpop.f32.mrf.mxu1  ;;  %v2042_v14 = vadd.f32 %v3181_v7, %v1881_v33 }
 0x17e   : > { %v3073_v13 = vpop.f32.mrf.mxu0  ;;  %v3184_v20 = vadd.f32 %v3183_v12, %v3182_v2 }
 0x17f   : > { %2730 = vst [vmem:[%s3858_s17] sm:$0xff] %v2729_v4   ;;  %v1884_v15 = vadd.f32 %v3072_v8, %v3751_v3  ;;  %v3185_v23 = vpop.f32.mrf.mxu1  ;;  %v2162_v35 = vmax.f32 %v2042_v14, 0.0 }
 0x180   : > { %v3074_v57 = vpop.f32.mrf.mxu0 }
 0x181   : > { %v2045_v24 = vadd.f32 %v3184_v20, %v1884_v15  ;;  %v3075_v26 = vadd.f32 %v3074_v57, %v3073_v13  ;;  %v3186_v27 = vpop.f32.mrf.mxu1 }
 0x182   : > { %v3076_v29 = vpop.f32.mrf.mxu0  ;;  %v3187_v45 = vadd.f32 %v3186_v27, %v3185_v23 }
 0x183   : > { %v2163_v36 = vmax.f32 %v2045_v24, 0.0  ;;  %v1889_v37 = vadd.f32 %v3075_v26, %v3756_v18  ;;  %v3188_v38 = vpop.f32.mrf.mxu1 }
 0x184   : > { %v3077_v39 = vpop.f32.mrf.mxu0 }
 0x185   : > { %v2734_v41 = vpack.c.bf16 %v2163_v36, %v2162_v35  ;;  %v3078_v48 = vadd.f32 %v3077_v39, %v3076_v29  ;;  %v3189_v49 = vpop.f32.mrf.mxu1  ;;  %v2050_v3 = vadd.f32 %v3187_v45, %v1889_v37 }
 0x186   : > { %v3079_v16 = vpop.f32.mrf.mxu0  ;;  %v3190_v52 = vadd.f32 %v3189_v49, %v3188_v38 }
 0x187   : > { %2806 = vst [vmem:[%s3858_s17 + $0x8] sm:$0xff] %v2734_v41   ;;  %v1892_v50 = vadd.f32 %v3078_v48, %v3761_v28  ;;  %v3191_v53 = vpop.f32.mrf.mxu1  ;;  %v2164_v18 = vmax.f32 %v2050_v3, 0.0 }
 0x188   : > { %v3080_v56 = vpop.f32.mrf.mxu0 }
 0x189   : > { %v2053_v59 = vadd.f32 %v3190_v52, %v1892_v50  ;;  %v3081_v61 = vadd.f32 %v3080_v56, %v3079_v16  ;;  %v3192_v63 = vpop.f32.mrf.mxu1 }
 0x18a   : > { %v3082_v1 = vpop.f32.mrf.mxu0  ;;  %v3193_v8 = vadd.f32 %v3192_v63, %v3191_v53 }
 0x18b   : > { %v2165_v33 = vmax.f32 %v2053_v59, 0.0  ;;  %v1897_v2 = vadd.f32 %v3081_v61, %v3766_v44  ;;  %v3194_v43 = vpop.f32.mrf.mxu1 }
 0x18c   : > { %v3083_v4 = vpop.f32.mrf.mxu0 }
 0x18d   : > { %v2739_v7 = vpack.c.bf16 %v2165_v33, %v2164_v18  ;;  %v3084_v12 = vadd.f32 %v3083_v4, %v3082_v1  ;;  %v3195_v13 = vpop.f32.mrf.mxu1  ;;  %v2058_v28 = vadd.f32 %v3193_v8, %v1897_v2 }
 0x18e   : > { %v3085_v14 = vpop.f32.mrf.mxu0  ;;  %v3196_v20 = vadd.f32 %v3195_v13, %v3194_v43 }
 0x18f   : > { %2807 = vst [vmem:[%s3858_s17 + $0x10] sm:$0xff] %v2739_v7   ;;  %v1900_v15 = vadd.f32 %v3084_v12, %v3771_v54  ;;  %v3197_v23 = vpop.f32.mrf.mxu1  ;;  %v2166_v44 = vmax.f32 %v2058_v28, 0.0 }
 0x190   : > { %v3086_v57 = vpop.f32.mrf.mxu0 }
 0x191   : > { %v2061_v24 = vadd.f32 %v3196_v20, %v1900_v15  ;;  %v3087_v26 = vadd.f32 %v3086_v57, %v3085_v14  ;;  %v3198_v27 = vpop.f32.mrf.mxu1 }
 0x192   : > { %v3088_v29 = vpop.f32.mrf.mxu0  ;;  %v3199_v41 = vadd.f32 %v3198_v27, %v3197_v23 }
 0x193   : > { %v2167_v35 = vmax.f32 %v2061_v24, 0.0  ;;  %v1905_v36 = vadd.f32 %v3087_v26, %v3776_v6  ;;  %v3200_v37 = vpop.f32.mrf.mxu1 }
 0x194   : > { %v3089_v38 = vpop.f32.mrf.mxu0 }
 0x195   : > { %v2744_v39 = vpack.c.bf16 %v2167_v35, %v2166_v44  ;;  %v3090_v45 = vadd.f32 %v3089_v38, %v3088_v29  ;;  %v3201_v48 = vpop.f32.mrf.mxu1  ;;  %v2066_v54 = vadd.f32 %v3199_v41, %v1905_v36 }
 0x196   : > { %v3091_v49 = vpop.f32.mrf.mxu0  ;;  %v3202_v3 = vadd.f32 %v3201_v48, %v3200_v37 }
 0x197   : > { %2808 = vst [vmem:[%s3858_s17 + $0x18] sm:$0xff] %v2744_v39   ;;  %v1908_v16 = vadd.f32 %v3090_v45, %v3781_v17  ;;  %v3203_v50 = vpop.f32.mrf.mxu1  ;;  %v2168_v6 = vmax.f32 %v2066_v54, 0.0 }
 0x198   : > { %v3092_v52 = vpop.f32.mrf.mxu0 }
 0x199   : > { %v2069_v53 = vadd.f32 %v3202_v3, %v1908_v16  ;;  %v3093_v56 = vadd.f32 %v3092_v52, %v3091_v49  ;;  %v3204_v59 = vpop.f32.mrf.mxu1 }
 0x19a   : > { %v3094_v61 = vpop.f32.mrf.mxu0  ;;  %v3205_v43 = vadd.f32 %v3204_v59, %v3203_v50 }
 0x19b   : > { %v2169_v63 = vmax.f32 %v2069_v53, 0.0  ;;  %v1913_v1 = vadd.f32 %v3093_v56, %v3786_v34  ;;  %v3206_v18 = vpop.f32.mrf.mxu1 }
 0x19c   : > { %v3095_v33 = vpop.f32.mrf.mxu0 }
 0x19d   : > { %v2749_v2 = vpack.c.bf16 %v2169_v63, %v2168_v6  ;;  %v3096_v4 = vadd.f32 %v3095_v33, %v3094_v61  ;;  %v3207_v7 = vpop.f32.mrf.mxu1  ;;  %v2074_v17 = vadd.f32 %v3205_v43, %v1913_v1 }
 0x19e   : > { %v3097_v8 = vpop.f32.mrf.mxu0  ;;  %v3208_v13 = vadd.f32 %v3207_v7, %v3206_v18 }
 0x19f   : > { %2809 = vst [vmem:[%s3858_s17 + $0x20] sm:$0xff] %v2749_v2   ;;  %v1916_v12 = vadd.f32 %v3096_v4, %v3789_v42  ;;  %v3209_v14 = vpop.f32.mrf.mxu1  ;;  %v2170_v34 = vmax.f32 %v2074_v17, 0.0 }
 0x1a0   : > { %v3098_v28 = vpop.f32.mrf.mxu0 }
 0x1a1   : > { %v2077_v15 = vadd.f32 %v3208_v13, %v1916_v12  ;;  %v3099_v20 = vadd.f32 %v3098_v28, %v3097_v8  ;;  %v3210_v23 = vpop.f32.mrf.mxu1 }
 0x1a2   : > { %v3100_v57 = vpop.f32.mrf.mxu0  ;;  %v3211_v35 = vadd.f32 %v3210_v23, %v3209_v14 }
 0x1a3   : > { %v2171_v24 = vmax.f32 %v2077_v15, 0.0  ;;  %v1921_v26 = vadd.f32 %v3099_v20, %v3792_v55  ;;  %v3212_v27 = vpop.f32.mrf.mxu1 }
 0x1a4   : > { %v3101_v29 = vpop.f32.mrf.mxu0 }
 0x1a5   : > { %v2754_v44 = vpack.c.bf16 %v2171_v24, %v2170_v34  ;;  %v3102_v36 = vadd.f32 %v3101_v29, %v3100_v57  ;;  %v3213_v37 = vpop.f32.mrf.mxu1  ;;  %v2082_v42 = vadd.f32 %v3211_v35, %v1921_v26 }
 0x1a6   : > { %v3103_v38 = vpop.f32.mrf.mxu0  ;;  %v3214_v41 = vadd.f32 %v3213_v37, %v3212_v27 }
 0x1a7   : > { %2810 = vst [vmem:[%s3858_s17 + $0x28] sm:$0xff] %v2754_v44   ;;  %v1924_v39 = vadd.f32 %v3102_v36, %v3795_v0  ;;  %v3215_v45 = vpop.f32.mrf.mxu1  ;;  %v2172_v55 = vmax.f32 %v2082_v42, 0.0 }
 0x1a8   : > { %v3104_v48 = vpop.f32.mrf.mxu0 }
 0x1a9   : > { %v2085_v49 = vadd.f32 %v3214_v41, %v1924_v39  ;;  %v3105_v54 = vadd.f32 %v3104_v48, %v3103_v38  ;;  %v3216_v16 = vpop.f32.mrf.mxu1 }
 0x1aa   : > { %v3106_v3 = vpop.f32.mrf.mxu0  ;;  %v3217_v61 = vadd.f32 %v3216_v16, %v3215_v45 }
 0x1ab   : > { %v2173_v50 = vmax.f32 %v2085_v49, 0.0  ;;  %v1929_v52 = vadd.f32 %v3105_v54, %v3798_v10  ;;  %v3218_v53 = vpop.f32.mrf.mxu1 }
 0x1ac   : > { %v3107_v56 = vpop.f32.mrf.mxu0 }
 0x1ad   : > { %v2759_v59 = vpack.c.bf16 %v2173_v50, %v2172_v55  ;;  %v3108_v6 = vadd.f32 %v3107_v56, %v3106_v3  ;;  %v3219_v63 = vpop.f32.mrf.mxu1  ;;  %v2090_v0 = vadd.f32 %v3217_v61, %v1929_v52 }
 0x1ae   : > { %v3109_v1 = vpop.f32.mrf.mxu0  ;;  %v3220_v33 = vadd.f32 %v3219_v63, %v3218_v53 }
 0x1af   : > { %2811 = vst [vmem:[%s3858_s17 + $0x30] sm:$0xff] %v2759_v59   ;;  %v1932_v18 = vadd.f32 %v3108_v6, %v3801_v21  ;;  %v3221_v2 = vpop.f32.mrf.mxu1  ;;  %v2174_v10 = vmax.f32 %v2090_v0, 0.0 }
 0x1b0   : > { %v3110_v43 = vpop.f32.mrf.mxu0 }
 0x1b1   : > { %v2093_v4 = vadd.f32 %v3220_v33, %v1932_v18  ;;  %v3111_v7 = vadd.f32 %v3110_v43, %v3109_v1  ;;  %v3222_v8 = vpop.f32.mrf.mxu1 }
 0x1b2   : > { %v3112_v17 = vpop.f32.mrf.mxu0  ;;  %v3223_v20 = vadd.f32 %v3222_v8, %v3221_v2 }
 0x1b3   : > { %v2175_v12 = vmax.f32 %v2093_v4, 0.0  ;;  %v1937_v13 = vadd.f32 %v3111_v7, %v3804_v30  ;;  %v3224_v14 = vpop.f32.mrf.mxu1 }
 0x1b4   : > { %v3113_v28 = vpop.f32.mrf.mxu0 }
 0x1b5   : > { %v2764_v15 = vpack.c.bf16 %v2175_v12, %v2174_v10  ;;  %v3114_v23 = vadd.f32 %v3113_v28, %v3112_v17  ;;  %v3225_v57 = vpop.f32.mrf.mxu1  ;;  %v2098_v21 = vadd.f32 %v3223_v20, %v1937_v13 }
 0x1b6   : > { %v3115_v34 = vpop.f32.mrf.mxu0  ;;  %v3226_v26 = vadd.f32 %v3225_v57, %v3224_v14 }
 0x1b7   : > { %2812 = vst [vmem:[%s3858_s17 + $0x38] sm:$0xff] %v2764_v15   ;;  %v1940_v24 = vadd.f32 %v3114_v23, %v3807_v40  ;;  %v3227_v27 = vpop.f32.mrf.mxu1  ;;  %v2176_v30 = vmax.f32 %v2098_v21, 0.0 }
 0x1b8   : > { %v3116_v29 = vpop.f32.mrf.mxu0 }
 0x1b9   : > { %v2101_v44 = vadd.f32 %v3226_v26, %v1940_v24  ;;  %v3117_v35 = vadd.f32 %v3116_v29, %v3115_v34  ;;  %v3228_v36 = vpop.f32.mrf.mxu1 }
 0x1ba   : > { %v3118_v37 = vpop.f32.mrf.mxu0  ;;  %v3229_v48 = vadd.f32 %v3228_v36, %v3227_v27 }
 0x1bb   : > { %v2177_v38 = vmax.f32 %v2101_v44, 0.0  ;;  %v1945_v42 = vadd.f32 %v3117_v35, %v3810_v51  ;;  %v3230_v39 = vpop.f32.mrf.mxu1 }
 0x1bc   : > { %v3119_v41 = vpop.f32.mrf.mxu0 }
 0x1bd   : > { %v2769_v45 = vpack.c.bf16 %v2177_v38, %v2176_v30  ;;  %v3120_v49 = vadd.f32 %v3119_v41, %v3118_v37  ;;  %v3231_v54 = vpop.f32.mrf.mxu1  ;;  %v2106_v40 = vadd.f32 %v3229_v48, %v1945_v42 }
 0x1be   : > { %v3121_v16 = vpop.f32.mrf.mxu0  ;;  %v3232_v55 = vadd.f32 %v3231_v54, %v3230_v39 }
 0x1bf   : > { %2813 = vst [vmem:[%s3858_s17 + $0x40] sm:$0xff] %v2769_v45   ;;  %v1948_v3 = vadd.f32 %v3120_v49, %v3813_v62  ;;  %v3233_v50 = vpop.f32.mrf.mxu1  ;;  %v2178_v51 = vmax.f32 %v2106_v40, 0.0 }
 0x1c0   : > { %v3122_v52 = vpop.f32.mrf.mxu0 }
 0x1c1   : > { %v2109_v53 = vadd.f32 %v3232_v55, %v1948_v3  ;;  %v3123_v56 = vadd.f32 %v3122_v52, %v3121_v16  ;;  %v3234_v59 = vpop.f32.mrf.mxu1 }
 0x1c2   : > { %v3124_v61 = vpop.f32.mrf.mxu0  ;;  %v3235_v33 = vadd.f32 %v3234_v59, %v3233_v50 }
 0x1c3   : > { %v2179_v6 = vmax.f32 %v2109_v53, 0.0  ;;  %v1953_v63 = vadd.f32 %v3123_v56, %v3816_v9  ;;  %v3236_v1 = vpop.f32.mrf.mxu1 }
 0x1c4   : > { %v3125_v0 = vpop.f32.mrf.mxu0 }
 0x1c5   : > { %v2774_v18 = vpack.c.bf16 %v2179_v6, %v2178_v51  ;;  %v3126_v2 = vadd.f32 %v3125_v0, %v3124_v61  ;;  %v3237_v43 = vpop.f32.mrf.mxu1  ;;  %v2114_v62 = vadd.f32 %v3235_v33, %v1953_v63 }
 0x1c6   : > { %v3127_v4 = vpop.f32.mrf.mxu0  ;;  %v3238_v8 = vadd.f32 %v3237_v43, %v3236_v1 }
 0x1c7   : > { %2814 = vst [vmem:[%s3858_s17 + $0x48] sm:$0xff] %v2774_v18   ;;  %v1956_v7 = vadd.f32 %v3126_v2, %v3819_v22  ;;  %v3239_v17 = vpop.f32.mrf.mxu1  ;;  %v2180_v9 = vmax.f32 %v2114_v62, 0.0 }
 0x1c8   : > { %v3128_v10 = vpop.f32.mrf.mxu0 }
 0x1c9   : > { %v2117_v12 = vadd.f32 %v3238_v8, %v1956_v7  ;;  %v3129_v13 = vadd.f32 %v3128_v10, %v3127_v4  ;;  %v3240_v14 = vpop.f32.mrf.mxu1 }
 0x1ca   : > { %v3130_v28 = vpop.f32.mrf.mxu0  ;;  %v3241_v21 = vadd.f32 %v3240_v14, %v3239_v17 }
 0x1cb   : > { %v2181_v15 = vmax.f32 %v2117_v12, 0.0  ;;  %v1961_v20 = vadd.f32 %v3129_v13, %v3822_v32  ;;  %v3242_v23 = vpop.f32.mrf.mxu1 }
 0x1cc   : > { %v3131_v57 = vpop.f32.mrf.mxu0 }
 0x1cd   : > { %v2779_v34 = vpack.c.bf16 %v2181_v15, %v2180_v9  ;;  %v3132_v24 = vadd.f32 %v3131_v57, %v3130_v28  ;;  %v3243_v26 = vpop.f32.mrf.mxu1  ;;  %v2122_v22 = vadd.f32 %v3241_v21, %v1961_v20 }
 0x1ce   : > { %v3133_v27 = vpop.f32.mrf.mxu0  ;;  %v3244_v44 = vadd.f32 %v3243_v26, %v3242_v23 }
 0x1cf   : > { %2815 = vst [vmem:[%s3858_s17 + $0x50] sm:$0xff] %v2779_v34   ;;  %v1964_v29 = vadd.f32 %v3132_v24, %v3825_v46  ;;  %v3245_v35 = vpop.f32.mrf.mxu1  ;;  %v2182_v32 = vmax.f32 %v2122_v22, 0.0 }
 0x1d0   : > { %v3134_v36 = vpop.f32.mrf.mxu0 }
 0x1d1   : > { %v2125_v37 = vadd.f32 %v3244_v44, %v1964_v29  ;;  %v3135_v30 = vadd.f32 %v3134_v36, %v3133_v27  ;;  %v3246_v38 = vpop.f32.mrf.mxu1 }
 0x1d2   : > { %v3136_v42 = vpop.f32.mrf.mxu0  ;;  %v3247_v54 = vadd.f32 %v3246_v38, %v3245_v35 }
 0x1d3   : > { %v2183_v39 = vmax.f32 %v2125_v37, 0.0  ;;  %v1969_v41 = vadd.f32 %v3135_v30, %v3828_v58  ;;  %v3248_v45 = vpop.f32.mrf.mxu1 }
 0x1d4   : > { %v3137_v48 = vpop.f32.mrf.mxu0 }
 0x1d5   : > { %v2784_v49 = vpack.c.bf16 %v2183_v39, %v2182_v32  ;;  %v3138_v16 = vadd.f32 %v3137_v48, %v3136_v42  ;;  %v3249_v40 = vpop.f32.mrf.mxu1  ;;  %v2130_v46 = vadd.f32 %v3247_v54, %v1969_v41 }
 0x1d6   : > { %v3139_v3 = vpop.f32.mrf.mxu0  ;;  %v3250_v50 = vadd.f32 %v3249_v40, %v3248_v45 }
 0x1d7   : > { %2816 = vst [vmem:[%s3858_s17 + $0x58] sm:$0xff] %v2784_v49   ;;  %v1972_v55 = vadd.f32 %v3138_v16, %v3831_v5  ;;  %v3251_v52 = vpop.f32.mrf.mxu1  ;;  %v2184_v58 = vmax.f32 %v2130_v46, 0.0 }
 0x1d8   : > { %v3140_v53 = vpop.f32.mrf.mxu0 }
 0x1d9   : > { %v2133_v56 = vadd.f32 %v3250_v50, %v1972_v55  ;;  %v3141_v59 = vadd.f32 %v3140_v53, %v3139_v3  ;;  %v3252_v61 = vpop.f32.mrf.mxu1 }
 0x1da   : > { %v3142_v51 = vpop.f32.mrf.mxu0  ;;  %v3253_v33 = vadd.f32 %v3252_v61, %v3251_v52 }
 0x1db   : > { %v2185_v6 = vmax.f32 %v2133_v56, 0.0  ;;  %v1977_v63 = vadd.f32 %v3141_v59, %v3834_v19  ;;  %v3254_v1 = vpop.f32.mrf.mxu1 }
 0x1dc   : > { %v3143_v0 = vpop.f32.mrf.mxu0 }
 0x1dd   : > { %v2789_v18 = vpack.c.bf16 %v2185_v6, %v2184_v58  ;;  %v3144_v2 = vadd.f32 %v3143_v0, %v3142_v51  ;;  %v3255_v43 = vpop.f32.mrf.mxu1  ;;  %v2138_v5 = vadd.f32 %v3253_v33, %v1977_v63 }
 0x1de   : > { %v3145_v4 = vpop.f32.mrf.mxu0  ;;  %v3256_v7 = vadd.f32 %v3255_v43, %v3254_v1 }
 0x1df   : > { %2817 = vst [vmem:[%s3858_s17 + $0x60] sm:$0xff] %v2789_v18   ;;  %v1980_v62 = vadd.f32 %v3144_v2, %v3837_v31  ;;  %v3257_v8 = vpop.f32.mrf.mxu1  ;;  %v2186_v19 = vmax.f32 %v2138_v5, 0.0 }
 0x1e0   : > { %v3146_v17 = vpop.f32.mrf.mxu0 }
 0x1e1   : > { %v2141_v10 = vadd.f32 %v3256_v7, %v1980_v62  ;;  %v3147_v12 = vadd.f32 %v3146_v17, %v3145_v4  ;;  %v3258_v13 = vpop.f32.mrf.mxu1 }
 0x1e2   : > { %v3148_v14 = vpop.f32.mrf.mxu0  ;;  %v3259_v57 = vadd.f32 %v3258_v13, %v3257_v8 }
 0x1e3   : > { %v2187_v28 = vmax.f32 %v2141_v10, 0.0  ;;  %v1985_v9 = vadd.f32 %v3147_v12, %v3840_v47  ;;  %v3260_v15 = vpop.f32.mrf.mxu1 }
 0x1e4   : > { %v3149_v20 = vpop.f32.mrf.mxu0 }
 0x1e5   : > { %v2794_v23 = vpack.c.bf16 %v2187_v28, %v2186_v19  ;;  %v3150_v34 = vadd.f32 %v3149_v20, %v3148_v14  ;;  %v3261_v21 = vpop.f32.mrf.mxu1  ;;  %v2146_v31 = vadd.f32 %v3259_v57, %v1985_v9 }
 0x1e6   : > { %v3151_v24 = vpop.f32.mrf.mxu0  ;;  %v3262_v27 = vadd.f32 %v3261_v21, %v3260_v15 }
 0x1e7   : > { %2818 = vst [vmem:[%s3858_s17 + $0x68] sm:$0xff] %v2794_v23   ;;  %v1988_v26 = vadd.f32 %v3150_v34, %v3843_v60  ;;  %v3263_v22 = vpop.f32.mrf.mxu1  ;;  %v2188_v47 = vmax.f32 %v2146_v31, 0.0 }
 0x1e8   : > { %v3152_v29 = vpop.f32.mrf.mxu0 }
 0x1e9   : > { %v2149_v44 = vadd.f32 %v3262_v27, %v1988_v26  ;;  %v3153_v35 = vadd.f32 %v3152_v29, %v3151_v24  ;;  %v3264_v36 = vpop.f32.mrf.mxu1 }
 0x1ea   : > { %v3154_v37 = vpop.f32.mrf.mxu0  ;;  %v3265_v41 = vadd.f32 %v3264_v36, %v3263_v22 }
 0x1eb   : > { %v2189_v30 = vmax.f32 %v2149_v44, 0.0  ;;  %v1993_v38 = vadd.f32 %v3153_v35, %v3846_v11  ;;  %v3266_v42 = vpop.f32.mrf.mxu1 }
 0x1ec   : > { %v3155_v32 = vpop.f32.mrf.mxu0 }
 0x1ed   : > { %v2799_v39 = vpack.c.bf16 %v2189_v30, %v2188_v47  ;;  %v3156_v45 = vadd.f32 %v3155_v32, %v3154_v37  ;;  %v3267_v48 = vpop.f32.mrf.mxu1  ;;  %v2154_v60 = vadd.f32 %v3265_v41, %v1993_v38 }
 0x1ee   : > { %v3268_v54 = vadd.f32 %v3267_v48, %v3266_v42 }
 0x1ef   : > { %2819 = vst [vmem:[%s3858_s17 + $0x70] sm:$0xff] %v2799_v39   ;;  %v1996_v49 = vadd.f32 %v3156_v45, %v3849_v25  ;;  %v2190_v40 = vmax.f32 %v2154_v60, 0.0 }
 0x1f1   : > { %v2157_v16 = vadd.f32 %v3268_v54, %v1996_v49 }
 0x1f3   : > { %v2191_v3 = vmax.f32 %v2157_v16, 0.0 }
 0x1f5   : > { %v2804_v46 = vpack.c.bf16 %v2191_v3, %v2190_v40 }
 0x1f7   : > { %2820 = vst [vmem:[%s3858_s17 + $0x78] sm:$0xff] %v2804_v46  }
 0x1f8 PF: > { %s13_s14 = sadd.s32 1, %s3379_s14   ;;  %s3918_s12 = smov %s3375_s13 }
 0x1f9   : > { %p10_p5 = scmp.ge.s32.totalorder %s13_s14, 4   ;;  %s3919_s13 = smov %s3921_s15 }
 0x1fb   :  { %12 = sbr.rel (!%p10_p5) target bundleno = 2 (0x2), region = 68 }

// kernel: discriminator_forward.7
= control target key start
LH: loop header
LB: loop body
LE: loop exit
PB: predicated region body
PF: predicated region fallthrough
CT: control target
= control target key end

     0   :  { %s5248_s12 = smov 0   ;;  %s5250_s13 = smov 0   ;;  %s6635_s0 = inlined_call_operand.vmem [shape: bf16[128,2048], index: 0, kind: input, shape index: {}]   ;;  %s6636_s1 = inlined_call_operand.vmem [shape: bf16[2048,256], index: 1, kind: input, shape index: {}]   ;;  %s6637_s2 = inlined_call_operand.vmem [shape: f32[1,256], index: 2, kind: input, shape index: {}]   ;;  %s6638_s3 = inlined_call_operand.vmem [shape: bf16[128,256], index: 3, kind: output, shape index: {}]  }
   0x1   :  { %s5252_s14 = smov 0   ;;  %s5254_s15 = smov 0  }
   0x2   :  { %s5256_s16 = smov 0  }
   0x3 LB: > { %s22_s17 = sadd.s32 1, %s5222_s15  ;;  %s4158_s18 = sadd.s32 4294967295, %s5226_s16   ;;  %s5226_s16 = sphi %s5256_s16, %s13_s16   ;;  %s5222_s15 = sphi %s5254_s15, %s6645_s15   ;;  %s5218_s14 = sphi %s5252_s14, %s6644_s14   ;;  %s5214_s13 = sphi %s5250_s13, %s6643_s13   ;;  %s5210_s12 = sphi %s5248_s12, %s6642_s12  }
   0x4   : > { %p23_p0 = scmp.ge.s32.totalorder %s22_s17, 2  ;;  %p65_p1 = scmp.ne.s32.totalorder %s5214_s13, %s5210_s12 }
   0x5   : > { %p66_p2 = scmp.eq.s32.totalorder %s5226_s16, 0  ;;  %p123_p4 = scmp.eq.s32.totalorder %s4158_s18, 1 }
   0x6   : > { %s6647_s17 = smov (%p23_p0, %s22_s17), 0  ;;  %s58_s20 = sadd.s32 1, %s5214_s13 }
   0x7   : > { %p67_p3 = por %p66_p2, %p65_p1  ;;  %s55_s19 = ssub.s32 %s5222_s15, %s6647_s17 }
   0x8   : > { %p56_p5 = scmp.eq.s32.totalorder %s55_s19, 0  ;;  %p5283_p6 = por %p123_p4, %p65_p1 }
   0x9   : > { %p4162_p7 = scmp.ge.s32.totalorder %s5226_s16, 2 }
   0xa   : > { %s5288_s22 = scalar_select %p56_p5, %s5214_s13, %s58_s20  }
   0xb   : > { %155 = sbr.rel (%p4162_p7) target bundleno = 190 (0xbe), region = 20 }
  0x10   : > { %158 = sbr.rel (!%p67_p3) target bundleno = 190 (0xbe), region = 24  ;;  %s160_s23 = sand.u32 (%p67_p3), 1, %s5214_s13  }
  0x11   : > { %s4164_s24 = sshll.u32 (%p67_p3), %s5222_s15, 2  ;;  %s4163_s25 = sshll.u32 (%p67_p3), %s160_s23, 10 }
  0x12   : > { %s5296_s28 = scalar_lea.vmem (%p67_p3), %s6636_s1, %s4164_s24  ;;  %s5300_s29 = scalar_lea.vmem (%p67_p3), [#allocation2], %s4163_s25 }
  0x13   : > { %v181_v0 = vld [vmem:[%s5296_s28] sm:$0xf] (%p67_p3)  ;;  %v183_v1 = vld [vmem:[%s5296_s28 + $0x8] sm:$0xf] (%p67_p3)  ;;  %v185_v2 = vld [vmem:[%s5296_s28 + $0x10] sm:$0xf] (%p67_p3) }
  0x14   : > { %182 = vst [vmem:[%s5300_s29] sm:$0xf] (%p67_p3), %v181_v0  ;;  %184 = vst [vmem:[%s5300_s29 + $0x4] sm:$0xf] (%p67_p3), %v183_v1  ;;  %v187_v3 = vld [vmem:[%s5296_s28 + $0x18] sm:$0xf] (%p67_p3) }
  0x15   : > { %v189_v4 = vld [vmem:[%s5296_s28 + $0x20] sm:$0xf]  ;;  %186 = vst [vmem:[%s5300_s29 + $0x8] sm:$0xf] %v185_v2  ;;  %188 = vst [vmem:[%s5300_s29 + $0xc] sm:$0xf] %v187_v3 }
  0x16   : > { %190 = vst [vmem:[%s5300_s29 + $0x10] sm:$0xf] %v189_v4  ;;  %v191_v5 = vld [vmem:[%s5296_s28 + $0x28] sm:$0xf]  ;;  %v193_v6 = vld [vmem:[%s5296_s28 + $0x30] sm:$0xf] }
  0x17   : > { %v195_v7 = vld [vmem:[%s5296_s28 + $0x38] sm:$0xf]  ;;  %192 = vst [vmem:[%s5300_s29 + $0x14] sm:$0xf] %v191_v5  ;;  %194 = vst [vmem:[%s5300_s29 + $0x18] sm:$0xf] %v193_v6 }
  0x18   : > { %196 = vst [vmem:[%s5300_s29 + $0x1c] sm:$0xf] %v195_v7  ;;  %v197_v8 = vld [vmem:[%s5296_s28 + $0x40] sm:$0xf]  ;;  %v199_v9 = vld [vmem:[%s5296_s28 + $0x48] sm:$0xf] }
  0x19   : > { %v201_v10 = vld [vmem:[%s5296_s28 + $0x50] sm:$0xf]  ;;  %198 = vst [vmem:[%s5300_s29 + $0x20] sm:$0xf] %v197_v8  ;;  %200 = vst [vmem:[%s5300_s29 + $0x24] sm:$0xf] %v199_v9 }
  0x1a   : > { %202 = vst [vmem:[%s5300_s29 + $0x28] sm:$0xf] %v201_v10  ;;  %v203_v11 = vld [vmem:[%s5296_s28 + $0x58] sm:$0xf]  ;;  %v205_v12 = vld [vmem:[%s5296_s28 + $0x60] sm:$0xf] }
  0x1b   : > { %v207_v13 = vld [vmem:[%s5296_s28 + $0x68] sm:$0xf]  ;;  %204 = vst [vmem:[%s5300_s29 + $0x2c] sm:$0xf] %v203_v11  ;;  %206 = vst [vmem:[%s5300_s29 + $0x30] sm:$0xf] %v205_v12 }
  0x1c   : > { %208 = vst [vmem:[%s5300_s29 + $0x34] sm:$0xf] %v207_v13  ;;  %v209_v14 = vld [vmem:[%s5296_s28 + $0x70] sm:$0xf]  ;;  %v211_v15 = vld [vmem:[%s5296_s28 + $0x78] sm:$0xf] }
  0x1d   : > { %v213_v16 = vld [vmem:[%s5296_s28 + $0x80] sm:$0xf]  ;;  %210 = vst [vmem:[%s5300_s29 + $0x38] sm:$0xf] %v209_v14  ;;  %212 = vst [vmem:[%s5300_s29 + $0x3c] sm:$0xf] %v211_v15 }
  0x1e   : > { %214 = vst [vmem:[%s5300_s29 + $0x40] sm:$0xf] %v213_v16  ;;  %v215_v17 = vld [vmem:[%s5296_s28 + $0x88] sm:$0xf]  ;;  %v217_v18 = vld [vmem:[%s5296_s28 + $0x90] sm:$0xf] }
  0x1f   : > { %v219_v19 = vld [vmem:[%s5296_s28 + $0x98] sm:$0xf]  ;;  %216 = vst [vmem:[%s5300_s29 + $0x44] sm:$0xf] %v215_v17  ;;  %218 = vst [vmem:[%s5300_s29 + $0x48] sm:$0xf] %v217_v18 }
  0x20   : > { %220 = vst [vmem:[%s5300_s29 + $0x4c] sm:$0xf] %v219_v19  ;;  %v221_v20 = vld [vmem:[%s5296_s28 + $0xa0] sm:$0xf]  ;;  %v223_v21 = vld [vmem:[%s5296_s28 + $0xa8] sm:$0xf] }
  0x21   : > { %v225_v22 = vld [vmem:[%s5296_s28 + $0xb0] sm:$0xf]  ;;  %222 = vst [vmem:[%s5300_s29 + $0x50] sm:$0xf] %v221_v20  ;;  %224 = vst [vmem:[%s5300_s29 + $0x54] sm:$0xf] %v223_v21 }
  0x22   : > { %226 = vst [vmem:[%s5300_s29 + $0x58] sm:$0xf] %v225_v22  ;;  %v227_v23 = vld [vmem:[%s5296_s28 + $0xb8] sm:$0xf]  ;;  %v229_v24 = vld [vmem:[%s5296_s28 + $0xc0] sm:$0xf] }
  0x23   : > { %v231_v25 = vld [vmem:[%s5296_s28 + $0xc8] sm:$0xf]  ;;  %228 = vst [vmem:[%s5300_s29 + $0x5c] sm:$0xf] %v227_v23  ;;  %230 = vst [vmem:[%s5300_s29 + $0x60] sm:$0xf] %v229_v24 }
  0x24   : > { %232 = vst [vmem:[%s5300_s29 + $0x64] sm:$0xf] %v231_v25  ;;  %v233_v26 = vld [vmem:[%s5296_s28 + $0xd0] sm:$0xf]  ;;  %v235_v27 = vld [vmem:[%s5296_s28 + $0xd8] sm:$0xf] }
  0x25   : > { %v237_v28 = vld [vmem:[%s5296_s28 + $0xe0] sm:$0xf]  ;;  %234 = vst [vmem:[%s5300_s29 + $0x68] sm:$0xf] %v233_v26  ;;  %236 = vst [vmem:[%s5300_s29 + $0x6c] sm:$0xf] %v235_v27 }
  0x26   : > { %238 = vst [vmem:[%s5300_s29 + $0x70] sm:$0xf] %v237_v28  ;;  %v239_v29 = vld [vmem:[%s5296_s28 + $0xe8] sm:$0xf]  ;;  %v241_v30 = vld [vmem:[%s5296_s28 + $0xf0] sm:$0xf] }
  0x27   : > { %v243_v31 = vld [vmem:[%s5296_s28 + $0xf8] sm:$0xf]  ;;  %240 = vst [vmem:[%s5300_s29 + $0x74] sm:$0xf] %v239_v29  ;;  %242 = vst [vmem:[%s5300_s29 + $0x78] sm:$0xf] %v241_v30 }
  0x28   : > { %244 = vst [vmem:[%s5300_s29 + $0x7c] sm:$0xf] %v243_v31  ;;  %v245_v32 = vld [vmem:[%s5296_s28 + $0x100] sm:$0xf]  ;;  %v247_v33 = vld [vmem:[%s5296_s28 + $0x108] sm:$0xf] }
  0x29   : > { %v249_v34 = vld [vmem:[%s5296_s28 + $0x110] sm:$0xf]  ;;  %246 = vst [vmem:[%s5300_s29 + $0x80] sm:$0xf] %v245_v32  ;;  %248 = vst [vmem:[%s5300_s29 + $0x84] sm:$0xf] %v247_v33 }
  0x2a   : > { %250 = vst [vmem:[%s5300_s29 + $0x88] sm:$0xf] %v249_v34  ;;  %v251_v35 = vld [vmem:[%s5296_s28 + $0x118] sm:$0xf]  ;;  %v253_v36 = vld [vmem:[%s5296_s28 + $0x120] sm:$0xf] }
  0x2b   : > { %v255_v37 = vld [vmem:[%s5296_s28 + $0x128] sm:$0xf]  ;;  %252 = vst [vmem:[%s5300_s29 + $0x8c] sm:$0xf] %v251_v35  ;;  %254 = vst [vmem:[%s5300_s29 + $0x90] sm:$0xf] %v253_v36 }
  0x2c   : > { %256 = vst [vmem:[%s5300_s29 + $0x94] sm:$0xf] %v255_v37  ;;  %v257_v38 = vld [vmem:[%s5296_s28 + $0x130] sm:$0xf]  ;;  %v259_v39 = vld [vmem:[%s5296_s28 + $0x138] sm:$0xf] }
  0x2d   : > { %v261_v40 = vld [vmem:[%s5296_s28 + $0x140] sm:$0xf]  ;;  %258 = vst [vmem:[%s5300_s29 + $0x98] sm:$0xf] %v257_v38  ;;  %260 = vst [vmem:[%s5300_s29 + $0x9c] sm:$0xf] %v259_v39 }
  0x2e   : > { %262 = vst [vmem:[%s5300_s29 + $0xa0] sm:$0xf] %v261_v40  ;;  %v263_v41 = vld [vmem:[%s5296_s28 + $0x148] sm:$0xf]  ;;  %v265_v42 = vld [vmem:[%s5296_s28 + $0x150] sm:$0xf] }
  0x2f   : > { %v267_v43 = vld [vmem:[%s5296_s28 + $0x158] sm:$0xf]  ;;  %264 = vst [vmem:[%s5300_s29 + $0xa4] sm:$0xf] %v263_v41  ;;  %266 = vst [vmem:[%s5300_s29 + $0xa8] sm:$0xf] %v265_v42 }
  0x30   : > { %268 = vst [vmem:[%s5300_s29 + $0xac] sm:$0xf] %v267_v43  ;;  %v269_v44 = vld [vmem:[%s5296_s28 + $0x160] sm:$0xf]  ;;  %v271_v45 = vld [vmem:[%s5296_s28 + $0x168] sm:$0xf] }
  0x31   : > { %v273_v46 = vld [vmem:[%s5296_s28 + $0x170] sm:$0xf]  ;;  %270 = vst [vmem:[%s5300_s29 + $0xb0] sm:$0xf] %v269_v44  ;;  %272 = vst [vmem:[%s5300_s29 + $0xb4] sm:$0xf] %v271_v45 }
  0x32   : > { %274 = vst [vmem:[%s5300_s29 + $0xb8] sm:$0xf] %v273_v46  ;;  %v275_v47 = vld [vmem:[%s5296_s28 + $0x178] sm:$0xf]  ;;  %v277_v48 = vld [vmem:[%s5296_s28 + $0x180] sm:$0xf] }
  0x33   : > { %v279_v49 = vld [vmem:[%s5296_s28 + $0x188] sm:$0xf]  ;;  %276 = vst [vmem:[%s5300_s29 + $0xbc] sm:$0xf] %v275_v47  ;;  %278 = vst [vmem:[%s5300_s29 + $0xc0] sm:$0xf] %v277_v48 }
  0x34   : > { %280 = vst [vmem:[%s5300_s29 + $0xc4] sm:$0xf] %v279_v49  ;;  %v281_v50 = vld [vmem:[%s5296_s28 + $0x190] sm:$0xf]  ;;  %v283_v51 = vld [vmem:[%s5296_s28 + $0x198] sm:$0xf] }
  0x35   : > { %v285_v52 = vld [vmem:[%s5296_s28 + $0x1a0] sm:$0xf]  ;;  %282 = vst [vmem:[%s5300_s29 + $0xc8] sm:$0xf] %v281_v50  ;;  %284 = vst [vmem:[%s5300_s29 + $0xcc] sm:$0xf] %v283_v51 }
  0x36   : > { %286 = vst [vmem:[%s5300_s29 + $0xd0] sm:$0xf] %v285_v52  ;;  %v287_v53 = vld [vmem:[%s5296_s28 + $0x1a8] sm:$0xf]  ;;  %v289_v54 = vld [vmem:[%s5296_s28 + $0x1b0] sm:$0xf] }
  0x37   : > { %v291_v55 = vld [vmem:[%s5296_s28 + $0x1b8] sm:$0xf]  ;;  %288 = vst [vmem:[%s5300_s29 + $0xd4] sm:$0xf] %v287_v53  ;;  %290 = vst [vmem:[%s5300_s29 + $0xd8] sm:$0xf] %v289_v54 }
  0x38   : > { %292 = vst [vmem:[%s5300_s29 + $0xdc] sm:$0xf] %v291_v55  ;;  %v293_v56 = vld [vmem:[%s5296_s28 + $0x1c0] sm:$0xf]  ;;  %v295_v57 = vld [vmem:[%s5296_s28 + $0x1c8] sm:$0xf] }
  0x39   : > { %v297_v58 = vld [vmem:[%s5296_s28 + $0x1d0] sm:$0xf]  ;;  %294 = vst [vmem:[%s5300_s29 + $0xe0] sm:$0xf] %v293_v56  ;;  %296 = vst [vmem:[%s5300_s29 + $0xe4] sm:$0xf] %v295_v57 }
  0x3a   : > { %298 = vst [vmem:[%s5300_s29 + $0xe8] sm:$0xf] %v297_v58  ;;  %v299_v59 = vld [vmem:[%s5296_s28 + $0x1d8] sm:$0xf]  ;;  %v301_v60 = vld [vmem:[%s5296_s28 + $0x1e0] sm:$0xf] }
  0x3b   : > { %v303_v61 = vld [vmem:[%s5296_s28 + $0x1e8] sm:$0xf]  ;;  %300 = vst [vmem:[%s5300_s29 + $0xec] sm:$0xf] %v299_v59  ;;  %302 = vst [vmem:[%s5300_s29 + $0xf0] sm:$0xf] %v301_v60 }
  0x3c   : > { %304 = vst [vmem:[%s5300_s29 + $0xf4] sm:$0xf] %v303_v61  ;;  %v305_v62 = vld [vmem:[%s5296_s28 + $0x1f0] sm:$0xf]  ;;  %v307_v63 = vld [vmem:[%s5296_s28 + $0x1f8] sm:$0xf] }
  0x3d   : > { %v309_v0 = vld [vmem:[%s5296_s28 + $0x200] sm:$0xf]  ;;  %306 = vst [vmem:[%s5300_s29 + $0xf8] sm:$0xf] %v305_v62  ;;  %308 = vst [vmem:[%s5300_s29 + $0xfc] sm:$0xf] %v307_v63 }
  0x3e   : > { %310 = vst [vmem:[%s5300_s29 + $0x100] sm:$0xf] %v309_v0  ;;  %v311_v1 = vld [vmem:[%s5296_s28 + $0x208] sm:$0xf]  ;;  %v313_v2 = vld [vmem:[%s5296_s28 + $0x210] sm:$0xf] }
  0x3f   : > { %v315_v3 = vld [vmem:[%s5296_s28 + $0x218] sm:$0xf]  ;;  %312 = vst [vmem:[%s5300_s29 + $0x104] sm:$0xf] %v311_v1  ;;  %314 = vst [vmem:[%s5300_s29 + $0x108] sm:$0xf] %v313_v2 }
  0x40   : > { %316 = vst [vmem:[%s5300_s29 + $0x10c] sm:$0xf] %v315_v3  ;;  %v317_v4 = vld [vmem:[%s5296_s28 + $0x220] sm:$0xf]  ;;  %v319_v5 = vld [vmem:[%s5296_s28 + $0x228] sm:$0xf] }
  0x41   : > { %v321_v6 = vld [vmem:[%s5296_s28 + $0x230] sm:$0xf]  ;;  %318 = vst [vmem:[%s5300_s29 + $0x110] sm:$0xf] %v317_v4  ;;  %320 = vst [vmem:[%s5300_s29 + $0x114] sm:$0xf] %v319_v5 }
  0x42   : > { %322 = vst [vmem:[%s5300_s29 + $0x118] sm:$0xf] %v321_v6  ;;  %v323_v7 = vld [vmem:[%s5296_s28 + $0x238] sm:$0xf]  ;;  %v325_v8 = vld [vmem:[%s5296_s28 + $0x240] sm:$0xf] }
  0x43   : > { %v327_v9 = vld [vmem:[%s5296_s28 + $0x248] sm:$0xf]  ;;  %324 = vst [vmem:[%s5300_s29 + $0x11c] sm:$0xf] %v323_v7  ;;  %326 = vst [vmem:[%s5300_s29 + $0x120] sm:$0xf] %v325_v8 }
  0x44   : > { %328 = vst [vmem:[%s5300_s29 + $0x124] sm:$0xf] %v327_v9  ;;  %v329_v10 = vld [vmem:[%s5296_s28 + $0x250] sm:$0xf]  ;;  %v331_v11 = vld [vmem:[%s5296_s28 + $0x258] sm:$0xf] }
  0x45   : > { %v333_v12 = vld [vmem:[%s5296_s28 + $0x260] sm:$0xf]  ;;  %330 = vst [vmem:[%s5300_s29 + $0x128] sm:$0xf] %v329_v10  ;;  %332 = vst [vmem:[%s5300_s29 + $0x12c] sm:$0xf] %v331_v11 }
  0x46   : > { %334 = vst [vmem:[%s5300_s29 + $0x130] sm:$0xf] %v333_v12  ;;  %v335_v13 = vld [vmem:[%s5296_s28 + $0x268] sm:$0xf]  ;;  %v337_v14 = vld [vmem:[%s5296_s28 + $0x270] sm:$0xf] }
  0x47   : > { %v339_v15 = vld [vmem:[%s5296_s28 + $0x278] sm:$0xf]  ;;  %336 = vst [vmem:[%s5300_s29 + $0x134] sm:$0xf] %v335_v13  ;;  %338 = vst [vmem:[%s5300_s29 + $0x138] sm:$0xf] %v337_v14 }
  0x48   : > { %340 = vst [vmem:[%s5300_s29 + $0x13c] sm:$0xf] %v339_v15  ;;  %v341_v16 = vld [vmem:[%s5296_s28 + $0x280] sm:$0xf]  ;;  %v343_v17 = vld [vmem:[%s5296_s28 + $0x288] sm:$0xf] }
  0x49   : > { %v345_v18 = vld [vmem:[%s5296_s28 + $0x290] sm:$0xf]  ;;  %342 = vst [vmem:[%s5300_s29 + $0x140] sm:$0xf] %v341_v16  ;;  %344 = vst [vmem:[%s5300_s29 + $0x144] sm:$0xf] %v343_v17 }
  0x4a   : > { %346 = vst [vmem:[%s5300_s29 + $0x148] sm:$0xf] %v345_v18  ;;  %v347_v19 = vld [vmem:[%s5296_s28 + $0x298] sm:$0xf]  ;;  %v349_v20 = vld [vmem:[%s5296_s28 + $0x2a0] sm:$0xf] }
  0x4b   : > { %v351_v21 = vld [vmem:[%s5296_s28 + $0x2a8] sm:$0xf]  ;;  %348 = vst [vmem:[%s5300_s29 + $0x14c] sm:$0xf] %v347_v19  ;;  %350 = vst [vmem:[%s5300_s29 + $0x150] sm:$0xf] %v349_v20 }
  0x4c   : > { %352 = vst [vmem:[%s5300_s29 + $0x154] sm:$0xf] %v351_v21  ;;  %v353_v22 = vld [vmem:[%s5296_s28 + $0x2b0] sm:$0xf]  ;;  %v355_v23 = vld [vmem:[%s5296_s28 + $0x2b8] sm:$0xf] }
  0x4d   : > { %v357_v24 = vld [vmem:[%s5296_s28 + $0x2c0] sm:$0xf]  ;;  %354 = vst [vmem:[%s5300_s29 + $0x158] sm:$0xf] %v353_v22  ;;  %356 = vst [vmem:[%s5300_s29 + $0x15c] sm:$0xf] %v355_v23 }
  0x4e   : > { %358 = vst [vmem:[%s5300_s29 + $0x160] sm:$0xf] %v357_v24  ;;  %v359_v25 = vld [vmem:[%s5296_s28 + $0x2c8] sm:$0xf]  ;;  %v361_v26 = vld [vmem:[%s5296_s28 + $0x2d0] sm:$0xf] }
  0x4f   : > { %v363_v27 = vld [vmem:[%s5296_s28 + $0x2d8] sm:$0xf]  ;;  %360 = vst [vmem:[%s5300_s29 + $0x164] sm:$0xf] %v359_v25  ;;  %362 = vst [vmem:[%s5300_s29 + $0x168] sm:$0xf] %v361_v26 }
  0x50   : > { %364 = vst [vmem:[%s5300_s29 + $0x16c] sm:$0xf] %v363_v27  ;;  %v365_v28 = vld [vmem:[%s5296_s28 + $0x2e0] sm:$0xf]  ;;  %v367_v29 = vld [vmem:[%s5296_s28 + $0x2e8] sm:$0xf] }
  0x51   : > { %v369_v30 = vld [vmem:[%s5296_s28 + $0x2f0] sm:$0xf]  ;;  %366 = vst [vmem:[%s5300_s29 + $0x170] sm:$0xf] %v365_v28  ;;  %368 = vst [vmem:[%s5300_s29 + $0x174] sm:$0xf] %v367_v29 }
  0x52   : > { %370 = vst [vmem:[%s5300_s29 + $0x178] sm:$0xf] %v369_v30  ;;  %v371_v31 = vld [vmem:[%s5296_s28 + $0x2f8] sm:$0xf]  ;;  %v373_v32 = vld [vmem:[%s5296_s28 + $0x300] sm:$0xf] }
  0x53   : > { %v375_v33 = vld [vmem:[%s5296_s28 + $0x308] sm:$0xf]  ;;  %372 = vst [vmem:[%s5300_s29 + $0x17c] sm:$0xf] %v371_v31  ;;  %374 = vst [vmem:[%s5300_s29 + $0x180] sm:$0xf] %v373_v32 }
  0x54   : > { %376 = vst [vmem:[%s5300_s29 + $0x184] sm:$0xf] %v375_v33  ;;  %v377_v34 = vld [vmem:[%s5296_s28 + $0x310] sm:$0xf]  ;;  %v379_v35 = vld [vmem:[%s5296_s28 + $0x318] sm:$0xf] }
  0x55   : > { %v381_v36 = vld [vmem:[%s5296_s28 + $0x320] sm:$0xf]  ;;  %378 = vst [vmem:[%s5300_s29 + $0x188] sm:$0xf] %v377_v34  ;;  %380 = vst [vmem:[%s5300_s29 + $0x18c] sm:$0xf] %v379_v35 }
  0x56   : > { %382 = vst [vmem:[%s5300_s29 + $0x190] sm:$0xf] %v381_v36  ;;  %v383_v37 = vld [vmem:[%s5296_s28 + $0x328] sm:$0xf]  ;;  %v385_v38 = vld [vmem:[%s5296_s28 + $0x330] sm:$0xf] }
  0x57   : > { %v387_v39 = vld [vmem:[%s5296_s28 + $0x338] sm:$0xf]  ;;  %384 = vst [vmem:[%s5300_s29 + $0x194] sm:$0xf] %v383_v37  ;;  %386 = vst [vmem:[%s5300_s29 + $0x198] sm:$0xf] %v385_v38 }
  0x58   : > { %388 = vst [vmem:[%s5300_s29 + $0x19c] sm:$0xf] %v387_v39  ;;  %v389_v40 = vld [vmem:[%s5296_s28 + $0x340] sm:$0xf]  ;;  %v391_v41 = vld [vmem:[%s5296_s28 + $0x348] sm:$0xf] }
  0x59   : > { %v393_v42 = vld [vmem:[%s5296_s28 + $0x350] sm:$0xf]  ;;  %390 = vst [vmem:[%s5300_s29 + $0x1a0] sm:$0xf] %v389_v40  ;;  %392 = vst [vmem:[%s5300_s29 + $0x1a4] sm:$0xf] %v391_v41 }
  0x5a   : > { %394 = vst [vmem:[%s5300_s29 + $0x1a8] sm:$0xf] %v393_v42  ;;  %v395_v43 = vld [vmem:[%s5296_s28 + $0x358] sm:$0xf]  ;;  %v397_v44 = vld [vmem:[%s5296_s28 + $0x360] sm:$0xf] }
  0x5b   : > { %v399_v45 = vld [vmem:[%s5296_s28 + $0x368] sm:$0xf]  ;;  %396 = vst [vmem:[%s5300_s29 + $0x1ac] sm:$0xf] %v395_v43  ;;  %398 = vst [vmem:[%s5300_s29 + $0x1b0] sm:$0xf] %v397_v44 }
  0x5c   : > { %400 = vst [vmem:[%s5300_s29 + $0x1b4] sm:$0xf] %v399_v45  ;;  %v401_v46 = vld [vmem:[%s5296_s28 + $0x370] sm:$0xf]  ;;  %v403_v47 = vld [vmem:[%s5296_s28 + $0x378] sm:$0xf] }
  0x5d   : > { %v405_v48 = vld [vmem:[%s5296_s28 + $0x380] sm:$0xf]  ;;  %402 = vst [vmem:[%s5300_s29 + $0x1b8] sm:$0xf] %v401_v46  ;;  %404 = vst [vmem:[%s5300_s29 + $0x1bc] sm:$0xf] %v403_v47 }
  0x5e   : > { %406 = vst [vmem:[%s5300_s29 + $0x1c0] sm:$0xf] %v405_v48  ;;  %v407_v49 = vld [vmem:[%s5296_s28 + $0x388] sm:$0xf]  ;;  %v409_v50 = vld [vmem:[%s5296_s28 + $0x390] sm:$0xf] }
  0x5f   : > { %v411_v51 = vld [vmem:[%s5296_s28 + $0x398] sm:$0xf]  ;;  %408 = vst [vmem:[%s5300_s29 + $0x1c4] sm:$0xf] %v407_v49  ;;  %410 = vst [vmem:[%s5300_s29 + $0x1c8] sm:$0xf] %v409_v50 }
  0x60   : > { %412 = vst [vmem:[%s5300_s29 + $0x1cc] sm:$0xf] %v411_v51  ;;  %v413_v52 = vld [vmem:[%s5296_s28 + $0x3a0] sm:$0xf]  ;;  %v415_v53 = vld [vmem:[%s5296_s28 + $0x3a8] sm:$0xf] }
  0x61   : > { %v417_v54 = vld [vmem:[%s5296_s28 + $0x3b0] sm:$0xf]  ;;  %414 = vst [vmem:[%s5300_s29 + $0x1d0] sm:$0xf] %v413_v52  ;;  %416 = vst [vmem:[%s5300_s29 + $0x1d4] sm:$0xf] %v415_v53 }
  0x62   : > { %418 = vst [vmem:[%s5300_s29 + $0x1d8] sm:$0xf] %v417_v54  ;;  %v419_v55 = vld [vmem:[%s5296_s28 + $0x3b8] sm:$0xf]  ;;  %v421_v56 = vld [vmem:[%s5296_s28 + $0x3c0] sm:$0xf] }
  0x63   : > { %v423_v57 = vld [vmem:[%s5296_s28 + $0x3c8] sm:$0xf]  ;;  %420 = vst [vmem:[%s5300_s29 + $0x1dc] sm:$0xf] %v419_v55  ;;  %422 = vst [vmem:[%s5300_s29 + $0x1e0] sm:$0xf] %v421_v56 }
  0x64   : > { %424 = vst [vmem:[%s5300_s29 + $0x1e4] sm:$0xf] %v423_v57  ;;  %v425_v58 = vld [vmem:[%s5296_s28 + $0x3d0] sm:$0xf]  ;;  %v427_v59 = vld [vmem:[%s5296_s28 + $0x3d8] sm:$0xf] }
  0x65   : > { %v429_v60 = vld [vmem:[%s5296_s28 + $0x3e0] sm:$0xf]  ;;  %426 = vst [vmem:[%s5300_s29 + $0x1e8] sm:$0xf] %v425_v58  ;;  %428 = vst [vmem:[%s5300_s29 + $0x1ec] sm:$0xf] %v427_v59 }
  0x66   : > { %430 = vst [vmem:[%s5300_s29 + $0x1f0] sm:$0xf] %v429_v60  ;;  %v431_v61 = vld [vmem:[%s5296_s28 + $0x3e8] sm:$0xf]  ;;  %v433_v62 = vld [vmem:[%s5296_s28 + $0x3f0] sm:$0xf] }
  0x67   : > { %v435_v63 = vld [vmem:[%s5296_s28 + $0x3f8] sm:$0xf]  ;;  %432 = vst [vmem:[%s5300_s29 + $0x1f4] sm:$0xf] %v431_v61  ;;  %434 = vst [vmem:[%s5300_s29 + $0x1f8] sm:$0xf] %v433_v62 }
  0x68   : > { %436 = vst [vmem:[%s5300_s29 + $0x1fc] sm:$0xf] %v435_v63  ;;  %v437_v0 = vld [vmem:[%s5296_s28 + $0x400] sm:$0xf]  ;;  %v439_v1 = vld [vmem:[%s5296_s28 + $0x408] sm:$0xf] }
  0x69   : > { %v441_v2 = vld [vmem:[%s5296_s28 + $0x410] sm:$0xf]  ;;  %438 = vst [vmem:[%s5300_s29 + $0x200] sm:$0xf] %v437_v0  ;;  %440 = vst [vmem:[%s5300_s29 + $0x204] sm:$0xf] %v439_v1 }
  0x6a   : > { %442 = vst [vmem:[%s5300_s29 + $0x208] sm:$0xf] %v441_v2  ;;  %v443_v3 = vld [vmem:[%s5296_s28 + $0x418] sm:$0xf]  ;;  %v445_v4 = vld [vmem:[%s5296_s28 + $0x420] sm:$0xf] }
  0x6b   : > { %v447_v5 = vld [vmem:[%s5296_s28 + $0x428] sm:$0xf]  ;;  %444 = vst [vmem:[%s5300_s29 + $0x20c] sm:$0xf] %v443_v3  ;;  %446 = vst [vmem:[%s5300_s29 + $0x210] sm:$0xf] %v445_v4 }
  0x6c   : > { %448 = vst [vmem:[%s5300_s29 + $0x214] sm:$0xf] %v447_v5  ;;  %v449_v6 = vld [vmem:[%s5296_s28 + $0x430] sm:$0xf]  ;;  %v451_v7 = vld [vmem:[%s5296_s28 + $0x438] sm:$0xf] }
  0x6d   : > { %v453_v8 = vld [vmem:[%s5296_s28 + $0x440] sm:$0xf]  ;;  %450 = vst [vmem:[%s5300_s29 + $0x218] sm:$0xf] %v449_v6  ;;  %452 = vst [vmem:[%s5300_s29 + $0x21c] sm:$0xf] %v451_v7 }
  0x6e   : > { %454 = vst [vmem:[%s5300_s29 + $0x220] sm:$0xf] %v453_v8  ;;  %v455_v9 = vld [vmem:[%s5296_s28 + $0x448] sm:$0xf]  ;;  %v457_v10 = vld [vmem:[%s5296_s28 + $0x450] sm:$0xf] }
  0x6f   : > { %v459_v11 = vld [vmem:[%s5296_s28 + $0x458] sm:$0xf]  ;;  %456 = vst [vmem:[%s5300_s29 + $0x224] sm:$0xf] %v455_v9  ;;  %458 = vst [vmem:[%s5300_s29 + $0x228] sm:$0xf] %v457_v10 }
  0x70   : > { %460 = vst [vmem:[%s5300_s29 + $0x22c] sm:$0xf] %v459_v11  ;;  %v461_v12 = vld [vmem:[%s5296_s28 + $0x460] sm:$0xf]  ;;  %v463_v13 = vld [vmem:[%s5296_s28 + $0x468] sm:$0xf] }
  0x71   : > { %v465_v14 = vld [vmem:[%s5296_s28 + $0x470] sm:$0xf]  ;;  %462 = vst [vmem:[%s5300_s29 + $0x230] sm:$0xf] %v461_v12  ;;  %464 = vst [vmem:[%s5300_s29 + $0x234] sm:$0xf] %v463_v13 }
  0x72   : > { %466 = vst [vmem:[%s5300_s29 + $0x238] sm:$0xf] %v465_v14  ;;  %v467_v15 = vld [vmem:[%s5296_s28 + $0x478] sm:$0xf]  ;;  %v469_v16 = vld [vmem:[%s5296_s28 + $0x480] sm:$0xf] }
  0x73   : > { %v471_v17 = vld [vmem:[%s5296_s28 + $0x488] sm:$0xf]  ;;  %468 = vst [vmem:[%s5300_s29 + $0x23c] sm:$0xf] %v467_v15  ;;  %470 = vst [vmem:[%s5300_s29 + $0x240] sm:$0xf] %v469_v16 }
  0x74   : > { %472 = vst [vmem:[%s5300_s29 + $0x244] sm:$0xf] %v471_v17  ;;  %v473_v18 = vld [vmem:[%s5296_s28 + $0x490] sm:$0xf]  ;;  %v475_v19 = vld [vmem:[%s5296_s28 + $0x498] sm:$0xf] }
  0x75   : > { %v477_v20 = vld [vmem:[%s5296_s28 + $0x4a0] sm:$0xf]  ;;  %474 = vst [vmem:[%s5300_s29 + $0x248] sm:$0xf] %v473_v18  ;;  %476 = vst [vmem:[%s5300_s29 + $0x24c] sm:$0xf] %v475_v19 }
  0x76   : > { %478 = vst [vmem:[%s5300_s29 + $0x250] sm:$0xf] %v477_v20  ;;  %v479_v21 = vld [vmem:[%s5296_s28 + $0x4a8] sm:$0xf]  ;;  %v481_v22 = vld [vmem:[%s5296_s28 + $0x4b0] sm:$0xf] }
  0x77   : > { %v483_v23 = vld [vmem:[%s5296_s28 + $0x4b8] sm:$0xf]  ;;  %480 = vst [vmem:[%s5300_s29 + $0x254] sm:$0xf] %v479_v21  ;;  %482 = vst [vmem:[%s5300_s29 + $0x258] sm:$0xf] %v481_v22 }
  0x78   : > { %484 = vst [vmem:[%s5300_s29 + $0x25c] sm:$0xf] %v483_v23  ;;  %v485_v24 = vld [vmem:[%s5296_s28 + $0x4c0] sm:$0xf]  ;;  %v487_v25 = vld [vmem:[%s5296_s28 + $0x4c8] sm:$0xf] }
  0x79   : > { %v489_v26 = vld [vmem:[%s5296_s28 + $0x4d0] sm:$0xf]  ;;  %486 = vst [vmem:[%s5300_s29 + $0x260] sm:$0xf] %v485_v24  ;;  %488 = vst [vmem:[%s5300_s29 + $0x264] sm:$0xf] %v487_v25 }
  0x7a   : > { %490 = vst [vmem:[%s5300_s29 + $0x268] sm:$0xf] %v489_v26  ;;  %v491_v27 = vld [vmem:[%s5296_s28 + $0x4d8] sm:$0xf]  ;;  %v493_v28 = vld [vmem:[%s5296_s28 + $0x4e0] sm:$0xf] }
  0x7b   : > { %v495_v29 = vld [vmem:[%s5296_s28 + $0x4e8] sm:$0xf]  ;;  %492 = vst [vmem:[%s5300_s29 + $0x26c] sm:$0xf] %v491_v27  ;;  %494 = vst [vmem:[%s5300_s29 + $0x270] sm:$0xf] %v493_v28 }
  0x7c   : > { %496 = vst [vmem:[%s5300_s29 + $0x274] sm:$0xf] %v495_v29  ;;  %v497_v30 = vld [vmem:[%s5296_s28 + $0x4f0] sm:$0xf]  ;;  %v499_v31 = vld [vmem:[%s5296_s28 + $0x4f8] sm:$0xf] }
  0x7d   : > { %v501_v32 = vld [vmem:[%s5296_s28 + $0x500] sm:$0xf]  ;;  %498 = vst [vmem:[%s5300_s29 + $0x278] sm:$0xf] %v497_v30  ;;  %500 = vst [vmem:[%s5300_s29 + $0x27c] sm:$0xf] %v499_v31 }
  0x7e   : > { %502 = vst [vmem:[%s5300_s29 + $0x280] sm:$0xf] %v501_v32  ;;  %v503_v33 = vld [vmem:[%s5296_s28 + $0x508] sm:$0xf]  ;;  %v505_v34 = vld [vmem:[%s5296_s28 + $0x510] sm:$0xf] }
  0x7f   : > { %v507_v35 = vld [vmem:[%s5296_s28 + $0x518] sm:$0xf]  ;;  %504 = vst [vmem:[%s5300_s29 + $0x284] sm:$0xf] %v503_v33  ;;  %506 = vst [vmem:[%s5300_s29 + $0x288] sm:$0xf] %v505_v34 }
  0x80   : > { %508 = vst [vmem:[%s5300_s29 + $0x28c] sm:$0xf] %v507_v35  ;;  %v509_v36 = vld [vmem:[%s5296_s28 + $0x520] sm:$0xf]  ;;  %v511_v37 = vld [vmem:[%s5296_s28 + $0x528] sm:$0xf] }
  0x81   : > { %v513_v38 = vld [vmem:[%s5296_s28 + $0x530] sm:$0xf]  ;;  %510 = vst [vmem:[%s5300_s29 + $0x290] sm:$0xf] %v509_v36  ;;  %512 = vst [vmem:[%s5300_s29 + $0x294] sm:$0xf] %v511_v37 }
  0x82   : > { %514 = vst [vmem:[%s5300_s29 + $0x298] sm:$0xf] %v513_v38  ;;  %v515_v39 = vld [vmem:[%s5296_s28 + $0x538] sm:$0xf]  ;;  %v517_v40 = vld [vmem:[%s5296_s28 + $0x540] sm:$0xf] }
  0x83   : > { %v519_v41 = vld [vmem:[%s5296_s28 + $0x548] sm:$0xf]  ;;  %516 = vst [vmem:[%s5300_s29 + $0x29c] sm:$0xf] %v515_v39  ;;  %518 = vst [vmem:[%s5300_s29 + $0x2a0] sm:$0xf] %v517_v40 }
  0x84   : > { %520 = vst [vmem:[%s5300_s29 + $0x2a4] sm:$0xf] %v519_v41  ;;  %v521_v42 = vld [vmem:[%s5296_s28 + $0x550] sm:$0xf]  ;;  %v523_v43 = vld [vmem:[%s5296_s28 + $0x558] sm:$0xf] }
  0x85   : > { %v525_v44 = vld [vmem:[%s5296_s28 + $0x560] sm:$0xf]  ;;  %522 = vst [vmem:[%s5300_s29 + $0x2a8] sm:$0xf] %v521_v42  ;;  %524 = vst [vmem:[%s5300_s29 + $0x2ac] sm:$0xf] %v523_v43 }
  0x86   : > { %526 = vst [vmem:[%s5300_s29 + $0x2b0] sm:$0xf] %v525_v44  ;;  %v527_v45 = vld [vmem:[%s5296_s28 + $0x568] sm:$0xf]  ;;  %v529_v46 = vld [vmem:[%s5296_s28 + $0x570] sm:$0xf] }
  0x87   : > { %v531_v47 = vld [vmem:[%s5296_s28 + $0x578] sm:$0xf]  ;;  %528 = vst [vmem:[%s5300_s29 + $0x2b4] sm:$0xf] %v527_v45  ;;  %530 = vst [vmem:[%s5300_s29 + $0x2b8] sm:$0xf] %v529_v46 }
  0x88   : > { %532 = vst [vmem:[%s5300_s29 + $0x2bc] sm:$0xf] %v531_v47  ;;  %v533_v48 = vld [vmem:[%s5296_s28 + $0x580] sm:$0xf]  ;;  %v535_v49 = vld [vmem:[%s5296_s28 + $0x588] sm:$0xf] }
  0x89   : > { %v537_v50 = vld [vmem:[%s5296_s28 + $0x590] sm:$0xf]  ;;  %534 = vst [vmem:[%s5300_s29 + $0x2c0] sm:$0xf] %v533_v48  ;;  %536 = vst [vmem:[%s5300_s29 + $0x2c4] sm:$0xf] %v535_v49 }
  0x8a   : > { %538 = vst [vmem:[%s5300_s29 + $0x2c8] sm:$0xf] %v537_v50  ;;  %v539_v51 = vld [vmem:[%s5296_s28 + $0x598] sm:$0xf]  ;;  %v541_v52 = vld [vmem:[%s5296_s28 + $0x5a0] sm:$0xf] }
  0x8b   : > { %v543_v53 = vld [vmem:[%s5296_s28 + $0x5a8] sm:$0xf]  ;;  %540 = vst [vmem:[%s5300_s29 + $0x2cc] sm:$0xf] %v539_v51  ;;  %542 = vst [vmem:[%s5300_s29 + $0x2d0] sm:$0xf] %v541_v52 }
  0x8c   : > { %544 = vst [vmem:[%s5300_s29 + $0x2d4] sm:$0xf] %v543_v53  ;;  %v545_v54 = vld [vmem:[%s5296_s28 + $0x5b0] sm:$0xf]  ;;  %v547_v55 = vld [vmem:[%s5296_s28 + $0x5b8] sm:$0xf] }
  0x8d   : > { %v549_v56 = vld [vmem:[%s5296_s28 + $0x5c0] sm:$0xf]  ;;  %546 = vst [vmem:[%s5300_s29 + $0x2d8] sm:$0xf] %v545_v54  ;;  %548 = vst [vmem:[%s5300_s29 + $0x2dc] sm:$0xf] %v547_v55 }
  0x8e   : > { %550 = vst [vmem:[%s5300_s29 + $0x2e0] sm:$0xf] %v549_v56  ;;  %v551_v57 = vld [vmem:[%s5296_s28 + $0x5c8] sm:$0xf]  ;;  %v553_v58 = vld [vmem:[%s5296_s28 + $0x5d0] sm:$0xf] }
  0x8f   : > { %v555_v59 = vld [vmem:[%s5296_s28 + $0x5d8] sm:$0xf]  ;;  %552 = vst [vmem:[%s5300_s29 + $0x2e4] sm:$0xf] %v551_v57  ;;  %554 = vst [vmem:[%s5300_s29 + $0x2e8] sm:$0xf] %v553_v58 }
  0x90   : > { %556 = vst [vmem:[%s5300_s29 + $0x2ec] sm:$0xf] %v555_v59  ;;  %v557_v60 = vld [vmem:[%s5296_s28 + $0x5e0] sm:$0xf]  ;;  %v559_v61 = vld [vmem:[%s5296_s28 + $0x5e8] sm:$0xf] }
  0x91   : > { %v561_v62 = vld [vmem:[%s5296_s28 + $0x5f0] sm:$0xf]  ;;  %558 = vst [vmem:[%s5300_s29 + $0x2f0] sm:$0xf] %v557_v60  ;;  %560 = vst [vmem:[%s5300_s29 + $0x2f4] sm:$0xf] %v559_v61 }
  0x92   : > { %562 = vst [vmem:[%s5300_s29 + $0x2f8] sm:$0xf] %v561_v62  ;;  %v563_v63 = vld [vmem:[%s5296_s28 + $0x5f8] sm:$0xf]  ;;  %v565_v0 = vld [vmem:[%s5296_s28 + $0x600] sm:$0xf] }
  0x93   : > { %v567_v1 = vld [vmem:[%s5296_s28 + $0x608] sm:$0xf]  ;;  %564 = vst [vmem:[%s5300_s29 + $0x2fc] sm:$0xf] %v563_v63  ;;  %566 = vst [vmem:[%s5300_s29 + $0x300] sm:$0xf] %v565_v0 }
  0x94   : > { %568 = vst [vmem:[%s5300_s29 + $0x304] sm:$0xf] %v567_v1  ;;  %v569_v2 = vld [vmem:[%s5296_s28 + $0x610] sm:$0xf]  ;;  %v571_v3 = vld [vmem:[%s5296_s28 + $0x618] sm:$0xf] }
  0x95   : > { %v573_v4 = vld [vmem:[%s5296_s28 + $0x620] sm:$0xf]  ;;  %570 = vst [vmem:[%s5300_s29 + $0x308] sm:$0xf] %v569_v2  ;;  %572 = vst [vmem:[%s5300_s29 + $0x30c] sm:$0xf] %v571_v3 }
  0x96   : > { %574 = vst [vmem:[%s5300_s29 + $0x310] sm:$0xf] %v573_v4  ;;  %v575_v5 = vld [vmem:[%s5296_s28 + $0x628] sm:$0xf]  ;;  %v577_v6 = vld [vmem:[%s5296_s28 + $0x630] sm:$0xf] }
  0x97   : > { %v579_v7 = vld [vmem:[%s5296_s28 + $0x638] sm:$0xf]  ;;  %576 = vst [vmem:[%s5300_s29 + $0x314] sm:$0xf] %v575_v5  ;;  %578 = vst [vmem:[%s5300_s29 + $0x318] sm:$0xf] %v577_v6 }
  0x98   : > { %580 = vst [vmem:[%s5300_s29 + $0x31c] sm:$0xf] %v579_v7  ;;  %v581_v8 = vld [vmem:[%s5296_s28 + $0x640] sm:$0xf]  ;;  %v583_v9 = vld [vmem:[%s5296_s28 + $0x648] sm:$0xf] }
  0x99   : > { %v585_v10 = vld [vmem:[%s5296_s28 + $0x650] sm:$0xf]  ;;  %582 = vst [vmem:[%s5300_s29 + $0x320] sm:$0xf] %v581_v8  ;;  %584 = vst [vmem:[%s5300_s29 + $0x324] sm:$0xf] %v583_v9 }
  0x9a   : > { %586 = vst [vmem:[%s5300_s29 + $0x328] sm:$0xf] %v585_v10  ;;  %v587_v11 = vld [vmem:[%s5296_s28 + $0x658] sm:$0xf]  ;;  %v589_v12 = vld [vmem:[%s5296_s28 + $0x660] sm:$0xf] }
  0x9b   : > { %v591_v13 = vld [vmem:[%s5296_s28 + $0x668] sm:$0xf]  ;;  %588 = vst [vmem:[%s5300_s29 + $0x32c] sm:$0xf] %v587_v11  ;;  %590 = vst [vmem:[%s5300_s29 + $0x330] sm:$0xf] %v589_v12 }
  0x9c   : > { %592 = vst [vmem:[%s5300_s29 + $0x334] sm:$0xf] %v591_v13  ;;  %v593_v14 = vld [vmem:[%s5296_s28 + $0x670] sm:$0xf]  ;;  %v595_v15 = vld [vmem:[%s5296_s28 + $0x678] sm:$0xf] }
  0x9d   : > { %v597_v16 = vld [vmem:[%s5296_s28 + $0x680] sm:$0xf]  ;;  %594 = vst [vmem:[%s5300_s29 + $0x338] sm:$0xf] %v593_v14  ;;  %596 = vst [vmem:[%s5300_s29 + $0x33c] sm:$0xf] %v595_v15 }
  0x9e   : > { %598 = vst [vmem:[%s5300_s29 + $0x340] sm:$0xf] %v597_v16  ;;  %v599_v17 = vld [vmem:[%s5296_s28 + $0x688] sm:$0xf]  ;;  %v601_v18 = vld [vmem:[%s5296_s28 + $0x690] sm:$0xf] }
  0x9f   : > { %v603_v19 = vld [vmem:[%s5296_s28 + $0x698] sm:$0xf]  ;;  %600 = vst [vmem:[%s5300_s29 + $0x344] sm:$0xf] %v599_v17  ;;  %602 = vst [vmem:[%s5300_s29 + $0x348] sm:$0xf] %v601_v18 }
  0xa0   : > { %604 = vst [vmem:[%s5300_s29 + $0x34c] sm:$0xf] %v603_v19  ;;  %v605_v20 = vld [vmem:[%s5296_s28 + $0x6a0] sm:$0xf]  ;;  %v607_v21 = vld [vmem:[%s5296_s28 + $0x6a8] sm:$0xf] }
  0xa1   : > { %v609_v22 = vld [vmem:[%s5296_s28 + $0x6b0] sm:$0xf]  ;;  %606 = vst [vmem:[%s5300_s29 + $0x350] sm:$0xf] %v605_v20  ;;  %608 = vst [vmem:[%s5300_s29 + $0x354] sm:$0xf] %v607_v21 }
  0xa2   : > { %610 = vst [vmem:[%s5300_s29 + $0x358] sm:$0xf] %v609_v22  ;;  %v611_v23 = vld [vmem:[%s5296_s28 + $0x6b8] sm:$0xf]  ;;  %v613_v24 = vld [vmem:[%s5296_s28 + $0x6c0] sm:$0xf] }
  0xa3   : > { %v615_v25 = vld [vmem:[%s5296_s28 + $0x6c8] sm:$0xf]  ;;  %612 = vst [vmem:[%s5300_s29 + $0x35c] sm:$0xf] %v611_v23  ;;  %614 = vst [vmem:[%s5300_s29 + $0x360] sm:$0xf] %v613_v24 }
  0xa4   : > { %616 = vst [vmem:[%s5300_s29 + $0x364] sm:$0xf] %v615_v25  ;;  %v617_v26 = vld [vmem:[%s5296_s28 + $0x6d0] sm:$0xf]  ;;  %v619_v27 = vld [vmem:[%s5296_s28 + $0x6d8] sm:$0xf] }
  0xa5   : > { %v621_v28 = vld [vmem:[%s5296_s28 + $0x6e0] sm:$0xf]  ;;  %618 = vst [vmem:[%s5300_s29 + $0x368] sm:$0xf] %v617_v26  ;;  %620 = vst [vmem:[%s5300_s29 + $0x36c] sm:$0xf] %v619_v27 }
  0xa6   : > { %622 = vst [vmem:[%s5300_s29 + $0x370] sm:$0xf] %v621_v28  ;;  %v623_v29 = vld [vmem:[%s5296_s28 + $0x6e8] sm:$0xf]  ;;  %v625_v30 = vld [vmem:[%s5296_s28 + $0x6f0] sm:$0xf] }
  0xa7   : > { %v627_v31 = vld [vmem:[%s5296_s28 + $0x6f8] sm:$0xf]  ;;  %624 = vst [vmem:[%s5300_s29 + $0x374] sm:$0xf] %v623_v29  ;;  %626 = vst [vmem:[%s5300_s29 + $0x378] sm:$0xf] %v625_v30 }
  0xa8   : > { %628 = vst [vmem:[%s5300_s29 + $0x37c] sm:$0xf] %v627_v31  ;;  %v629_v32 = vld [vmem:[%s5296_s28 + $0x700] sm:$0xf]  ;;  %v631_v33 = vld [vmem:[%s5296_s28 + $0x708] sm:$0xf] }
  0xa9   : > { %v633_v34 = vld [vmem:[%s5296_s28 + $0x710] sm:$0xf]  ;;  %630 = vst [vmem:[%s5300_s29 + $0x380] sm:$0xf] %v629_v32  ;;  %632 = vst [vmem:[%s5300_s29 + $0x384] sm:$0xf] %v631_v33 }
  0xaa   : > { %634 = vst [vmem:[%s5300_s29 + $0x388] sm:$0xf] %v633_v34  ;;  %v635_v35 = vld [vmem:[%s5296_s28 + $0x718] sm:$0xf]  ;;  %v637_v36 = vld [vmem:[%s5296_s28 + $0x720] sm:$0xf] }
  0xab   : > { %v639_v37 = vld [vmem:[%s5296_s28 + $0x728] sm:$0xf]  ;;  %636 = vst [vmem:[%s5300_s29 + $0x38c] sm:$0xf] %v635_v35  ;;  %638 = vst [vmem:[%s5300_s29 + $0x390] sm:$0xf] %v637_v36 }
  0xac   : > { %640 = vst [vmem:[%s5300_s29 + $0x394] sm:$0xf] %v639_v37  ;;  %v641_v38 = vld [vmem:[%s5296_s28 + $0x730] sm:$0xf]  ;;  %v643_v39 = vld [vmem:[%s5296_s28 + $0x738] sm:$0xf] }
  0xad   : > { %v645_v40 = vld [vmem:[%s5296_s28 + $0x740] sm:$0xf]  ;;  %642 = vst [vmem:[%s5300_s29 + $0x398] sm:$0xf] %v641_v38  ;;  %644 = vst [vmem:[%s5300_s29 + $0x39c] sm:$0xf] %v643_v39 }
  0xae   : > { %646 = vst [vmem:[%s5300_s29 + $0x3a0] sm:$0xf] %v645_v40  ;;  %v647_v41 = vld [vmem:[%s5296_s28 + $0x748] sm:$0xf]  ;;  %v649_v42 = vld [vmem:[%s5296_s28 + $0x750] sm:$0xf] }
  0xaf   : > { %v651_v43 = vld [vmem:[%s5296_s28 + $0x758] sm:$0xf]  ;;  %648 = vst [vmem:[%s5300_s29 + $0x3a4] sm:$0xf] %v647_v41  ;;  %650 = vst [vmem:[%s5300_s29 + $0x3a8] sm:$0xf] %v649_v42 }
  0xb0   : > { %652 = vst [vmem:[%s5300_s29 + $0x3ac] sm:$0xf] %v651_v43  ;;  %v653_v44 = vld [vmem:[%s5296_s28 + $0x760] sm:$0xf]  ;;  %v655_v45 = vld [vmem:[%s5296_s28 + $0x768] sm:$0xf] }
  0xb1   : > { %v657_v46 = vld [vmem:[%s5296_s28 + $0x770] sm:$0xf]  ;;  %654 = vst [vmem:[%s5300_s29 + $0x3b0] sm:$0xf] %v653_v44  ;;  %656 = vst [vmem:[%s5300_s29 + $0x3b4] sm:$0xf] %v655_v45 }
  0xb2   : > { %658 = vst [vmem:[%s5300_s29 + $0x3b8] sm:$0xf] %v657_v46  ;;  %v659_v47 = vld [vmem:[%s5296_s28 + $0x778] sm:$0xf]  ;;  %v661_v48 = vld [vmem:[%s5296_s28 + $0x780] sm:$0xf] }
  0xb3   : > { %v663_v49 = vld [vmem:[%s5296_s28 + $0x788] sm:$0xf]  ;;  %660 = vst [vmem:[%s5300_s29 + $0x3bc] sm:$0xf] %v659_v47  ;;  %662 = vst [vmem:[%s5300_s29 + $0x3c0] sm:$0xf] %v661_v48 }
  0xb4   : > { %664 = vst [vmem:[%s5300_s29 + $0x3c4] sm:$0xf] %v663_v49  ;;  %v665_v50 = vld [vmem:[%s5296_s28 + $0x790] sm:$0xf]  ;;  %v667_v51 = vld [vmem:[%s5296_s28 + $0x798] sm:$0xf] }
  0xb5   : > { %v669_v52 = vld [vmem:[%s5296_s28 + $0x7a0] sm:$0xf]  ;;  %666 = vst [vmem:[%s5300_s29 + $0x3c8] sm:$0xf] %v665_v50  ;;  %668 = vst [vmem:[%s5300_s29 + $0x3cc] sm:$0xf] %v667_v51 }
  0xb6   : > { %670 = vst [vmem:[%s5300_s29 + $0x3d0] sm:$0xf] %v669_v52  ;;  %v671_v53 = vld [vmem:[%s5296_s28 + $0x7a8] sm:$0xf]  ;;  %v673_v54 = vld [vmem:[%s5296_s28 + $0x7b0] sm:$0xf] }
  0xb7   : > { %v675_v55 = vld [vmem:[%s5296_s28 + $0x7b8] sm:$0xf]  ;;  %672 = vst [vmem:[%s5300_s29 + $0x3d4] sm:$0xf] %v671_v53  ;;  %674 = vst [vmem:[%s5300_s29 + $0x3d8] sm:$0xf] %v673_v54 }
  0xb8   : > { %676 = vst [vmem:[%s5300_s29 + $0x3dc] sm:$0xf] %v675_v55  ;;  %v677_v56 = vld [vmem:[%s5296_s28 + $0x7c0] sm:$0xf]  ;;  %v679_v57 = vld [vmem:[%s5296_s28 + $0x7c8] sm:$0xf] }
  0xb9   : > { %v681_v58 = vld [vmem:[%s5296_s28 + $0x7d0] sm:$0xf]  ;;  %678 = vst [vmem:[%s5300_s29 + $0x3e0] sm:$0xf] %v677_v56  ;;  %680 = vst [vmem:[%s5300_s29 + $0x3e4] sm:$0xf] %v679_v57 }
  0xba   : > { %682 = vst [vmem:[%s5300_s29 + $0x3e8] sm:$0xf] %v681_v58  ;;  %v683_v59 = vld [vmem:[%s5296_s28 + $0x7d8] sm:$0xf]  ;;  %v685_v60 = vld [vmem:[%s5296_s28 + $0x7e0] sm:$0xf] }
  0xbb   : > { %v687_v61 = vld [vmem:[%s5296_s28 + $0x7e8] sm:$0xf]  ;;  %684 = vst [vmem:[%s5300_s29 + $0x3ec] sm:$0xf] %v683_v59  ;;  %686 = vst [vmem:[%s5300_s29 + $0x3f0] sm:$0xf] %v685_v60 }
  0xbc   : > { %688 = vst [vmem:[%s5300_s29 + $0x3f4] sm:$0xf] %v687_v61  ;;  %v689_v62 = vld [vmem:[%s5296_s28 + $0x7f0] sm:$0xf]  ;;  %v691_v63 = vld [vmem:[%s5296_s28 + $0x7f8] sm:$0xf] }
  0xbd   : > { %690 = vst [vmem:[%s5300_s29 + $0x3f8] sm:$0xf] %v689_v62  ;;  %692 = vst [vmem:[%s5300_s29 + $0x3fc] sm:$0xf] %v691_v63 }
  0xbe PF: > { %p4165_p8 = scmp.ge.s32.totalorder %s5226_s16, 1  ;;  %p1233_p9 = scmp.lt.s32.totalorder %s5226_s16, 3 }
  0xc0   : > { %p1234_p10 = pnand %p4165_p8, %p1233_p9 }
  0xc2   : > { %1237 = sbr.rel (%p1234_p10) target bundleno = 702 (0x2be), region = 69 }
  0xc7   : > { %s1240_s30 = sand.u32 1, %s5210_s12   ;;  %v5818_v0 = vld [vmem:[%s6635_s0] sm:$0xff]  ;;  %v5828_v2 = vld [vmem:[%s6635_s0 + $0x8] sm:$0xff]  ;;  %p1278_p11 = scmp.lt.s32.totalorder %s5218_s14, 1 }
  0xc8   : > { %v5823_v1 = vld [vmem:[%s6635_s0 + $0x40] sm:$0xff]  ;;  %s4166_s10 = sshll.u32 %s1240_s30, 10  ;;  %v5837_v4 = vld [vmem:[%s6635_s0 + $0x48] sm:$0xff]  ;;  %s4167_s5 = sshll.u32 %s1240_s30, 6 }
  0xc9   : > { %v4170_v3 = vcombine.high %v5818_v0, %v5823_v1  ;;  %v4172_v5 = vcombine.high %v5828_v2, %v5837_v4  ;;  %s5841_s19 = scalar_lea.vmem [#allocation2], %s4166_s10  ;;  %v1299_v35 = vld [vmem:[%s6635_s0 + $0x80] sm:$0xff]  ;;  %v1300_v38 = vld [vmem:[%s6635_s0 + $0x88] sm:$0xff]  ;;  %v4169_v42 = vcombine.low %v5818_v0, %v5823_v1  ;;  %v4171_v43 = vcombine.low %v5828_v2, %v5837_v4  ;;  %s6554_s12 = scalar_lea.vmem [#allocation3], %s4167_s5 }
  0xca   : > { %v5060_v6 = vld [vmem:[%s5841_s19 + $0x78] sm:$0xff]   ;;  %v5064_v10 = vld [vmem:[%s5841_s19 + $0x70] sm:$0xff]   ;;  %v5068_v14 = vld [vmem:[%s5841_s19 + $0x68] sm:$0xff]   ;;  %s1279_s29 = scalar_select %p1278_p11, %s5218_s14, 1 }
  0xcb   : > { %3114 = vmatprep.mubr.bf16.mxu0 %v4170_v3  ;;  %v5061_v7 = vld [vmem:[%s5841_s19 + $0xf8] sm:$0xff]   ;;  %3211 = vmatprep.mubr.bf16.mxu1 %v4172_v5  ;;  %v5065_v11 = vld [vmem:[%s5841_s19 + $0xf0] sm:$0xff]   ;;  %v5069_v15 = vld [vmem:[%s5841_s19 + $0xe8] sm:$0xff]   ;;  %s4442_s30 = sshll.u32 (%p5283_p6), %s5218_s14, 2 }
  0xcc   : > { %4508 = vmatprep.subr.bf16.mxu0 %v5060_v6  ;;  %v5062_v8 = vld [vmem:[%s5841_s19 + $0x38] sm:$0xff]   ;;  %4572 = vmatprep.subr.bf16.mxu1 %v5061_v7  ;;  %v5066_v12 = vld [vmem:[%s5841_s19 + $0x30] sm:$0xff]   ;;  %v5070_v16 = vld [vmem:[%s5841_s19 + $0x28] sm:$0xff]   ;;  %s1280_s10 = scalar_lea.vmem %s6637_s2, %s1279_s29  ;;  %s3965_s8 = scalar_lea.vmem (%p5283_p6), %s6638_s3, %s4442_s30 }
  0xcd   : > { %v5063_v9 = vld [vmem:[%s5841_s19 + $0xb8] sm:$0xff]   ;;  %4509 = vmatpush3.bf16.msra.mxu0 %v5062_v8  ;;  %v5067_v13 = vld [vmem:[%s5841_s19 + $0xb0] sm:$0xff]   ;;  %v5071_v17 = vld [vmem:[%s5841_s19 + $0xa8] sm:$0xff]  }
  0xce   : > { %4573 = vmatpush3.bf16.msra.mxu1 %v5063_v9  ;;  %4510 = vmatprep.subr.bf16.mxu0 %v5064_v10  ;;  %v5072_v18 = vld [vmem:[%s5841_s19 + $0x60] sm:$0xff]   ;;  %v5076_v22 = vld [vmem:[%s5841_s19 + $0x58] sm:$0xff]   ;;  %v5080_v26 = vld [vmem:[%s5841_s19 + $0x50] sm:$0xff]  }
  0xcf   : > { %4574 = vmatprep.subr.bf16.mxu1 %v5065_v11  ;;  %v5073_v19 = vld [vmem:[%s5841_s19 + $0xe0] sm:$0xff]   ;;  %v5077_v23 = vld [vmem:[%s5841_s19 + $0xd8] sm:$0xff]   ;;  %v5081_v27 = vld [vmem:[%s5841_s19 + $0xd0] sm:$0xff]  }
  0xd0   : > { %v5074_v20 = vld [vmem:[%s5841_s19 + $0x20] sm:$0xff]   ;;  %v5078_v24 = vld [vmem:[%s5841_s19 + $0x18] sm:$0xff]   ;;  %v5082_v28 = vld [vmem:[%s5841_s19 + $0x10] sm:$0xff]  }
  0xd1   : > { %4511 = vmatpush3.bf16.msra.mxu0 %v5066_v12  ;;  %v5075_v21 = vld [vmem:[%s5841_s19 + $0xa0] sm:$0xff]   ;;  %v5079_v25 = vld [vmem:[%s5841_s19 + $0x98] sm:$0xff]   ;;  %v5083_v29 = vld [vmem:[%s5841_s19 + $0x90] sm:$0xff]  }
  0xd2   : > { %4575 = vmatpush3.bf16.msra.mxu1 %v5067_v13  ;;  %4512 = vmatprep.subr.bf16.mxu0 %v5068_v14  ;;  %v5084_v30 = vld [vmem:[%s5841_s19 + $0x48] sm:$0xff]   ;;  %v5088_v34 = vld [vmem:[%s5841_s19 + $0x40] sm:$0xff]   ;;  %v5092_v44 = vld [vmem:[%s5841_s19 + $0x178] sm:$0xff]  }
  0xd3   : > { %4576 = vmatprep.subr.bf16.mxu1 %v5069_v15  ;;  %v5085_v31 = vld [vmem:[%s5841_s19 + $0xc8] sm:$0xff]   ;;  %v1307_v36 = vld [vmem:[%s6635_s0 + $0xc0] sm:$0xff]  ;;  %v5093_v45 = vld [vmem:[%s5841_s19 + $0x138] sm:$0xff]  }
  0xd4   : > { %v5086_v32 = vld [vmem:[%s5841_s19 + $0x8] sm:$0xff]   ;;  %v5089_v37 = vld [vmem:[%s5841_s19 + $0xc0] sm:$0xff]   ;;  %v4186_v46 = vcombine.high %v1299_v35, %v1307_v36  ;;  %v5094_v47 = vld [vmem:[%s5841_s19 + $0x1f8] sm:$0xff]   ;;  %v4185_v54 = vcombine.low %v1299_v35, %v1307_v36 }
  0xd5   : > { %4513 = vmatpush3.bf16.msra.mxu0 %v5070_v16  ;;  %v5087_v33 = vld [vmem:[%s5841_s19 + $0x88] sm:$0xff]   ;;  %v5090_v40 = vld [vmem:[%s5841_s19] sm:$0xff]   ;;  %v5095_v49 = vld [vmem:[%s5841_s19 + $0x1b8] sm:$0xff]  }
  0xd6   : > { %4577 = vmatpush3.bf16.msra.mxu1 %v5071_v17  ;;  %4514 = vmatprep.subr.bf16.mxu0 %v5072_v18  ;;  %v1308_v39 = vld [vmem:[%s6635_s0 + $0xc8] sm:$0xff]  ;;  %v5091_v41 = vld [vmem:[%s5841_s19 + $0x80] sm:$0xff]   ;;  %v5096_v50 = vld [vmem:[%s5841_s19 + $0x170] sm:$0xff]  }
  0xd7   : > { %4578 = vmatprep.subr.bf16.mxu1 %v5073_v19  ;;  %v4188_v48 = vcombine.high %v1300_v38, %v1308_v39  ;;  %v1315_v51 = vld [vmem:[%s6635_s0 + $0x100] sm:$0xff]  ;;  %v5097_v52 = vld [vmem:[%s5841_s19 + $0x130] sm:$0xff]   ;;  %v4187_v56 = vcombine.low %v1300_v38, %v1308_v39  ;;  %v1316_v58 = vld [vmem:[%s6635_s0 + $0x108] sm:$0xff] }
  0xd8   : > { %v5098_v53 = vld [vmem:[%s5841_s19 + $0x1f0] sm:$0xff]   ;;  %v1323_v57 = vld [vmem:[%s6635_s0 + $0x140] sm:$0xff]  ;;  %v1324_v59 = vld [vmem:[%s6635_s0 + $0x148] sm:$0xff] }
  0xd9   : > { %4515 = vmatpush3.bf16.msra.mxu0 %v5074_v20  ;;  %v5099_v55 = vld [vmem:[%s5841_s19 + $0x1b0] sm:$0xff]   ;;  %v4202_v60 = vcombine.high %v1315_v51, %v1323_v57  ;;  %v4204_v61 = vcombine.high %v1316_v58, %v1324_v59  ;;  %v5100_v62 = vld [vmem:[%s5841_s19 + $0x168] sm:$0xff]   ;;  %v1331_v2 = vld [vmem:[%s6635_s0 + $0x180] sm:$0xff]  ;;  %v4201_v6 = vcombine.low %v1315_v51, %v1323_v57  ;;  %v4203_v8 = vcombine.low %v1316_v58, %v1324_v59 }
  0xda   : > { %4579 = vmatpush3.bf16.msra.mxu1 %v5075_v21  ;;  %4516 = vmatprep.subr.bf16.mxu0 %v5076_v22  ;;  %v5101_v63 = vld [vmem:[%s5841_s19 + $0x128] sm:$0xff]   ;;  %v1339_v3 = vld [vmem:[%s6635_s0 + $0x1c0] sm:$0xff]  ;;  %v5108_v18 = vld [vmem:[%s5841_s19 + $0x158] sm:$0xff]  }
  0xdb   : > { %4580 = vmatprep.subr.bf16.mxu1 %v5077_v23  ;;  %v5102_v0 = vld [vmem:[%s5841_s19 + $0x1e8] sm:$0xff]   ;;  %v5104_v7 = vld [vmem:[%s5841_s19 + $0x160] sm:$0xff]   ;;  %v4218_v9 = vcombine.high %v1331_v2, %v1339_v3  ;;  %v5109_v19 = vld [vmem:[%s5841_s19 + $0x118] sm:$0xff]   ;;  %v4217_v21 = vcombine.low %v1331_v2, %v1339_v3 }
  0xdc   : > { %v5103_v1 = vld [vmem:[%s5841_s19 + $0x1a8] sm:$0xff]   ;;  %v5105_v10 = vld [vmem:[%s5841_s19 + $0x120] sm:$0xff]   ;;  %v5110_v20 = vld [vmem:[%s5841_s19 + $0x1d8] sm:$0xff]  }
  0xdd   : > { %4517 = vmatpush3.bf16.msra.mxu0 %v5078_v24  ;;  %v1332_v4 = vld [vmem:[%s6635_s0 + $0x188] sm:$0xff]  ;;  %v5106_v12 = vld [vmem:[%s5841_s19 + $0x1e0] sm:$0xff]   ;;  %v5111_v22 = vld [vmem:[%s5841_s19 + $0x198] sm:$0xff]  }
  0xde   : > { %4581 = vmatpush3.bf16.msra.mxu1 %v5079_v25  ;;  %4518 = vmatprep.subr.bf16.mxu0 %v5080_v26  ;;  %v1340_v5 = vld [vmem:[%s6635_s0 + $0x1c8] sm:$0xff]  ;;  %v5107_v13 = vld [vmem:[%s5841_s19 + $0x1a0] sm:$0xff]   ;;  %v5112_v26 = vld [vmem:[%s5841_s19 + $0x150] sm:$0xff]  }
  0xdf   : > { %4582 = vmatprep.subr.bf16.mxu1 %v5081_v27  ;;  %v4220_v11 = vcombine.high %v1332_v4, %v1340_v5  ;;  %v1347_v14 = vld [vmem:[%s6635_s0 + $0x200] sm:$0xff]  ;;  %v1348_v16 = vld [vmem:[%s6635_s0 + $0x208] sm:$0xff]  ;;  %v4219_v23 = vcombine.low %v1332_v4, %v1340_v5  ;;  %v5113_v27 = vld [vmem:[%s5841_s19 + $0x110] sm:$0xff]  }
  0xe0   : > { %v1355_v15 = vld [vmem:[%s6635_s0 + $0x240] sm:$0xff]  ;;  %v1356_v17 = vld [vmem:[%s6635_s0 + $0x248] sm:$0xff]  ;;  %v1286_v2 = vld [vmem:[%s6635_s0 + $0x18] sm:$0xff] }
  0xe1   : > { %4519 = vmatpush3.bf16.msra.mxu0 %v5082_v28  ;;  %v4234_v24 = vcombine.high %v1347_v14, %v1355_v15  ;;  %v4236_v25 = vcombine.high %v1348_v16, %v1356_v17  ;;  %v5114_v28 = vld [vmem:[%s5841_s19 + $0x1d0] sm:$0xff]   ;;  %v5116_v35 = vld [vmem:[%s5841_s19 + $0x148] sm:$0xff]   ;;  %v4235_v36 = vcombine.low %v1348_v16, %v1356_v17  ;;  %v1403_v57 = vld [vmem:[%s6635_s0 + $0x3c0] sm:$0xff] }
  0xe2   : > { %4583 = vmatpush3.bf16.msra.mxu1 %v5083_v29  ;;  %4520 = vmatprep.subr.bf16.mxu0 %v5084_v30  ;;  %v5115_v29 = vld [vmem:[%s5841_s19 + $0x190] sm:$0xff]   ;;  %v1363_v30 = vld [vmem:[%s6635_s0 + $0x280] sm:$0xff]  ;;  %v5117_v38 = vld [vmem:[%s5841_s19 + $0x108] sm:$0xff]  }
  0xe3   : > { %4584 = vmatprep.subr.bf16.mxu1 %v5085_v31  ;;  %v1371_v31 = vld [vmem:[%s6635_s0 + $0x2c0] sm:$0xff]  ;;  %v1396_v58 = vld [vmem:[%s6635_s0 + $0x388] sm:$0xff]  ;;  %v1294_v3 = vld [vmem:[%s6635_s0 + $0x58] sm:$0xff] }
  0xe4   : > { %v1404_v59 = vld [vmem:[%s6635_s0 + $0x3c8] sm:$0xff] }
  0xe5   : > { %4521 = vmatpush3.bf16.msra.mxu0 %v5086_v32  ;;  %v1364_v32 = vld [vmem:[%s6635_s0 + $0x288] sm:$0xff]  ;;  %v4283_v5 = vcombine.low %v1396_v58, %v1404_v59 }
  0xe6   : > { %4585 = vmatpush3.bf16.msra.mxu1 %v5087_v33  ;;  %4522 = vmatprep.subr.bf16.mxu0 %v5088_v34  ;;  %v1372_v33 = vld [vmem:[%s6635_s0 + $0x2c8] sm:$0xff]  ;;  %v4233_v34 = vcombine.low %v1347_v14, %v1355_v15  ;;  %v5125_v14 = vld [vmem:[%s5841_s19 + $0x238] sm:$0xff]  }
  0xe7   : > { %4586 = vmatprep.subr.bf16.mxu1 %v5089_v37  ;;  %v4250_v37 = vcombine.high %v1363_v30, %v1371_v31  ;;  %v4252_v39 = vcombine.high %v1364_v32, %v1372_v33  ;;  %v4251_v51 = vcombine.low %v1364_v32, %v1372_v33  ;;  %v5127_v15 = vld [vmem:[%s5841_s19 + $0x2b8] sm:$0xff]   ;;  %v5135_v33 = vld [vmem:[%s5841_s19 + $0x2a8] sm:$0xff]  }
  0xe9   : > { %4523 = vmatpush3.bf16.msra.mxu0 %v5090_v40  ;;  %v5118_v40 = vld [vmem:[%s5841_s19 + $0x1c8] sm:$0xff]  }
  0xea   : > { %4587 = vmatpush3.bf16.msra.mxu1 %v5091_v41  ;;  %4636 = vmatprep.subr.bf16.mxu0 %v5092_v44  ;;  %v5119_v41 = vld [vmem:[%s5841_s19 + $0x188] sm:$0xff]  }
  0xeb   : > { %4700 = vmatprep.subr.bf16.mxu1 %v5094_v47  ;;  %v1380_v44 = vld [vmem:[%s6635_s0 + $0x308] sm:$0xff]  ;;  %v5121_v47 = vld [vmem:[%s5841_s19 + $0x100] sm:$0xff]  }
  0xec   : > { %3115 = vmatmul.mubr.bf16.vlgmr.msra.gmra.mxu0 %v4169_v42  ;;  %v1379_v42 = vld [vmem:[%s6635_s0 + $0x300] sm:$0xff] }
  0xed   : > { %3212 = vmatmul.mubr.bf16.vlgmr.msra.gmra.mxu1 %v4171_v43  ;;  %4637 = vmatpush3.bf16.msra.mxu0 %v5093_v45  ;;  %v1387_v43 = vld [vmem:[%s6635_s0 + $0x340] sm:$0xff]  ;;  %v1388_v45 = vld [vmem:[%s6635_s0 + $0x348] sm:$0xff] }
  0xee   : > { %3122 = vmatprep.mubr.bf16.mxu0 %v4186_v46  ;;  %4701 = vmatpush3.bf16.msra.mxu1 %v5095_v49  ;;  %v5120_v46 = vld [vmem:[%s5841_s19 + $0x140] sm:$0xff]   ;;  %v4249_v49 = vcombine.low %v1363_v30, %v1371_v31  ;;  %v5133_v31 = vld [vmem:[%s5841_s19 + $0x228] sm:$0xff]  }
  0xef   : > { %3219 = vmatprep.mubr.bf16.mxu1 %v4188_v48  ;;  %4638 = vmatprep.subr.bf16.mxu0 %v5096_v50  ;;  %v5122_v48 = vld [vmem:[%s5841_s19 + $0x1c0] sm:$0xff]  }
  0xf0   : > { %4702 = vmatprep.subr.bf16.mxu1 %v5098_v53  ;;  %v5123_v50 = vld [vmem:[%s5841_s19 + $0x180] sm:$0xff]   ;;  %v4268_v53 = vcombine.high %v1380_v44, %v1388_v45 }
  0xf1   : > { %4639 = vmatpush3.bf16.msra.mxu0 %v5097_v52  ;;  %v4266_v52 = vcombine.high %v1379_v42, %v1387_v43 }
  0xf2   : > { %4703 = vmatpush3.bf16.msra.mxu1 %v5099_v55  ;;  %4640 = vmatprep.subr.bf16.mxu0 %v5100_v62  ;;  %v5126_v55 = vld [vmem:[%s5841_s19 + $0x2f8] sm:$0xff]  }
  0xf3   : > { %4704 = vmatprep.subr.bf16.mxu1 %v5102_v0  ;;  %v1285_v0 = vld [vmem:[%s6635_s0 + $0x10] sm:$0xff] }
  0xf4   : > { %3123 = vmatmul.mubr.bf16.gmra.mxu0 %v4185_v54  ;;  %v5124_v54 = vld [vmem:[%s5841_s19 + $0x278] sm:$0xff]  }
  0xf5   : > { %3220 = vmatmul.mubr.bf16.gmra.mxu1 %v4187_v56  ;;  %3130 = vmatprep.mubr.bf16.mxu0 %v4202_v60  ;;  %v1395_v56 = vld [vmem:[%s6635_s0 + $0x380] sm:$0xff]  ;;  %v4265_v60 = vcombine.low %v1379_v42, %v1387_v43  ;;  %v5140_v42 = vld [vmem:[%s5841_s19 + $0x258] sm:$0xff]  }
  0xf6   : > { %3227 = vmatprep.mubr.bf16.mxu1 %v4204_v61  ;;  %4641 = vmatpush3.bf16.msra.mxu0 %v5101_v63  ;;  %v4267_v61 = vcombine.low %v1380_v44, %v1388_v45  ;;  %v4282_v62 = vcombine.high %v1395_v56, %v1403_v57  ;;  %v4284_v63 = vcombine.high %v1396_v58, %v1404_v59  ;;  %v5142_v44 = vld [vmem:[%s5841_s19 + $0x2d8] sm:$0xff]   ;;  %v5148_v58 = vld [vmem:[%s5841_s19 + $0x248] sm:$0xff]  }
  0xf7   : > { %4705 = vmatpush3.bf16.msra.mxu1 %v5103_v1  ;;  %4642 = vmatprep.subr.bf16.mxu0 %v5104_v7  ;;  %v1293_v1 = vld [vmem:[%s6635_s0 + $0x50] sm:$0xff]  ;;  %v4281_v4 = vcombine.low %v1395_v56, %v1403_v57  ;;  %v4176_v7 = vcombine.high %v1286_v2, %v1294_v3 }
  0xf8   : > { %4706 = vmatprep.subr.bf16.mxu1 %v5106_v12  ;;  %v1310_v12 = vld [vmem:[%s6635_s0 + $0xd8] sm:$0xff]  ;;  %v5145_v56 = vld [vmem:[%s5841_s19 + $0x210] sm:$0xff]  }
  0xf9   : > { %v5147_v57 = vld [vmem:[%s5841_s19 + $0x290] sm:$0xff]  }
  0xfa   : > { %4643 = vmatpush3.bf16.msra.mxu0 %v5105_v10  ;;  %v1302_v10 = vld [vmem:[%s6635_s0 + $0x98] sm:$0xff] }
  0xfb   : > { %4707 = vmatpush3.bf16.msra.mxu1 %v5107_v13  ;;  %4644 = vmatprep.subr.bf16.mxu0 %v5108_v18  ;;  %v4175_v13 = vcombine.low %v1286_v2, %v1294_v3  ;;  %v4192_v17 = vcombine.high %v1302_v10, %v1310_v12  ;;  %v5128_v18 = vld [vmem:[%s5841_s19 + $0x270] sm:$0xff]   ;;  %v5152_v2 = vld [vmem:[%s5841_s19 + $0x240] sm:$0xff]  }
  0xfc   : > { %3131 = vmatmul.mubr.bf16.gmra.mxu0 %v4201_v6  ;;  %4708 = vmatprep.subr.bf16.mxu1 %v5110_v20  ;;  %v4174_v6 = vcombine.high %v1285_v0, %v1293_v1  ;;  %v5130_v20 = vld [vmem:[%s5841_s19 + $0x2f0] sm:$0xff]  }
  0xfd   : > { %3228 = vmatmul.mubr.bf16.gmra.mxu1 %v4203_v8  ;;  %3138 = vmatprep.mubr.bf16.mxu0 %v4218_v9  ;;  %v1301_v8 = vld [vmem:[%s6635_s0 + $0x90] sm:$0xff] }
  0xfe   : > { %3235 = vmatprep.mubr.bf16.mxu1 %v4220_v11  ;;  %4645 = vmatpush3.bf16.msra.mxu0 %v5109_v19  ;;  %v1309_v9 = vld [vmem:[%s6635_s0 + $0xd0] sm:$0xff]  ;;  %v4173_v11 = vcombine.low %v1285_v0, %v1293_v1  ;;  %v5151_v1 = vld [vmem:[%s5841_s19 + $0x288] sm:$0xff]  }
  0xff   : > { %4709 = vmatpush3.bf16.msra.mxu1 %v5111_v22  ;;  %4646 = vmatprep.subr.bf16.mxu0 %v5112_v26  ;;  %v4190_v16 = vcombine.high %v1301_v8, %v1309_v9  ;;  %v5129_v19 = vld [vmem:[%s5841_s19 + $0x230] sm:$0xff]   ;;  %v5132_v26 = vld [vmem:[%s5841_s19 + $0x268] sm:$0xff]  }
 0x100   : > { %4710 = vmatprep.subr.bf16.mxu1 %v5114_v28  ;;  %v1317_v22 = vld [vmem:[%s6635_s0 + $0x110] sm:$0xff]  ;;  %v4189_v28 = vcombine.low %v1301_v8, %v1309_v9  ;;  %v5153_v8 = vld [vmem:[%s5841_s19 + $0x200] sm:$0xff]  }
 0x101   : > { %v1365_v3 = vld [vmem:[%s6635_s0 + $0x290] sm:$0xff]  ;;  %v5155_v9 = vld [vmem:[%s5841_s19 + $0x280] sm:$0xff]  }
 0x102   : > { %4647 = vmatpush3.bf16.msra.mxu0 %v5113_v27  ;;  %v5134_v27 = vld [vmem:[%s5841_s19 + $0x2e8] sm:$0xff]  }
 0x103   : > { %4711 = vmatpush3.bf16.msra.mxu1 %v5115_v29  ;;  %4648 = vmatprep.subr.bf16.mxu0 %v5116_v35  ;;  %v4191_v29 = vcombine.low %v1302_v10, %v1310_v12  ;;  %v1333_v35 = vld [vmem:[%s6635_s0 + $0x190] sm:$0xff]  ;;  %v5156_v10 = vld [vmem:[%s5841_s19 + $0x378] sm:$0xff]  }
 0x104   : > { %3139 = vmatmul.mubr.bf16.gmra.mxu0 %v4217_v21  ;;  %4712 = vmatprep.subr.bf16.mxu1 %v5118_v40  ;;  %v5131_v21 = vld [vmem:[%s5841_s19 + $0x2b0] sm:$0xff]   ;;  %v5137_v40 = vld [vmem:[%s5841_s19 + $0x220] sm:$0xff]   ;;  %v5158_v12 = vld [vmem:[%s5841_s19 + $0x3f8] sm:$0xff]  }
 0x105   : > { %3236 = vmatmul.mubr.bf16.gmra.mxu1 %v4219_v23  ;;  %3146 = vmatprep.mubr.bf16.mxu0 %v4234_v24  ;;  %v1325_v23 = vld [vmem:[%s6635_s0 + $0x150] sm:$0xff]  ;;  %v1318_v24 = vld [vmem:[%s6635_s0 + $0x118] sm:$0xff] }
 0x106   : > { %3243 = vmatprep.mubr.bf16.mxu1 %v4236_v25  ;;  %4649 = vmatpush3.bf16.msra.mxu0 %v5117_v38  ;;  %v1326_v25 = vld [vmem:[%s6635_s0 + $0x158] sm:$0xff]  ;;  %v4206_v30 = vcombine.high %v1317_v22, %v1325_v23  ;;  %v4205_v43 = vcombine.low %v1317_v22, %v1325_v23 }
 0x107   : > { %4713 = vmatpush3.bf16.msra.mxu1 %v5119_v41  ;;  %4650 = vmatprep.subr.bf16.mxu0 %v5120_v46  ;;  %v4208_v32 = vcombine.high %v1318_v24, %v1326_v25  ;;  %v1334_v38 = vld [vmem:[%s6635_s0 + $0x198] sm:$0xff]  ;;  %v5139_v41 = vld [vmem:[%s5841_s19 + $0x2a0] sm:$0xff]   ;;  %v4207_v45 = vcombine.low %v1318_v24, %v1326_v25  ;;  %v1397_v24 = vld [vmem:[%s6635_s0 + $0x390] sm:$0xff] }
 0x108   : > { %4714 = vmatprep.subr.bf16.mxu1 %v5122_v48  ;;  %v5141_v48 = vld [vmem:[%s5841_s19 + $0x218] sm:$0xff]   ;;  %v1405_v25 = vld [vmem:[%s6635_s0 + $0x3d0] sm:$0xff] }
 0x10a   : > { %4651 = vmatpush3.bf16.msra.mxu0 %v5121_v47 }
 0x10b   : > { %4715 = vmatpush3.bf16.msra.mxu1 %v5123_v50  ;;  %4764 = vmatprep.subr.bf16.mxu0 %v5124_v54  ;;  %v5144_v50 = vld [vmem:[%s5841_s19 + $0x250] sm:$0xff]   ;;  %v1350_v54 = vld [vmem:[%s6635_s0 + $0x218] sm:$0xff] }
 0x10c   : > { %3147 = vmatmul.mubr.bf16.gmra.mxu0 %v4233_v34  ;;  %4828 = vmatprep.subr.bf16.mxu1 %v5126_v55  ;;  %v5136_v34 = vld [vmem:[%s5841_s19 + $0x260] sm:$0xff]   ;;  %v1358_v55 = vld [vmem:[%s6635_s0 + $0x258] sm:$0xff] }
 0x10d   : > { %3244 = vmatmul.mubr.bf16.gmra.mxu1 %v4235_v36  ;;  %3154 = vmatprep.mubr.bf16.mxu0 %v4250_v37  ;;  %v1341_v36 = vld [vmem:[%s6635_s0 + $0x1d0] sm:$0xff]  ;;  %v5138_v37 = vld [vmem:[%s5841_s19 + $0x2e0] sm:$0xff]   ;;  %v4240_v0 = vcombine.high %v1350_v54, %v1358_v55 }
 0x10e   : > { %3251 = vmatprep.mubr.bf16.mxu1 %v4252_v39  ;;  %v1342_v39 = vld [vmem:[%s6635_s0 + $0x1d8] sm:$0xff]  ;;  %v4222_v46 = vcombine.high %v1333_v35, %v1341_v36  ;;  %v4221_v59 = vcombine.low %v1333_v35, %v1341_v36  ;;  %v1296_v35 = vld [vmem:[%s6635_s0 + $0x68] sm:$0xff]  ;;  %v4285_v36 = vcombine.low %v1397_v24, %v1405_v25 }
 0x10f   : > { %v4224_v47 = vcombine.high %v1334_v38, %v1342_v39 }
 0x114   : > { %3155 = vmatmul.mubr.bf16.gmra.mxu0 %v4249_v49  ;;  %v5143_v49 = vld [vmem:[%s5841_s19 + $0x298] sm:$0xff]  }
 0x115   : > { %3252 = vmatmul.mubr.bf16.gmra.mxu1 %v4251_v51  ;;  %3162 = vmatprep.mubr.bf16.mxu0 %v4266_v52  ;;  %v1349_v51 = vld [vmem:[%s6635_s0 + $0x210] sm:$0xff] }
 0x116   : > { %3259 = vmatprep.mubr.bf16.mxu1 %v4268_v53  ;;  %v1357_v52 = vld [vmem:[%s6635_s0 + $0x250] sm:$0xff] }
 0x117   : > { %v5146_v53 = vld [vmem:[%s5841_s19 + $0x2d0] sm:$0xff]  }
 0x11c   : > { %3163 = vmatmul.mubr.bf16.gmra.mxu0 %v4265_v60  ;;  %v5150_v60 = vld [vmem:[%s5841_s19 + $0x2c8] sm:$0xff]  }
 0x11d   : > { %3260 = vmatmul.mubr.bf16.gmra.mxu1 %v4267_v61  ;;  %3170 = vmatprep.mubr.bf16.mxu0 %v4282_v62  ;;  %v4223_v61 = vcombine.low %v1334_v38, %v1342_v39  ;;  %v4238_v62 = vcombine.high %v1349_v51, %v1357_v52 }
 0x11e   : > { %3267 = vmatprep.mubr.bf16.mxu1 %v4284_v63  ;;  %v5149_v63 = vld [vmem:[%s5841_s19 + $0x208] sm:$0xff]  }
 0x124   : > { %3171 = vmatmul.mubr.bf16.gmra.mxu0 %v4281_v4  ;;  %v1373_v4 = vld [vmem:[%s6635_s0 + $0x2d0] sm:$0xff] }
 0x125   : > { %3268 = vmatmul.mubr.bf16.gmra.mxu1 %v4283_v5  ;;  %3308 = vmatprep.mubr.bf16.mxu0 %v4174_v6  ;;  %v5154_v5 = vld [vmem:[%s5841_s19 + $0x2c0] sm:$0xff]   ;;  %v1366_v6 = vld [vmem:[%s6635_s0 + $0x298] sm:$0xff] }
 0x126   : > { %3405 = vmatprep.mubr.bf16.mxu1 %v4176_v7  ;;  %v1374_v7 = vld [vmem:[%s6635_s0 + $0x2d8] sm:$0xff] }
 0x12c   : > { %3309 = vmatmul.mubr.bf16.vlgmr.msra.gmra.mxu0 %v4173_v11  ;;  %v4237_v11 = vcombine.low %v1349_v51, %v1357_v52  ;;  %v5162_v51 = vld [vmem:[%s5841_s19 + $0x3f0] sm:$0xff]  }
 0x12d   : > { %3406 = vmatmul.mubr.bf16.vlgmr.msra.gmra.mxu1 %v4175_v13  ;;  %4765 = vmatpush3.bf16.msra.mxu0 %v5125_v14  ;;  %v4239_v13 = vcombine.low %v1350_v54, %v1358_v55  ;;  %v4254_v14 = vcombine.high %v1365_v3, %v1373_v4  ;;  %v5161_v52 = vld [vmem:[%s5841_s19 + $0x330] sm:$0xff]   ;;  %v1319_v54 = vld [vmem:[%s6635_s0 + $0x120] sm:$0xff] }
 0x12e   : > { %4829 = vmatpush3.bf16.msra.mxu1 %v5127_v15  ;;  %3316 = vmatprep.mubr.bf16.mxu0 %v4190_v16  ;;  %v4256_v15 = vcombine.high %v1366_v6, %v1374_v7  ;;  %v1381_v16 = vld [vmem:[%s6635_s0 + $0x310] sm:$0xff]  ;;  %v1327_v55 = vld [vmem:[%s6635_s0 + $0x160] sm:$0xff] }
 0x12f   : > { %3413 = vmatprep.mubr.bf16.mxu1 %v4192_v17  ;;  %4766 = vmatprep.subr.bf16.mxu0 %v5128_v18  ;;  %v1389_v17 = vld [vmem:[%s6635_s0 + $0x350] sm:$0xff]  ;;  %v1382_v18 = vld [vmem:[%s6635_s0 + $0x318] sm:$0xff] }
 0x130   : > { %4830 = vmatprep.subr.bf16.mxu1 %v5130_v20  ;;  %v4253_v20 = vcombine.low %v1365_v3, %v1373_v4  ;;  %v4270_v22 = vcombine.high %v1381_v16, %v1389_v17  ;;  %v5170_v3 = vld [vmem:[%s5841_s19 + $0x3e0] sm:$0xff]  }
 0x131   : > { %4767 = vmatpush3.bf16.msra.mxu0 %v5129_v19  ;;  %v1390_v19 = vld [vmem:[%s6635_s0 + $0x358] sm:$0xff]  ;;  %v1335_v4 = vld [vmem:[%s6635_s0 + $0x1a0] sm:$0xff] }
 0x132   : > { %4831 = vmatpush3.bf16.msra.mxu1 %v5131_v21  ;;  %4768 = vmatprep.subr.bf16.mxu0 %v5132_v26  ;;  %v4255_v21 = vcombine.low %v1366_v6, %v1374_v7  ;;  %v4272_v23 = vcombine.high %v1382_v18, %v1390_v19  ;;  %v1398_v26 = vld [vmem:[%s6635_s0 + $0x398] sm:$0xff]  ;;  %v1336_v6 = vld [vmem:[%s6635_s0 + $0x1a8] sm:$0xff]  ;;  %v5169_v7 = vld [vmem:[%s5841_s19 + $0x320] sm:$0xff]  }
 0x133   : > { %4832 = vmatprep.subr.bf16.mxu1 %v5134_v27  ;;  %v1406_v27 = vld [vmem:[%s6635_s0 + $0x3d8] sm:$0xff] }
 0x134   : > { %3317 = vmatmul.mubr.bf16.gmra.mxu0 %v4189_v28  ;;  %v4269_v28 = vcombine.low %v1381_v16, %v1389_v17  ;;  %v5173_v16 = vld [vmem:[%s5841_s19 + $0x318] sm:$0xff]  }
 0x135   : > { %3414 = vmatmul.mubr.bf16.gmra.mxu1 %v4191_v29  ;;  %3324 = vmatprep.mubr.bf16.mxu0 %v4206_v30  ;;  %v4271_v29 = vcombine.low %v1382_v18, %v1390_v19  ;;  %v4286_v30 = vcombine.high %v1397_v24, %v1405_v25  ;;  %v5175_v17 = vld [vmem:[%s5841_s19 + $0x398] sm:$0xff]   ;;  %v5176_v18 = vld [vmem:[%s5841_s19 + $0x350] sm:$0xff]   ;;  %v1360_v24 = vld [vmem:[%s6635_s0 + $0x268] sm:$0xff] }
 0x136   : > { %3421 = vmatprep.mubr.bf16.mxu1 %v4208_v32  ;;  %4769 = vmatpush3.bf16.msra.mxu0 %v5133_v31  ;;  %v4288_v31 = vcombine.high %v1398_v26, %v1406_v27  ;;  %v1287_v32 = vld [vmem:[%s6635_s0 + $0x20] sm:$0xff]  ;;  %v5178_v19 = vld [vmem:[%s5841_s19 + $0x3d0] sm:$0xff]  }
 0x137   : > { %4833 = vmatpush3.bf16.msra.mxu1 %v5135_v33  ;;  %4770 = vmatprep.subr.bf16.mxu0 %v5136_v34  ;;  %v1295_v33 = vld [vmem:[%s6635_s0 + $0x60] sm:$0xff]  ;;  %v1288_v34 = vld [vmem:[%s6635_s0 + $0x28] sm:$0xff]  ;;  %v5179_v25 = vld [vmem:[%s5841_s19 + $0x390] sm:$0xff]  }
 0x138   : > { %4834 = vmatprep.subr.bf16.mxu1 %v5138_v37  ;;  %v4287_v37 = vcombine.low %v1398_v26, %v1406_v27  ;;  %v4178_v38 = vcombine.high %v1287_v32, %v1295_v33  ;;  %v4180_v39 = vcombine.high %v1288_v34, %v1296_v35  ;;  %v5180_v26 = vld [vmem:[%s5841_s19 + $0x348] sm:$0xff]  }
 0x13a   : > { %4771 = vmatpush3.bf16.msra.mxu0 %v5137_v40  ;;  %v1303_v40 = vld [vmem:[%s6635_s0 + $0xa0] sm:$0xff] }
 0x13b   : > { %4835 = vmatpush3.bf16.msra.mxu1 %v5139_v41  ;;  %4772 = vmatprep.subr.bf16.mxu0 %v5140_v42  ;;  %v1311_v41 = vld [vmem:[%s6635_s0 + $0xe0] sm:$0xff]  ;;  %v4177_v42 = vcombine.low %v1287_v32, %v1295_v33  ;;  %v5181_v32 = vld [vmem:[%s5841_s19 + $0x308] sm:$0xff]  }
 0x13c   : > { %3325 = vmatmul.mubr.bf16.gmra.mxu0 %v4205_v43  ;;  %4836 = vmatprep.subr.bf16.mxu1 %v5142_v44  ;;  %v1304_v43 = vld [vmem:[%s6635_s0 + $0xa8] sm:$0xff] }
 0x13d   : > { %3422 = vmatmul.mubr.bf16.gmra.mxu1 %v4207_v45  ;;  %3332 = vmatprep.mubr.bf16.mxu0 %v4222_v46  ;;  %v1312_v44 = vld [vmem:[%s6635_s0 + $0xe8] sm:$0xff]  ;;  %v4179_v45 = vcombine.low %v1288_v34, %v1296_v35  ;;  %v5157_v46 = vld [vmem:[%s5841_s19 + $0x338] sm:$0xff]   ;;  %v5184_v34 = vld [vmem:[%s5841_s19 + $0x340] sm:$0xff]  }
 0x13e   : > { %3429 = vmatprep.mubr.bf16.mxu1 %v4224_v47  ;;  %4773 = vmatpush3.bf16.msra.mxu0 %v5141_v48  ;;  %v5159_v47 = vld [vmem:[%s5841_s19 + $0x3b8] sm:$0xff]   ;;  %v4194_v48 = vcombine.high %v1303_v40, %v1311_v41  ;;  %v5183_v33 = vld [vmem:[%s5841_s19 + $0x388] sm:$0xff]   ;;  %v5186_v35 = vld [vmem:[%s5841_s19 + $0x3c0] sm:$0xff]  }
 0x13f   : > { %4837 = vmatpush3.bf16.msra.mxu1 %v5143_v49  ;;  %4774 = vmatprep.subr.bf16.mxu0 %v5144_v50  ;;  %v4196_v49 = vcombine.high %v1304_v43, %v1312_v44  ;;  %v5160_v50 = vld [vmem:[%s5841_s19 + $0x370] sm:$0xff]  }
 0x140   : > { %4838 = vmatprep.subr.bf16.mxu1 %v5146_v53  ;;  %v5163_v53 = vld [vmem:[%s5841_s19 + $0x3b0] sm:$0xff]  }
 0x142   : > { %4775 = vmatpush3.bf16.msra.mxu0 %v5145_v56  ;;  %v5164_v56 = vld [vmem:[%s5841_s19 + $0x368] sm:$0xff]  }
 0x143   : > { %4839 = vmatpush3.bf16.msra.mxu1 %v5147_v57  ;;  %4776 = vmatprep.subr.bf16.mxu0 %v5148_v58  ;;  %v1320_v57 = vld [vmem:[%s6635_s0 + $0x128] sm:$0xff] }
 0x144   : > { %3333 = vmatmul.mubr.bf16.gmra.mxu0 %v4221_v59  ;;  %4840 = vmatprep.subr.bf16.mxu1 %v5150_v60  ;;  %v1328_v58 = vld [vmem:[%s6635_s0 + $0x168] sm:$0xff]  ;;  %v4193_v60 = vcombine.low %v1303_v40, %v1311_v41  ;;  %v5187_v41 = vld [vmem:[%s5841_s19 + $0x380] sm:$0xff]  }
 0x145   : > { %3430 = vmatmul.mubr.bf16.gmra.mxu1 %v4223_v61  ;;  %3340 = vmatprep.mubr.bf16.mxu0 %v4238_v62  ;;  %v5166_v59 = vld [vmem:[%s5841_s19 + $0x3e8] sm:$0xff]   ;;  %v4195_v61 = vcombine.low %v1304_v43, %v1312_v44  ;;  %v4210_v62 = vcombine.high %v1319_v54, %v1327_v55 }
 0x146   : > { %3437 = vmatprep.mubr.bf16.mxu1 %v4240_v0  ;;  %4777 = vmatpush3.bf16.msra.mxu0 %v5149_v63  ;;  %v4212_v63 = vcombine.high %v1320_v57, %v1328_v58  ;;  %v5165_v0 = vld [vmem:[%s5841_s19 + $0x328] sm:$0xff]  }
 0x147   : > { %4841 = vmatpush3.bf16.msra.mxu1 %v5151_v1  ;;  %4778 = vmatprep.subr.bf16.mxu0 %v5152_v2  ;;  %v5167_v1 = vld [vmem:[%s5841_s19 + $0x3a8] sm:$0xff]   ;;  %v5168_v2 = vld [vmem:[%s5841_s19 + $0x360] sm:$0xff]  }
 0x148   : > { %4842 = vmatprep.subr.bf16.mxu1 %v5154_v5  ;;  %v1343_v5 = vld [vmem:[%s6635_s0 + $0x1e0] sm:$0xff]  ;;  %v1376_v40 = vld [vmem:[%s6635_s0 + $0x2e8] sm:$0xff] }
 0x149   : > { %v4225_v27 = vcombine.low %v1335_v4, %v1343_v5 }
 0x14a   : > { %4779 = vmatpush3.bf16.msra.mxu0 %v5153_v8  ;;  %v1344_v8 = vld [vmem:[%s6635_s0 + $0x1e8] sm:$0xff] }
 0x14b   : > { %4843 = vmatpush3.bf16.msra.mxu1 %v5155_v9  ;;  %4892 = vmatprep.subr.bf16.mxu0 %v5156_v10  ;;  %v5171_v9 = vld [vmem:[%s5841_s19 + $0x3a0] sm:$0xff]   ;;  %v5172_v10 = vld [vmem:[%s5841_s19 + $0x358] sm:$0xff]  }
 0x14c   : > { %3341 = vmatmul.mubr.bf16.gmra.mxu0 %v4237_v11  ;;  %4956 = vmatprep.subr.bf16.mxu1 %v5158_v12  ;;  %v4209_v11 = vcombine.low %v1319_v54, %v1327_v55  ;;  %v5174_v12 = vld [vmem:[%s5841_s19 + $0x3d8] sm:$0xff]   ;;  %v1399_v54 = vld [vmem:[%s6635_s0 + $0x3a0] sm:$0xff] }
 0x14d   : > { %3438 = vmatmul.mubr.bf16.gmra.mxu1 %v4239_v13  ;;  %3348 = vmatprep.mubr.bf16.mxu0 %v4254_v14  ;;  %v4211_v13 = vcombine.low %v1320_v57, %v1328_v58  ;;  %v4226_v14 = vcombine.high %v1335_v4, %v1343_v5  ;;  %v1407_v55 = vld [vmem:[%s6635_s0 + $0x3e0] sm:$0xff]  ;;  %v1408_v57 = vld [vmem:[%s6635_s0 + $0x3e8] sm:$0xff] }
 0x14e   : > { %3445 = vmatprep.mubr.bf16.mxu1 %v4256_v15  ;;  %v4228_v15 = vcombine.high %v1336_v6, %v1344_v8 }
 0x154   : > { %3349 = vmatmul.mubr.bf16.gmra.mxu0 %v4253_v20  ;;  %v1351_v20 = vld [vmem:[%s6635_s0 + $0x220] sm:$0xff] }
 0x155   : > { %3446 = vmatmul.mubr.bf16.gmra.mxu1 %v4255_v21  ;;  %3356 = vmatprep.mubr.bf16.mxu0 %v4270_v22  ;;  %v1359_v21 = vld [vmem:[%s6635_s0 + $0x260] sm:$0xff]  ;;  %v1352_v22 = vld [vmem:[%s6635_s0 + $0x228] sm:$0xff] }
 0x156   : > { %3453 = vmatprep.mubr.bf16.mxu1 %v4272_v23  ;;  %v5177_v23 = vld [vmem:[%s5841_s19 + $0x310] sm:$0xff]   ;;  %v4243_v43 = vcombine.low %v1352_v22, %v1360_v24 }
 0x15c   : > { %3357 = vmatmul.mubr.bf16.gmra.mxu0 %v4269_v28  ;;  %v5182_v28 = vld [vmem:[%s5841_s19 + $0x3c8] sm:$0xff]  }
 0x15d   : > { %3454 = vmatmul.mubr.bf16.gmra.mxu1 %v4271_v29  ;;  %3364 = vmatprep.mubr.bf16.mxu0 %v4286_v30  ;;  %v4227_v29 = vcombine.low %v1336_v6, %v1344_v8  ;;  %v4242_v30 = vcombine.high %v1351_v20, %v1359_v21  ;;  %v1305_v6 = vld [vmem:[%s6635_s0 + $0xb0] sm:$0xff]  ;;  %v1306_v8 = vld [vmem:[%s6635_s0 + $0xb8] sm:$0xff] }
 0x15e   : > { %3461 = vmatprep.mubr.bf16.mxu1 %v4288_v31  ;;  %v4244_v31 = vcombine.high %v1352_v22, %v1360_v24  ;;  %v1322_v22 = vld [vmem:[%s6635_s0 + $0x138] sm:$0xff] }
 0x164   : > { %3365 = vmatmul.mubr.bf16.gmra.mxu0 %v4285_v36  ;;  %v1367_v36 = vld [vmem:[%s6635_s0 + $0x2a0] sm:$0xff] }
 0x165   : > { %3462 = vmatmul.mubr.bf16.gmra.mxu1 %v4287_v37  ;;  %3502 = vmatprep.mubr.bf16.mxu0 %v4178_v38  ;;  %v1375_v37 = vld [vmem:[%s6635_s0 + $0x2e0] sm:$0xff] }
 0x166   : > { %3599 = vmatprep.mubr.bf16.mxu1 %v4180_v39  ;;  %v5185_v38 = vld [vmem:[%s5841_s19 + $0x300] sm:$0xff]   ;;  %v1368_v39 = vld [vmem:[%s6635_s0 + $0x2a8] sm:$0xff]  ;;  %v4258_v44 = vcombine.high %v1367_v36, %v1375_v37 }
 0x16c   : > { %3503 = vmatmul.mubr.bf16.vlgmr.msra.gmra.mxu0 %v4177_v42  ;;  %v4241_v42 = vcombine.low %v1351_v20, %v1359_v21 }
 0x16d   : > { %3600 = vmatmul.mubr.bf16.vlgmr.msra.gmra.mxu1 %v4179_v45  ;;  %4893 = vmatpush3.bf16.msra.mxu0 %v5157_v46  ;;  %v4260_v45 = vcombine.high %v1368_v39, %v1376_v40  ;;  %v1383_v46 = vld [vmem:[%s6635_s0 + $0x320] sm:$0xff] }
 0x16e   : > { %4957 = vmatpush3.bf16.msra.mxu1 %v5159_v47  ;;  %3510 = vmatprep.mubr.bf16.mxu0 %v4194_v48  ;;  %v1391_v47 = vld [vmem:[%s6635_s0 + $0x360] sm:$0xff]  ;;  %v1384_v48 = vld [vmem:[%s6635_s0 + $0x328] sm:$0xff] }
 0x16f   : > { %3607 = vmatprep.mubr.bf16.mxu1 %v4196_v49  ;;  %4894 = vmatprep.subr.bf16.mxu0 %v5160_v50  ;;  %v1392_v49 = vld [vmem:[%s6635_s0 + $0x368] sm:$0xff]  ;;  %v4257_v50 = vcombine.low %v1367_v36, %v1375_v37  ;;  %v4273_v58 = vcombine.low %v1383_v46, %v1391_v47 }
 0x170   : > { %4958 = vmatprep.subr.bf16.mxu1 %v5162_v51  ;;  %v4259_v51 = vcombine.low %v1368_v39, %v1376_v40 }
 0x171   : > { %4895 = vmatpush3.bf16.msra.mxu0 %v5161_v52  ;;  %v4274_v52 = vcombine.high %v1383_v46, %v1391_v47  ;;  %v1338_v46 = vld [vmem:[%s6635_s0 + $0x1b8] sm:$0xff] }
 0x172   : > { %4959 = vmatpush3.bf16.msra.mxu1 %v5163_v53  ;;  %4896 = vmatprep.subr.bf16.mxu0 %v5164_v56  ;;  %v4276_v53 = vcombine.high %v1384_v48, %v1392_v49  ;;  %v1400_v56 = vld [vmem:[%s6635_s0 + $0x3a8] sm:$0xff]  ;;  %v1346_v47 = vld [vmem:[%s6635_s0 + $0x1f8] sm:$0xff] }
 0x173   : > { %4960 = vmatprep.subr.bf16.mxu1 %v5166_v59  ;;  %v4275_v59 = vcombine.low %v1384_v48, %v1392_v49 }
 0x174   : > { %3511 = vmatmul.mubr.bf16.gmra.mxu0 %v4193_v60  ;;  %v4290_v60 = vcombine.high %v1399_v54, %v1407_v55 }
 0x175   : > { %3608 = vmatmul.mubr.bf16.gmra.mxu1 %v4195_v61  ;;  %3518 = vmatprep.mubr.bf16.mxu0 %v4210_v62  ;;  %v4292_v61 = vcombine.high %v1400_v56, %v1408_v57  ;;  %v1289_v62 = vld [vmem:[%s6635_s0 + $0x30] sm:$0xff] }
 0x176   : > { %3615 = vmatprep.mubr.bf16.mxu1 %v4212_v63  ;;  %4897 = vmatpush3.bf16.msra.mxu0 %v5165_v0  ;;  %v1297_v63 = vld [vmem:[%s6635_s0 + $0x70] sm:$0xff]  ;;  %v1290_v0 = vld [vmem:[%s6635_s0 + $0x38] sm:$0xff] }
 0x177   : > { %4961 = vmatpush3.bf16.msra.mxu1 %v5167_v1  ;;  %4898 = vmatprep.subr.bf16.mxu0 %v5168_v2  ;;  %v1298_v1 = vld [vmem:[%s6635_s0 + $0x78] sm:$0xff]  ;;  %v4289_v2 = vcombine.low %v1399_v54, %v1407_v55  ;;  %v4182_v4 = vcombine.high %v1289_v62, %v1297_v63 }
 0x178   : > { %4962 = vmatprep.subr.bf16.mxu1 %v5170_v3  ;;  %v4291_v3 = vcombine.low %v1400_v56, %v1408_v57  ;;  %v4184_v5 = vcombine.high %v1290_v0, %v1298_v1  ;;  %v4232_v56 = vcombine.high %v1338_v46, %v1346_v47 }
 0x17a   : > { %4899 = vmatpush3.bf16.msra.mxu0 %v5169_v7  ;;  %v1313_v7 = vld [vmem:[%s6635_s0 + $0xf0] sm:$0xff] }
 0x17b   : > { %4963 = vmatpush3.bf16.msra.mxu1 %v5171_v9  ;;  %4900 = vmatprep.subr.bf16.mxu0 %v5172_v10  ;;  %v1314_v9 = vld [vmem:[%s6635_s0 + $0xf8] sm:$0xff]  ;;  %v4181_v10 = vcombine.low %v1289_v62, %v1297_v63 }
 0x17c   : > { %3519 = vmatmul.mubr.bf16.gmra.mxu0 %v4209_v11  ;;  %4964 = vmatprep.subr.bf16.mxu1 %v5174_v12  ;;  %v4183_v11 = vcombine.low %v1290_v0, %v1298_v1  ;;  %v4198_v12 = vcombine.high %v1305_v6, %v1313_v7  ;;  %v1353_v1 = vld [vmem:[%s6635_s0 + $0x230] sm:$0xff] }
 0x17d   : > { %3616 = vmatmul.mubr.bf16.gmra.mxu1 %v4211_v13  ;;  %3526 = vmatprep.mubr.bf16.mxu0 %v4226_v14  ;;  %v4200_v13 = vcombine.high %v1306_v8, %v1314_v9 }
 0x17e   : > { %3623 = vmatprep.mubr.bf16.mxu1 %v4228_v15  ;;  %4901 = vmatpush3.bf16.msra.mxu0 %v5173_v16  ;;  %v6280_v16 = vld [vmem:[%s1280_s10] ss:$0 sm:$0xff] }
 0x17f   : > { %4965 = vmatpush3.bf16.msra.mxu1 %v5175_v17  ;;  %4902 = vmatprep.subr.bf16.mxu0 %v5176_v18  ;;  %v1321_v18 = vld [vmem:[%s6635_s0 + $0x130] sm:$0xff] }
 0x180   : > { %4966 = vmatprep.subr.bf16.mxu1 %v5178_v19  ;;  %v1329_v19 = vld [vmem:[%s6635_s0 + $0x170] sm:$0xff] }
 0x182   : > { %4903 = vmatpush3.bf16.msra.mxu0 %v5177_v23  ;;  %v1330_v23 = vld [vmem:[%s6635_s0 + $0x178] sm:$0xff] }
 0x183   : > { %4967 = vmatpush3.bf16.msra.mxu1 %v5179_v25  ;;  %4904 = vmatprep.subr.bf16.mxu0 %v5180_v26  ;;  %v4197_v26 = vcombine.low %v1305_v6, %v1313_v7  ;;  %v1354_v6 = vld [vmem:[%s6635_s0 + $0x238] sm:$0xff] }
 0x184   : > { %3527 = vmatmul.mubr.bf16.gmra.mxu0 %v4225_v27  ;;  %4968 = vmatprep.subr.bf16.mxu1 %v5182_v28  ;;  %v1362_v7 = vld [vmem:[%s6635_s0 + $0x278] sm:$0xff] }
 0x185   : > { %3624 = vmatmul.mubr.bf16.gmra.mxu1 %v4227_v29  ;;  %3534 = vmatprep.mubr.bf16.mxu0 %v4242_v30  ;;  %v4199_v29 = vcombine.low %v1306_v8, %v1314_v9  ;;  %v4214_v30 = vcombine.high %v1321_v18, %v1329_v19 }
 0x186   : > { %3631 = vmatprep.mubr.bf16.mxu1 %v4244_v31  ;;  %4905 = vmatpush3.bf16.msra.mxu0 %v5181_v32  ;;  %v4216_v32 = vcombine.high %v1322_v22, %v1330_v23 }
 0x187   : > { %4969 = vmatpush3.bf16.msra.mxu1 %v5183_v33  ;;  %4906 = vmatprep.subr.bf16.mxu0 %v5184_v34 }
 0x188   : > { %4970 = vmatprep.subr.bf16.mxu1 %v5186_v35 }
 0x18a   : > { %4907 = vmatpush3.bf16.msra.mxu0 %v5185_v38 }
 0x18b   : > { %4971 = vmatpush3.bf16.msra.mxu1 %v5187_v41  ;;  %v1337_v41 = vld [vmem:[%s6635_s0 + $0x1b0] sm:$0xff] }
 0x18c   : > { %3535 = vmatmul.mubr.bf16.gmra.mxu0 %v4241_v42  ;;  %v1345_v42 = vld [vmem:[%s6635_s0 + $0x1f0] sm:$0xff] }
 0x18d   : > { %3632 = vmatmul.mubr.bf16.gmra.mxu1 %v4243_v43  ;;  %3542 = vmatprep.mubr.bf16.mxu0 %v4258_v44  ;;  %v4230_v54 = vcombine.high %v1337_v41, %v1345_v42 }
 0x18e   : > { %3639 = vmatprep.mubr.bf16.mxu1 %v4260_v45 }
 0x194   : > { %3543 = vmatmul.mubr.bf16.gmra.mxu0 %v4257_v50  ;;  %v4213_v50 = vcombine.low %v1321_v18, %v1329_v19 }
 0x195   : > { %3640 = vmatmul.mubr.bf16.gmra.mxu1 %v4259_v51  ;;  %3550 = vmatprep.mubr.bf16.mxu0 %v4274_v52 }
 0x196   : > { %3647 = vmatprep.mubr.bf16.mxu1 %v4276_v53  ;;  %v4215_v53 = vcombine.low %v1322_v22, %v1330_v23 }
 0x19c   : > { %3551 = vmatmul.mubr.bf16.gmra.mxu0 %v4273_v58 }
 0x19d   : > { %3648 = vmatmul.mubr.bf16.gmra.mxu1 %v4275_v59  ;;  %3558 = vmatprep.mubr.bf16.mxu0 %v4290_v60 }
 0x19e   : > { %3655 = vmatprep.mubr.bf16.mxu1 %v4292_v61 }
 0x1a4   : > { %3559 = vmatmul.mubr.bf16.gmra.mxu0 %v4289_v2  ;;  %v1361_v2 = vld [vmem:[%s6635_s0 + $0x270] sm:$0xff] }
 0x1a5   : > { %3656 = vmatmul.mubr.bf16.gmra.mxu1 %v4291_v3  ;;  %3696 = vmatprep.mubr.bf16.mxu0 %v4182_v4 }
 0x1a6   : > { %3793 = vmatprep.mubr.bf16.mxu1 %v4184_v5 }
 0x1ac   : > { %v4524_v14 = vpop.f32.mrf.mxu0  ;;  %3697 = vmatmul.mubr.bf16.vlgmr.msra.gmra.mxu0 %v4181_v10  ;;  %v4229_v10 = vcombine.low %v1337_v41, %v1345_v42 }
 0x1ad   : > { %v4588_v15 = vpop.f32.mrf.mxu1  ;;  %3794 = vmatmul.mubr.bf16.vlgmr.msra.gmra.mxu1 %v4183_v11  ;;  %3704 = vmatprep.mubr.bf16.mxu0 %v4198_v12 }
 0x1ae   : > { %v4525_v17 = vpop.f32.mrf.mxu0  ;;  %3801 = vmatprep.mubr.bf16.mxu1 %v4200_v13  ;;  %v4231_v13 = vcombine.low %v1338_v46, %v1346_v47 }
 0x1af   : > { %v4526_v20 = vadd.f32 %v4525_v17, %v4524_v14  ;;  %v4589_v21 = vpop.f32.mrf.mxu1  ;;  %v4246_v14 = vcombine.high %v1353_v1, %v1361_v2  ;;  %v4248_v17 = vcombine.high %v1354_v6, %v1362_v7 }
 0x1b0   : > { %v4590_v24 = vadd.f32 %v4589_v21, %v4588_v15  ;;  %v4527_v25 = vpop.f32.mrf.mxu0 }
 0x1b1   : > { %v3117_v27 = vadd.f32 %v4526_v20, %v6280_v16  ;;  %v4591_v28 = vpop.f32.mrf.mxu1 }
 0x1b2   : > { %v4528_v31 = vpop.f32.mrf.mxu0 }
 0x1b3   : > { %v6295_v33 = vadd.f32 %v4590_v24, %v3117_v27  ;;  %v4529_v34 = vadd.f32 %v4528_v31, %v4527_v25  ;;  %v4592_v35 = vpop.f32.mrf.mxu1  ;;  %v1377_v27 = vld [vmem:[%s6635_s0 + $0x2f0] sm:$0xff]  ;;  %v1370_v31 = vld [vmem:[%s6635_s0 + $0x2b8] sm:$0xff] }
 0x1b4   : > { %v4593_v36 = vadd.f32 %v4592_v35, %v4591_v28  ;;  %v4530_v37 = vpop.f32.mrf.mxu0  ;;  %3705 = vmatmul.mubr.bf16.gmra.mxu0 %v4197_v26  ;;  %v1369_v26 = vld [vmem:[%s6635_s0 + $0x2b0] sm:$0xff] }
 0x1b5   : > { %v3120_v38 = vadd.f32 %v4529_v34, %v6280_v16  ;;  %v4594_v39 = vpop.f32.mrf.mxu1  ;;  %3802 = vmatmul.mubr.bf16.gmra.mxu1 %v4199_v29  ;;  %3712 = vmatprep.mubr.bf16.mxu0 %v4214_v30 }
 0x1b6   : > { %v4531_v40 = vpop.f32.mrf.mxu0  ;;  %3809 = vmatprep.mubr.bf16.mxu1 %v4216_v32  ;;  %v1378_v32 = vld [vmem:[%s6635_s0 + $0x2f8] sm:$0xff] }
 0x1b7   : > { %v6304_v43 = vadd.f32 %v4593_v36, %v3120_v38  ;;  %v4532_v44 = vadd.f32 %v4531_v40, %v4530_v37  ;;  %v4595_v45 = vpop.f32.mrf.mxu1  ;;  %v4245_v36 = vcombine.low %v1353_v1, %v1361_v2  ;;  %v4262_v40 = vcombine.high %v1369_v26, %v1377_v27 }
 0x1b8   : > { %v4596_v48 = vadd.f32 %v4595_v45, %v4594_v39  ;;  %v4533_v49 = vpop.f32.mrf.mxu0  ;;  %v4247_v39 = vcombine.low %v1354_v6, %v1362_v7  ;;  %v4264_v42 = vcombine.high %v1370_v31, %v1378_v32  ;;  %v4263_v1 = vcombine.low %v1370_v31, %v1378_v32 }
 0x1b9   : > { %v3125_v51 = vadd.f32 %v4532_v44, %v6280_v16  ;;  %v4597_v52 = vpop.f32.mrf.mxu1 }
 0x1ba   : > { %v4534_v55 = vpop.f32.mrf.mxu0 }
 0x1bb   : > { %v6313_v57 = vadd.f32 %v4596_v48, %v3125_v51  ;;  %v4535_v58 = vadd.f32 %v4534_v55, %v4533_v49  ;;  %v4598_v59 = vpop.f32.mrf.mxu1 }
 0x1bc   : > { %v4599_v60 = vadd.f32 %v4598_v59, %v4597_v52  ;;  %v4536_v61 = vpop.f32.mrf.mxu0  ;;  %3713 = vmatmul.mubr.bf16.gmra.mxu0 %v4213_v50  ;;  %v1385_v52 = vld [vmem:[%s6635_s0 + $0x330] sm:$0xff]  ;;  %v1394_v59 = vld [vmem:[%s6635_s0 + $0x378] sm:$0xff] }
 0x1bd   : > { %v3128_v62 = vadd.f32 %v4535_v58, %v6280_v16  ;;  %v4600_v63 = vpop.f32.mrf.mxu1  ;;  %3810 = vmatmul.mubr.bf16.gmra.mxu1 %v4215_v53  ;;  %3720 = vmatprep.mubr.bf16.mxu0 %v4230_v54  ;;  %v1393_v53 = vld [vmem:[%s6635_s0 + $0x370] sm:$0xff]  ;;  %v1386_v58 = vld [vmem:[%s6635_s0 + $0x338] sm:$0xff] }
 0x1be   : > { %v4537_v0 = vpop.f32.mrf.mxu0  ;;  %3817 = vmatprep.mubr.bf16.mxu1 %v4232_v56  ;;  %v4278_v2 = vcombine.high %v1385_v52, %v1393_v53 }
 0x1bf   : > { %v6322_v3 = vadd.f32 %v4599_v60, %v3128_v62  ;;  %v4538_v4 = vadd.f32 %v4537_v0, %v4536_v61  ;;  %v4601_v5 = vpop.f32.mrf.mxu1  ;;  %v4261_v62 = vcombine.low %v1369_v26, %v1377_v27 }
 0x1c0   : > { %v4602_v8 = vadd.f32 %v4601_v5, %v4600_v63  ;;  %v4539_v9 = vpop.f32.mrf.mxu0  ;;  %v4280_v5 = vcombine.high %v1386_v58, %v1394_v59 }
 0x1c1   : > { %v3133_v11 = vadd.f32 %v4538_v4, %v6280_v16  ;;  %v4603_v12 = vpop.f32.mrf.mxu1 }
 0x1c2   : > { %v4540_v15 = vpop.f32.mrf.mxu0 }
 0x1c3   : > { %v6331_v18 = vadd.f32 %v4602_v8, %v3133_v11  ;;  %v4541_v19 = vadd.f32 %v4540_v15, %v4539_v9  ;;  %v4604_v20 = vpop.f32.mrf.mxu1  ;;  %v1409_v15 = vld [vmem:[%s6635_s0 + $0x3f0] sm:$0xff] }
 0x1c4   : > { %v4605_v21 = vadd.f32 %v4604_v20, %v4603_v12  ;;  %v4542_v22 = vpop.f32.mrf.mxu0  ;;  %3721 = vmatmul.mubr.bf16.gmra.mxu0 %v4229_v10 }
 0x1c5   : > { %v3136_v23 = vadd.f32 %v4541_v19, %v6280_v16  ;;  %v4606_v24 = vpop.f32.mrf.mxu1  ;;  %3818 = vmatmul.mubr.bf16.gmra.mxu1 %v4231_v13  ;;  %3728 = vmatprep.mubr.bf16.mxu0 %v4246_v14  ;;  %v1401_v14 = vld [vmem:[%s6635_s0 + $0x3b0] sm:$0xff] }
 0x1c6   : > { %v4543_v25 = vpop.f32.mrf.mxu0  ;;  %3825 = vmatprep.mubr.bf16.mxu1 %v4248_v17 }
 0x1c7   : > { %v6340_v28 = vadd.f32 %v4605_v21, %v3136_v23  ;;  %v4544_v29 = vadd.f32 %v4543_v25, %v4542_v22  ;;  %v4607_v30 = vpop.f32.mrf.mxu1  ;;  %v1402_v21 = vld [vmem:[%s6635_s0 + $0x3b8] sm:$0xff]  ;;  %v4277_v25 = vcombine.low %v1385_v52, %v1393_v53 }
 0x1c8   : > { %v4608_v34 = vadd.f32 %v4607_v30, %v4606_v24  ;;  %v4545_v35 = vpop.f32.mrf.mxu0  ;;  %v1410_v22 = vld [vmem:[%s6635_s0 + $0x3f8] sm:$0xff]  ;;  %v4294_v30 = vcombine.high %v1401_v14, %v1409_v15 }
 0x1c9   : > { %v3141_v37 = vadd.f32 %v4544_v29, %v6280_v16  ;;  %v4609_v38 = vpop.f32.mrf.mxu1  ;;  %v4279_v29 = vcombine.low %v1386_v58, %v1394_v59  ;;  %v4296_v32 = vcombine.high %v1402_v21, %v1410_v22  ;;  %v4295_v52 = vcombine.low %v1402_v21, %v1410_v22 }
 0x1ca   : > { %v4546_v41 = vpop.f32.mrf.mxu0 }
 0x1cb   : > { %v6349_v44 = vadd.f32 %v4608_v34, %v3141_v37  ;;  %v4547_v45 = vadd.f32 %v4546_v41, %v4545_v35  ;;  %v4610_v46 = vpop.f32.mrf.mxu1 }
 0x1cc   : > { %v4611_v47 = vadd.f32 %v4610_v46, %v4609_v38  ;;  %v4548_v48 = vpop.f32.mrf.mxu0  ;;  %3729 = vmatmul.mubr.bf16.gmra.mxu0 %v4245_v36 }
 0x1cd   : > { %v3144_v49 = vadd.f32 %v4547_v45, %v6280_v16  ;;  %v4612_v50 = vpop.f32.mrf.mxu1  ;;  %3826 = vmatmul.mubr.bf16.gmra.mxu1 %v4247_v39  ;;  %3736 = vmatprep.mubr.bf16.mxu0 %v4262_v40 }
 0x1ce   : > { %v4549_v51 = vpop.f32.mrf.mxu0  ;;  %3833 = vmatprep.mubr.bf16.mxu1 %v4264_v42 }
 0x1cf   : > { %v6358_v54 = vadd.f32 %v4611_v47, %v3144_v49  ;;  %v4550_v55 = vadd.f32 %v4549_v51, %v4548_v48  ;;  %v4613_v56 = vpop.f32.mrf.mxu1  ;;  %v4293_v49 = vcombine.low %v1401_v14, %v1409_v15 }
 0x1d0   : > { %v4614_v60 = vadd.f32 %v4613_v56, %v4612_v50  ;;  %v4551_v61 = vpop.f32.mrf.mxu0 }
 0x1d1   : > { %v3149_v63 = vadd.f32 %v4550_v55, %v6280_v16  ;;  %v4615_v0 = vpop.f32.mrf.mxu1 }
 0x1d2   : > { %v4552_v4 = vpop.f32.mrf.mxu0 }
 0x1d3   : > { %v6367_v6 = vadd.f32 %v4614_v60, %v3149_v63  ;;  %v4553_v7 = vadd.f32 %v4552_v4, %v4551_v61  ;;  %v4616_v8 = vpop.f32.mrf.mxu1 }
 0x1d4   : > { %v4617_v9 = vadd.f32 %v4616_v8, %v4615_v0  ;;  %v4554_v10 = vpop.f32.mrf.mxu0  ;;  %3737 = vmatmul.mubr.bf16.gmra.mxu0 %v4261_v62 }
 0x1d5   : > { %v3152_v11 = vadd.f32 %v4553_v7, %v6280_v16  ;;  %v4618_v12 = vpop.f32.mrf.mxu1  ;;  %3834 = vmatmul.mubr.bf16.gmra.mxu1 %v4263_v1  ;;  %3744 = vmatprep.mubr.bf16.mxu0 %v4278_v2 }
 0x1d6   : > { %v4555_v13 = vpop.f32.mrf.mxu0  ;;  %3841 = vmatprep.mubr.bf16.mxu1 %v4280_v5 }
 0x1d7   : > { %v6376_v17 = vadd.f32 %v4617_v9, %v3152_v11  ;;  %v4556_v19 = vadd.f32 %v4555_v13, %v4554_v10  ;;  %v4619_v20 = vpop.f32.mrf.mxu1 }
 0x1d8   : > { %v4620_v23 = vadd.f32 %v4619_v20, %v4618_v12  ;;  %v4557_v24 = vpop.f32.mrf.mxu0 }
 0x1d9   : > { %v3157_v26 = vadd.f32 %v4556_v19, %v6280_v16  ;;  %v4621_v27 = vpop.f32.mrf.mxu1 }
 0x1da   : > { %v4558_v31 = vpop.f32.mrf.mxu0 }
 0x1db   : > { %v6385_v34 = vadd.f32 %v4620_v23, %v3157_v26  ;;  %v4559_v35 = vadd.f32 %v4558_v31, %v4557_v24  ;;  %v4622_v36 = vpop.f32.mrf.mxu1 }
 0x1dc   : > { %v4623_v37 = vadd.f32 %v4622_v36, %v4621_v27  ;;  %v4560_v38 = vpop.f32.mrf.mxu0  ;;  %3745 = vmatmul.mubr.bf16.gmra.mxu0 %v4277_v25 }
 0x1dd   : > { %v3160_v39 = vadd.f32 %v4559_v35, %v6280_v16  ;;  %v4624_v40 = vpop.f32.mrf.mxu1  ;;  %3842 = vmatmul.mubr.bf16.gmra.mxu1 %v4279_v29  ;;  %3752 = vmatprep.mubr.bf16.mxu0 %v4294_v30 }
 0x1de   : > { %v4561_v41 = vpop.f32.mrf.mxu0  ;;  %3849 = vmatprep.mubr.bf16.mxu1 %v4296_v32 }
 0x1df   : > { %v6388_v42 = vadd.f32 %v4623_v37, %v3160_v39  ;;  %v4562_v45 = vadd.f32 %v4561_v41, %v4560_v38  ;;  %v4625_v46 = vpop.f32.mrf.mxu1 }
 0x1e0   : > { %v4626_v47 = vadd.f32 %v4625_v46, %v4624_v40  ;;  %v4563_v48 = vpop.f32.mrf.mxu0 }
 0x1e1   : > { %v3165_v50 = vadd.f32 %v4562_v45, %v6280_v16  ;;  %v4627_v51 = vpop.f32.mrf.mxu1 }
 0x1e2   : > { %v4564_v53 = vpop.f32.mrf.mxu0 }
 0x1e3   : > { %v6391_v55 = vadd.f32 %v4626_v47, %v3165_v50  ;;  %v4565_v56 = vadd.f32 %v4564_v53, %v4563_v48  ;;  %v4628_v58 = vpop.f32.mrf.mxu1 }
 0x1e4   : > { %v4629_v59 = vadd.f32 %v4628_v58, %v4627_v51  ;;  %v4566_v60 = vpop.f32.mrf.mxu0  ;;  %3753 = vmatmul.mubr.bf16.gmra.mxu0 %v4293_v49 }
 0x1e5   : > { %v3168_v61 = vadd.f32 %v4565_v56, %v6280_v16  ;;  %v4630_v62 = vpop.f32.mrf.mxu1  ;;  %3850 = vmatmul.mubr.bf16.gmra.mxu1 %v4295_v52 }
 0x1e6   : > { %v4567_v63 = vpop.f32.mrf.mxu0 }
 0x1e7   : > { %v6394_v0 = vadd.f32 %v4629_v59, %v3168_v61  ;;  %v4568_v1 = vadd.f32 %v4567_v63, %v4566_v60  ;;  %v4631_v2 = vpop.f32.mrf.mxu1 }
 0x1e8   : > { %v4632_v4 = vadd.f32 %v4631_v2, %v4630_v62  ;;  %v4569_v5 = vpop.f32.mrf.mxu0 }
 0x1e9   : > { %v3173_v7 = vadd.f32 %v4568_v1, %v6280_v16  ;;  %v4633_v8 = vpop.f32.mrf.mxu1 }
 0x1ea   : > { %v4570_v9 = vpop.f32.mrf.mxu0 }
 0x1eb   : > { %v6397_v10 = vadd.f32 %v4632_v4, %v3173_v7  ;;  %v4571_v11 = vadd.f32 %v4570_v9, %v4569_v5  ;;  %v4634_v12 = vpop.f32.mrf.mxu1 }
 0x1ec   : > { %v4635_v13 = vadd.f32 %v4634_v12, %v4633_v8  ;;  %v4652_v14 = vpop.f32.mrf.mxu0 }
 0x1ed   : > { %v3176_v15 = vadd.f32 %v4571_v11, %v6280_v16  ;;  %v4716_v19 = vpop.f32.mrf.mxu1 }
 0x1ee   : > { %v4653_v20 = vpop.f32.mrf.mxu0 }
 0x1ef   : > { %v6400_v21 = vadd.f32 %v4635_v13, %v3176_v15  ;;  %v4654_v22 = vadd.f32 %v4653_v20, %v4652_v14  ;;  %v4717_v23 = vpop.f32.mrf.mxu1 }
 0x1f0   : > { %v4718_v24 = vadd.f32 %v4717_v23, %v4716_v19  ;;  %v4655_v25 = vpop.f32.mrf.mxu0 }
 0x1f1   : > { %v3311_v26 = vadd.f32 %v4654_v22, %v6295_v33  ;;  %v4719_v27 = vpop.f32.mrf.mxu1 }
 0x1f2   : > { %v4656_v29 = vpop.f32.mrf.mxu0 }
 0x1f3   : > { %v6403_v30 = vadd.f32 %v4718_v24, %v3311_v26  ;;  %v4657_v31 = vadd.f32 %v4656_v29, %v4655_v25  ;;  %v4720_v32 = vpop.f32.mrf.mxu1 }
 0x1f4   : > { %v4721_v35 = vadd.f32 %v4720_v32, %v4719_v27  ;;  %v4658_v36 = vpop.f32.mrf.mxu0 }
 0x1f5   : > { %v3314_v16 = vadd.f32 %v4657_v31, %v6304_v43  ;;  %v4722_v37 = vpop.f32.mrf.mxu1 }
 0x1f6   : > { %v4659_v38 = vpop.f32.mrf.mxu0 }
 0x1f7   : > { %v6406_v39 = vadd.f32 %v4721_v35, %v3314_v16  ;;  %v4660_v40 = vadd.f32 %v4659_v38, %v4658_v36  ;;  %v4723_v41 = vpop.f32.mrf.mxu1 }
 0x1f8   : > { %v4724_v45 = vadd.f32 %v4723_v41, %v4722_v37  ;;  %v4661_v46 = vpop.f32.mrf.mxu0 }
 0x1f9   : > { %v3319_v33 = vadd.f32 %v4660_v40, %v6313_v57  ;;  %v4725_v47 = vpop.f32.mrf.mxu1 }
 0x1fa   : > { %v4662_v48 = vpop.f32.mrf.mxu0 }
 0x1fb   : > { %v6409_v49 = vadd.f32 %v4724_v45, %v3319_v33  ;;  %v4663_v50 = vadd.f32 %v4662_v48, %v4661_v46  ;;  %v4726_v51 = vpop.f32.mrf.mxu1 }
 0x1fc   : > { %v4727_v52 = vadd.f32 %v4726_v51, %v4725_v47  ;;  %v4664_v53 = vpop.f32.mrf.mxu0 }
 0x1fd   : > { %v3322_v43 = vadd.f32 %v4663_v50, %v6322_v3  ;;  %v4728_v56 = vpop.f32.mrf.mxu1 }
 0x1fe   : > { %v4665_v58 = vpop.f32.mrf.mxu0 }
 0x1ff   : > { %v6412_v59 = vadd.f32 %v4727_v52, %v3322_v43  ;;  %v4666_v60 = vadd.f32 %v4665_v58, %v4664_v53  ;;  %v4729_v61 = vpop.f32.mrf.mxu1 }
 0x200   : > { %v4730_v62 = vadd.f32 %v4729_v61, %v4728_v56  ;;  %v4667_v63 = vpop.f32.mrf.mxu0 }
 0x201   : > { %v3327_v57 = vadd.f32 %v4666_v60, %v6331_v18  ;;  %v4731_v1 = vpop.f32.mrf.mxu1 }
 0x202   : > { %v4668_v2 = vpop.f32.mrf.mxu0 }
 0x203   : > { %v6415_v4 = vadd.f32 %v4730_v62, %v3327_v57  ;;  %v4669_v5 = vadd.f32 %v4668_v2, %v4667_v63  ;;  %v4732_v7 = vpop.f32.mrf.mxu1 }
 0x204   : > { %v4733_v8 = vadd.f32 %v4732_v7, %v4731_v1  ;;  %v4670_v9 = vpop.f32.mrf.mxu0 }
 0x205   : > { %v3330_v3 = vadd.f32 %v4669_v5, %v6340_v28  ;;  %v4734_v11 = vpop.f32.mrf.mxu1 }
 0x206   : > { %v4671_v12 = vpop.f32.mrf.mxu0 }
 0x207   : > { %v6418_v13 = vadd.f32 %v4733_v8, %v3330_v3  ;;  %v4672_v14 = vadd.f32 %v4671_v12, %v4670_v9  ;;  %v4735_v15 = vpop.f32.mrf.mxu1 }
 0x208   : > { %v4736_v19 = vadd.f32 %v4735_v15, %v4734_v11  ;;  %v4673_v20 = vpop.f32.mrf.mxu0 }
 0x209   : > { %v3335_v18 = vadd.f32 %v4672_v14, %v6349_v44  ;;  %v4737_v22 = vpop.f32.mrf.mxu1 }
 0x20a   : > { %v4674_v23 = vpop.f32.mrf.mxu0 }
 0x20b   : > { %v6421_v24 = vadd.f32 %v4736_v19, %v3335_v18  ;;  %v4675_v25 = vadd.f32 %v4674_v23, %v4673_v20  ;;  %v4738_v26 = vpop.f32.mrf.mxu1 }
 0x20c   : > { %v4739_v27 = vadd.f32 %v4738_v26, %v4737_v22  ;;  %v4676_v29 = vpop.f32.mrf.mxu0 }
 0x20d   : > { %v3338_v28 = vadd.f32 %v4675_v25, %v6358_v54  ;;  %v4740_v31 = vpop.f32.mrf.mxu1 }
 0x20e   : > { %v4677_v32 = vpop.f32.mrf.mxu0 }
 0x20f   : > { %v6424_v35 = vadd.f32 %v4739_v27, %v3338_v28  ;;  %v4678_v36 = vadd.f32 %v4677_v32, %v4676_v29  ;;  %v4741_v16 = vpop.f32.mrf.mxu1 }
 0x210   : > { %v4742_v37 = vadd.f32 %v4741_v16, %v4740_v31  ;;  %v4679_v38 = vpop.f32.mrf.mxu0 }
 0x211   : > { %v3343_v44 = vadd.f32 %v4678_v36, %v6367_v6  ;;  %v4743_v40 = vpop.f32.mrf.mxu1 }
 0x212   : > { %v4680_v41 = vpop.f32.mrf.mxu0 }
 0x213   : > { %v6427_v45 = vadd.f32 %v4742_v37, %v3343_v44  ;;  %v4681_v46 = vadd.f32 %v4680_v41, %v4679_v38  ;;  %v4744_v33 = vpop.f32.mrf.mxu1 }
 0x214   : > { %v4745_v47 = vadd.f32 %v4744_v33, %v4743_v40  ;;  %v4682_v48 = vpop.f32.mrf.mxu0 }
 0x215   : > { %v3346_v54 = vadd.f32 %v4681_v46, %v6376_v17  ;;  %v4746_v50 = vpop.f32.mrf.mxu1 }
 0x216   : > { %v4683_v51 = vpop.f32.mrf.mxu0 }
 0x217   : > { %v6430_v52 = vadd.f32 %v4745_v47, %v3346_v54  ;;  %v4684_v53 = vadd.f32 %v4683_v51, %v4682_v48  ;;  %v4747_v43 = vpop.f32.mrf.mxu1 }
 0x218   : > { %v4748_v56 = vadd.f32 %v4747_v43, %v4746_v50  ;;  %v4685_v58 = vpop.f32.mrf.mxu0 }
 0x219   : > { %v3351_v6 = vadd.f32 %v4684_v53, %v6385_v34  ;;  %v4749_v60 = vpop.f32.mrf.mxu1 }
 0x21a   : > { %v4686_v61 = vpop.f32.mrf.mxu0 }
 0x21b   : > { %v6433_v62 = vadd.f32 %v4748_v56, %v3351_v6  ;;  %v4687_v63 = vadd.f32 %v4686_v61, %v4685_v58  ;;  %v4750_v57 = vpop.f32.mrf.mxu1 }
 0x21c   : > { %v4751_v1 = vadd.f32 %v4750_v57, %v4749_v60  ;;  %v4688_v2 = vpop.f32.mrf.mxu0 }
 0x21d   : > { %v3354_v17 = vadd.f32 %v4687_v63, %v6388_v42  ;;  %v4752_v5 = vpop.f32.mrf.mxu1 }
 0x21e   : > { %v4689_v7 = vpop.f32.mrf.mxu0 }
 0x21f   : > { %v6436_v8 = vadd.f32 %v4751_v1, %v3354_v17  ;;  %v4690_v9 = vadd.f32 %v4689_v7, %v4688_v2  ;;  %v4753_v3 = vpop.f32.mrf.mxu1 }
 0x220   : > { %v4754_v11 = vadd.f32 %v4753_v3, %v4752_v5  ;;  %v4691_v12 = vpop.f32.mrf.mxu0 }
 0x221   : > { %v3359_v34 = vadd.f32 %v4690_v9, %v6391_v55  ;;  %v4755_v14 = vpop.f32.mrf.mxu1 }
 0x222   : > { %v4692_v15 = vpop.f32.mrf.mxu0 }
 0x223   : > { %v6439_v19 = vadd.f32 %v4754_v11, %v3359_v34  ;;  %v4693_v20 = vadd.f32 %v4692_v15, %v4691_v12  ;;  %v4756_v18 = vpop.f32.mrf.mxu1 }
 0x224   : > { %v4757_v22 = vadd.f32 %v4756_v18, %v4755_v14  ;;  %v4694_v23 = vpop.f32.mrf.mxu0 }
 0x225   : > { %v3362_v42 = vadd.f32 %v4693_v20, %v6394_v0  ;;  %v4758_v25 = vpop.f32.mrf.mxu1 }
 0x226   : > { %v4695_v26 = vpop.f32.mrf.mxu0 }
 0x227   : > { %v6442_v27 = vadd.f32 %v4757_v22, %v3362_v42  ;;  %v4696_v29 = vadd.f32 %v4695_v26, %v4694_v23  ;;  %v4759_v28 = vpop.f32.mrf.mxu1 }
 0x228   : > { %v4760_v31 = vadd.f32 %v4759_v28, %v4758_v25  ;;  %v4697_v32 = vpop.f32.mrf.mxu0 }
 0x229   : > { %v3367_v55 = vadd.f32 %v4696_v29, %v6397_v10  ;;  %v4761_v36 = vpop.f32.mrf.mxu1 }
 0x22a   : > { %v4698_v16 = vpop.f32.mrf.mxu0 }
 0x22b   : > { %v6445_v37 = vadd.f32 %v4760_v31, %v3367_v55  ;;  %v4699_v38 = vadd.f32 %v4698_v16, %v4697_v32  ;;  %v4762_v44 = vpop.f32.mrf.mxu1 }
 0x22c   : > { %v4763_v40 = vadd.f32 %v4762_v44, %v4761_v36  ;;  %v4780_v41 = vpop.f32.mrf.mxu0 }
 0x22d   : > { %v3370_v0 = vadd.f32 %v4699_v38, %v6400_v21  ;;  %v4844_v46 = vpop.f32.mrf.mxu1 }
 0x22e   : > { %v4781_v33 = vpop.f32.mrf.mxu0 }
 0x22f   : > { %v6448_v47 = vadd.f32 %v4763_v40, %v3370_v0  ;;  %v4782_v48 = vadd.f32 %v4781_v33, %v4780_v41  ;;  %v4845_v54 = vpop.f32.mrf.mxu1 }
 0x230   : > { %v4846_v50 = vadd.f32 %v4845_v54, %v4844_v46  ;;  %v6450_v51 = vpop.f32.mrf.mxu0 }
 0x231   : > { %v3505_v10 = vadd.f32 %v4782_v48, %v6403_v30  ;;  %v6453_v53 = vpop.f32.mrf.mxu1 }
 0x232   : > { %v6455_v43 = vpop.f32.mrf.mxu0 }
 0x233   : > { %v6457_v56 = vadd.f32 %v4846_v50, %v3505_v10  ;;  %v6459_v58 = vpop.f32.mrf.mxu1 }
 0x234   : > { %v4786_v21 = vpop.f32.mrf.mxu0 }
 0x235   : > { %v4850_v6 = vpop.f32.mrf.mxu1 }
 0x236   : > { %v4787_v60 = vpop.f32.mrf.mxu0 }
 0x237   : > { %v4788_v61 = vadd.f32 %v4787_v60, %v4786_v21  ;;  %v4851_v63 = vpop.f32.mrf.mxu1 }
 0x238   : > { %v4852_v57 = vadd.f32 %v4851_v63, %v4850_v6  ;;  %v6461_v1 = vpop.f32.mrf.mxu0 }
 0x239   : > { %v3513_v2 = vadd.f32 %v4788_v61, %v6409_v49  ;;  %v6464_v17 = vpop.f32.mrf.mxu1 }
 0x23a   : > { %v6466_v30 = vpop.f32.mrf.mxu0 }
 0x23b   : > { %v6468_v5 = vadd.f32 %v4852_v57, %v3513_v2  ;;  %v6470_v7 = vpop.f32.mrf.mxu1 }
 0x23c   : > { %v4792_v9 = vpop.f32.mrf.mxu0 }
 0x23d   : > { %v4856_v3 = vpop.f32.mrf.mxu1 }
 0x23e   : > { %v4793_v11 = vpop.f32.mrf.mxu0 }
 0x23f   : > { %v4794_v12 = vadd.f32 %v4793_v11, %v4792_v9  ;;  %v4857_v34 = vpop.f32.mrf.mxu1 }
 0x240   : > { %v4858_v14 = vadd.f32 %v4857_v34, %v4856_v3  ;;  %v6472_v15 = vpop.f32.mrf.mxu0 }
 0x241   : > { %v3521_v20 = vadd.f32 %v4794_v12, %v6415_v4  ;;  %v6475_v18 = vpop.f32.mrf.mxu1 }
 0x242   : > { %v6477_v49 = vpop.f32.mrf.mxu0 }
 0x243   : > { %v6479_v22 = vadd.f32 %v4858_v14, %v3521_v20  ;;  %v6481_v23 = vpop.f32.mrf.mxu1 }
 0x244   : > { %v4798_v42 = vpop.f32.mrf.mxu0 }
 0x245   : > { %v4862_v25 = vpop.f32.mrf.mxu1 }
 0x246   : > { %v4799_v26 = vpop.f32.mrf.mxu0 }
 0x247   : > { %v4800_v29 = vadd.f32 %v4799_v26, %v4798_v42  ;;  %v4863_v28 = vpop.f32.mrf.mxu1 }
 0x248   : > { %v4864_v31 = vadd.f32 %v4863_v28, %v4862_v25  ;;  %v6483_v32 = vpop.f32.mrf.mxu0 }
 0x249   : > { %v3529_v55 = vadd.f32 %v4800_v29, %v6421_v24  ;;  %v6486_v36 = vpop.f32.mrf.mxu1 }
 0x24a   : > { %v6488_v4 = vpop.f32.mrf.mxu0 }
 0x24b   : > { %v6490_v16 = vadd.f32 %v4864_v31, %v3529_v55  ;;  %v6492_v38 = vpop.f32.mrf.mxu1 }
 0x24c   : > { %v4804_v44 = vpop.f32.mrf.mxu0 }
 0x24d   : > { %v4868_v40 = vpop.f32.mrf.mxu1 }
 0x24e   : > { %v4805_v41 = vpop.f32.mrf.mxu0 }
 0x24f   : > { %v4806_v0 = vadd.f32 %v4805_v41, %v4804_v44  ;;  %v4869_v46 = vpop.f32.mrf.mxu1 }
 0x250   : > { %v4870_v33 = vadd.f32 %v4869_v46, %v4868_v40  ;;  %v6494_v48 = vpop.f32.mrf.mxu0 }
 0x251   : > { %v3537_v54 = vadd.f32 %v4806_v0, %v6427_v45  ;;  %v6497_v50 = vpop.f32.mrf.mxu1 }
 0x252   : > { %v6499_v24 = vpop.f32.mrf.mxu0 }
 0x253   : > { %v6501_v10 = vadd.f32 %v4870_v33, %v3537_v54  ;;  %v6503_v21 = vpop.f32.mrf.mxu1 }
 0x254   : > { %v4810_v6 = vpop.f32.mrf.mxu0 }
 0x255   : > { %v4874_v60 = vpop.f32.mrf.mxu1 }
 0x256   : > { %v4811_v61 = vpop.f32.mrf.mxu0 }
 0x257   : > { %v4812_v63 = vadd.f32 %v4811_v61, %v4810_v6  ;;  %v4875_v57 = vpop.f32.mrf.mxu1 }
 0x258   : > { %v4876_v2 = vadd.f32 %v4875_v57, %v4874_v60  ;;  %v6505_v9 = vpop.f32.mrf.mxu0  ;;  %v4785_v57 = vadd.f32 %v6455_v43, %v6450_v51 }
 0x259   : > { %v3545_v3 = vadd.f32 %v4812_v63, %v6433_v62  ;;  %v6508_v11 = vpop.f32.mrf.mxu1 }
 0x25a   : > { %v6510_v45 = vpop.f32.mrf.mxu0 }
 0x25b   : > { %v6512_v12 = vadd.f32 %v4876_v2, %v3545_v3  ;;  %v6514_v34 = vpop.f32.mrf.mxu1 }
 0x25c   : > { %v4816_v14 = vpop.f32.mrf.mxu0 }
 0x25d   : > { %v4880_v20 = vpop.f32.mrf.mxu1 }
 0x25e   : > { %v4817_v42 = vpop.f32.mrf.mxu0 }
 0x25f   : > { %v4818_v25 = vadd.f32 %v4817_v42, %v4816_v14  ;;  %v4881_v26 = vpop.f32.mrf.mxu1 }
 0x260   : > { %v4882_v29 = vadd.f32 %v4881_v26, %v4880_v20  ;;  %v6516_v28 = vpop.f32.mrf.mxu0 }
 0x261   : > { %v3553_v31 = vadd.f32 %v4818_v25, %v6439_v19  ;;  %v6519_v55 = vpop.f32.mrf.mxu1  ;;  %v3508_v25 = vadd.f32 %v4785_v57, %v6406_v39 }
 0x262   : > { %v6521_v62 = vpop.f32.mrf.mxu0 }
 0x263   : > { %v6523_v44 = vadd.f32 %v4882_v29, %v3553_v31  ;;  %v6525_v40 = vpop.f32.mrf.mxu1 }
 0x264   : > { %v4822_v41 = vpop.f32.mrf.mxu0 }
 0x265   : > { %v4886_v0 = vpop.f32.mrf.mxu1 }
 0x266   : > { %v4823_v46 = vpop.f32.mrf.mxu0 }
 0x267   : > { %v4824_v33 = vadd.f32 %v4823_v46, %v4822_v41  ;;  %v4887_v54 = vpop.f32.mrf.mxu1  ;;  %v4791_v46 = vadd.f32 %v6466_v30, %v6461_v1  ;;  %v4855_v1 = vadd.f32 %v6470_v7, %v6464_v17 }
 0x268   : > { %v4888_v6 = vadd.f32 %v4887_v54, %v4886_v0  ;;  %v6527_v60 = vpop.f32.mrf.mxu0 }
 0x269   : > { %v3561_v61 = vadd.f32 %v4824_v33, %v6445_v37  ;;  %v6530_v63 = vpop.f32.mrf.mxu1  ;;  %v4849_v37 = vadd.f32 %v6459_v58, %v6453_v53  ;;  %v3516_v53 = vadd.f32 %v4791_v46, %v6412_v59 }
 0x26a   : > { %v6532_v19 = vpop.f32.mrf.mxu0 }
 0x26b   : > { %v6536_v2 = vadd.f32 %v4888_v6, %v3561_v61  ;;  %v6538_v3 = vpop.f32.mrf.mxu1  ;;  %v3605_v43 = vadd.f32 %v4849_v37, %v3508_v25  ;;  %v4797_v37 = vadd.f32 %v6477_v49, %v6472_v15 }
 0x26c   : > { %v4908_v14 = vpop.f32.mrf.mxu0 }
 0x26d   : > { %6640 = vst [vmem:[#allocation4_spill] sm:$0xff] %v6536_v2  ;;  %v4972_v20 = vpop.f32.mrf.mxu1 }
 0x26e   : > { %v4909_v42 = vpop.f32.mrf.mxu0 }
 0x26f   : > { %v4910_v26 = vadd.f32 %v4909_v42, %v4908_v14  ;;  %v4973_v29 = vpop.f32.mrf.mxu1 }
 0x270   : > { %v4911_v31 = vpop.f32.mrf.mxu0  ;;  %v4974_v33 = vadd.f32 %v4973_v29, %v4972_v20 }
 0x271   : > { %v3699_v41 = vadd.f32 %v4910_v26, %v6457_v56  ;;  %v4975_v0 = vpop.f32.mrf.mxu1 }
 0x272   : > { %v4912_v51 = vpop.f32.mrf.mxu0 }
 0x273   : > { %v4913_v54 = vadd.f32 %v4912_v51, %v4911_v31  ;;  %v4976_v6 = vpop.f32.mrf.mxu1  ;;  %v3796_v39 = vadd.f32 %v4974_v33, %v3699_v41 }
 0x274   : > { %v4914_v61 = vpop.f32.mrf.mxu0  ;;  %v4977_v14 = vadd.f32 %v4976_v6, %v4975_v0  ;;  %v3613_v0 = vadd.f32 %v4855_v1, %v3516_v53 }
 0x275   : > { %v3702_v57 = vadd.f32 %v4913_v54, %v3605_v43  ;;  %v4978_v42 = vpop.f32.mrf.mxu1  ;;  %v3858_v30 = vmax.f32 %v3796_v39, 0.0  ;;  %v4861_v39 = vadd.f32 %v6481_v23, %v6475_v18 }
 0x276   : > { %v4915_v2 = vpop.f32.mrf.mxu0 }
 0x277   : > { %v3799_v56 = vadd.f32 %v4977_v14, %v3702_v57  ;;  %v4916_v58 = vadd.f32 %v4915_v2, %v4914_v61  ;;  %v4979_v26 = vpop.f32.mrf.mxu1 }
 0x278   : > { %v4917_v25 = vpop.f32.mrf.mxu0  ;;  %v4980_v51 = vadd.f32 %v4979_v26, %v4978_v42 }
 0x279   : > { %v3859_v20 = vmax.f32 %v3799_v56, 0.0  ;;  %v3707_v29 = vadd.f32 %v4916_v58, %v6468_v5  ;;  %v4981_v31 = vpop.f32.mrf.mxu1  ;;  %v3524_v5 = vadd.f32 %v4797_v37, %v6418_v13 }
 0x27a   : > { %v4918_v41 = vpop.f32.mrf.mxu0 }
 0x27b   : > { %v4464_v59 = vpack.c.bf16 %v3859_v20, %v3858_v30  ;;  %v4919_v43 = vadd.f32 %v4918_v41, %v4917_v25  ;;  %v4982_v46 = vpop.f32.mrf.mxu1  ;;  %v3804_v17 = vadd.f32 %v4980_v51, %v3707_v29  ;;  %v3621_v58 = vadd.f32 %v4861_v39, %v3524_v5 }
 0x27c   : > { %v4920_v2 = vpop.f32.mrf.mxu0  ;;  %v4983_v33 = vadd.f32 %v4982_v46, %v4981_v31  ;;  %v4803_v25 = vadd.f32 %v6488_v4, %v6483_v32  ;;  %v4867_v32 = vadd.f32 %v6492_v38, %v6486_v36 }
 0x27d   : > { %4465 = vst [vmem:[%s6554_s12] sm:$0xff] %v4464_v59   ;;  %v3710_v7 = vadd.f32 %v4919_v43, %v3613_v0  ;;  %v4984_v54 = vpop.f32.mrf.mxu1  ;;  %v3860_v14 = vmax.f32 %v3804_v17, 0.0 }
 0x27e   : > { %v4921_v6 = vpop.f32.mrf.mxu0  ;;  %v3532_v0 = vadd.f32 %v4803_v25, %v6424_v35 }
 0x27f   : > { %v3807_v61 = vadd.f32 %v4983_v33, %v3710_v7  ;;  %v4922_v15 = vadd.f32 %v4921_v6, %v4920_v2  ;;  %v4985_v49 = vpop.f32.mrf.mxu1  ;;  %v4809_v7 = vadd.f32 %v6499_v24, %v6494_v48  ;;  %v4873_v48 = vadd.f32 %v6503_v21, %v6497_v50 }
 0x280   : > { %v4923_v57 = vpop.f32.mrf.mxu0  ;;  %v4986_v1 = vadd.f32 %v4985_v49, %v4984_v54  ;;  %v3629_v54 = vadd.f32 %v4867_v32, %v3532_v0 }
 0x281   : > { %v3861_v42 = vmax.f32 %v3807_v61, 0.0  ;;  %v3715_v53 = vadd.f32 %v4922_v15, %v6479_v22  ;;  %v4987_v56 = vpop.f32.mrf.mxu1  ;;  %v3540_v38 = vadd.f32 %v4809_v7, %v6430_v52 }
 0x282   : > { %v4924_v26 = vpop.f32.mrf.mxu0 }
 0x283   : > { %v4469_v13 = vpack.c.bf16 %v3861_v42, %v3860_v14  ;;  %v4925_v30 = vadd.f32 %v4924_v26, %v4923_v57  ;;  %v4988_v20 = vpop.f32.mrf.mxu1  ;;  %v3812_v31 = vadd.f32 %v4986_v1, %v3715_v53 }
 0x284   : > { %v4926_v29 = vpop.f32.mrf.mxu0  ;;  %v4989_v18 = vadd.f32 %v4988_v20, %v4987_v56 }
 0x285   : > { %4501 = vst [vmem:[%s6554_s12 + $0x8] sm:$0xff] %v4469_v13   ;;  %v3718_v37 = vadd.f32 %v4925_v30, %v3621_v58  ;;  %v4990_v23 = vpop.f32.mrf.mxu1  ;;  %v3862_v4 = vmax.f32 %v3812_v31, 0.0  ;;  %v3637_v13 = vadd.f32 %v4873_v48, %v3540_v38  ;;  %v4815_v30 = vadd.f32 %v6510_v45, %v6505_v9 }
 0x286   : > { %v4927_v41 = vpop.f32.mrf.mxu0  ;;  %v4879_v9 = vadd.f32 %v6514_v34, %v6508_v11 }
 0x287   : > { %v3815_v22 = vadd.f32 %v4989_v18, %v3718_v37  ;;  %v4928_v59 = vadd.f32 %v4927_v41, %v4926_v29  ;;  %v4991_v51 = vpop.f32.mrf.mxu1  ;;  %v3548_v0 = vadd.f32 %v4815_v30, %v6436_v8 }
 0x288   : > { %v4929_v43 = vpop.f32.mrf.mxu0  ;;  %v4992_v35 = vadd.f32 %v4991_v51, %v4990_v23 }
 0x289   : > { %v3863_v46 = vmax.f32 %v3815_v22, 0.0  ;;  %v3723_v2 = vadd.f32 %v4928_v59, %v6490_v16  ;;  %v4993_v17 = vpop.f32.mrf.mxu1 }
 0x28a   : > { %v4930_v33 = vpop.f32.mrf.mxu0 }
 0x28b   : > { %v4474_v5 = vpack.c.bf16 %v3863_v46, %v3862_v4  ;;  %v4931_v6 = vadd.f32 %v4930_v33, %v4929_v43  ;;  %v4994_v61 = vpop.f32.mrf.mxu1  ;;  %v3820_v49 = vadd.f32 %v4992_v35, %v3723_v2  ;;  %v4821_v46 = vadd.f32 %v6521_v62, %v6516_v28 }
 0x28c   : > { %v4932_v15 = vpop.f32.mrf.mxu0  ;;  %v4995_v57 = vadd.f32 %v4994_v61, %v4993_v17  ;;  %v3645_v17 = vadd.f32 %v4879_v9, %v3548_v0  ;;  %v4885_v28 = vadd.f32 %v6525_v40, %v6519_v55 }
 0x28d   : > { %4502 = vst [vmem:[%s6554_s12 + $0x10] sm:$0xff] %v4474_v5   ;;  %v3726_v39 = vadd.f32 %v4931_v6, %v3629_v54  ;;  %v4996_v36 = vpop.f32.mrf.mxu1  ;;  %v3864_v56 = vmax.f32 %v3820_v49, 0.0  ;;  %v3556_v34 = vadd.f32 %v4821_v46, %v6442_v27 }
 0x28e   : > { %v4933_v14 = vpop.f32.mrf.mxu0 }
 0x28f   : > { %v3823_v16 = vadd.f32 %v4995_v57, %v3726_v39  ;;  %v4934_v42 = vadd.f32 %v4933_v14, %v4932_v15  ;;  %v4997_v53 = vpop.f32.mrf.mxu1 }
 0x290   : > { %v4935_v24 = vpop.f32.mrf.mxu0  ;;  %v4998_v20 = vadd.f32 %v4997_v53, %v4996_v36  ;;  %v4827_v53 = vadd.f32 %v6532_v19, %v6527_v60  ;;  %v4891_v60 = vadd.f32 %v6538_v3, %v6530_v63  ;;  %v3982_v3 = vld [vmem:[%s6554_s12] sm:$0xf] (%p5283_p6) }
 0x291   : > { %v3865_v58 = vmax.f32 %v3823_v16, 0.0  ;;  %v3731_v26 = vadd.f32 %v4934_v42, %v6501_v10  ;;  %v4999_v25 = vpop.f32.mrf.mxu1  ;;  %v3653_v16 = vadd.f32 %v4885_v28, %v3556_v34  ;;  %3983 = vst [vmem:[%s3965_s8] sm:$0xf] (%p5283_p6), %v3982_v3 }
 0x292   : > { %v4936_v1 = vpop.f32.mrf.mxu0 }
 0x293   : > { %v4479_v52 = vpack.c.bf16 %v3865_v58, %v3864_v56  ;;  %v4937_v29 = vadd.f32 %v4936_v1, %v4935_v24  ;;  %v5000_v31 = vpop.f32.mrf.mxu1  ;;  %v3828_v18 = vadd.f32 %v4998_v20, %v3731_v26  ;;  %v3564_v1 = vadd.f32 %v4827_v53, %v6448_v47 }
 0x294   : > { %v4938_v37 = vpop.f32.mrf.mxu0  ;;  %v5001_v50 = vadd.f32 %v5000_v31, %v4999_v25  ;;  %v6641_v31 = vld [vmem:[#allocation4_spill] sm:$0xff]  ;;  %v3990_v46 = vld [vmem:[%s6554_s12 + $0x10] sm:$0xf] (%p5283_p6) }
 0x295   : > { %4503 = vst [vmem:[%s6554_s12 + $0x18] sm:$0xff] %v4479_v52   ;;  %v3734_v23 = vadd.f32 %v4937_v29, %v3637_v13  ;;  %v5002_v21 = vpop.f32.mrf.mxu1  ;;  %v3866_v45 = vmax.f32 %v3828_v18, 0.0  ;;  %3991 = vst [vmem:[%s3965_s8 + $0x20] sm:$0xf] (%p5283_p6), %v3990_v46 }
 0x296   : > { %v4939_v41 = vpop.f32.mrf.mxu0 }
 0x297   : > { %v3831_v10 = vadd.f32 %v5001_v50, %v3734_v23  ;;  %v4940_v22 = vadd.f32 %v4939_v41, %v4938_v37  ;;  %v5003_v59 = vpop.f32.mrf.mxu1  ;;  %v3661_v50 = vadd.f32 %v4891_v60, %v3564_v1 }
 0x298   : > { %v4941_v51 = vpop.f32.mrf.mxu0  ;;  %v5004_v8 = vadd.f32 %v5003_v59, %v5002_v21 }
 0x299   : > { %v3867_v43 = vmax.f32 %v3831_v10, 0.0  ;;  %v3739_v32 = vadd.f32 %v4940_v22, %v6512_v12  ;;  %v5005_v4 = vpop.f32.mrf.mxu1 }
 0x29a   : > { %v4942_v2 = vpop.f32.mrf.mxu0 }
 0x29b   : > { %v4484_v7 = vpack.c.bf16 %v3867_v43, %v3866_v45  ;;  %v4943_v33 = vadd.f32 %v4942_v2, %v4941_v51  ;;  %v5006_v54 = vpop.f32.mrf.mxu1  ;;  %v3836_v35 = vadd.f32 %v5004_v8, %v3739_v32  ;;  %v3984_v43 = vld [vmem:[%s6554_s12 + $0x4] sm:$0xf] (%p5283_p6)  ;;  %v3986_v32 = vld [vmem:[%s6554_s12 + $0x8] sm:$0xf] (%p5283_p6)  ;;  %v3992_v2 = vld [vmem:[%s6554_s12 + $0x14] sm:$0xf] (%p5283_p6) }
 0x29c   : > { %v4944_v5 = vpop.f32.mrf.mxu0  ;;  %v5007_v61 = vadd.f32 %v5006_v54, %v5005_v4  ;;  %v3988_v4 = vld [vmem:[%s6554_s12 + $0xc] sm:$0xf] (%p5283_p6)  ;;  %3985 = vst [vmem:[%s3965_s8 + $0x8] sm:$0xf] (%p5283_p6), %v3984_v43  ;;  %3987 = vst [vmem:[%s3965_s8 + $0x10] sm:$0xf] (%p5283_p6), %v3986_v32 }
 0x29d   : > { %4504 = vst [vmem:[%s6554_s12 + $0x20] sm:$0xff] %v4484_v7   ;;  %v3742_v6 = vadd.f32 %v4943_v33, %v3645_v17  ;;  %v5008_v11 = vpop.f32.mrf.mxu1  ;;  %v3868_v57 = vmax.f32 %v3836_v35, 0.0  ;;  %3989 = vst [vmem:[%s3965_s8 + $0x18] sm:$0xf] (%p5283_p6), %v3988_v4  ;;  %v3994_v17 = vld [vmem:[%s6554_s12 + $0x18] sm:$0xf] (%p5283_p6) }
 0x29e   : > { %v4945_v15 = vpop.f32.mrf.mxu0  ;;  %v3996_v7 = vld [vmem:[%s6554_s12 + $0x1c] sm:$0xf] (%p5283_p6)  ;;  %3993 = vst [vmem:[%s3965_s8 + $0x28] sm:$0xf] (%p5283_p6), %v3992_v2  ;;  %3995 = vst [vmem:[%s3965_s8 + $0x30] sm:$0xf] (%p5283_p6), %v3994_v17 }
 0x29f   : > { %v3839_v12 = vadd.f32 %v5007_v61, %v3742_v6  ;;  %v4946_v49 = vadd.f32 %v4945_v15, %v4944_v5  ;;  %v5009_v39 = vpop.f32.mrf.mxu1  ;;  %3997 = vst [vmem:[%s3965_s8 + $0x38] sm:$0xf] (%p5283_p6), %v3996_v7 }
 0x2a0   : > { %v4947_v62 = vpop.f32.mrf.mxu0  ;;  %v5010_v48 = vadd.f32 %v5009_v39, %v5008_v11 }
 0x2a1   : > { %v3869_v36 = vmax.f32 %v3839_v12, 0.0  ;;  %v3747_v38 = vadd.f32 %v4946_v49, %v6523_v44  ;;  %v5011_v14 = vpop.f32.mrf.mxu1 }
 0x2a2   : > { %v4948_v42 = vpop.f32.mrf.mxu0 }
 0x2a3   : > { %v4489_v27 = vpack.c.bf16 %v3869_v36, %v3868_v57  ;;  %v4949_v24 = vadd.f32 %v4948_v42, %v4947_v62  ;;  %v5012_v56 = vpop.f32.mrf.mxu1  ;;  %v3844_v26 = vadd.f32 %v5010_v48, %v3747_v38 }
 0x2a4   : > { %v4950_v58 = vpop.f32.mrf.mxu0  ;;  %v5013_v55 = vadd.f32 %v5012_v56, %v5011_v14  ;;  %v3998_v8 = vld [vmem:[%s6554_s12 + $0x20] sm:$0xf] (%p5283_p6)  ;;  %v4000_v33 = vld [vmem:[%s6554_s12 + $0x24] sm:$0xf] (%p5283_p6) }
 0x2a5   : > { %4505 = vst [vmem:[%s6554_s12 + $0x28] sm:$0xff] %v4489_v27   ;;  %v3750_v25 = vadd.f32 %v4949_v24, %v3653_v16  ;;  %v5014_v40 = vpop.f32.mrf.mxu1  ;;  %v3870_v19 = vmax.f32 %v3844_v26, 0.0  ;;  %3999 = vst [vmem:[%s3965_s8 + $0x40] sm:$0xf] (%p5283_p6), %v3998_v8 }
 0x2a6   : > { %v4951_v13 = vpop.f32.mrf.mxu0  ;;  %4001 = vst [vmem:[%s3965_s8 + $0x48] sm:$0xf] (%p5283_p6), %v4000_v33 }
 0x2a7   : > { %v3847_v44 = vadd.f32 %v5013_v55, %v3750_v25  ;;  %v4952_v30 = vadd.f32 %v4951_v13, %v4950_v58  ;;  %v5015_v52 = vpop.f32.mrf.mxu1 }
 0x2a8   : > { %v4953_v20 = vpop.f32.mrf.mxu0  ;;  %v5016_v41 = vadd.f32 %v5015_v52, %v5014_v40 }
 0x2a9   : > { %v3871_v29 = vmax.f32 %v3847_v44, 0.0  ;;  %v3755_v37 = vadd.f32 %v4952_v30, %v6641_v31  ;;  %v5017_v18 = vpop.f32.mrf.mxu1 }
 0x2aa   : > { %v4954_v23 = vpop.f32.mrf.mxu0 }
 0x2ab   : > { %v4494_v21 = vpack.c.bf16 %v3871_v29, %v3870_v19  ;;  %v4955_v0 = vadd.f32 %v4954_v23, %v4953_v20  ;;  %v5018_v47 = vpop.f32.mrf.mxu1  ;;  %v3852_v10 = vadd.f32 %v5016_v41, %v3755_v37 }
 0x2ac   : > { %v5019_v59 = vadd.f32 %v5018_v47, %v5017_v18  ;;  %v4002_v54 = vld [vmem:[%s6554_s12 + $0x28] sm:$0xf] (%p5283_p6)  ;;  %v4004_v5 = vld [vmem:[%s6554_s12 + $0x2c] sm:$0xf] (%p5283_p6) }
 0x2ad   : > { %4506 = vst [vmem:[%s6554_s12 + $0x30] sm:$0xff] %v4494_v21   ;;  %v3758_v22 = vadd.f32 %v4955_v0, %v3661_v50  ;;  %v3872_v9 = vmax.f32 %v3852_v10, 0.0  ;;  %4003 = vst [vmem:[%s3965_s8 + $0x50] sm:$0xf] (%p5283_p6), %v4002_v54 }
 0x2ae   : > { %4005 = vst [vmem:[%s3965_s8 + $0x58] sm:$0xf] (%p5283_p6), %v4004_v5 }
 0x2af   : > { %v3855_v51 = vadd.f32 %v5019_v59, %v3758_v22 }
 0x2b1   : > { %v3873_v45 = vmax.f32 %v3855_v51, 0.0  ;;  %3960 = sbr.rel (!%p5283_p6) target bundleno = 702 (0x2be), region = 77 }
 0x2b3   : > { %v4499_v63 = vpack.c.bf16 %v3873_v45, %v3872_v9 }
 0x2b4   : > { %v4006_v35 = vld [vmem:[%s6554_s12 + $0x30] sm:$0xf] (%p5283_p6)  ;;  %v4008_v6 = vld [vmem:[%s6554_s12 + $0x34] sm:$0xf] (%p5283_p6) }
 0x2b5   : > { %4507 = vst [vmem:[%s6554_s12 + $0x38] sm:$0xff] %v4499_v63   ;;  %4007 = vst [vmem:[%s3965_s8 + $0x60] sm:$0xf] (%p5283_p6), %v4006_v35 }
 0x2b6   : > { %4009 = vst [vmem:[%s3965_s8 + $0x68] sm:$0xf] %v4008_v6 }
 0x2bc   : > { %v4010_v61 = vld [vmem:[%s6554_s12 + $0x38] sm:$0xf]  ;;  %v4012_v11 = vld [vmem:[%s6554_s12 + $0x3c] sm:$0xf] }
 0x2bd   : > { %4011 = vst [vmem:[%s3965_s8 + $0x70] sm:$0xf] %v4010_v61  ;;  %4013 = vst [vmem:[%s3965_s8 + $0x78] sm:$0xf] %v4012_v11 }
 0x2be PF: > { %s13_s16 = sadd.s32 1, %s5226_s16   ;;  %s6642_s12 = smov %s5214_s13 }
 0x2bf   : > { %p10_p12 = scmp.ge.s32.totalorder %s13_s16, 4   ;;  %s6643_s13 = smov %s5288_s22 }
 0x2c0   : > { %s6644_s14 = smov %s5222_s15  ;;  %s6645_s15 = smov %s6647_s17 }
 0x2c1   :  { %12 = sbr.rel (!%p10_p12) target bundleno = 3 (0x3), region = 155 }

// kernel: discriminator_forward.9
= control target key start
LH: loop header
LB: loop body
LE: loop exit
PB: predicated region body
PF: predicated region fallthrough
CT: control target
= control target key end

     0   :  { %v80_v1 = vlaneseq  ;;  %v1533_v11 = vmov 1983009808   ;;  %vm1376_vm0 = vcmask 1041408   ;;  %vm1520_vm1 = vcmask 1024   ;;  %s2522_s2 = inlined_call_operand.<no memory space> [shape: f32[1,1], index: 2, kind: input, shape index: {}]   ;;  %s2523_s1 = inlined_call_operand.vmem [shape: bf16[1,8192], index: 1, kind: input, shape index: {}]   ;;  %s2524_s0 = inlined_call_operand.vmem [shape: bf16[2,8192], index: 0, kind: input, shape index: {}]   ;;  %s2525_s3 = inlined_call_operand.vmem [shape: f32[2,1], index: 3, kind: output, shape index: {}]  }
   0x1   :  { %v8_v0 = vstv %s2522_s2  ;;  %v44_v2 = vld [vmem:[%s2523_s1 + $0x20] sm:$0xff]  ;;  %v45_v3 = vld [vmem:[%s2523_s1 + $0x28] sm:$0xff]  ;;  %v46_v5 = vld [vmem:[%s2523_s1 + $0x30] sm:$0xff]  ;;  %v1579_v12 = vunpack.c.l.s4 %v1533_v11 }
   0x2   :  { %9 = vst [vmem:[#allocation2] sm:$0x1] %v8_v0  ;;  %v1563_v4 = vshrl.u32 %v80_v1, 7  ;;  %v47_v6 = vld [vmem:[%s2523_s1 + $0x38] sm:$0xff]  ;;  %v1571_v7 = vunpack.c.l.bf16 %v44_v2  ;;  %v1573_v8 = vunpack.c.h.bf16 %v44_v2  ;;  %v1575_v9 = vunpack.c.l.bf16 %v45_v3  ;;  %v1660_v49 = vld [vmem:[%s2524_s0] sm:$0xff]  ;;  %v1665_v50 = vld [vmem:[%s2524_s0 + $0x8] sm:$0xff] }
   0x3   :  { %v1577_v10 = vunpack.c.h.bf16 %v45_v3  ;;  %v1593_v17 = vunpack.c.l.bf16 %v46_v5  ;;  %v1595_v18 = vunpack.c.h.bf16 %v46_v5  ;;  %v1597_v19 = vunpack.c.l.bf16 %v47_v6  ;;  %2546 = vst [vmem:[#allocation5_spill] sm:$0xff] %v1660_v49  ;;  %2547 = vst [vmem:[#allocation6_spill] sm:$0xff] %v1665_v50  ;;  %v1678_v55 = vld [vmem:[%s2524_s0 + $0x20] sm:$0xff]  ;;  %v1686_v57 = vld [vmem:[%s2524_s0 + $0x28] sm:$0xff] }
   0x4   :  { %v1582_v13 = vsub.s32 0, %v1563_v4  ;;  %v1585_v14 = vsub.s32 2, %v1563_v4  ;;  %v1588_v15 = vsub.s32 4, %v1563_v4  ;;  %v1591_v16 = vsub.s32 6, %v1563_v4  ;;  %v40_v56 = vld [vmem:[%s2523_s1] sm:$0xff]  ;;  %v1691_v58 = vld [vmem:[%s2524_s0 + $0x30] sm:$0xff] }
   0x5   :  { %v1599_v20 = vunpack.c.h.bf16 %v47_v6  ;;  %2548 = vst [vmem:[#allocation7_spill] sm:$0xff] %v1691_v58  ;;  %v1696_v59 = vld [vmem:[%s2524_s0 + $0x38] sm:$0xff]  ;;  %v41_v1 = vld [vmem:[%s2523_s1 + $0x8] sm:$0xff]  ;;  %v42_v2 = vld [vmem:[%s2523_s1 + $0x10] sm:$0xff]  ;;  %v1709_v3 = vunpack.c.l.bf16 %v40_v56  ;;  %v724_v5 = vunpack.c.0.s8 %v1579_v12  ;;  %v1724_v12 = vunpack.c.h.bf16 %v40_v56 }
   0x6   :  { %2544 = vst [vmem:[#allocation3_spill] sm:$0xff] %v1585_v14  ;;  %2545 = vst [vmem:[#allocation4_spill] sm:$0xff] %v1588_v15  ;;  %v211_v21 = vrot.slane %v1571_v7, %v1582_v13  ;;  %v215_v22 = vrot.slane %v1571_v7, %v1585_v14  ;;  %v219_v23 = vrot.slane %v1571_v7, %v1588_v15  ;;  %v1719_v61 = vld [vmem:[%s2523_s1 + $0x18] sm:$0xff]  ;;  %v1726_v6 = vunpack.c.l.bf16 %v41_v1 }
   0x7   :  { %v223_v24 = vrot.slane %v1571_v7, %v1591_v16  ;;  %v227_v25 = vrot.slane %v1573_v8, %v1582_v13  ;;  %v231_v26 = vrot.slane %v1573_v8, %v1585_v14  ;;  %v235_v27 = vrot.slane %v1573_v8, %v1588_v15  ;;  %2549 = vst [vmem:[#allocation8_spill] sm:$0xff] %v1696_v59 }
   0x8   :  { %v239_v28 = vrot.slane %v1573_v8, %v1591_v16  ;;  %v243_v29 = vrot.slane %v1575_v9, %v1582_v13  ;;  %v247_v30 = vrot.slane %v1575_v9, %v1585_v14  ;;  %v251_v31 = vrot.slane %v1575_v9, %v1588_v15  ;;  %2550 = vst [vmem:[#allocation9_spill] sm:$0xff] %v1719_v61 }
   0x9   :  { %v255_v32 = vrot.slane %v1575_v9, %v1591_v16  ;;  %v259_v33 = vrot.slane %v1577_v10, %v1582_v13  ;;  %v263_v34 = vrot.slane %v1577_v10, %v1585_v14  ;;  %v267_v35 = vrot.slane %v1577_v10, %v1588_v15 }
   0xa   :  { %v271_v36 = vrot.slane %v1577_v10, %v1591_v16  ;;  %v275_v37 = vrot.slane %v1593_v17, %v1582_v13  ;;  %v279_v38 = vrot.slane %v1593_v17, %v1585_v14  ;;  %v283_v39 = vrot.slane %v1593_v17, %v1588_v15 }
   0xb   :  { %v287_v40 = vrot.slane %v1593_v17, %v1591_v16  ;;  %v291_v41 = vrot.slane %v1595_v18, %v1582_v13  ;;  %v295_v42 = vrot.slane %v1595_v18, %v1585_v14  ;;  %v299_v43 = vrot.slane %v1595_v18, %v1588_v15 }
   0xc   :  { %v303_v44 = vrot.slane %v1595_v18, %v1591_v16  ;;  %v307_v45 = vrot.slane %v1597_v19, %v1582_v13  ;;  %v311_v46 = vrot.slane %v1597_v19, %v1585_v14  ;;  %v315_v47 = vrot.slane %v1597_v19, %v1588_v15 }
   0xd   :  { %v319_v48 = vrot.slane %v1597_v19, %v1591_v16  ;;  %v323_v51 = vrot.slane %v1599_v20, %v1582_v13  ;;  %v327_v52 = vrot.slane %v1599_v20, %v1585_v14  ;;  %v1728_v11 = vunpack.c.h.bf16 %v41_v1 }
   0xe   :  { %v1730_v63 = vunpack.c.l.bf16 %v42_v2  ;;  %v1732_v62 = vunpack.c.h.bf16 %v42_v2  ;;  %v1735_v53 = vunpack.c.l.bf16 %v1719_v61  ;;  %v83_v60 = vrot.slane %v1709_v3, %v1582_v13 }
   0xf   :  { %v87_v0 = vrot.slane %v1709_v3, %v1585_v14  ;;  %v1742_v56 = vsub.s32 %v724_v5, %v1563_v4  ;;  %v1748_v1 = vrot.slane %v211_v21, %v1582_v13  ;;  %v1754_v2 = vrot.slane %v215_v22, %v1582_v13 }
  0x10   :  { %2551 = vst [vmem:[#allocation10_spill] sm:$0xff] %v1732_v62  ;;  %2552 = vst [vmem:[#allocation11_spill] sm:$0xff] %v1735_v53  ;;  %v1760_v54 = vrot.slane %v219_v23, %v1582_v13  ;;  %v1766_v4 = vrot.slane %v223_v24, %v1582_v13  ;;  %v1772_v21 = vrot.slane %v227_v25, %v1582_v13 }
  0x11   :  { %2553 = vst [vmem:[#allocation12_spill] sm:$0xff] %v1742_v56  ;;  %v1778_v22 = vrot.slane %v231_v26, %v1582_v13  ;;  %v1784_v23 = vrot.slane %v235_v27, %v1582_v13  ;;  %v1790_v7 = vrot.slane %v239_v28, %v1582_v13  ;;  %v1796_v24 = vrot.slane %v243_v29, %v1582_v13 }
  0x12   :  { %v1802_v25 = vrot.slane %v247_v30, %v1582_v13  ;;  %v1808_v26 = vrot.slane %v251_v31, %v1582_v13  ;;  %v1814_v8 = vrot.slane %v255_v32, %v1582_v13  ;;  %v1820_v27 = vrot.slane %v259_v33, %v1582_v13 }
  0x13   :  { %v1826_v28 = vrot.slane %v263_v34, %v1582_v13  ;;  %v1832_v29 = vrot.slane %v267_v35, %v1582_v13  ;;  %v1838_v9 = vrot.slane %v271_v36, %v1582_v13  ;;  %v1844_v30 = vrot.slane %v275_v37, %v1582_v13 }
  0x14   :  { %v1850_v31 = vrot.slane %v279_v38, %v1582_v13  ;;  %v1856_v32 = vrot.slane %v283_v39, %v1582_v13  ;;  %v1862_v10 = vrot.slane %v287_v40, %v1582_v13  ;;  %v1868_v33 = vrot.slane %v291_v41, %v1582_v13 }
  0x15   :  { %v1874_v34 = vrot.slane %v295_v42, %v1582_v13  ;;  %v1880_v35 = vrot.slane %v299_v43, %v1582_v13  ;;  %v1886_v17 = vrot.slane %v303_v44, %v1582_v13  ;;  %v1892_v36 = vrot.slane %v307_v45, %v1582_v13 }
  0x16   :  { %v1898_v37 = vrot.slane %v311_v46, %v1582_v13  ;;  %v1904_v38 = vrot.slane %v315_v47, %v1582_v13  ;;  %v1910_v18 = vrot.slane %v319_v48, %v1582_v13  ;;  %v1916_v39 = vrot.slane %v323_v51, %v1582_v13 }
  0x17   :  { %v1922_v40 = vrot.slane %v327_v52, %v1582_v13  ;;  %v2554_v41 = vrot.slane %v1599_v20, %v1588_v15  ;;  %v2555_v19 = vrot.slane %v1599_v20, %v1591_v16  ;;  %v91_v44 = vrot.slane %v1709_v3, %v1588_v15 }
  0x18   :  { %v95_v45 = vrot.slane %v1709_v3, %v1591_v16  ;;  %v99_v46 = vrot.slane %v1724_v12, %v1582_v13  ;;  %v103_v47 = vrot.slane %v1724_v12, %v1585_v14  ;;  %v107_v48 = vrot.slane %v1724_v12, %v1588_v15 }
  0x19   :  { %v1928_v42 = vrot.slane %v2554_v41, %v1582_v13  ;;  %v1934_v43 = vrot.slane %v2555_v19, %v1582_v13  ;;  %v111_v20 = vrot.slane %v1724_v12, %v1591_v16  ;;  %v115_v51 = vrot.slane %v1726_v6, %v1582_v13 }
  0x1a   :  { %v119_v52 = vrot.slane %v1726_v6, %v1585_v14  ;;  %v123_v3 = vrot.slane %v1726_v6, %v1588_v15  ;;  %v127_v5 = vrot.slane %v1726_v6, %v1591_v16  ;;  %v131_v41 = vrot.slane %v1728_v11, %v1582_v13 }
  0x1b   :  { %v135_v19 = vrot.slane %v1728_v11, %v1585_v14  ;;  %v139_v12 = vrot.slane %v1728_v11, %v1588_v15  ;;  %v143_v50 = vrot.slane %v1728_v11, %v1591_v16  ;;  %v147_v49 = vrot.slane %v1730_v63, %v1582_v13 }
  0x1c   :  { %v151_v61 = vrot.slane %v1730_v63, %v1585_v14  ;;  %v155_v6 = vrot.slane %v1730_v63, %v1588_v15  ;;  %v159_v53 = vrot.slane %v1730_v63, %v1591_v16  ;;  %v1973_v62 = vrot.slane %v83_v60, %v1582_v13 }
  0x1d   :  { %v1976_v59 = vrot.slane %v87_v0, %v1582_v13  ;;  %v1979_v11 = vrot.slane %v91_v44, %v1582_v13  ;;  %v1982_v58 = vrot.slane %v95_v45, %v1582_v13  ;;  %v1985_v14 = vrot.slane %v99_v46, %v1582_v13 }
  0x1e   :  { %v1988_v15 = vrot.slane %v103_v47, %v1582_v13  ;;  %v1991_v63 = vrot.slane %v107_v48, %v1582_v13  ;;  %v1994_v60 = vrot.slane %v111_v20, %v1582_v13  ;;  %v1997_v0 = vrot.slane %v115_v51, %v1582_v13 }
  0x1f   :  { %v2000_v44 = vrot.slane %v119_v52, %v1582_v13  ;;  %v2003_v45 = vrot.slane %v123_v3, %v1582_v13  ;;  %v2006_v46 = vrot.slane %v127_v5, %v1582_v13  ;;  %v2009_v47 = vrot.slane %v131_v41, %v1582_v13 }
  0x20   :  { %v2012_v48 = vrot.slane %v135_v19, %v1582_v13  ;;  %v2015_v20 = vrot.slane %v139_v12, %v1582_v13  ;;  %v2018_v51 = vrot.slane %v143_v50, %v1582_v13  ;;  %v2021_v52 = vrot.slane %v147_v49, %v1582_v13 }
  0x21   :  { %v856_v3 = vcombine.low %v1748_v1, %v1754_v2  ;;  %v2026_v5 = vrot.slane %v151_v61, %v1582_v13  ;;  %v2029_v41 = vrot.slane %v155_v6, %v1582_v13  ;;  %v2032_v19 = vrot.slane %v159_v53, %v1582_v13 }
  0x22   :  { %v857_v12 = vcombine.low %v1760_v54, %v1766_v4  ;;  %v720_v50 = vcombine.low %v1973_v62, %v1976_v59  ;;  %v873_v1 = vcombine.low %v1772_v21, %v1778_v22  ;;  %v874_v61 = vcombine.low %v1784_v23, %v1790_v7 }
  0x23   :  { %v864_v49 = vrot.slane %v856_v3, %v1742_v56  ;;  %v721_v2 = vcombine.low %v1979_v11, %v1982_v58  ;;  %v890_v6 = vcombine.low %v1796_v24, %v1802_v25  ;;  %v891_v54 = vcombine.low %v1808_v26, %v1814_v8 }
  0x24   :  { %v871_v53 = vrot.slane %v857_v12, %v1742_v56  ;;  %v881_v59 = vrot.slane %v873_v1, %v1742_v56  ;;  %v888_v62 = vrot.slane %v874_v61, %v1742_v56  ;;  %v907_v4 = vcombine.low %v1820_v27, %v1826_v28 }
  0x25   :  { %v908_v21 = vcombine.low %v1832_v29, %v1838_v9  ;;  %v898_v58 = vrot.slane %v890_v6, %v1742_v56  ;;  %v905_v23 = vrot.slane %v891_v54, %v1742_v56  ;;  %v924_v7 = vcombine.low %v1844_v30, %v1850_v31  ;;  %v2563_v6 = vld [vmem:[#allocation8_spill] sm:$0xff] }
  0x26   :  { %v872_v22 = vcombine.low %v864_v49, %v871_v53  ;;  %v889_v24 = vcombine.low %v881_v59, %v888_v62  ;;  %v915_v25 = vrot.slane %v907_v4, %v1742_v56  ;;  %v925_v8 = vcombine.low %v1856_v32, %v1862_v10 }
  0x27   :  { %v922_v26 = vrot.slane %v908_v21, %v1742_v56  ;;  %v906_v27 = vcombine.low %v898_v58, %v905_v23  ;;  %v932_v28 = vrot.slane %v924_v7, %v1742_v56  ;;  %v941_v29 = vcombine.low %v1868_v33, %v1874_v34  ;;  %v2567_v21 = vld [vmem:[#allocation3_spill] sm:$0xff]  ;;  %v2568_v7 = vld [vmem:[#allocation4_spill] sm:$0xff] }
  0x28   :  { %v942_v9 = vcombine.low %v1880_v35, %v1886_v17  ;;  %v939_v30 = vrot.slane %v925_v8, %v1742_v56  ;;  %v958_v31 = vcombine.low %v1892_v36, %v1898_v37  ;;  %v959_v3 = vcombine.low %v1904_v38, %v1910_v18 }
  0x29   :  { %v923_v11 = vcombine.low %v915_v25, %v922_v26  ;;  %v949_v32 = vrot.slane %v941_v29, %v1742_v56  ;;  %v975_v12 = vcombine.low %v1916_v39, %v1922_v40  ;;  %v976_v33 = vcombine.low %v1928_v42, %v1934_v43 }
  0x2a   :  { %v956_v10 = vrot.slane %v942_v9, %v1742_v56  ;;  %v737_v34 = vcombine.low %v1985_v14, %v1988_v15  ;;  %v940_v35 = vcombine.low %v932_v28, %v939_v30  ;;  %v966_v17 = vrot.slane %v958_v31, %v1742_v56  ;;  %v2147_v30 = vld [vmem:[%s2524_s0 + $0x10] sm:$0xff] }
  0x2b   :  { %v973_v36 = vrot.slane %v959_v3, %v1742_v56  ;;  %v738_v37 = vcombine.low %v1991_v63, %v1994_v60  ;;  %v983_v18 = vrot.slane %v975_v12, %v1742_v56  ;;  %v990_v49 = vrot.slane %v976_v33, %v1742_v56 }
  0x2c   :  { %v957_v38 = vcombine.low %v949_v32, %v956_v10  ;;  %v754_v39 = vcombine.low %v1997_v0, %v2000_v44  ;;  %v755_v40 = vcombine.low %v2003_v45, %v2006_v46  ;;  %v771_v14 = vcombine.low %v2009_v47, %v2012_v48 }
  0x2d   :  { %v974_v15 = vcombine.low %v966_v17, %v973_v36  ;;  %v728_v42 = vrot.slane %v720_v50, %v1742_v56  ;;  %v735_v43 = vrot.slane %v721_v2, %v1742_v56  ;;  %v772_v63 = vcombine.low %v2015_v20, %v2018_v51  ;;  %v2560_v50 = vld [vmem:[#allocation7_spill] sm:$0xff]  ;;  %v2570_v36 = vld [vmem:[#allocation9_spill] sm:$0xff] }
  0x2e   :  { %v991_v60 = vcombine.low %v983_v18, %v990_v49  ;;  %v2556_v1 = vunpack.c.l.bf16 %v1678_v55  ;;  %v2557_v0 = vunpack.c.h.bf16 %v1678_v55  ;;  %v2558_v45 = vunpack.c.l.bf16 %v1686_v57 }
  0x2f   :  { %v2559_v47 = vunpack.c.h.bf16 %v1686_v57  ;;  %v2561_v53 = vunpack.c.l.bf16 %v2560_v50  ;;  %v2562_v20 = vunpack.c.h.bf16 %v2560_v50  ;;  %v2564_v54 = vunpack.c.l.bf16 %v2563_v6  ;;  %v2566_v57 = vld [vmem:[#allocation10_spill] sm:$0xff] }
  0x30   :  { %v1016_v61 = vmul.f32 %v872_v22, %v2556_v1  ;;  %v1017_v44 = vmul.f32 %v889_v24, %v2557_v0  ;;  %v1018_v46 = vmul.f32 %v906_v27, %v2558_v45  ;;  %v2565_v55 = vunpack.c.h.bf16 %v2563_v6  ;;  %v2569_v27 = vld [vmem:[#allocation11_spill] sm:$0xff] }
  0x31   :  { %v2106_v48 = vmul.f32 %v923_v11, %v2559_v47  ;;  %v2110_v2 = vmul.f32 %v940_v35, %v2561_v53  ;;  %v2114_v51 = vmul.f32 %v957_v38, %v2562_v20  ;;  %v2118_v59 = vmul.f32 %v974_v15, %v2564_v54  ;;  %v2575_v20 = vld [vmem:[#allocation6_spill] sm:$0xff] }
  0x32   :  { %v2122_v62 = vmul.f32 %v991_v60, %v2565_v55  ;;  %v163_v4 = vrot.slane %v2566_v57, %v1582_v13  ;;  %v167_v22 = vrot.slane %v2566_v57, %v2567_v21  ;;  %v745_v58 = vrot.slane %v737_v34, %v1742_v56 }
  0x33   :  { %v752_v23 = vrot.slane %v738_v37, %v1742_v56  ;;  %v171_v24 = vrot.slane %v2566_v57, %v2568_v7  ;;  %v175_v25 = vrot.slane %v2566_v57, %v1591_v16  ;;  %v788_v26 = vcombine.low %v2021_v52, %v2026_v5 }
  0x34   :  { %v789_v8 = vcombine.low %v2029_v41, %v2032_v19  ;;  %v179_v28 = vrot.slane %v2569_v27, %v1582_v13  ;;  %v183_v29 = vrot.slane %v2569_v27, %v2567_v21  ;;  %v762_v9 = vrot.slane %v754_v39, %v1742_v56 }
  0x35   :  { %v769_v11 = vrot.slane %v755_v40, %v1742_v56  ;;  %v187_v52 = vrot.slane %v2569_v27, %v2568_v7  ;;  %v736_v5 = vcombine.low %v728_v42, %v735_v43  ;;  %v779_v41 = vrot.slane %v771_v14, %v1742_v56  ;;  %v2571_v14 = vld [vmem:[#allocation5_spill] sm:$0xff] }
  0x36   :  { %v786_v19 = vrot.slane %v772_v63, %v1742_v56  ;;  %v191_v31 = vrot.slane %v2569_v27, %v1591_v16  ;;  %v483_v3 = vrot.slane %v163_v4, %v1582_v13  ;;  %v487_v32 = vrot.slane %v167_v22, %v1582_v13 }
  0x37   :  { %v753_v10 = vcombine.low %v745_v58, %v752_v23  ;;  %v491_v12 = vrot.slane %v171_v24, %v1582_v13  ;;  %v495_v33 = vrot.slane %v175_v25, %v1582_v13  ;;  %v796_v34 = vrot.slane %v788_v26, %v1742_v56 }
  0x38   :  { %v803_v35 = vrot.slane %v789_v8, %v1742_v56  ;;  %v28_v17 = vunpack.c.l.bf16 %v2147_v30  ;;  %v2163_v37 = vunpack.c.h.bf16 %v2570_v36  ;;  %v2166_v38 = vrot.slane %v179_v28, %v1582_v13 }
  0x39   :  { %v770_v18 = vcombine.low %v762_v9, %v769_v11  ;;  %v2169_v49 = vrot.slane %v183_v29, %v1582_v13  ;;  %v2172_v39 = vrot.slane %v187_v52, %v1582_v13  ;;  %v787_v40 = vcombine.low %v779_v41, %v786_v19 }
  0x3a   :  { %v2572_v15 = vunpack.c.l.bf16 %v2571_v14  ;;  %v2177_v43 = vrot.slane %v191_v31, %v1582_v13  ;;  %v805_v63 = vcombine.low %v483_v3, %v487_v32  ;;  %v2573_v60 = vunpack.c.h.bf16 %v2571_v14 }
  0x3b   :  { %v1176_v0 = vcombine.high %v1016_v61, %v1016_v61  ;;  %v804_v45 = vcombine.low %v796_v34, %v803_v35  ;;  %v806_v47 = vcombine.low %v491_v12, %v495_v33  ;;  %v2182_v53 = vrot.slane %v1016_v61, %v1742_v56 }
  0x3c   :  { %v1008_v42 = vmul.f32 %v736_v5, %v2572_v15  ;;  %v1009_v1 = vmul.f32 %v753_v10, %v2573_v60  ;;  %v2576_v6 = vunpack.c.l.bf16 %v2575_v20  ;;  %v1193_v57 = vcombine.high %v1017_v44, %v1017_v44 }
  0x3d   :  { %2574 = vst [vmem:[#allocation7_spill] sm:$0xff] %v2182_v53  ;;  %v2187_v55 = vrot.slane %v1176_v0, %v1742_v56  ;;  %v2190_v4 = vrot.slane %v1017_v44, %v1742_v56  ;;  %v2577_v22 = vunpack.c.h.bf16 %v2575_v20  ;;  %v1210_v24 = vcombine.high %v1018_v46, %v1018_v46 }
  0x3e   :  { %v1040_v50 = vcombine.high %v1008_v42, %v1008_v42  ;;  %v1010_v54 = vmul.f32 %v770_v18, %v2576_v6  ;;  %v1047_v23 = vrot.slane %v1008_v42, %v1742_v56  ;;  %v2196_v25 = vrot.slane %v1018_v46, %v1742_v56 }
  0x3f   :  { %v1011_v58 = vmul.f32 %v787_v40, %v2577_v22  ;;  %v1057_v61 = vcombine.high %v1009_v1, %v1009_v1  ;;  %v1064_v26 = vrot.slane %v1009_v1, %v1742_v56  ;;  %v2200_v8 = vrot.slane %v1193_v57, %v1742_v56 }
  0x40   :  { %v1227_v27 = vcombine.high %v2106_v48, %v2106_v48  ;;  %v1054_v44 = vrot.slane %v1040_v50, %v1742_v56  ;;  %v2206_v28 = vrot.slane %v1210_v24, %v1742_v56  ;;  %v2210_v29 = vrot.slane %v2106_v48, %v1742_v56 }
  0x41   :  { %v1244_v46 = vcombine.high %v2110_v2, %v2110_v2  ;;  %v1074_v9 = vcombine.high %v1010_v54, %v1010_v54  ;;  %v2219_v52 = vrot.slane %v2110_v2, %v1742_v56  ;;  %v1261_v5 = vcombine.high %v2114_v51, %v2114_v51 }
  0x42   :  { %v2215_v11 = vrot.slane %v1227_v27, %v1742_v56  ;;  %v1055_v41 = vcombine.high %v1047_v23, %v1047_v23  ;;  %v1081_v19 = vrot.slane %v1010_v54, %v1742_v56  ;;  %v2229_v31 = vrot.slane %v2114_v51, %v1742_v56 }
  0x43   :  { %v2225_v48 = vrot.slane %v1244_v46, %v1742_v56  ;;  %v1091_v3 = vcombine.high %v1011_v58, %v1011_v58  ;;  %v2232_v32 = vrot.slane %v1011_v58, %v1742_v56  ;;  %v2235_v2 = vrot.slane %v1261_v5, %v1742_v56 }
  0x44   :  { %v1278_v10 = vcombine.high %v2118_v59, %v2118_v59  ;;  %v1056_v12 = vcombine.high %v1054_v44, %v1054_v44  ;;  %v1071_v33 = vrot.slane %v1057_v61, %v1742_v56  ;;  %v2242_v34 = vrot.slane %v2118_v59, %v1742_v56 }
  0x45   :  { %v1295_v51 = vcombine.high %v2122_v62, %v2122_v62  ;;  %v1088_v35 = vrot.slane %v1074_v9, %v1742_v56  ;;  %v2252_v18 = vrot.slane %v2122_v62, %v1742_v56  ;;  %v1377_v40 = vsel %vm1376_vm0, %v1047_v23, 0.0 }
  0x46   :  { %v2248_v36 = vrot.slane %v1278_v10, %v1742_v56  ;;  %v2256_v14 = vrot.slane %v805_v63, %v1742_v56  ;;  %v1378_v15 = vsel %vm1376_vm0, %v1055_v41, 0.0  ;;  %v1380_v42 = vsel %vm1376_vm0, %v1054_v44, 0.0 }
  0x47   :  { %v2259_v59 = vrot.slane %v1295_v51, %v1742_v56  ;;  %v2264_v60 = vrot.slane %v806_v47, %v1742_v56  ;;  %v2266_v1 = vmul.f32 %v804_v45, %v28_v17  ;;  %v1072_v0 = vcombine.high %v1064_v26, %v1064_v26 }
  0x48   :  { %v1379_v62 = vadd.f32 %v1378_v15, %v1377_v40  ;;  %v1089_v50 = vcombine.high %v1081_v19, %v1081_v19  ;;  %v2269_v20 = vrot.slane %v1091_v3, %v1742_v56  ;;  %v1382_v6 = vsel %vm1376_vm0, %v1056_v12, 0.0 }
  0x49   :  { %v1073_v54 = vcombine.high %v1071_v33, %v1071_v33  ;;  %v1090_v57 = vcombine.high %v1088_v35, %v1088_v35  ;;  %v1191_v22 = vcombine.high %v2182_v53, %v2182_v53  ;;  %v1192_v17 = vcombine.high %v2187_v55, %v2187_v55 }
  0x4a   :  { %v1381_v47 = vadd.f32 %v1380_v42, %v1379_v62  ;;  %v1208_v45 = vcombine.high %v2190_v4, %v2190_v4  ;;  %v1225_v58 = vcombine.high %v2196_v25, %v2196_v25  ;;  %v1384_v23 = vsel %vm1376_vm0, %v1064_v26, 0.0 }
  0x4b   :  { %v1209_v24 = vcombine.high %v2200_v8, %v2200_v8  ;;  %v1226_v61 = vcombine.high %v2206_v28, %v2206_v28  ;;  %v1242_v27 = vcombine.high %v2210_v29, %v2210_v29  ;;  %v1243_v46 = vcombine.high %v2215_v11, %v2215_v11 }
  0x4c   :  { %v1383_v44 = vadd.f32 %v1382_v6, %v1381_v47  ;;  %v1259_v9 = vcombine.high %v2219_v52, %v2219_v52  ;;  %v1260_v5 = vcombine.high %v2225_v48, %v2225_v48  ;;  %v1386_v26 = vsel %vm1376_vm0, %v1072_v0, 0.0 }
  0x4d   :  { %v1276_v41 = vcombine.high %v2229_v31, %v2229_v31  ;;  %v1277_v3 = vcombine.high %v2235_v2, %v2235_v2  ;;  %v1293_v10 = vcombine.high %v2242_v34, %v2242_v34  ;;  %v1294_v51 = vcombine.high %v2248_v36, %v2248_v36 }
  0x4e   :  { %v1385_v12 = vadd.f32 %v1384_v23, %v1383_v44  ;;  %v1310_v40 = vcombine.high %v2252_v18, %v2252_v18  ;;  %v1311_v15 = vcombine.high %v2259_v59, %v2259_v59  ;;  %v1388_v42 = vsel %vm1376_vm0, %v1071_v33, 0.0 }
  0x4f   :  { %v1390_v62 = vsel %vm1376_vm0, %v1073_v54, 0.0  ;;  %v1392_v6 = vsel %vm1376_vm0, %v1081_v19, 0.0  ;;  %v1394_v47 = vsel %vm1376_vm0, %v1089_v50, 0.0  ;;  %v1396_v23 = vsel %vm1376_vm0, %v1088_v35, 0.0 }
  0x50   :  { %v1387_v0 = vadd.f32 %v1386_v26, %v1385_v12  ;;  %v1398_v44 = vsel %vm1376_vm0, %v1090_v57, 0.0  ;;  %v2315_v63 = vsel %vm1376_vm0, %v1191_v22, 0.0  ;;  %v2319_v53 = vsel %vm1376_vm0, %v2187_v55, 0.0 }
  0x51   :  { %v2322_v33 = vsel %vm1376_vm0, %v1192_v17, 0.0  ;;  %v2326_v19 = vsel %vm1376_vm0, %v2190_v4, 0.0  ;;  %v2329_v50 = vsel %vm1376_vm0, %v1208_v45, 0.0  ;;  %v2333_v35 = vsel %vm1376_vm0, %v2200_v8, 0.0 }
  0x52   :  { %v1389_v56 = vadd.f32 %v1388_v42, %v1387_v0  ;;  %v2336_v54 = vsel %vm1376_vm0, %v1209_v24, 0.0  ;;  %v2340_v55 = vsel %vm1376_vm0, %v2196_v25, 0.0  ;;  %v2343_v57 = vsel %vm1376_vm0, %v1225_v58, 0.0 }
  0x53   :  { %v2347_v4 = vsel %vm1376_vm0, %v2206_v28, 0.0  ;;  %v2350_v17 = vsel %vm1376_vm0, %v1226_v61, 0.0  ;;  %v2354_v8 = vsel %vm1376_vm0, %v2210_v29, 0.0  ;;  %v2357_v45 = vsel %vm1376_vm0, %v1242_v27, 0.0 }
  0x54   :  { %v1391_v22 = vadd.f32 %v1390_v62, %v1389_v56  ;;  %v2361_v25 = vsel %vm1376_vm0, %v2215_v11, 0.0  ;;  %v2364_v56 = vsel %vm1376_vm0, %v1243_v46, 0.0  ;;  %v2368_v28 = vsel %vm1376_vm0, %v2219_v52, 0.0 }
  0x55   :  { %v2371_v24 = vsel %vm1376_vm0, %v1259_v9, 0.0  ;;  %v2375_v29 = vsel %vm1376_vm0, %v2225_v48, 0.0  ;;  %v2378_v61 = vsel %vm1376_vm0, %v1260_v5, 0.0  ;;  %v2382_v11 = vsel %vm1376_vm0, %v2229_v31, 0.0 }
  0x56   :  { %v1393_v58 = vadd.f32 %v1392_v6, %v1391_v22  ;;  %v2385_v27 = vsel %vm1376_vm0, %v1276_v41, 0.0  ;;  %v2389_v52 = vsel %vm1376_vm0, %v2235_v2, 0.0  ;;  %v2392_v46 = vsel %vm1376_vm0, %v1277_v3, 0.0  ;;  %v19_v6 = vld [vmem:[%s2524_s0 + $0x18] sm:$0xff] }
  0x57   :  { %v2396_v48 = vsel %vm1376_vm0, %v2242_v34, 0.0  ;;  %v2399_v5 = vsel %vm1376_vm0, %v1293_v10, 0.0  ;;  %v2403_v31 = vsel %vm1376_vm0, %v2248_v36, 0.0  ;;  %v2406_v26 = vsel %vm1376_vm0, %v1294_v51, 0.0 }
  0x58   :  { %v1395_v9 = vadd.f32 %v1394_v47, %v1393_v58  ;;  %v2410_v2 = vsel %vm1376_vm0, %v2252_v18, 0.0  ;;  %v2413_v41 = vsel %vm1376_vm0, %v1310_v40, 0.0  ;;  %v2417_v34 = vsel %vm1376_vm0, %v2259_v59, 0.0 }
  0x59   :  { %v29_v3 = vunpack.c.h.bf16 %v2147_v30  ;;  %v195_v36 = vrot.slane %v2163_v37, %v1582_v13  ;;  %v2423_v12 = vsel %vm1376_vm0, %v1311_v15, 0.0  ;;  %v199_v18 = vrot.slane %v2163_v37, %v2567_v21 }
  0x5a   :  { %v1397_v10 = vadd.f32 %v1396_v23, %v1395_v9  ;;  %v203_v51 = vrot.slane %v2163_v37, %v2568_v7  ;;  %v207_v40 = vrot.slane %v2163_v37, %v1591_v16  ;;  %v1400_v59 = vsel %vm1376_vm0, %v2232_v32, 0.0  ;;  %v2578_v16 = vld [vmem:[#allocation12_spill] sm:$0xff] }
  0x5b   :  { %v821_v30 = vcombine.low %v2256_v14, %v2264_v60  ;;  %v822_v42 = vcombine.low %v2166_v38, %v2169_v49  ;;  %v823_v15 = vcombine.low %v2172_v39, %v2177_v43  ;;  %v1107_v21 = vcombine.high %v2269_v20, %v2269_v20 }
  0x5c   :  { %v1399_v0 = vadd.f32 %v1398_v44, %v1397_v10  ;;  %v1108_v7 = vcombine.high %v2266_v1, %v2266_v1  ;;  %v1115_v37 = vrot.slane %v2266_v1, %v2578_v16  ;;  %v2579_v62 = vcombine.high %v2232_v32, %v2232_v32 }
  0x5d   :  { %v515_v38 = vrot.slane %v195_v36, %v1582_v13  ;;  %v519_v49 = vrot.slane %v199_v18, %v1582_v13  ;;  %v523_v39 = vrot.slane %v203_v51, %v1582_v13  ;;  %v1404_v43 = vsel %vm1376_vm0, %v2269_v20, 0.0 }
  0x5e   :  { %v1402_v14 = vsel %vm1376_vm0, %v2579_v62, 0.0  ;;  %v1401_v60 = vadd.f32 %v1400_v59, %v1399_v0  ;;  %v527_v1 = vrot.slane %v207_v40, %v1582_v13  ;;  %v830_v32 = vrot.slane %v822_v42, %v2578_v16 }
  0x5f   :  { %v837_v47 = vrot.slane %v823_v15, %v2578_v16  ;;  %v1013_v44 = vmul.f32 %v821_v30, %v29_v3  ;;  %v1122_v22 = vrot.slane %v1108_v7, %v2578_v16  ;;  %v1123_v58 = vcombine.high %v1115_v37, %v1115_v37 }
  0x60   :  { %v1403_v23 = vadd.f32 %v1402_v14, %v1401_v60  ;;  %v1406_v9 = vsel %vm1376_vm0, %v1107_v21, 0.0  ;;  %v30_v10 = vunpack.c.l.bf16 %v19_v6  ;;  %v1408_v20 = vsel %vm1376_vm0, %v1115_v37, 0.0 }
  0x61   :  { %v838_v18 = vcombine.low %v830_v32, %v837_v47  ;;  %v839_v51 = vcombine.low %v515_v38, %v519_v49  ;;  %v840_v59 = vcombine.low %v523_v39, %v527_v1  ;;  %v1124_v13 = vcombine.high %v1122_v22, %v1122_v22 }
  0x62   :  { %v1405_v36 = vadd.f32 %v1404_v43, %v1403_v23  ;;  %v1125_v40 = vcombine.high %v1013_v44, %v1013_v44  ;;  %v1132_v42 = vrot.slane %v1013_v44, %v2578_v16  ;;  %v1410_v15 = vsel %vm1376_vm0, %v1123_v58, 0.0 }
  0x63   :  { %v1412_v30 = vsel %vm1376_vm0, %v1122_v22, 0.0  ;;  %v847_v7 = vrot.slane %v839_v51, %v2578_v16  ;;  %v854_v21 = vrot.slane %v840_v59, %v2578_v16  ;;  %v1014_v14 = vmul.f32 %v838_v18, %v30_v10 }
  0x64   :  { %v1407_v0 = vadd.f32 %v1406_v9, %v1405_v36  ;;  %v1139_v37 = vrot.slane %v1125_v40, %v2578_v16  ;;  %v1140_v60 = vcombine.high %v1132_v42, %v1132_v42  ;;  %v1414_v38 = vsel %vm1376_vm0, %v1124_v13, 0.0 }
  0x65   :  { %v1416_v39 = vsel %vm1376_vm0, %v1132_v42, 0.0  ;;  %v31_v43 = vunpack.c.h.bf16 %v19_v6  ;;  %v855_v1 = vcombine.low %v847_v7, %v854_v21  ;;  %v1142_v23 = vcombine.high %v1014_v14, %v1014_v14 }
  0x66   :  { %v1409_v3 = vadd.f32 %v1408_v20, %v1407_v0  ;;  %v1141_v47 = vcombine.high %v1139_v37, %v1139_v37  ;;  %v1149_v44 = vrot.slane %v1014_v14, %v2578_v16  ;;  %v1418_v22 = vsel %vm1376_vm0, %v1140_v60, 0.0 }
  0x67   :  { %v1420_v9 = vsel %vm1376_vm0, %v1139_v37, 0.0  ;;  %v1015_v10 = vmul.f32 %v855_v1, %v31_v43  ;;  %v1156_v20 = vrot.slane %v1142_v23, %v2578_v16 }
  0x68   :  { %v1411_v62 = vadd.f32 %v1410_v15, %v1409_v3  ;;  %v1157_v18 = vcombine.high %v1149_v44, %v1149_v44  ;;  %v1422_v51 = vsel %vm1376_vm0, %v1141_v47, 0.0  ;;  %v1424_v6 = vsel %vm1376_vm0, %v1149_v44, 0.0  ;;  %v2580_v44 = vld [vmem:[#allocation7_spill] sm:$0xff] }
  0x69   :  { %v1158_v13 = vcombine.high %v1156_v20, %v1156_v20  ;;  %v1159_v40 = vcombine.high %v1015_v10, %v1015_v10  ;;  %v1166_v42 = vrot.slane %v1015_v10, %v2578_v16 }
  0x6a   :  { %v1413_v49 = vadd.f32 %v1412_v30, %v1411_v62  ;;  %v1426_v15 = vsel %vm1376_vm0, %v1157_v18, 0.0  ;;  %v1428_v30 = vsel %vm1376_vm0, %v1156_v20, 0.0 }
  0x6b   :  { %v1173_v21 = vrot.slane %v1159_v40, %v2578_v16  ;;  %v1174_v62 = vcombine.high %v1166_v42, %v1166_v42  ;;  %v1430_v14 = vsel %vm1376_vm0, %v1158_v13, 0.0  ;;  %v1432_v60 = vsel %vm1376_vm0, %v1166_v42, 0.0 }
  0x6c   :  { %v1415_v32 = vadd.f32 %v1414_v38, %v1413_v49  ;;  %v1440_v16 = vsel %vm1376_vm0, %v2580_v44, 0.0 }
  0x6d   :  { %v1175_v49 = vcombine.high %v1173_v21, %v1173_v21  ;;  %v1436_v1 = vsel %vm1376_vm0, %v1173_v21, 0.0 }
  0x6e   :  { %v1417_v58 = vadd.f32 %v1416_v39, %v1415_v32  ;;  %v1434_v39 = vsel %vm1376_vm0, %v1174_v62, 0.0 }
  0x6f   :  { %v1438_v47 = vsel %vm1376_vm0, %v1175_v49, 0.0 }
  0x70   :  { %v1419_v36 = vadd.f32 %v1418_v22, %v1417_v58 }
  0x72   :  { %v1421_v59 = vadd.f32 %v1420_v9, %v1419_v36 }
  0x74   :  { %v1423_v0 = vadd.f32 %v1422_v51, %v1421_v59 }
  0x76   :  { %v1425_v3 = vadd.f32 %v1424_v6, %v1423_v0 }
  0x78   :  { %v1427_v7 = vadd.f32 %v1426_v15, %v1425_v3 }
  0x7a   :  { %v1429_v37 = vadd.f32 %v1428_v30, %v1427_v7 }
  0x7c   :  { %v1431_v38 = vadd.f32 %v1430_v14, %v1429_v37 }
  0x7e   :  { %v1433_v43 = vadd.f32 %v1432_v60, %v1431_v38 }
  0x80   :  { %v1435_v32 = vadd.f32 %v1434_v39, %v1433_v43 }
  0x82   :  { %v1437_v23 = vadd.f32 %v1436_v1, %v1435_v32 }
  0x84   :  { %v1439_v22 = vadd.f32 %v1438_v47, %v1437_v23 }
  0x86   :  { %v1441_v58 = vadd.f32 %v1440_v16, %v1439_v22 }
  0x88   :  { %v1443_v9 = vadd.f32 %v2315_v63, %v1441_v58 }
  0x8a   :  { %v1445_v36 = vadd.f32 %v2319_v53, %v1443_v9 }
  0x8c   :  { %v1447_v10 = vadd.f32 %v2322_v33, %v1445_v36 }
  0x8e   :  { %v1449_v20 = vadd.f32 %v2326_v19, %v1447_v10 }
  0x90   :  { %v1451_v18 = vadd.f32 %v2329_v50, %v1449_v20 }
  0x92   :  { %v1453_v51 = vadd.f32 %v2333_v35, %v1451_v18 }
  0x94   :  { %v1455_v59 = vadd.f32 %v2336_v54, %v1453_v51 }
  0x96   :  { %v1457_v6 = vadd.f32 %v2340_v55, %v1455_v59 }
  0x98   :  { %v1459_v0 = vadd.f32 %v2343_v57, %v1457_v6 }
  0x9a   :  { %v1461_v13 = vadd.f32 %v2347_v4, %v1459_v0 }
  0x9c   :  { %v1463_v63 = vadd.f32 %v2350_v17, %v1461_v13 }
  0x9e   :  { %v1465_v53 = vadd.f32 %v2354_v8, %v1463_v63 }
  0xa0   :  { %v1467_v33 = vadd.f32 %v2357_v45, %v1465_v53 }
  0xa2   :  { %v1469_v19 = vadd.f32 %v2361_v25, %v1467_v33 }
  0xa4   :  { %v1471_v50 = vadd.f32 %v2364_v56, %v1469_v19 }
  0xa6   :  { %v1473_v35 = vadd.f32 %v2368_v28, %v1471_v50 }
  0xa8   :  { %v1475_v54 = vadd.f32 %v2371_v24, %v1473_v35 }
  0xaa   :  { %v1477_v55 = vadd.f32 %v2375_v29, %v1475_v54 }
  0xac   :  { %v1479_v57 = vadd.f32 %v2378_v61, %v1477_v55 }
  0xae   :  { %v1481_v4 = vadd.f32 %v2382_v11, %v1479_v57 }
  0xb0   :  { %v1483_v17 = vadd.f32 %v2385_v27, %v1481_v4 }
  0xb2   :  { %v1485_v8 = vadd.f32 %v2389_v52, %v1483_v17  ;;  %v1526_v52 = vld [vmem:[#allocation2] ss:$0 sm:$0xff] }
  0xb4   :  { %v1487_v45 = vadd.f32 %v2392_v46, %v1485_v8 }
  0xb6   :  { %v1489_v25 = vadd.f32 %v2396_v48, %v1487_v45 }
  0xb8   :  { %v1491_v56 = vadd.f32 %v2399_v5, %v1489_v25 }
  0xba   :  { %v1493_v28 = vadd.f32 %v2403_v31, %v1491_v56 }
  0xbc   :  { %v1495_v24 = vadd.f32 %v2406_v26, %v1493_v28 }
  0xbe   :  { %v1497_v29 = vadd.f32 %v2410_v2, %v1495_v24 }
  0xc0   :  { %v1499_v61 = vadd.f32 %v2413_v41, %v1497_v29 }
  0xc2   :  { %v1501_v11 = vadd.f32 %v2417_v34, %v1499_v61 }
  0xc4   :  { %v1503_v27 = vadd.f32 %v2423_v12, %v1501_v11 }
  0xc6   :  { %1504 = vadd.xlane.f32.xlu0 %v1503_v27 }
 0x14f   :  { %v1505_v40 = vpop.xlane.xlu0 %1504 }
 0x150   :  { %v1513_v46 = vadd.f32 %v1526_v52, %v1505_v40 }
 0x152   :  { %v1527_v42 = vmul.f32 -1.442695, %v1513_v46 }
 0x154   :  { %1529 = vpow2.f32 %v1527_v42 }
 0x161   :  { %v1530_v48 = vpop.eup %1529 }
 0x162   :  { %v1517_v5 = vadd.f32 1.0, %v1530_v48 }
 0x164   :  { %1531 = vrcp.f32 %v1517_v5 }
 0x171   :  { %v1532_v31 = vpop.eup %1531 }
 0x172   :  { %1521 = vst.msk [vmem:[%s2525_s3] sm:$0x3] %vm1520_vm1, %v1532_v31 }

// kernel: discriminator_forward.8
= control target key start
LH: loop header
LB: loop body
LE: loop exit
PB: predicated region body
PF: predicated region fallthrough
CT: control target
= control target key end

     0   :  { %s10376_s12 = smov 0   ;;  %s10378_s13 = smov 0   ;;  %s12595_s0 = inlined_call_operand.vmem [shape: bf16[32,4096], index: 0, kind: input, shape index: {}]   ;;  %s12596_s1 = inlined_call_operand.vmem [shape: bf16[4096,512], index: 1, kind: input, shape index: {}]   ;;  %s12597_s2 = inlined_call_operand.vmem [shape: f32[1,512], index: 2, kind: input, shape index: {}]   ;;  %s12598_s3 = inlined_call_operand.vmem [shape: bf16[32,512], index: 3, kind: output, shape index: {}]  }
   0x1   :  { %s10380_s14 = smov 0   ;;  %s10382_s15 = smov 0  }
   0x2   :  { %s10384_s16 = smov 0  }
   0x3 LB: > { %s22_s17 = sadd.s32 1, %s10350_s15  ;;  %s8905_s18 = sadd.s32 4294967295, %s10354_s16   ;;  %s10354_s16 = sphi %s10384_s16, %s13_s16   ;;  %s10350_s15 = sphi %s10382_s15, %s12641_s15   ;;  %s10346_s14 = sphi %s10380_s14, %s12640_s14   ;;  %s10342_s13 = sphi %s10378_s13, %s12639_s13   ;;  %s10338_s12 = sphi %s10376_s12, %s12638_s12  }
   0x4   : > { %p23_p0 = scmp.ge.s32.totalorder %s22_s17, 2  ;;  %p65_p1 = scmp.ne.s32.totalorder %s10342_s13, %s10338_s12 }
   0x5   : > { %p66_p2 = scmp.eq.s32.totalorder %s10354_s16, 0  ;;  %p123_p4 = scmp.eq.s32.totalorder %s8905_s18, 1 }
   0x6   : > { %s12643_s17 = smov (%p23_p0, %s22_s17), 0  ;;  %s58_s20 = sadd.s32 1, %s10342_s13 }
   0x7   : > { %p67_p3 = por %p66_p2, %p65_p1  ;;  %s55_s19 = ssub.s32 %s10350_s15, %s12643_s17 }
   0x8   : > { %p56_p5 = scmp.eq.s32.totalorder %s55_s19, 0  ;;  %p10411_p6 = por %p123_p4, %p65_p1 }
   0x9   : > { %p8909_p7 = scmp.ge.s32.totalorder %s10354_s16, 2 }
   0xa   : > { %s10416_s22 = scalar_select %p56_p5, %s10342_s13, %s58_s20  }
   0xb   : > { %155 = sbr.rel (%p8909_p7) target bundleno = 276 (0x114), region = 20 }
  0x10   : > { %158 = sbr.rel (!%p67_p3) target bundleno = 276 (0x114), region = 24  ;;  %s160_s23 = sand.u32 (%p67_p3), 1, %s10342_s13  }
  0x11   : > { %s9502_s24 = sshll.u32 (%p67_p3), %s10350_s15, 3  ;;  %s8910_s25 = sshll.u32 (%p67_p3), %s160_s23, 12 }
  0x12   : > { %s10424_s28 = scalar_lea.vmem (%p67_p3), %s12596_s1, %s9502_s24  ;;  %s10429_s29 = scalar_lea.vmem (%p67_p3), [#allocation2], %s8910_s25 }
  0x13   : > { %v1219_v0 = vld [vmem:[%s10424_s28] sm:$0xff] (%p67_p3)  ;;  %v1221_v1 = vld [vmem:[%s10424_s28 + $0x10] sm:$0xff] (%p67_p3) }
  0x14   : > { %v1223_v2 = vld [vmem:[%s10424_s28 + $0x20] sm:$0xff] (%p67_p3)  ;;  %1220 = vst [vmem:[%s10429_s29] sm:$0xff] (%p67_p3), %v1219_v0  ;;  %1222 = vst [vmem:[%s10429_s29 + $0x8] sm:$0xff] (%p67_p3), %v1221_v1  ;;  %v1225_v3 = vld [vmem:[%s10424_s28 + $0x30] sm:$0xff] (%p67_p3) }
  0x15   : > { %1224 = vst [vmem:[%s10429_s29 + $0x10] sm:$0xff] %v1223_v2  ;;  %v1227_v4 = vld [vmem:[%s10424_s28 + $0x40] sm:$0xff]  ;;  %v1229_v5 = vld [vmem:[%s10424_s28 + $0x50] sm:$0xff]  ;;  %1226 = vst [vmem:[%s10429_s29 + $0x18] sm:$0xff] %v1225_v3 }
  0x16   : > { %1228 = vst [vmem:[%s10429_s29 + $0x20] sm:$0xff] %v1227_v4  ;;  %1230 = vst [vmem:[%s10429_s29 + $0x28] sm:$0xff] %v1229_v5  ;;  %v1231_v6 = vld [vmem:[%s10424_s28 + $0x60] sm:$0xff]  ;;  %v1233_v7 = vld [vmem:[%s10424_s28 + $0x70] sm:$0xff] }
  0x17   : > { %v1235_v8 = vld [vmem:[%s10424_s28 + $0x80] sm:$0xff]  ;;  %1232 = vst [vmem:[%s10429_s29 + $0x30] sm:$0xff] %v1231_v6  ;;  %1234 = vst [vmem:[%s10429_s29 + $0x38] sm:$0xff] %v1233_v7  ;;  %v1237_v9 = vld [vmem:[%s10424_s28 + $0x90] sm:$0xff] }
  0x18   : > { %1236 = vst [vmem:[%s10429_s29 + $0x40] sm:$0xff] %v1235_v8  ;;  %v1239_v10 = vld [vmem:[%s10424_s28 + $0xa0] sm:$0xff]  ;;  %v1241_v11 = vld [vmem:[%s10424_s28 + $0xb0] sm:$0xff]  ;;  %1238 = vst [vmem:[%s10429_s29 + $0x48] sm:$0xff] %v1237_v9 }
  0x19   : > { %1240 = vst [vmem:[%s10429_s29 + $0x50] sm:$0xff] %v1239_v10  ;;  %1242 = vst [vmem:[%s10429_s29 + $0x58] sm:$0xff] %v1241_v11  ;;  %v1243_v12 = vld [vmem:[%s10424_s28 + $0xc0] sm:$0xff]  ;;  %v1245_v13 = vld [vmem:[%s10424_s28 + $0xd0] sm:$0xff] }
  0x1a   : > { %v1247_v14 = vld [vmem:[%s10424_s28 + $0xe0] sm:$0xff]  ;;  %1244 = vst [vmem:[%s10429_s29 + $0x60] sm:$0xff] %v1243_v12  ;;  %1246 = vst [vmem:[%s10429_s29 + $0x68] sm:$0xff] %v1245_v13  ;;  %v1249_v15 = vld [vmem:[%s10424_s28 + $0xf0] sm:$0xff] }
  0x1b   : > { %1248 = vst [vmem:[%s10429_s29 + $0x70] sm:$0xff] %v1247_v14  ;;  %v1251_v16 = vld [vmem:[%s10424_s28 + $0x100] sm:$0xff]  ;;  %v1253_v17 = vld [vmem:[%s10424_s28 + $0x110] sm:$0xff]  ;;  %1250 = vst [vmem:[%s10429_s29 + $0x78] sm:$0xff] %v1249_v15 }
  0x1c   : > { %1252 = vst [vmem:[%s10429_s29 + $0x80] sm:$0xff] %v1251_v16  ;;  %1254 = vst [vmem:[%s10429_s29 + $0x88] sm:$0xff] %v1253_v17  ;;  %v1255_v18 = vld [vmem:[%s10424_s28 + $0x120] sm:$0xff]  ;;  %v1257_v19 = vld [vmem:[%s10424_s28 + $0x130] sm:$0xff] }
  0x1d   : > { %v1259_v20 = vld [vmem:[%s10424_s28 + $0x140] sm:$0xff]  ;;  %1256 = vst [vmem:[%s10429_s29 + $0x90] sm:$0xff] %v1255_v18  ;;  %1258 = vst [vmem:[%s10429_s29 + $0x98] sm:$0xff] %v1257_v19  ;;  %v1261_v21 = vld [vmem:[%s10424_s28 + $0x150] sm:$0xff] }
  0x1e   : > { %1260 = vst [vmem:[%s10429_s29 + $0xa0] sm:$0xff] %v1259_v20  ;;  %v1263_v22 = vld [vmem:[%s10424_s28 + $0x160] sm:$0xff]  ;;  %v1265_v23 = vld [vmem:[%s10424_s28 + $0x170] sm:$0xff]  ;;  %1262 = vst [vmem:[%s10429_s29 + $0xa8] sm:$0xff] %v1261_v21 }
  0x1f   : > { %1264 = vst [vmem:[%s10429_s29 + $0xb0] sm:$0xff] %v1263_v22  ;;  %1266 = vst [vmem:[%s10429_s29 + $0xb8] sm:$0xff] %v1265_v23  ;;  %v1267_v24 = vld [vmem:[%s10424_s28 + $0x180] sm:$0xff]  ;;  %v1269_v25 = vld [vmem:[%s10424_s28 + $0x190] sm:$0xff] }
  0x20   : > { %v1271_v26 = vld [vmem:[%s10424_s28 + $0x1a0] sm:$0xff]  ;;  %1268 = vst [vmem:[%s10429_s29 + $0xc0] sm:$0xff] %v1267_v24  ;;  %1270 = vst [vmem:[%s10429_s29 + $0xc8] sm:$0xff] %v1269_v25  ;;  %v1273_v27 = vld [vmem:[%s10424_s28 + $0x1b0] sm:$0xff] }
  0x21   : > { %1272 = vst [vmem:[%s10429_s29 + $0xd0] sm:$0xff] %v1271_v26  ;;  %v1275_v28 = vld [vmem:[%s10424_s28 + $0x1c0] sm:$0xff]  ;;  %v1277_v29 = vld [vmem:[%s10424_s28 + $0x1d0] sm:$0xff]  ;;  %1274 = vst [vmem:[%s10429_s29 + $0xd8] sm:$0xff] %v1273_v27 }
  0x22   : > { %1276 = vst [vmem:[%s10429_s29 + $0xe0] sm:$0xff] %v1275_v28  ;;  %1278 = vst [vmem:[%s10429_s29 + $0xe8] sm:$0xff] %v1277_v29  ;;  %v1279_v30 = vld [vmem:[%s10424_s28 + $0x1e0] sm:$0xff]  ;;  %v1281_v31 = vld [vmem:[%s10424_s28 + $0x1f0] sm:$0xff] }
  0x23   : > { %v1283_v32 = vld [vmem:[%s10424_s28 + $0x200] sm:$0xff]  ;;  %1280 = vst [vmem:[%s10429_s29 + $0xf0] sm:$0xff] %v1279_v30  ;;  %1282 = vst [vmem:[%s10429_s29 + $0xf8] sm:$0xff] %v1281_v31  ;;  %v1285_v33 = vld [vmem:[%s10424_s28 + $0x210] sm:$0xff] }
  0x24   : > { %1284 = vst [vmem:[%s10429_s29 + $0x100] sm:$0xff] %v1283_v32  ;;  %v1287_v34 = vld [vmem:[%s10424_s28 + $0x220] sm:$0xff]  ;;  %v1289_v35 = vld [vmem:[%s10424_s28 + $0x230] sm:$0xff]  ;;  %1286 = vst [vmem:[%s10429_s29 + $0x108] sm:$0xff] %v1285_v33 }
  0x25   : > { %1288 = vst [vmem:[%s10429_s29 + $0x110] sm:$0xff] %v1287_v34  ;;  %1290 = vst [vmem:[%s10429_s29 + $0x118] sm:$0xff] %v1289_v35  ;;  %v1291_v36 = vld [vmem:[%s10424_s28 + $0x240] sm:$0xff]  ;;  %v1293_v37 = vld [vmem:[%s10424_s28 + $0x250] sm:$0xff] }
  0x26   : > { %v1295_v38 = vld [vmem:[%s10424_s28 + $0x260] sm:$0xff]  ;;  %1292 = vst [vmem:[%s10429_s29 + $0x120] sm:$0xff] %v1291_v36  ;;  %1294 = vst [vmem:[%s10429_s29 + $0x128] sm:$0xff] %v1293_v37  ;;  %v1297_v39 = vld [vmem:[%s10424_s28 + $0x270] sm:$0xff] }
  0x27   : > { %1296 = vst [vmem:[%s10429_s29 + $0x130] sm:$0xff] %v1295_v38  ;;  %v1299_v40 = vld [vmem:[%s10424_s28 + $0x280] sm:$0xff]  ;;  %v1301_v41 = vld [vmem:[%s10424_s28 + $0x290] sm:$0xff]  ;;  %1298 = vst [vmem:[%s10429_s29 + $0x138] sm:$0xff] %v1297_v39 }
  0x28   : > { %1300 = vst [vmem:[%s10429_s29 + $0x140] sm:$0xff] %v1299_v40  ;;  %1302 = vst [vmem:[%s10429_s29 + $0x148] sm:$0xff] %v1301_v41  ;;  %v1303_v42 = vld [vmem:[%s10424_s28 + $0x2a0] sm:$0xff]  ;;  %v1305_v43 = vld [vmem:[%s10424_s28 + $0x2b0] sm:$0xff] }
  0x29   : > { %v1307_v44 = vld [vmem:[%s10424_s28 + $0x2c0] sm:$0xff]  ;;  %1304 = vst [vmem:[%s10429_s29 + $0x150] sm:$0xff] %v1303_v42  ;;  %1306 = vst [vmem:[%s10429_s29 + $0x158] sm:$0xff] %v1305_v43  ;;  %v1309_v45 = vld [vmem:[%s10424_s28 + $0x2d0] sm:$0xff] }
  0x2a   : > { %1308 = vst [vmem:[%s10429_s29 + $0x160] sm:$0xff] %v1307_v44  ;;  %v1311_v46 = vld [vmem:[%s10424_s28 + $0x2e0] sm:$0xff]  ;;  %v1313_v47 = vld [vmem:[%s10424_s28 + $0x2f0] sm:$0xff]  ;;  %1310 = vst [vmem:[%s10429_s29 + $0x168] sm:$0xff] %v1309_v45 }
  0x2b   : > { %1312 = vst [vmem:[%s10429_s29 + $0x170] sm:$0xff] %v1311_v46  ;;  %1314 = vst [vmem:[%s10429_s29 + $0x178] sm:$0xff] %v1313_v47  ;;  %v1315_v48 = vld [vmem:[%s10424_s28 + $0x300] sm:$0xff]  ;;  %v1317_v49 = vld [vmem:[%s10424_s28 + $0x310] sm:$0xff] }
  0x2c   : > { %v1319_v50 = vld [vmem:[%s10424_s28 + $0x320] sm:$0xff]  ;;  %1316 = vst [vmem:[%s10429_s29 + $0x180] sm:$0xff] %v1315_v48  ;;  %1318 = vst [vmem:[%s10429_s29 + $0x188] sm:$0xff] %v1317_v49  ;;  %v1321_v51 = vld [vmem:[%s10424_s28 + $0x330] sm:$0xff] }
  0x2d   : > { %1320 = vst [vmem:[%s10429_s29 + $0x190] sm:$0xff] %v1319_v50  ;;  %v1323_v52 = vld [vmem:[%s10424_s28 + $0x340] sm:$0xff]  ;;  %v1325_v53 = vld [vmem:[%s10424_s28 + $0x350] sm:$0xff]  ;;  %1322 = vst [vmem:[%s10429_s29 + $0x198] sm:$0xff] %v1321_v51 }
  0x2e   : > { %1324 = vst [vmem:[%s10429_s29 + $0x1a0] sm:$0xff] %v1323_v52  ;;  %1326 = vst [vmem:[%s10429_s29 + $0x1a8] sm:$0xff] %v1325_v53  ;;  %v1327_v54 = vld [vmem:[%s10424_s28 + $0x360] sm:$0xff]  ;;  %v1329_v55 = vld [vmem:[%s10424_s28 + $0x370] sm:$0xff] }
  0x2f   : > { %v1331_v56 = vld [vmem:[%s10424_s28 + $0x380] sm:$0xff]  ;;  %1328 = vst [vmem:[%s10429_s29 + $0x1b0] sm:$0xff] %v1327_v54  ;;  %1330 = vst [vmem:[%s10429_s29 + $0x1b8] sm:$0xff] %v1329_v55  ;;  %v1333_v57 = vld [vmem:[%s10424_s28 + $0x390] sm:$0xff] }
  0x30   : > { %1332 = vst [vmem:[%s10429_s29 + $0x1c0] sm:$0xff] %v1331_v56  ;;  %v1335_v58 = vld [vmem:[%s10424_s28 + $0x3a0] sm:$0xff]  ;;  %v1337_v59 = vld [vmem:[%s10424_s28 + $0x3b0] sm:$0xff]  ;;  %1334 = vst [vmem:[%s10429_s29 + $0x1c8] sm:$0xff] %v1333_v57 }
  0x31   : > { %1336 = vst [vmem:[%s10429_s29 + $0x1d0] sm:$0xff] %v1335_v58  ;;  %1338 = vst [vmem:[%s10429_s29 + $0x1d8] sm:$0xff] %v1337_v59  ;;  %v1339_v60 = vld [vmem:[%s10424_s28 + $0x3c0] sm:$0xff]  ;;  %v1341_v61 = vld [vmem:[%s10424_s28 + $0x3d0] sm:$0xff] }
  0x32   : > { %v1343_v62 = vld [vmem:[%s10424_s28 + $0x3e0] sm:$0xff]  ;;  %1340 = vst [vmem:[%s10429_s29 + $0x1e0] sm:$0xff] %v1339_v60  ;;  %1342 = vst [vmem:[%s10429_s29 + $0x1e8] sm:$0xff] %v1341_v61  ;;  %v1345_v63 = vld [vmem:[%s10424_s28 + $0x3f0] sm:$0xff] }
  0x33   : > { %1344 = vst [vmem:[%s10429_s29 + $0x1f0] sm:$0xff] %v1343_v62  ;;  %v1347_v0 = vld [vmem:[%s10424_s28 + $0x400] sm:$0xff]  ;;  %v1349_v1 = vld [vmem:[%s10424_s28 + $0x410] sm:$0xff]  ;;  %1346 = vst [vmem:[%s10429_s29 + $0x1f8] sm:$0xff] %v1345_v63 }
  0x34   : > { %1348 = vst [vmem:[%s10429_s29 + $0x200] sm:$0xff] %v1347_v0  ;;  %1350 = vst [vmem:[%s10429_s29 + $0x208] sm:$0xff] %v1349_v1  ;;  %v1351_v2 = vld [vmem:[%s10424_s28 + $0x420] sm:$0xff]  ;;  %v1353_v3 = vld [vmem:[%s10424_s28 + $0x430] sm:$0xff] }
  0x35   : > { %v1355_v4 = vld [vmem:[%s10424_s28 + $0x440] sm:$0xff]  ;;  %1352 = vst [vmem:[%s10429_s29 + $0x210] sm:$0xff] %v1351_v2  ;;  %1354 = vst [vmem:[%s10429_s29 + $0x218] sm:$0xff] %v1353_v3  ;;  %v1357_v5 = vld [vmem:[%s10424_s28 + $0x450] sm:$0xff] }
  0x36   : > { %1356 = vst [vmem:[%s10429_s29 + $0x220] sm:$0xff] %v1355_v4  ;;  %v1359_v6 = vld [vmem:[%s10424_s28 + $0x460] sm:$0xff]  ;;  %v1361_v7 = vld [vmem:[%s10424_s28 + $0x470] sm:$0xff]  ;;  %1358 = vst [vmem:[%s10429_s29 + $0x228] sm:$0xff] %v1357_v5 }
  0x37   : > { %1360 = vst [vmem:[%s10429_s29 + $0x230] sm:$0xff] %v1359_v6  ;;  %1362 = vst [vmem:[%s10429_s29 + $0x238] sm:$0xff] %v1361_v7  ;;  %v1363_v8 = vld [vmem:[%s10424_s28 + $0x480] sm:$0xff]  ;;  %v1365_v9 = vld [vmem:[%s10424_s28 + $0x490] sm:$0xff] }
  0x38   : > { %v1367_v10 = vld [vmem:[%s10424_s28 + $0x4a0] sm:$0xff]  ;;  %1364 = vst [vmem:[%s10429_s29 + $0x240] sm:$0xff] %v1363_v8  ;;  %1366 = vst [vmem:[%s10429_s29 + $0x248] sm:$0xff] %v1365_v9  ;;  %v1369_v11 = vld [vmem:[%s10424_s28 + $0x4b0] sm:$0xff] }
  0x39   : > { %1368 = vst [vmem:[%s10429_s29 + $0x250] sm:$0xff] %v1367_v10  ;;  %v1371_v12 = vld [vmem:[%s10424_s28 + $0x4c0] sm:$0xff]  ;;  %v1373_v13 = vld [vmem:[%s10424_s28 + $0x4d0] sm:$0xff]  ;;  %1370 = vst [vmem:[%s10429_s29 + $0x258] sm:$0xff] %v1369_v11 }
  0x3a   : > { %1372 = vst [vmem:[%s10429_s29 + $0x260] sm:$0xff] %v1371_v12  ;;  %1374 = vst [vmem:[%s10429_s29 + $0x268] sm:$0xff] %v1373_v13  ;;  %v1375_v14 = vld [vmem:[%s10424_s28 + $0x4e0] sm:$0xff]  ;;  %v1377_v15 = vld [vmem:[%s10424_s28 + $0x4f0] sm:$0xff] }
  0x3b   : > { %v1379_v16 = vld [vmem:[%s10424_s28 + $0x500] sm:$0xff]  ;;  %1376 = vst [vmem:[%s10429_s29 + $0x270] sm:$0xff] %v1375_v14  ;;  %1378 = vst [vmem:[%s10429_s29 + $0x278] sm:$0xff] %v1377_v15  ;;  %v1381_v17 = vld [vmem:[%s10424_s28 + $0x510] sm:$0xff] }
  0x3c   : > { %1380 = vst [vmem:[%s10429_s29 + $0x280] sm:$0xff] %v1379_v16  ;;  %v1383_v18 = vld [vmem:[%s10424_s28 + $0x520] sm:$0xff]  ;;  %v1385_v19 = vld [vmem:[%s10424_s28 + $0x530] sm:$0xff]  ;;  %1382 = vst [vmem:[%s10429_s29 + $0x288] sm:$0xff] %v1381_v17 }
  0x3d   : > { %1384 = vst [vmem:[%s10429_s29 + $0x290] sm:$0xff] %v1383_v18  ;;  %1386 = vst [vmem:[%s10429_s29 + $0x298] sm:$0xff] %v1385_v19  ;;  %v1387_v20 = vld [vmem:[%s10424_s28 + $0x540] sm:$0xff]  ;;  %v1389_v21 = vld [vmem:[%s10424_s28 + $0x550] sm:$0xff] }
  0x3e   : > { %v1391_v22 = vld [vmem:[%s10424_s28 + $0x560] sm:$0xff]  ;;  %1388 = vst [vmem:[%s10429_s29 + $0x2a0] sm:$0xff] %v1387_v20  ;;  %1390 = vst [vmem:[%s10429_s29 + $0x2a8] sm:$0xff] %v1389_v21  ;;  %v1393_v23 = vld [vmem:[%s10424_s28 + $0x570] sm:$0xff] }
  0x3f   : > { %1392 = vst [vmem:[%s10429_s29 + $0x2b0] sm:$0xff] %v1391_v22  ;;  %v1395_v24 = vld [vmem:[%s10424_s28 + $0x580] sm:$0xff]  ;;  %v1397_v25 = vld [vmem:[%s10424_s28 + $0x590] sm:$0xff]  ;;  %1394 = vst [vmem:[%s10429_s29 + $0x2b8] sm:$0xff] %v1393_v23 }
  0x40   : > { %1396 = vst [vmem:[%s10429_s29 + $0x2c0] sm:$0xff] %v1395_v24  ;;  %1398 = vst [vmem:[%s10429_s29 + $0x2c8] sm:$0xff] %v1397_v25  ;;  %v1399_v26 = vld [vmem:[%s10424_s28 + $0x5a0] sm:$0xff]  ;;  %v1401_v27 = vld [vmem:[%s10424_s28 + $0x5b0] sm:$0xff] }
  0x41   : > { %v1403_v28 = vld [vmem:[%s10424_s28 + $0x5c0] sm:$0xff]  ;;  %1400 = vst [vmem:[%s10429_s29 + $0x2d0] sm:$0xff] %v1399_v26  ;;  %1402 = vst [vmem:[%s10429_s29 + $0x2d8] sm:$0xff] %v1401_v27  ;;  %v1405_v29 = vld [vmem:[%s10424_s28 + $0x5d0] sm:$0xff] }
  0x42   : > { %1404 = vst [vmem:[%s10429_s29 + $0x2e0] sm:$0xff] %v1403_v28  ;;  %v1407_v30 = vld [vmem:[%s10424_s28 + $0x5e0] sm:$0xff]  ;;  %v1409_v31 = vld [vmem:[%s10424_s28 + $0x5f0] sm:$0xff]  ;;  %1406 = vst [vmem:[%s10429_s29 + $0x2e8] sm:$0xff] %v1405_v29 }
  0x43   : > { %1408 = vst [vmem:[%s10429_s29 + $0x2f0] sm:$0xff] %v1407_v30  ;;  %1410 = vst [vmem:[%s10429_s29 + $0x2f8] sm:$0xff] %v1409_v31  ;;  %v1411_v32 = vld [vmem:[%s10424_s28 + $0x600] sm:$0xff]  ;;  %v1413_v33 = vld [vmem:[%s10424_s28 + $0x610] sm:$0xff] }
  0x44   : > { %v1415_v34 = vld [vmem:[%s10424_s28 + $0x620] sm:$0xff]  ;;  %1412 = vst [vmem:[%s10429_s29 + $0x300] sm:$0xff] %v1411_v32  ;;  %1414 = vst [vmem:[%s10429_s29 + $0x308] sm:$0xff] %v1413_v33  ;;  %v1417_v35 = vld [vmem:[%s10424_s28 + $0x630] sm:$0xff] }
  0x45   : > { %1416 = vst [vmem:[%s10429_s29 + $0x310] sm:$0xff] %v1415_v34  ;;  %v1419_v36 = vld [vmem:[%s10424_s28 + $0x640] sm:$0xff]  ;;  %v1421_v37 = vld [vmem:[%s10424_s28 + $0x650] sm:$0xff]  ;;  %1418 = vst [vmem:[%s10429_s29 + $0x318] sm:$0xff] %v1417_v35 }
  0x46   : > { %1420 = vst [vmem:[%s10429_s29 + $0x320] sm:$0xff] %v1419_v36  ;;  %1422 = vst [vmem:[%s10429_s29 + $0x328] sm:$0xff] %v1421_v37  ;;  %v1423_v38 = vld [vmem:[%s10424_s28 + $0x660] sm:$0xff]  ;;  %v1425_v39 = vld [vmem:[%s10424_s28 + $0x670] sm:$0xff] }
  0x47   : > { %v1427_v40 = vld [vmem:[%s10424_s28 + $0x680] sm:$0xff]  ;;  %1424 = vst [vmem:[%s10429_s29 + $0x330] sm:$0xff] %v1423_v38  ;;  %1426 = vst [vmem:[%s10429_s29 + $0x338] sm:$0xff] %v1425_v39  ;;  %v1429_v41 = vld [vmem:[%s10424_s28 + $0x690] sm:$0xff] }
  0x48   : > { %1428 = vst [vmem:[%s10429_s29 + $0x340] sm:$0xff] %v1427_v40  ;;  %v1431_v42 = vld [vmem:[%s10424_s28 + $0x6a0] sm:$0xff]  ;;  %v1433_v43 = vld [vmem:[%s10424_s28 + $0x6b0] sm:$0xff]  ;;  %1430 = vst [vmem:[%s10429_s29 + $0x348] sm:$0xff] %v1429_v41 }
  0x49   : > { %1432 = vst [vmem:[%s10429_s29 + $0x350] sm:$0xff] %v1431_v42  ;;  %1434 = vst [vmem:[%s10429_s29 + $0x358] sm:$0xff] %v1433_v43  ;;  %v1435_v44 = vld [vmem:[%s10424_s28 + $0x6c0] sm:$0xff]  ;;  %v1437_v45 = vld [vmem:[%s10424_s28 + $0x6d0] sm:$0xff] }
  0x4a   : > { %v1439_v46 = vld [vmem:[%s10424_s28 + $0x6e0] sm:$0xff]  ;;  %1436 = vst [vmem:[%s10429_s29 + $0x360] sm:$0xff] %v1435_v44  ;;  %1438 = vst [vmem:[%s10429_s29 + $0x368] sm:$0xff] %v1437_v45  ;;  %v1441_v47 = vld [vmem:[%s10424_s28 + $0x6f0] sm:$0xff] }
  0x4b   : > { %1440 = vst [vmem:[%s10429_s29 + $0x370] sm:$0xff] %v1439_v46  ;;  %v1443_v48 = vld [vmem:[%s10424_s28 + $0x700] sm:$0xff]  ;;  %v1445_v49 = vld [vmem:[%s10424_s28 + $0x710] sm:$0xff]  ;;  %1442 = vst [vmem:[%s10429_s29 + $0x378] sm:$0xff] %v1441_v47 }
  0x4c   : > { %1444 = vst [vmem:[%s10429_s29 + $0x380] sm:$0xff] %v1443_v48  ;;  %1446 = vst [vmem:[%s10429_s29 + $0x388] sm:$0xff] %v1445_v49  ;;  %v1447_v50 = vld [vmem:[%s10424_s28 + $0x720] sm:$0xff]  ;;  %v1449_v51 = vld [vmem:[%s10424_s28 + $0x730] sm:$0xff] }
  0x4d   : > { %v1451_v52 = vld [vmem:[%s10424_s28 + $0x740] sm:$0xff]  ;;  %1448 = vst [vmem:[%s10429_s29 + $0x390] sm:$0xff] %v1447_v50  ;;  %1450 = vst [vmem:[%s10429_s29 + $0x398] sm:$0xff] %v1449_v51  ;;  %v1453_v53 = vld [vmem:[%s10424_s28 + $0x750] sm:$0xff] }
  0x4e   : > { %1452 = vst [vmem:[%s10429_s29 + $0x3a0] sm:$0xff] %v1451_v52  ;;  %v1455_v54 = vld [vmem:[%s10424_s28 + $0x760] sm:$0xff]  ;;  %v1457_v55 = vld [vmem:[%s10424_s28 + $0x770] sm:$0xff]  ;;  %1454 = vst [vmem:[%s10429_s29 + $0x3a8] sm:$0xff] %v1453_v53 }
  0x4f   : > { %1456 = vst [vmem:[%s10429_s29 + $0x3b0] sm:$0xff] %v1455_v54  ;;  %1458 = vst [vmem:[%s10429_s29 + $0x3b8] sm:$0xff] %v1457_v55  ;;  %v1459_v56 = vld [vmem:[%s10424_s28 + $0x780] sm:$0xff]  ;;  %v1461_v57 = vld [vmem:[%s10424_s28 + $0x790] sm:$0xff] }
  0x50   : > { %v1463_v58 = vld [vmem:[%s10424_s28 + $0x7a0] sm:$0xff]  ;;  %1460 = vst [vmem:[%s10429_s29 + $0x3c0] sm:$0xff] %v1459_v56  ;;  %1462 = vst [vmem:[%s10429_s29 + $0x3c8] sm:$0xff] %v1461_v57  ;;  %v1465_v59 = vld [vmem:[%s10424_s28 + $0x7b0] sm:$0xff] }
  0x51   : > { %1464 = vst [vmem:[%s10429_s29 + $0x3d0] sm:$0xff] %v1463_v58  ;;  %v1467_v60 = vld [vmem:[%s10424_s28 + $0x7c0] sm:$0xff]  ;;  %v1469_v61 = vld [vmem:[%s10424_s28 + $0x7d0] sm:$0xff]  ;;  %1466 = vst [vmem:[%s10429_s29 + $0x3d8] sm:$0xff] %v1465_v59 }
  0x52   : > { %1468 = vst [vmem:[%s10429_s29 + $0x3e0] sm:$0xff] %v1467_v60  ;;  %1470 = vst [vmem:[%s10429_s29 + $0x3e8] sm:$0xff] %v1469_v61  ;;  %v1471_v62 = vld [vmem:[%s10424_s28 + $0x7e0] sm:$0xff]  ;;  %v1473_v63 = vld [vmem:[%s10424_s28 + $0x7f0] sm:$0xff] }
  0x53   : > { %v1475_v0 = vld [vmem:[%s10424_s28 + $0x800] sm:$0xff]  ;;  %1472 = vst [vmem:[%s10429_s29 + $0x3f0] sm:$0xff] %v1471_v62  ;;  %1474 = vst [vmem:[%s10429_s29 + $0x3f8] sm:$0xff] %v1473_v63  ;;  %v1477_v1 = vld [vmem:[%s10424_s28 + $0x810] sm:$0xff] }
  0x54   : > { %1476 = vst [vmem:[%s10429_s29 + $0x400] sm:$0xff] %v1475_v0  ;;  %v1479_v2 = vld [vmem:[%s10424_s28 + $0x820] sm:$0xff]  ;;  %v1481_v3 = vld [vmem:[%s10424_s28 + $0x830] sm:$0xff]  ;;  %1478 = vst [vmem:[%s10429_s29 + $0x408] sm:$0xff] %v1477_v1 }
  0x55   : > { %1480 = vst [vmem:[%s10429_s29 + $0x410] sm:$0xff] %v1479_v2  ;;  %1482 = vst [vmem:[%s10429_s29 + $0x418] sm:$0xff] %v1481_v3  ;;  %v1483_v4 = vld [vmem:[%s10424_s28 + $0x840] sm:$0xff]  ;;  %v1485_v5 = vld [vmem:[%s10424_s28 + $0x850] sm:$0xff] }
  0x56   : > { %v1487_v6 = vld [vmem:[%s10424_s28 + $0x860] sm:$0xff]  ;;  %1484 = vst [vmem:[%s10429_s29 + $0x420] sm:$0xff] %v1483_v4  ;;  %1486 = vst [vmem:[%s10429_s29 + $0x428] sm:$0xff] %v1485_v5  ;;  %v1489_v7 = vld [vmem:[%s10424_s28 + $0x870] sm:$0xff] }
  0x57   : > { %1488 = vst [vmem:[%s10429_s29 + $0x430] sm:$0xff] %v1487_v6  ;;  %v1491_v8 = vld [vmem:[%s10424_s28 + $0x880] sm:$0xff]  ;;  %v1493_v9 = vld [vmem:[%s10424_s28 + $0x890] sm:$0xff]  ;;  %1490 = vst [vmem:[%s10429_s29 + $0x438] sm:$0xff] %v1489_v7 }
  0x58   : > { %1492 = vst [vmem:[%s10429_s29 + $0x440] sm:$0xff] %v1491_v8  ;;  %1494 = vst [vmem:[%s10429_s29 + $0x448] sm:$0xff] %v1493_v9  ;;  %v1495_v10 = vld [vmem:[%s10424_s28 + $0x8a0] sm:$0xff]  ;;  %v1497_v11 = vld [vmem:[%s10424_s28 + $0x8b0] sm:$0xff] }
  0x59   : > { %v1499_v12 = vld [vmem:[%s10424_s28 + $0x8c0] sm:$0xff]  ;;  %1496 = vst [vmem:[%s10429_s29 + $0x450] sm:$0xff] %v1495_v10  ;;  %1498 = vst [vmem:[%s10429_s29 + $0x458] sm:$0xff] %v1497_v11  ;;  %v1501_v13 = vld [vmem:[%s10424_s28 + $0x8d0] sm:$0xff] }
  0x5a   : > { %1500 = vst [vmem:[%s10429_s29 + $0x460] sm:$0xff] %v1499_v12  ;;  %v1503_v14 = vld [vmem:[%s10424_s28 + $0x8e0] sm:$0xff]  ;;  %v1505_v15 = vld [vmem:[%s10424_s28 + $0x8f0] sm:$0xff]  ;;  %1502 = vst [vmem:[%s10429_s29 + $0x468] sm:$0xff] %v1501_v13 }
  0x5b   : > { %1504 = vst [vmem:[%s10429_s29 + $0x470] sm:$0xff] %v1503_v14  ;;  %1506 = vst [vmem:[%s10429_s29 + $0x478] sm:$0xff] %v1505_v15  ;;  %v1507_v16 = vld [vmem:[%s10424_s28 + $0x900] sm:$0xff]  ;;  %v1509_v17 = vld [vmem:[%s10424_s28 + $0x910] sm:$0xff] }
  0x5c   : > { %v1511_v18 = vld [vmem:[%s10424_s28 + $0x920] sm:$0xff]  ;;  %1508 = vst [vmem:[%s10429_s29 + $0x480] sm:$0xff] %v1507_v16  ;;  %1510 = vst [vmem:[%s10429_s29 + $0x488] sm:$0xff] %v1509_v17  ;;  %v1513_v19 = vld [vmem:[%s10424_s28 + $0x930] sm:$0xff] }
  0x5d   : > { %1512 = vst [vmem:[%s10429_s29 + $0x490] sm:$0xff] %v1511_v18  ;;  %v1515_v20 = vld [vmem:[%s10424_s28 + $0x940] sm:$0xff]  ;;  %v1517_v21 = vld [vmem:[%s10424_s28 + $0x950] sm:$0xff]  ;;  %1514 = vst [vmem:[%s10429_s29 + $0x498] sm:$0xff] %v1513_v19 }
  0x5e   : > { %1516 = vst [vmem:[%s10429_s29 + $0x4a0] sm:$0xff] %v1515_v20  ;;  %1518 = vst [vmem:[%s10429_s29 + $0x4a8] sm:$0xff] %v1517_v21  ;;  %v1519_v22 = vld [vmem:[%s10424_s28 + $0x960] sm:$0xff]  ;;  %v1521_v23 = vld [vmem:[%s10424_s28 + $0x970] sm:$0xff] }
  0x5f   : > { %v1523_v24 = vld [vmem:[%s10424_s28 + $0x980] sm:$0xff]  ;;  %1520 = vst [vmem:[%s10429_s29 + $0x4b0] sm:$0xff] %v1519_v22  ;;  %1522 = vst [vmem:[%s10429_s29 + $0x4b8] sm:$0xff] %v1521_v23  ;;  %v1525_v25 = vld [vmem:[%s10424_s28 + $0x990] sm:$0xff] }
  0x60   : > { %1524 = vst [vmem:[%s10429_s29 + $0x4c0] sm:$0xff] %v1523_v24  ;;  %v1527_v26 = vld [vmem:[%s10424_s28 + $0x9a0] sm:$0xff]  ;;  %v1529_v27 = vld [vmem:[%s10424_s28 + $0x9b0] sm:$0xff]  ;;  %1526 = vst [vmem:[%s10429_s29 + $0x4c8] sm:$0xff] %v1525_v25 }
  0x61   : > { %1528 = vst [vmem:[%s10429_s29 + $0x4d0] sm:$0xff] %v1527_v26  ;;  %1530 = vst [vmem:[%s10429_s29 + $0x4d8] sm:$0xff] %v1529_v27  ;;  %v1531_v28 = vld [vmem:[%s10424_s28 + $0x9c0] sm:$0xff]  ;;  %v1533_v29 = vld [vmem:[%s10424_s28 + $0x9d0] sm:$0xff] }
  0x62   : > { %v1535_v30 = vld [vmem:[%s10424_s28 + $0x9e0] sm:$0xff]  ;;  %1532 = vst [vmem:[%s10429_s29 + $0x4e0] sm:$0xff] %v1531_v28  ;;  %1534 = vst [vmem:[%s10429_s29 + $0x4e8] sm:$0xff] %v1533_v29  ;;  %v1537_v31 = vld [vmem:[%s10424_s28 + $0x9f0] sm:$0xff] }
  0x63   : > { %1536 = vst [vmem:[%s10429_s29 + $0x4f0] sm:$0xff] %v1535_v30  ;;  %v1539_v32 = vld [vmem:[%s10424_s28 + $0xa00] sm:$0xff]  ;;  %v1541_v33 = vld [vmem:[%s10424_s28 + $0xa10] sm:$0xff]  ;;  %1538 = vst [vmem:[%s10429_s29 + $0x4f8] sm:$0xff] %v1537_v31 }
  0x64   : > { %1540 = vst [vmem:[%s10429_s29 + $0x500] sm:$0xff] %v1539_v32  ;;  %1542 = vst [vmem:[%s10429_s29 + $0x508] sm:$0xff] %v1541_v33  ;;  %v1543_v34 = vld [vmem:[%s10424_s28 + $0xa20] sm:$0xff]  ;;  %v1545_v35 = vld [vmem:[%s10424_s28 + $0xa30] sm:$0xff] }
  0x65   : > { %v1547_v36 = vld [vmem:[%s10424_s28 + $0xa40] sm:$0xff]  ;;  %1544 = vst [vmem:[%s10429_s29 + $0x510] sm:$0xff] %v1543_v34  ;;  %1546 = vst [vmem:[%s10429_s29 + $0x518] sm:$0xff] %v1545_v35  ;;  %v1549_v37 = vld [vmem:[%s10424_s28 + $0xa50] sm:$0xff] }
  0x66   : > { %1548 = vst [vmem:[%s10429_s29 + $0x520] sm:$0xff] %v1547_v36  ;;  %v1551_v38 = vld [vmem:[%s10424_s28 + $0xa60] sm:$0xff]  ;;  %v1553_v39 = vld [vmem:[%s10424_s28 + $0xa70] sm:$0xff]  ;;  %1550 = vst [vmem:[%s10429_s29 + $0x528] sm:$0xff] %v1549_v37 }
  0x67   : > { %1552 = vst [vmem:[%s10429_s29 + $0x530] sm:$0xff] %v1551_v38  ;;  %1554 = vst [vmem:[%s10429_s29 + $0x538] sm:$0xff] %v1553_v39  ;;  %v1555_v40 = vld [vmem:[%s10424_s28 + $0xa80] sm:$0xff]  ;;  %v1557_v41 = vld [vmem:[%s10424_s28 + $0xa90] sm:$0xff] }
  0x68   : > { %v1559_v42 = vld [vmem:[%s10424_s28 + $0xaa0] sm:$0xff]  ;;  %1556 = vst [vmem:[%s10429_s29 + $0x540] sm:$0xff] %v1555_v40  ;;  %1558 = vst [vmem:[%s10429_s29 + $0x548] sm:$0xff] %v1557_v41  ;;  %v1561_v43 = vld [vmem:[%s10424_s28 + $0xab0] sm:$0xff] }
  0x69   : > { %1560 = vst [vmem:[%s10429_s29 + $0x550] sm:$0xff] %v1559_v42  ;;  %v1563_v44 = vld [vmem:[%s10424_s28 + $0xac0] sm:$0xff]  ;;  %v1565_v45 = vld [vmem:[%s10424_s28 + $0xad0] sm:$0xff]  ;;  %1562 = vst [vmem:[%s10429_s29 + $0x558] sm:$0xff] %v1561_v43 }
  0x6a   : > { %1564 = vst [vmem:[%s10429_s29 + $0x560] sm:$0xff] %v1563_v44  ;;  %1566 = vst [vmem:[%s10429_s29 + $0x568] sm:$0xff] %v1565_v45  ;;  %v1567_v46 = vld [vmem:[%s10424_s28 + $0xae0] sm:$0xff]  ;;  %v1569_v47 = vld [vmem:[%s10424_s28 + $0xaf0] sm:$0xff] }
  0x6b   : > { %v1571_v48 = vld [vmem:[%s10424_s28 + $0xb00] sm:$0xff]  ;;  %1568 = vst [vmem:[%s10429_s29 + $0x570] sm:$0xff] %v1567_v46  ;;  %1570 = vst [vmem:[%s10429_s29 + $0x578] sm:$0xff] %v1569_v47  ;;  %v1573_v49 = vld [vmem:[%s10424_s28 + $0xb10] sm:$0xff] }
  0x6c   : > { %1572 = vst [vmem:[%s10429_s29 + $0x580] sm:$0xff] %v1571_v48  ;;  %v1575_v50 = vld [vmem:[%s10424_s28 + $0xb20] sm:$0xff]  ;;  %v1577_v51 = vld [vmem:[%s10424_s28 + $0xb30] sm:$0xff]  ;;  %1574 = vst [vmem:[%s10429_s29 + $0x588] sm:$0xff] %v1573_v49 }
  0x6d   : > { %1576 = vst [vmem:[%s10429_s29 + $0x590] sm:$0xff] %v1575_v50  ;;  %1578 = vst [vmem:[%s10429_s29 + $0x598] sm:$0xff] %v1577_v51  ;;  %v1579_v52 = vld [vmem:[%s10424_s28 + $0xb40] sm:$0xff]  ;;  %v1581_v53 = vld [vmem:[%s10424_s28 + $0xb50] sm:$0xff] }
  0x6e   : > { %v1583_v54 = vld [vmem:[%s10424_s28 + $0xb60] sm:$0xff]  ;;  %1580 = vst [vmem:[%s10429_s29 + $0x5a0] sm:$0xff] %v1579_v52  ;;  %1582 = vst [vmem:[%s10429_s29 + $0x5a8] sm:$0xff] %v1581_v53  ;;  %v1585_v55 = vld [vmem:[%s10424_s28 + $0xb70] sm:$0xff] }
  0x6f   : > { %1584 = vst [vmem:[%s10429_s29 + $0x5b0] sm:$0xff] %v1583_v54  ;;  %v1587_v56 = vld [vmem:[%s10424_s28 + $0xb80] sm:$0xff]  ;;  %v1589_v57 = vld [vmem:[%s10424_s28 + $0xb90] sm:$0xff]  ;;  %1586 = vst [vmem:[%s10429_s29 + $0x5b8] sm:$0xff] %v1585_v55 }
  0x70   : > { %1588 = vst [vmem:[%s10429_s29 + $0x5c0] sm:$0xff] %v1587_v56  ;;  %1590 = vst [vmem:[%s10429_s29 + $0x5c8] sm:$0xff] %v1589_v57  ;;  %v1591_v58 = vld [vmem:[%s10424_s28 + $0xba0] sm:$0xff]  ;;  %v1593_v59 = vld [vmem:[%s10424_s28 + $0xbb0] sm:$0xff] }
  0x71   : > { %v1595_v60 = vld [vmem:[%s10424_s28 + $0xbc0] sm:$0xff]  ;;  %1592 = vst [vmem:[%s10429_s29 + $0x5d0] sm:$0xff] %v1591_v58  ;;  %1594 = vst [vmem:[%s10429_s29 + $0x5d8] sm:$0xff] %v1593_v59  ;;  %v1597_v61 = vld [vmem:[%s10424_s28 + $0xbd0] sm:$0xff] }
  0x72   : > { %1596 = vst [vmem:[%s10429_s29 + $0x5e0] sm:$0xff] %v1595_v60  ;;  %v1599_v62 = vld [vmem:[%s10424_s28 + $0xbe0] sm:$0xff]  ;;  %v1601_v63 = vld [vmem:[%s10424_s28 + $0xbf0] sm:$0xff]  ;;  %1598 = vst [vmem:[%s10429_s29 + $0x5e8] sm:$0xff] %v1597_v61 }
  0x73   : > { %1600 = vst [vmem:[%s10429_s29 + $0x5f0] sm:$0xff] %v1599_v62  ;;  %1602 = vst [vmem:[%s10429_s29 + $0x5f8] sm:$0xff] %v1601_v63  ;;  %v1603_v0 = vld [vmem:[%s10424_s28 + $0xc00] sm:$0xff]  ;;  %v1605_v1 = vld [vmem:[%s10424_s28 + $0xc10] sm:$0xff] }
  0x74   : > { %v1607_v2 = vld [vmem:[%s10424_s28 + $0xc20] sm:$0xff]  ;;  %1604 = vst [vmem:[%s10429_s29 + $0x600] sm:$0xff] %v1603_v0  ;;  %1606 = vst [vmem:[%s10429_s29 + $0x608] sm:$0xff] %v1605_v1  ;;  %v1609_v3 = vld [vmem:[%s10424_s28 + $0xc30] sm:$0xff] }
  0x75   : > { %1608 = vst [vmem:[%s10429_s29 + $0x610] sm:$0xff] %v1607_v2  ;;  %v1611_v4 = vld [vmem:[%s10424_s28 + $0xc40] sm:$0xff]  ;;  %v1613_v5 = vld [vmem:[%s10424_s28 + $0xc50] sm:$0xff]  ;;  %1610 = vst [vmem:[%s10429_s29 + $0x618] sm:$0xff] %v1609_v3 }
  0x76   : > { %1612 = vst [vmem:[%s10429_s29 + $0x620] sm:$0xff] %v1611_v4  ;;  %1614 = vst [vmem:[%s10429_s29 + $0x628] sm:$0xff] %v1613_v5  ;;  %v1615_v6 = vld [vmem:[%s10424_s28 + $0xc60] sm:$0xff]  ;;  %v1617_v7 = vld [vmem:[%s10424_s28 + $0xc70] sm:$0xff] }
  0x77   : > { %v1619_v8 = vld [vmem:[%s10424_s28 + $0xc80] sm:$0xff]  ;;  %1616 = vst [vmem:[%s10429_s29 + $0x630] sm:$0xff] %v1615_v6  ;;  %1618 = vst [vmem:[%s10429_s29 + $0x638] sm:$0xff] %v1617_v7  ;;  %v1621_v9 = vld [vmem:[%s10424_s28 + $0xc90] sm:$0xff] }
  0x78   : > { %1620 = vst [vmem:[%s10429_s29 + $0x640] sm:$0xff] %v1619_v8  ;;  %v1623_v10 = vld [vmem:[%s10424_s28 + $0xca0] sm:$0xff]  ;;  %v1625_v11 = vld [vmem:[%s10424_s28 + $0xcb0] sm:$0xff]  ;;  %1622 = vst [vmem:[%s10429_s29 + $0x648] sm:$0xff] %v1621_v9 }
  0x79   : > { %1624 = vst [vmem:[%s10429_s29 + $0x650] sm:$0xff] %v1623_v10  ;;  %1626 = vst [vmem:[%s10429_s29 + $0x658] sm:$0xff] %v1625_v11  ;;  %v1627_v12 = vld [vmem:[%s10424_s28 + $0xcc0] sm:$0xff]  ;;  %v1629_v13 = vld [vmem:[%s10424_s28 + $0xcd0] sm:$0xff] }
  0x7a   : > { %v1631_v14 = vld [vmem:[%s10424_s28 + $0xce0] sm:$0xff]  ;;  %1628 = vst [vmem:[%s10429_s29 + $0x660] sm:$0xff] %v1627_v12  ;;  %1630 = vst [vmem:[%s10429_s29 + $0x668] sm:$0xff] %v1629_v13  ;;  %v1633_v15 = vld [vmem:[%s10424_s28 + $0xcf0] sm:$0xff] }
  0x7b   : > { %1632 = vst [vmem:[%s10429_s29 + $0x670] sm:$0xff] %v1631_v14  ;;  %v1635_v16 = vld [vmem:[%s10424_s28 + $0xd00] sm:$0xff]  ;;  %v1637_v17 = vld [vmem:[%s10424_s28 + $0xd10] sm:$0xff]  ;;  %1634 = vst [vmem:[%s10429_s29 + $0x678] sm:$0xff] %v1633_v15 }
  0x7c   : > { %1636 = vst [vmem:[%s10429_s29 + $0x680] sm:$0xff] %v1635_v16  ;;  %1638 = vst [vmem:[%s10429_s29 + $0x688] sm:$0xff] %v1637_v17  ;;  %v1639_v18 = vld [vmem:[%s10424_s28 + $0xd20] sm:$0xff]  ;;  %v1641_v19 = vld [vmem:[%s10424_s28 + $0xd30] sm:$0xff] }
  0x7d   : > { %v1643_v20 = vld [vmem:[%s10424_s28 + $0xd40] sm:$0xff]  ;;  %1640 = vst [vmem:[%s10429_s29 + $0x690] sm:$0xff] %v1639_v18  ;;  %1642 = vst [vmem:[%s10429_s29 + $0x698] sm:$0xff] %v1641_v19  ;;  %v1645_v21 = vld [vmem:[%s10424_s28 + $0xd50] sm:$0xff] }
  0x7e   : > { %1644 = vst [vmem:[%s10429_s29 + $0x6a0] sm:$0xff] %v1643_v20  ;;  %v1647_v22 = vld [vmem:[%s10424_s28 + $0xd60] sm:$0xff]  ;;  %v1649_v23 = vld [vmem:[%s10424_s28 + $0xd70] sm:$0xff]  ;;  %1646 = vst [vmem:[%s10429_s29 + $0x6a8] sm:$0xff] %v1645_v21 }
  0x7f   : > { %1648 = vst [vmem:[%s10429_s29 + $0x6b0] sm:$0xff] %v1647_v22  ;;  %1650 = vst [vmem:[%s10429_s29 + $0x6b8] sm:$0xff] %v1649_v23  ;;  %v1651_v24 = vld [vmem:[%s10424_s28 + $0xd80] sm:$0xff]  ;;  %v1653_v25 = vld [vmem:[%s10424_s28 + $0xd90] sm:$0xff] }
  0x80   : > { %v1655_v26 = vld [vmem:[%s10424_s28 + $0xda0] sm:$0xff]  ;;  %1652 = vst [vmem:[%s10429_s29 + $0x6c0] sm:$0xff] %v1651_v24  ;;  %1654 = vst [vmem:[%s10429_s29 + $0x6c8] sm:$0xff] %v1653_v25  ;;  %v1657_v27 = vld [vmem:[%s10424_s28 + $0xdb0] sm:$0xff] }
  0x81   : > { %1656 = vst [vmem:[%s10429_s29 + $0x6d0] sm:$0xff] %v1655_v26  ;;  %v1659_v28 = vld [vmem:[%s10424_s28 + $0xdc0] sm:$0xff]  ;;  %v1661_v29 = vld [vmem:[%s10424_s28 + $0xdd0] sm:$0xff]  ;;  %1658 = vst [vmem:[%s10429_s29 + $0x6d8] sm:$0xff] %v1657_v27 }
  0x82   : > { %1660 = vst [vmem:[%s10429_s29 + $0x6e0] sm:$0xff] %v1659_v28  ;;  %1662 = vst [vmem:[%s10429_s29 + $0x6e8] sm:$0xff] %v1661_v29  ;;  %v1663_v30 = vld [vmem:[%s10424_s28 + $0xde0] sm:$0xff]  ;;  %v1665_v31 = vld [vmem:[%s10424_s28 + $0xdf0] sm:$0xff] }
  0x83   : > { %v1667_v32 = vld [vmem:[%s10424_s28 + $0xe00] sm:$0xff]  ;;  %1664 = vst [vmem:[%s10429_s29 + $0x6f0] sm:$0xff] %v1663_v30  ;;  %1666 = vst [vmem:[%s10429_s29 + $0x6f8] sm:$0xff] %v1665_v31  ;;  %v1669_v33 = vld [vmem:[%s10424_s28 + $0xe10] sm:$0xff] }
  0x84   : > { %1668 = vst [vmem:[%s10429_s29 + $0x700] sm:$0xff] %v1667_v32  ;;  %v1671_v34 = vld [vmem:[%s10424_s28 + $0xe20] sm:$0xff]  ;;  %v1673_v35 = vld [vmem:[%s10424_s28 + $0xe30] sm:$0xff]  ;;  %1670 = vst [vmem:[%s10429_s29 + $0x708] sm:$0xff] %v1669_v33 }
  0x85   : > { %1672 = vst [vmem:[%s10429_s29 + $0x710] sm:$0xff] %v1671_v34  ;;  %1674 = vst [vmem:[%s10429_s29 + $0x718] sm:$0xff] %v1673_v35  ;;  %v1675_v36 = vld [vmem:[%s10424_s28 + $0xe40] sm:$0xff]  ;;  %v1677_v37 = vld [vmem:[%s10424_s28 + $0xe50] sm:$0xff] }
  0x86   : > { %v1679_v38 = vld [vmem:[%s10424_s28 + $0xe60] sm:$0xff]  ;;  %1676 = vst [vmem:[%s10429_s29 + $0x720] sm:$0xff] %v1675_v36  ;;  %1678 = vst [vmem:[%s10429_s29 + $0x728] sm:$0xff] %v1677_v37  ;;  %v1681_v39 = vld [vmem:[%s10424_s28 + $0xe70] sm:$0xff] }
  0x87   : > { %1680 = vst [vmem:[%s10429_s29 + $0x730] sm:$0xff] %v1679_v38  ;;  %v1683_v40 = vld [vmem:[%s10424_s28 + $0xe80] sm:$0xff]  ;;  %v1685_v41 = vld [vmem:[%s10424_s28 + $0xe90] sm:$0xff]  ;;  %1682 = vst [vmem:[%s10429_s29 + $0x738] sm:$0xff] %v1681_v39 }
  0x88   : > { %1684 = vst [vmem:[%s10429_s29 + $0x740] sm:$0xff] %v1683_v40  ;;  %1686 = vst [vmem:[%s10429_s29 + $0x748] sm:$0xff] %v1685_v41  ;;  %v1687_v42 = vld [vmem:[%s10424_s28 + $0xea0] sm:$0xff]  ;;  %v1689_v43 = vld [vmem:[%s10424_s28 + $0xeb0] sm:$0xff] }
  0x89   : > { %v1691_v44 = vld [vmem:[%s10424_s28 + $0xec0] sm:$0xff]  ;;  %1688 = vst [vmem:[%s10429_s29 + $0x750] sm:$0xff] %v1687_v42  ;;  %1690 = vst [vmem:[%s10429_s29 + $0x758] sm:$0xff] %v1689_v43  ;;  %v1693_v45 = vld [vmem:[%s10424_s28 + $0xed0] sm:$0xff] }
  0x8a   : > { %1692 = vst [vmem:[%s10429_s29 + $0x760] sm:$0xff] %v1691_v44  ;;  %v1695_v46 = vld [vmem:[%s10424_s28 + $0xee0] sm:$0xff]  ;;  %v1697_v47 = vld [vmem:[%s10424_s28 + $0xef0] sm:$0xff]  ;;  %1694 = vst [vmem:[%s10429_s29 + $0x768] sm:$0xff] %v1693_v45 }
  0x8b   : > { %1696 = vst [vmem:[%s10429_s29 + $0x770] sm:$0xff] %v1695_v46  ;;  %1698 = vst [vmem:[%s10429_s29 + $0x778] sm:$0xff] %v1697_v47  ;;  %v1699_v48 = vld [vmem:[%s10424_s28 + $0xf00] sm:$0xff]  ;;  %v1701_v49 = vld [vmem:[%s10424_s28 + $0xf10] sm:$0xff] }
  0x8c   : > { %v1703_v50 = vld [vmem:[%s10424_s28 + $0xf20] sm:$0xff]  ;;  %1700 = vst [vmem:[%s10429_s29 + $0x780] sm:$0xff] %v1699_v48  ;;  %1702 = vst [vmem:[%s10429_s29 + $0x788] sm:$0xff] %v1701_v49  ;;  %v1705_v51 = vld [vmem:[%s10424_s28 + $0xf30] sm:$0xff] }
  0x8d   : > { %1704 = vst [vmem:[%s10429_s29 + $0x790] sm:$0xff] %v1703_v50  ;;  %v1707_v52 = vld [vmem:[%s10424_s28 + $0xf40] sm:$0xff]  ;;  %v1709_v53 = vld [vmem:[%s10424_s28 + $0xf50] sm:$0xff]  ;;  %1706 = vst [vmem:[%s10429_s29 + $0x798] sm:$0xff] %v1705_v51 }
  0x8e   : > { %1708 = vst [vmem:[%s10429_s29 + $0x7a0] sm:$0xff] %v1707_v52  ;;  %1710 = vst [vmem:[%s10429_s29 + $0x7a8] sm:$0xff] %v1709_v53  ;;  %v1711_v54 = vld [vmem:[%s10424_s28 + $0xf60] sm:$0xff]  ;;  %v1713_v55 = vld [vmem:[%s10424_s28 + $0xf70] sm:$0xff] }
  0x8f   : > { %v1715_v56 = vld [vmem:[%s10424_s28 + $0xf80] sm:$0xff]  ;;  %1712 = vst [vmem:[%s10429_s29 + $0x7b0] sm:$0xff] %v1711_v54  ;;  %1714 = vst [vmem:[%s10429_s29 + $0x7b8] sm:$0xff] %v1713_v55  ;;  %v1717_v57 = vld [vmem:[%s10424_s28 + $0xf90] sm:$0xff] }
  0x90   : > { %1716 = vst [vmem:[%s10429_s29 + $0x7c0] sm:$0xff] %v1715_v56  ;;  %v1719_v58 = vld [vmem:[%s10424_s28 + $0xfa0] sm:$0xff]  ;;  %v1721_v59 = vld [vmem:[%s10424_s28 + $0xfb0] sm:$0xff]  ;;  %1718 = vst [vmem:[%s10429_s29 + $0x7c8] sm:$0xff] %v1717_v57 }
  0x91   : > { %1720 = vst [vmem:[%s10429_s29 + $0x7d0] sm:$0xff] %v1719_v58  ;;  %1722 = vst [vmem:[%s10429_s29 + $0x7d8] sm:$0xff] %v1721_v59  ;;  %v1723_v60 = vld [vmem:[%s10424_s28 + $0xfc0] sm:$0xff]  ;;  %v1725_v61 = vld [vmem:[%s10424_s28 + $0xfd0] sm:$0xff] }
  0x92   : > { %v1727_v62 = vld [vmem:[%s10424_s28 + $0xfe0] sm:$0xff]  ;;  %1724 = vst [vmem:[%s10429_s29 + $0x7e0] sm:$0xff] %v1723_v60  ;;  %1726 = vst [vmem:[%s10429_s29 + $0x7e8] sm:$0xff] %v1725_v61  ;;  %v1729_v63 = vld [vmem:[%s10424_s28 + $0xff0] sm:$0xff] }
  0x93   : > { %1728 = vst [vmem:[%s10429_s29 + $0x7f0] sm:$0xff] %v1727_v62  ;;  %v1731_v0 = vld [vmem:[%s10424_s28 + $0x1000] sm:$0xff]  ;;  %v1733_v1 = vld [vmem:[%s10424_s28 + $0x1010] sm:$0xff]  ;;  %1730 = vst [vmem:[%s10429_s29 + $0x7f8] sm:$0xff] %v1729_v63 }
  0x94   : > { %1732 = vst [vmem:[%s10429_s29 + $0x800] sm:$0xff] %v1731_v0  ;;  %1734 = vst [vmem:[%s10429_s29 + $0x808] sm:$0xff] %v1733_v1  ;;  %v1735_v2 = vld [vmem:[%s10424_s28 + $0x1020] sm:$0xff]  ;;  %v1737_v3 = vld [vmem:[%s10424_s28 + $0x1030] sm:$0xff] }
  0x95   : > { %v1739_v4 = vld [vmem:[%s10424_s28 + $0x1040] sm:$0xff]  ;;  %1736 = vst [vmem:[%s10429_s29 + $0x810] sm:$0xff] %v1735_v2  ;;  %1738 = vst [vmem:[%s10429_s29 + $0x818] sm:$0xff] %v1737_v3  ;;  %v1741_v5 = vld [vmem:[%s10424_s28 + $0x1050] sm:$0xff] }
  0x96   : > { %1740 = vst [vmem:[%s10429_s29 + $0x820] sm:$0xff] %v1739_v4  ;;  %v1743_v6 = vld [vmem:[%s10424_s28 + $0x1060] sm:$0xff]  ;;  %v1745_v7 = vld [vmem:[%s10424_s28 + $0x1070] sm:$0xff]  ;;  %1742 = vst [vmem:[%s10429_s29 + $0x828] sm:$0xff] %v1741_v5 }
  0x97   : > { %1744 = vst [vmem:[%s10429_s29 + $0x830] sm:$0xff] %v1743_v6  ;;  %1746 = vst [vmem:[%s10429_s29 + $0x838] sm:$0xff] %v1745_v7  ;;  %v1747_v8 = vld [vmem:[%s10424_s28 + $0x1080] sm:$0xff]  ;;  %v1749_v9 = vld [vmem:[%s10424_s28 + $0x1090] sm:$0xff] }
  0x98   : > { %v1751_v10 = vld [vmem:[%s10424_s28 + $0x10a0] sm:$0xff]  ;;  %1748 = vst [vmem:[%s10429_s29 + $0x840] sm:$0xff] %v1747_v8  ;;  %1750 = vst [vmem:[%s10429_s29 + $0x848] sm:$0xff] %v1749_v9  ;;  %v1753_v11 = vld [vmem:[%s10424_s28 + $0x10b0] sm:$0xff] }
  0x99   : > { %1752 = vst [vmem:[%s10429_s29 + $0x850] sm:$0xff] %v1751_v10  ;;  %v1755_v12 = vld [vmem:[%s10424_s28 + $0x10c0] sm:$0xff]  ;;  %v1757_v13 = vld [vmem:[%s10424_s28 + $0x10d0] sm:$0xff]  ;;  %1754 = vst [vmem:[%s10429_s29 + $0x858] sm:$0xff] %v1753_v11 }
  0x9a   : > { %1756 = vst [vmem:[%s10429_s29 + $0x860] sm:$0xff] %v1755_v12  ;;  %1758 = vst [vmem:[%s10429_s29 + $0x868] sm:$0xff] %v1757_v13  ;;  %v1759_v14 = vld [vmem:[%s10424_s28 + $0x10e0] sm:$0xff]  ;;  %v1761_v15 = vld [vmem:[%s10424_s28 + $0x10f0] sm:$0xff] }
  0x9b   : > { %v1763_v16 = vld [vmem:[%s10424_s28 + $0x1100] sm:$0xff]  ;;  %1760 = vst [vmem:[%s10429_s29 + $0x870] sm:$0xff] %v1759_v14  ;;  %1762 = vst [vmem:[%s10429_s29 + $0x878] sm:$0xff] %v1761_v15  ;;  %v1765_v17 = vld [vmem:[%s10424_s28 + $0x1110] sm:$0xff] }
  0x9c   : > { %1764 = vst [vmem:[%s10429_s29 + $0x880] sm:$0xff] %v1763_v16  ;;  %v1767_v18 = vld [vmem:[%s10424_s28 + $0x1120] sm:$0xff]  ;;  %v1769_v19 = vld [vmem:[%s10424_s28 + $0x1130] sm:$0xff]  ;;  %1766 = vst [vmem:[%s10429_s29 + $0x888] sm:$0xff] %v1765_v17 }
  0x9d   : > { %1768 = vst [vmem:[%s10429_s29 + $0x890] sm:$0xff] %v1767_v18  ;;  %1770 = vst [vmem:[%s10429_s29 + $0x898] sm:$0xff] %v1769_v19  ;;  %v1771_v20 = vld [vmem:[%s10424_s28 + $0x1140] sm:$0xff]  ;;  %v1773_v21 = vld [vmem:[%s10424_s28 + $0x1150] sm:$0xff] }
  0x9e   : > { %v1775_v22 = vld [vmem:[%s10424_s28 + $0x1160] sm:$0xff]  ;;  %1772 = vst [vmem:[%s10429_s29 + $0x8a0] sm:$0xff] %v1771_v20  ;;  %1774 = vst [vmem:[%s10429_s29 + $0x8a8] sm:$0xff] %v1773_v21  ;;  %v1777_v23 = vld [vmem:[%s10424_s28 + $0x1170] sm:$0xff] }
  0x9f   : > { %1776 = vst [vmem:[%s10429_s29 + $0x8b0] sm:$0xff] %v1775_v22  ;;  %v1779_v24 = vld [vmem:[%s10424_s28 + $0x1180] sm:$0xff]  ;;  %v1781_v25 = vld [vmem:[%s10424_s28 + $0x1190] sm:$0xff]  ;;  %1778 = vst [vmem:[%s10429_s29 + $0x8b8] sm:$0xff] %v1777_v23 }
  0xa0   : > { %1780 = vst [vmem:[%s10429_s29 + $0x8c0] sm:$0xff] %v1779_v24  ;;  %1782 = vst [vmem:[%s10429_s29 + $0x8c8] sm:$0xff] %v1781_v25  ;;  %v1783_v26 = vld [vmem:[%s10424_s28 + $0x11a0] sm:$0xff]  ;;  %v1785_v27 = vld [vmem:[%s10424_s28 + $0x11b0] sm:$0xff] }
  0xa1   : > { %v1787_v28 = vld [vmem:[%s10424_s28 + $0x11c0] sm:$0xff]  ;;  %1784 = vst [vmem:[%s10429_s29 + $0x8d0] sm:$0xff] %v1783_v26  ;;  %1786 = vst [vmem:[%s10429_s29 + $0x8d8] sm:$0xff] %v1785_v27  ;;  %v1789_v29 = vld [vmem:[%s10424_s28 + $0x11d0] sm:$0xff] }
  0xa2   : > { %1788 = vst [vmem:[%s10429_s29 + $0x8e0] sm:$0xff] %v1787_v28  ;;  %v1791_v30 = vld [vmem:[%s10424_s28 + $0x11e0] sm:$0xff]  ;;  %v1793_v31 = vld [vmem:[%s10424_s28 + $0x11f0] sm:$0xff]  ;;  %1790 = vst [vmem:[%s10429_s29 + $0x8e8] sm:$0xff] %v1789_v29 }
  0xa3   : > { %1792 = vst [vmem:[%s10429_s29 + $0x8f0] sm:$0xff] %v1791_v30  ;;  %1794 = vst [vmem:[%s10429_s29 + $0x8f8] sm:$0xff] %v1793_v31  ;;  %v1795_v32 = vld [vmem:[%s10424_s28 + $0x1200] sm:$0xff]  ;;  %v1797_v33 = vld [vmem:[%s10424_s28 + $0x1210] sm:$0xff] }
  0xa4   : > { %v1799_v34 = vld [vmem:[%s10424_s28 + $0x1220] sm:$0xff]  ;;  %1796 = vst [vmem:[%s10429_s29 + $0x900] sm:$0xff] %v1795_v32  ;;  %1798 = vst [vmem:[%s10429_s29 + $0x908] sm:$0xff] %v1797_v33  ;;  %v1801_v35 = vld [vmem:[%s10424_s28 + $0x1230] sm:$0xff] }
  0xa5   : > { %1800 = vst [vmem:[%s10429_s29 + $0x910] sm:$0xff] %v1799_v34  ;;  %v1803_v36 = vld [vmem:[%s10424_s28 + $0x1240] sm:$0xff]  ;;  %v1805_v37 = vld [vmem:[%s10424_s28 + $0x1250] sm:$0xff]  ;;  %1802 = vst [vmem:[%s10429_s29 + $0x918] sm:$0xff] %v1801_v35 }
  0xa6   : > { %1804 = vst [vmem:[%s10429_s29 + $0x920] sm:$0xff] %v1803_v36  ;;  %1806 = vst [vmem:[%s10429_s29 + $0x928] sm:$0xff] %v1805_v37  ;;  %v1807_v38 = vld [vmem:[%s10424_s28 + $0x1260] sm:$0xff]  ;;  %v1809_v39 = vld [vmem:[%s10424_s28 + $0x1270] sm:$0xff] }
  0xa7   : > { %v1811_v40 = vld [vmem:[%s10424_s28 + $0x1280] sm:$0xff]  ;;  %1808 = vst [vmem:[%s10429_s29 + $0x930] sm:$0xff] %v1807_v38  ;;  %1810 = vst [vmem:[%s10429_s29 + $0x938] sm:$0xff] %v1809_v39  ;;  %v1813_v41 = vld [vmem:[%s10424_s28 + $0x1290] sm:$0xff] }
  0xa8   : > { %1812 = vst [vmem:[%s10429_s29 + $0x940] sm:$0xff] %v1811_v40  ;;  %v1815_v42 = vld [vmem:[%s10424_s28 + $0x12a0] sm:$0xff]  ;;  %v1817_v43 = vld [vmem:[%s10424_s28 + $0x12b0] sm:$0xff]  ;;  %1814 = vst [vmem:[%s10429_s29 + $0x948] sm:$0xff] %v1813_v41 }
  0xa9   : > { %1816 = vst [vmem:[%s10429_s29 + $0x950] sm:$0xff] %v1815_v42  ;;  %1818 = vst [vmem:[%s10429_s29 + $0x958] sm:$0xff] %v1817_v43  ;;  %v1819_v44 = vld [vmem:[%s10424_s28 + $0x12c0] sm:$0xff]  ;;  %v1821_v45 = vld [vmem:[%s10424_s28 + $0x12d0] sm:$0xff] }
  0xaa   : > { %v1823_v46 = vld [vmem:[%s10424_s28 + $0x12e0] sm:$0xff]  ;;  %1820 = vst [vmem:[%s10429_s29 + $0x960] sm:$0xff] %v1819_v44  ;;  %1822 = vst [vmem:[%s10429_s29 + $0x968] sm:$0xff] %v1821_v45  ;;  %v1825_v47 = vld [vmem:[%s10424_s28 + $0x12f0] sm:$0xff] }
  0xab   : > { %1824 = vst [vmem:[%s10429_s29 + $0x970] sm:$0xff] %v1823_v46  ;;  %v1827_v48 = vld [vmem:[%s10424_s28 + $0x1300] sm:$0xff]  ;;  %v1829_v49 = vld [vmem:[%s10424_s28 + $0x1310] sm:$0xff]  ;;  %1826 = vst [vmem:[%s10429_s29 + $0x978] sm:$0xff] %v1825_v47 }
  0xac   : > { %1828 = vst [vmem:[%s10429_s29 + $0x980] sm:$0xff] %v1827_v48  ;;  %1830 = vst [vmem:[%s10429_s29 + $0x988] sm:$0xff] %v1829_v49  ;;  %v1831_v50 = vld [vmem:[%s10424_s28 + $0x1320] sm:$0xff]  ;;  %v1833_v51 = vld [vmem:[%s10424_s28 + $0x1330] sm:$0xff] }
  0xad   : > { %v1835_v52 = vld [vmem:[%s10424_s28 + $0x1340] sm:$0xff]  ;;  %1832 = vst [vmem:[%s10429_s29 + $0x990] sm:$0xff] %v1831_v50  ;;  %1834 = vst [vmem:[%s10429_s29 + $0x998] sm:$0xff] %v1833_v51  ;;  %v1837_v53 = vld [vmem:[%s10424_s28 + $0x1350] sm:$0xff] }
  0xae   : > { %1836 = vst [vmem:[%s10429_s29 + $0x9a0] sm:$0xff] %v1835_v52  ;;  %v1839_v54 = vld [vmem:[%s10424_s28 + $0x1360] sm:$0xff]  ;;  %v1841_v55 = vld [vmem:[%s10424_s28 + $0x1370] sm:$0xff]  ;;  %1838 = vst [vmem:[%s10429_s29 + $0x9a8] sm:$0xff] %v1837_v53 }
  0xaf   : > { %1840 = vst [vmem:[%s10429_s29 + $0x9b0] sm:$0xff] %v1839_v54  ;;  %1842 = vst [vmem:[%s10429_s29 + $0x9b8] sm:$0xff] %v1841_v55  ;;  %v1843_v56 = vld [vmem:[%s10424_s28 + $0x1380] sm:$0xff]  ;;  %v1845_v57 = vld [vmem:[%s10424_s28 + $0x1390] sm:$0xff] }
  0xb0   : > { %v1847_v58 = vld [vmem:[%s10424_s28 + $0x13a0] sm:$0xff]  ;;  %1844 = vst [vmem:[%s10429_s29 + $0x9c0] sm:$0xff] %v1843_v56  ;;  %1846 = vst [vmem:[%s10429_s29 + $0x9c8] sm:$0xff] %v1845_v57  ;;  %v1849_v59 = vld [vmem:[%s10424_s28 + $0x13b0] sm:$0xff] }
  0xb1   : > { %1848 = vst [vmem:[%s10429_s29 + $0x9d0] sm:$0xff] %v1847_v58  ;;  %v1851_v60 = vld [vmem:[%s10424_s28 + $0x13c0] sm:$0xff]  ;;  %v1853_v61 = vld [vmem:[%s10424_s28 + $0x13d0] sm:$0xff]  ;;  %1850 = vst [vmem:[%s10429_s29 + $0x9d8] sm:$0xff] %v1849_v59 }
  0xb2   : > { %1852 = vst [vmem:[%s10429_s29 + $0x9e0] sm:$0xff] %v1851_v60  ;;  %1854 = vst [vmem:[%s10429_s29 + $0x9e8] sm:$0xff] %v1853_v61  ;;  %v1855_v62 = vld [vmem:[%s10424_s28 + $0x13e0] sm:$0xff]  ;;  %v1857_v63 = vld [vmem:[%s10424_s28 + $0x13f0] sm:$0xff] }
  0xb3   : > { %v1859_v0 = vld [vmem:[%s10424_s28 + $0x1400] sm:$0xff]  ;;  %1856 = vst [vmem:[%s10429_s29 + $0x9f0] sm:$0xff] %v1855_v62  ;;  %1858 = vst [vmem:[%s10429_s29 + $0x9f8] sm:$0xff] %v1857_v63  ;;  %v1861_v1 = vld [vmem:[%s10424_s28 + $0x1410] sm:$0xff] }
  0xb4   : > { %1860 = vst [vmem:[%s10429_s29 + $0xa00] sm:$0xff] %v1859_v0  ;;  %v1863_v2 = vld [vmem:[%s10424_s28 + $0x1420] sm:$0xff]  ;;  %v1865_v3 = vld [vmem:[%s10424_s28 + $0x1430] sm:$0xff]  ;;  %1862 = vst [vmem:[%s10429_s29 + $0xa08] sm:$0xff] %v1861_v1 }
  0xb5   : > { %1864 = vst [vmem:[%s10429_s29 + $0xa10] sm:$0xff] %v1863_v2  ;;  %1866 = vst [vmem:[%s10429_s29 + $0xa18] sm:$0xff] %v1865_v3  ;;  %v1867_v4 = vld [vmem:[%s10424_s28 + $0x1440] sm:$0xff]  ;;  %v1869_v5 = vld [vmem:[%s10424_s28 + $0x1450] sm:$0xff] }
  0xb6   : > { %v1871_v6 = vld [vmem:[%s10424_s28 + $0x1460] sm:$0xff]  ;;  %1868 = vst [vmem:[%s10429_s29 + $0xa20] sm:$0xff] %v1867_v4  ;;  %1870 = vst [vmem:[%s10429_s29 + $0xa28] sm:$0xff] %v1869_v5  ;;  %v1873_v7 = vld [vmem:[%s10424_s28 + $0x1470] sm:$0xff] }
  0xb7   : > { %1872 = vst [vmem:[%s10429_s29 + $0xa30] sm:$0xff] %v1871_v6  ;;  %v1875_v8 = vld [vmem:[%s10424_s28 + $0x1480] sm:$0xff]  ;;  %v1877_v9 = vld [vmem:[%s10424_s28 + $0x1490] sm:$0xff]  ;;  %1874 = vst [vmem:[%s10429_s29 + $0xa38] sm:$0xff] %v1873_v7 }
  0xb8   : > { %1876 = vst [vmem:[%s10429_s29 + $0xa40] sm:$0xff] %v1875_v8  ;;  %1878 = vst [vmem:[%s10429_s29 + $0xa48] sm:$0xff] %v1877_v9  ;;  %v1879_v10 = vld [vmem:[%s10424_s28 + $0x14a0] sm:$0xff]  ;;  %v1881_v11 = vld [vmem:[%s10424_s28 + $0x14b0] sm:$0xff] }
  0xb9   : > { %v1883_v12 = vld [vmem:[%s10424_s28 + $0x14c0] sm:$0xff]  ;;  %1880 = vst [vmem:[%s10429_s29 + $0xa50] sm:$0xff] %v1879_v10  ;;  %1882 = vst [vmem:[%s10429_s29 + $0xa58] sm:$0xff] %v1881_v11  ;;  %v1885_v13 = vld [vmem:[%s10424_s28 + $0x14d0] sm:$0xff] }
  0xba   : > { %1884 = vst [vmem:[%s10429_s29 + $0xa60] sm:$0xff] %v1883_v12  ;;  %v1887_v14 = vld [vmem:[%s10424_s28 + $0x14e0] sm:$0xff]  ;;  %v1889_v15 = vld [vmem:[%s10424_s28 + $0x14f0] sm:$0xff]  ;;  %1886 = vst [vmem:[%s10429_s29 + $0xa68] sm:$0xff] %v1885_v13 }
  0xbb   : > { %1888 = vst [vmem:[%s10429_s29 + $0xa70] sm:$0xff] %v1887_v14  ;;  %1890 = vst [vmem:[%s10429_s29 + $0xa78] sm:$0xff] %v1889_v15  ;;  %v1891_v16 = vld [vmem:[%s10424_s28 + $0x1500] sm:$0xff]  ;;  %v1893_v17 = vld [vmem:[%s10424_s28 + $0x1510] sm:$0xff] }
  0xbc   : > { %v1895_v18 = vld [vmem:[%s10424_s28 + $0x1520] sm:$0xff]  ;;  %1892 = vst [vmem:[%s10429_s29 + $0xa80] sm:$0xff] %v1891_v16  ;;  %1894 = vst [vmem:[%s10429_s29 + $0xa88] sm:$0xff] %v1893_v17  ;;  %v1897_v19 = vld [vmem:[%s10424_s28 + $0x1530] sm:$0xff] }
  0xbd   : > { %1896 = vst [vmem:[%s10429_s29 + $0xa90] sm:$0xff] %v1895_v18  ;;  %v1899_v20 = vld [vmem:[%s10424_s28 + $0x1540] sm:$0xff]  ;;  %v1901_v21 = vld [vmem:[%s10424_s28 + $0x1550] sm:$0xff]  ;;  %1898 = vst [vmem:[%s10429_s29 + $0xa98] sm:$0xff] %v1897_v19 }
  0xbe   : > { %1900 = vst [vmem:[%s10429_s29 + $0xaa0] sm:$0xff] %v1899_v20  ;;  %1902 = vst [vmem:[%s10429_s29 + $0xaa8] sm:$0xff] %v1901_v21  ;;  %v1903_v22 = vld [vmem:[%s10424_s28 + $0x1560] sm:$0xff]  ;;  %v1905_v23 = vld [vmem:[%s10424_s28 + $0x1570] sm:$0xff] }
  0xbf   : > { %v1907_v24 = vld [vmem:[%s10424_s28 + $0x1580] sm:$0xff]  ;;  %1904 = vst [vmem:[%s10429_s29 + $0xab0] sm:$0xff] %v1903_v22  ;;  %1906 = vst [vmem:[%s10429_s29 + $0xab8] sm:$0xff] %v1905_v23  ;;  %v1909_v25 = vld [vmem:[%s10424_s28 + $0x1590] sm:$0xff] }
  0xc0   : > { %1908 = vst [vmem:[%s10429_s29 + $0xac0] sm:$0xff] %v1907_v24  ;;  %v1911_v26 = vld [vmem:[%s10424_s28 + $0x15a0] sm:$0xff]  ;;  %v1913_v27 = vld [vmem:[%s10424_s28 + $0x15b0] sm:$0xff]  ;;  %1910 = vst [vmem:[%s10429_s29 + $0xac8] sm:$0xff] %v1909_v25 }
  0xc1   : > { %1912 = vst [vmem:[%s10429_s29 + $0xad0] sm:$0xff] %v1911_v26  ;;  %1914 = vst [vmem:[%s10429_s29 + $0xad8] sm:$0xff] %v1913_v27  ;;  %v1915_v28 = vld [vmem:[%s10424_s28 + $0x15c0] sm:$0xff]  ;;  %v1917_v29 = vld [vmem:[%s10424_s28 + $0x15d0] sm:$0xff] }
  0xc2   : > { %v1919_v30 = vld [vmem:[%s10424_s28 + $0x15e0] sm:$0xff]  ;;  %1916 = vst [vmem:[%s10429_s29 + $0xae0] sm:$0xff] %v1915_v28  ;;  %1918 = vst [vmem:[%s10429_s29 + $0xae8] sm:$0xff] %v1917_v29  ;;  %v1921_v31 = vld [vmem:[%s10424_s28 + $0x15f0] sm:$0xff] }
  0xc3   : > { %1920 = vst [vmem:[%s10429_s29 + $0xaf0] sm:$0xff] %v1919_v30  ;;  %v1923_v32 = vld [vmem:[%s10424_s28 + $0x1600] sm:$0xff]  ;;  %v1925_v33 = vld [vmem:[%s10424_s28 + $0x1610] sm:$0xff]  ;;  %1922 = vst [vmem:[%s10429_s29 + $0xaf8] sm:$0xff] %v1921_v31 }
  0xc4   : > { %1924 = vst [vmem:[%s10429_s29 + $0xb00] sm:$0xff] %v1923_v32  ;;  %1926 = vst [vmem:[%s10429_s29 + $0xb08] sm:$0xff] %v1925_v33  ;;  %v1927_v34 = vld [vmem:[%s10424_s28 + $0x1620] sm:$0xff]  ;;  %v1929_v35 = vld [vmem:[%s10424_s28 + $0x1630] sm:$0xff] }
  0xc5   : > { %v1931_v36 = vld [vmem:[%s10424_s28 + $0x1640] sm:$0xff]  ;;  %1928 = vst [vmem:[%s10429_s29 + $0xb10] sm:$0xff] %v1927_v34  ;;  %1930 = vst [vmem:[%s10429_s29 + $0xb18] sm:$0xff] %v1929_v35  ;;  %v1933_v37 = vld [vmem:[%s10424_s28 + $0x1650] sm:$0xff] }
  0xc6   : > { %1932 = vst [vmem:[%s10429_s29 + $0xb20] sm:$0xff] %v1931_v36  ;;  %v1935_v38 = vld [vmem:[%s10424_s28 + $0x1660] sm:$0xff]  ;;  %v1937_v39 = vld [vmem:[%s10424_s28 + $0x1670] sm:$0xff]  ;;  %1934 = vst [vmem:[%s10429_s29 + $0xb28] sm:$0xff] %v1933_v37 }
  0xc7   : > { %1936 = vst [vmem:[%s10429_s29 + $0xb30] sm:$0xff] %v1935_v38  ;;  %1938 = vst [vmem:[%s10429_s29 + $0xb38] sm:$0xff] %v1937_v39  ;;  %v1939_v40 = vld [vmem:[%s10424_s28 + $0x1680] sm:$0xff]  ;;  %v1941_v41 = vld [vmem:[%s10424_s28 + $0x1690] sm:$0xff] }
  0xc8   : > { %v1943_v42 = vld [vmem:[%s10424_s28 + $0x16a0] sm:$0xff]  ;;  %1940 = vst [vmem:[%s10429_s29 + $0xb40] sm:$0xff] %v1939_v40  ;;  %1942 = vst [vmem:[%s10429_s29 + $0xb48] sm:$0xff] %v1941_v41  ;;  %v1945_v43 = vld [vmem:[%s10424_s28 + $0x16b0] sm:$0xff] }
  0xc9   : > { %1944 = vst [vmem:[%s10429_s29 + $0xb50] sm:$0xff] %v1943_v42  ;;  %v1947_v44 = vld [vmem:[%s10424_s28 + $0x16c0] sm:$0xff]  ;;  %v1949_v45 = vld [vmem:[%s10424_s28 + $0x16d0] sm:$0xff]  ;;  %1946 = vst [vmem:[%s10429_s29 + $0xb58] sm:$0xff] %v1945_v43 }
  0xca   : > { %1948 = vst [vmem:[%s10429_s29 + $0xb60] sm:$0xff] %v1947_v44  ;;  %1950 = vst [vmem:[%s10429_s29 + $0xb68] sm:$0xff] %v1949_v45  ;;  %v1951_v46 = vld [vmem:[%s10424_s28 + $0x16e0] sm:$0xff]  ;;  %v1953_v47 = vld [vmem:[%s10424_s28 + $0x16f0] sm:$0xff] }
  0xcb   : > { %v1955_v48 = vld [vmem:[%s10424_s28 + $0x1700] sm:$0xff]  ;;  %1952 = vst [vmem:[%s10429_s29 + $0xb70] sm:$0xff] %v1951_v46  ;;  %1954 = vst [vmem:[%s10429_s29 + $0xb78] sm:$0xff] %v1953_v47  ;;  %v1957_v49 = vld [vmem:[%s10424_s28 + $0x1710] sm:$0xff] }
  0xcc   : > { %1956 = vst [vmem:[%s10429_s29 + $0xb80] sm:$0xff] %v1955_v48  ;;  %v1959_v50 = vld [vmem:[%s10424_s28 + $0x1720] sm:$0xff]  ;;  %v1961_v51 = vld [vmem:[%s10424_s28 + $0x1730] sm:$0xff]  ;;  %1958 = vst [vmem:[%s10429_s29 + $0xb88] sm:$0xff] %v1957_v49 }
  0xcd   : > { %1960 = vst [vmem:[%s10429_s29 + $0xb90] sm:$0xff] %v1959_v50  ;;  %1962 = vst [vmem:[%s10429_s29 + $0xb98] sm:$0xff] %v1961_v51  ;;  %v1963_v52 = vld [vmem:[%s10424_s28 + $0x1740] sm:$0xff]  ;;  %v1965_v53 = vld [vmem:[%s10424_s28 + $0x1750] sm:$0xff] }
  0xce   : > { %v1967_v54 = vld [vmem:[%s10424_s28 + $0x1760] sm:$0xff]  ;;  %1964 = vst [vmem:[%s10429_s29 + $0xba0] sm:$0xff] %v1963_v52  ;;  %1966 = vst [vmem:[%s10429_s29 + $0xba8] sm:$0xff] %v1965_v53  ;;  %v1969_v55 = vld [vmem:[%s10424_s28 + $0x1770] sm:$0xff] }
  0xcf   : > { %1968 = vst [vmem:[%s10429_s29 + $0xbb0] sm:$0xff] %v1967_v54  ;;  %v1971_v56 = vld [vmem:[%s10424_s28 + $0x1780] sm:$0xff]  ;;  %v1973_v57 = vld [vmem:[%s10424_s28 + $0x1790] sm:$0xff]  ;;  %1970 = vst [vmem:[%s10429_s29 + $0xbb8] sm:$0xff] %v1969_v55 }
  0xd0   : > { %1972 = vst [vmem:[%s10429_s29 + $0xbc0] sm:$0xff] %v1971_v56  ;;  %1974 = vst [vmem:[%s10429_s29 + $0xbc8] sm:$0xff] %v1973_v57  ;;  %v1975_v58 = vld [vmem:[%s10424_s28 + $0x17a0] sm:$0xff]  ;;  %v1977_v59 = vld [vmem:[%s10424_s28 + $0x17b0] sm:$0xff] }
  0xd1   : > { %v1979_v60 = vld [vmem:[%s10424_s28 + $0x17c0] sm:$0xff]  ;;  %1976 = vst [vmem:[%s10429_s29 + $0xbd0] sm:$0xff] %v1975_v58  ;;  %1978 = vst [vmem:[%s10429_s29 + $0xbd8] sm:$0xff] %v1977_v59  ;;  %v1981_v61 = vld [vmem:[%s10424_s28 + $0x17d0] sm:$0xff] }
  0xd2   : > { %1980 = vst [vmem:[%s10429_s29 + $0xbe0] sm:$0xff] %v1979_v60  ;;  %v1983_v62 = vld [vmem:[%s10424_s28 + $0x17e0] sm:$0xff]  ;;  %v1985_v63 = vld [vmem:[%s10424_s28 + $0x17f0] sm:$0xff]  ;;  %1982 = vst [vmem:[%s10429_s29 + $0xbe8] sm:$0xff] %v1981_v61 }
  0xd3   : > { %1984 = vst [vmem:[%s10429_s29 + $0xbf0] sm:$0xff] %v1983_v62  ;;  %1986 = vst [vmem:[%s10429_s29 + $0xbf8] sm:$0xff] %v1985_v63  ;;  %v1987_v0 = vld [vmem:[%s10424_s28 + $0x1800] sm:$0xff]  ;;  %v1989_v1 = vld [vmem:[%s10424_s28 + $0x1810] sm:$0xff] }
  0xd4   : > { %v1991_v2 = vld [vmem:[%s10424_s28 + $0x1820] sm:$0xff]  ;;  %1988 = vst [vmem:[%s10429_s29 + $0xc00] sm:$0xff] %v1987_v0  ;;  %1990 = vst [vmem:[%s10429_s29 + $0xc08] sm:$0xff] %v1989_v1  ;;  %v1993_v3 = vld [vmem:[%s10424_s28 + $0x1830] sm:$0xff] }
  0xd5   : > { %1992 = vst [vmem:[%s10429_s29 + $0xc10] sm:$0xff] %v1991_v2  ;;  %v1995_v4 = vld [vmem:[%s10424_s28 + $0x1840] sm:$0xff]  ;;  %v1997_v5 = vld [vmem:[%s10424_s28 + $0x1850] sm:$0xff]  ;;  %1994 = vst [vmem:[%s10429_s29 + $0xc18] sm:$0xff] %v1993_v3 }
  0xd6   : > { %1996 = vst [vmem:[%s10429_s29 + $0xc20] sm:$0xff] %v1995_v4  ;;  %1998 = vst [vmem:[%s10429_s29 + $0xc28] sm:$0xff] %v1997_v5  ;;  %v1999_v6 = vld [vmem:[%s10424_s28 + $0x1860] sm:$0xff]  ;;  %v2001_v7 = vld [vmem:[%s10424_s28 + $0x1870] sm:$0xff] }
  0xd7   : > { %v2003_v8 = vld [vmem:[%s10424_s28 + $0x1880] sm:$0xff]  ;;  %2000 = vst [vmem:[%s10429_s29 + $0xc30] sm:$0xff] %v1999_v6  ;;  %2002 = vst [vmem:[%s10429_s29 + $0xc38] sm:$0xff] %v2001_v7  ;;  %v2005_v9 = vld [vmem:[%s10424_s28 + $0x1890] sm:$0xff] }
  0xd8   : > { %2004 = vst [vmem:[%s10429_s29 + $0xc40] sm:$0xff] %v2003_v8  ;;  %v2007_v10 = vld [vmem:[%s10424_s28 + $0x18a0] sm:$0xff]  ;;  %v2009_v11 = vld [vmem:[%s10424_s28 + $0x18b0] sm:$0xff]  ;;  %2006 = vst [vmem:[%s10429_s29 + $0xc48] sm:$0xff] %v2005_v9 }
  0xd9   : > { %2008 = vst [vmem:[%s10429_s29 + $0xc50] sm:$0xff] %v2007_v10  ;;  %2010 = vst [vmem:[%s10429_s29 + $0xc58] sm:$0xff] %v2009_v11  ;;  %v2011_v12 = vld [vmem:[%s10424_s28 + $0x18c0] sm:$0xff]  ;;  %v2013_v13 = vld [vmem:[%s10424_s28 + $0x18d0] sm:$0xff] }
  0xda   : > { %v2015_v14 = vld [vmem:[%s10424_s28 + $0x18e0] sm:$0xff]  ;;  %2012 = vst [vmem:[%s10429_s29 + $0xc60] sm:$0xff] %v2011_v12  ;;  %2014 = vst [vmem:[%s10429_s29 + $0xc68] sm:$0xff] %v2013_v13  ;;  %v2017_v15 = vld [vmem:[%s10424_s28 + $0x18f0] sm:$0xff] }
  0xdb   : > { %2016 = vst [vmem:[%s10429_s29 + $0xc70] sm:$0xff] %v2015_v14  ;;  %v2019_v16 = vld [vmem:[%s10424_s28 + $0x1900] sm:$0xff]  ;;  %v2021_v17 = vld [vmem:[%s10424_s28 + $0x1910] sm:$0xff]  ;;  %2018 = vst [vmem:[%s10429_s29 + $0xc78] sm:$0xff] %v2017_v15 }
  0xdc   : > { %2020 = vst [vmem:[%s10429_s29 + $0xc80] sm:$0xff] %v2019_v16  ;;  %2022 = vst [vmem:[%s10429_s29 + $0xc88] sm:$0xff] %v2021_v17  ;;  %v2023_v18 = vld [vmem:[%s10424_s28 + $0x1920] sm:$0xff]  ;;  %v2025_v19 = vld [vmem:[%s10424_s28 + $0x1930] sm:$0xff] }
  0xdd   : > { %v2027_v20 = vld [vmem:[%s10424_s28 + $0x1940] sm:$0xff]  ;;  %2024 = vst [vmem:[%s10429_s29 + $0xc90] sm:$0xff] %v2023_v18  ;;  %2026 = vst [vmem:[%s10429_s29 + $0xc98] sm:$0xff] %v2025_v19  ;;  %v2029_v21 = vld [vmem:[%s10424_s28 + $0x1950] sm:$0xff] }
  0xde   : > { %2028 = vst [vmem:[%s10429_s29 + $0xca0] sm:$0xff] %v2027_v20  ;;  %v2031_v22 = vld [vmem:[%s10424_s28 + $0x1960] sm:$0xff]  ;;  %v2033_v23 = vld [vmem:[%s10424_s28 + $0x1970] sm:$0xff]  ;;  %2030 = vst [vmem:[%s10429_s29 + $0xca8] sm:$0xff] %v2029_v21 }
  0xdf   : > { %2032 = vst [vmem:[%s10429_s29 + $0xcb0] sm:$0xff] %v2031_v22  ;;  %2034 = vst [vmem:[%s10429_s29 + $0xcb8] sm:$0xff] %v2033_v23  ;;  %v2035_v24 = vld [vmem:[%s10424_s28 + $0x1980] sm:$0xff]  ;;  %v2037_v25 = vld [vmem:[%s10424_s28 + $0x1990] sm:$0xff] }
  0xe0   : > { %v2039_v26 = vld [vmem:[%s10424_s28 + $0x19a0] sm:$0xff]  ;;  %2036 = vst [vmem:[%s10429_s29 + $0xcc0] sm:$0xff] %v2035_v24  ;;  %2038 = vst [vmem:[%s10429_s29 + $0xcc8] sm:$0xff] %v2037_v25  ;;  %v2041_v27 = vld [vmem:[%s10424_s28 + $0x19b0] sm:$0xff] }
  0xe1   : > { %2040 = vst [vmem:[%s10429_s29 + $0xcd0] sm:$0xff] %v2039_v26  ;;  %v2043_v28 = vld [vmem:[%s10424_s28 + $0x19c0] sm:$0xff]  ;;  %v2045_v29 = vld [vmem:[%s10424_s28 + $0x19d0] sm:$0xff]  ;;  %2042 = vst [vmem:[%s10429_s29 + $0xcd8] sm:$0xff] %v2041_v27 }
  0xe2   : > { %2044 = vst [vmem:[%s10429_s29 + $0xce0] sm:$0xff] %v2043_v28  ;;  %2046 = vst [vmem:[%s10429_s29 + $0xce8] sm:$0xff] %v2045_v29  ;;  %v2047_v30 = vld [vmem:[%s10424_s28 + $0x19e0] sm:$0xff]  ;;  %v2049_v31 = vld [vmem:[%s10424_s28 + $0x19f0] sm:$0xff] }
  0xe3   : > { %v2051_v32 = vld [vmem:[%s10424_s28 + $0x1a00] sm:$0xff]  ;;  %2048 = vst [vmem:[%s10429_s29 + $0xcf0] sm:$0xff] %v2047_v30  ;;  %2050 = vst [vmem:[%s10429_s29 + $0xcf8] sm:$0xff] %v2049_v31  ;;  %v2053_v33 = vld [vmem:[%s10424_s28 + $0x1a10] sm:$0xff] }
  0xe4   : > { %2052 = vst [vmem:[%s10429_s29 + $0xd00] sm:$0xff] %v2051_v32  ;;  %v2055_v34 = vld [vmem:[%s10424_s28 + $0x1a20] sm:$0xff]  ;;  %v2057_v35 = vld [vmem:[%s10424_s28 + $0x1a30] sm:$0xff]  ;;  %2054 = vst [vmem:[%s10429_s29 + $0xd08] sm:$0xff] %v2053_v33 }
  0xe5   : > { %2056 = vst [vmem:[%s10429_s29 + $0xd10] sm:$0xff] %v2055_v34  ;;  %2058 = vst [vmem:[%s10429_s29 + $0xd18] sm:$0xff] %v2057_v35  ;;  %v2059_v36 = vld [vmem:[%s10424_s28 + $0x1a40] sm:$0xff]  ;;  %v2061_v37 = vld [vmem:[%s10424_s28 + $0x1a50] sm:$0xff] }
  0xe6   : > { %v2063_v38 = vld [vmem:[%s10424_s28 + $0x1a60] sm:$0xff]  ;;  %2060 = vst [vmem:[%s10429_s29 + $0xd20] sm:$0xff] %v2059_v36  ;;  %2062 = vst [vmem:[%s10429_s29 + $0xd28] sm:$0xff] %v2061_v37  ;;  %v2065_v39 = vld [vmem:[%s10424_s28 + $0x1a70] sm:$0xff] }
  0xe7   : > { %2064 = vst [vmem:[%s10429_s29 + $0xd30] sm:$0xff] %v2063_v38  ;;  %v2067_v40 = vld [vmem:[%s10424_s28 + $0x1a80] sm:$0xff]  ;;  %v2069_v41 = vld [vmem:[%s10424_s28 + $0x1a90] sm:$0xff]  ;;  %2066 = vst [vmem:[%s10429_s29 + $0xd38] sm:$0xff] %v2065_v39 }
  0xe8   : > { %2068 = vst [vmem:[%s10429_s29 + $0xd40] sm:$0xff] %v2067_v40  ;;  %2070 = vst [vmem:[%s10429_s29 + $0xd48] sm:$0xff] %v2069_v41  ;;  %v2071_v42 = vld [vmem:[%s10424_s28 + $0x1aa0] sm:$0xff]  ;;  %v2073_v43 = vld [vmem:[%s10424_s28 + $0x1ab0] sm:$0xff] }
  0xe9   : > { %v2075_v44 = vld [vmem:[%s10424_s28 + $0x1ac0] sm:$0xff]  ;;  %2072 = vst [vmem:[%s10429_s29 + $0xd50] sm:$0xff] %v2071_v42  ;;  %2074 = vst [vmem:[%s10429_s29 + $0xd58] sm:$0xff] %v2073_v43  ;;  %v2077_v45 = vld [vmem:[%s10424_s28 + $0x1ad0] sm:$0xff] }
  0xea   : > { %2076 = vst [vmem:[%s10429_s29 + $0xd60] sm:$0xff] %v2075_v44  ;;  %v2079_v46 = vld [vmem:[%s10424_s28 + $0x1ae0] sm:$0xff]  ;;  %v2081_v47 = vld [vmem:[%s10424_s28 + $0x1af0] sm:$0xff]  ;;  %2078 = vst [vmem:[%s10429_s29 + $0xd68] sm:$0xff] %v2077_v45 }
  0xeb   : > { %2080 = vst [vmem:[%s10429_s29 + $0xd70] sm:$0xff] %v2079_v46  ;;  %2082 = vst [vmem:[%s10429_s29 + $0xd78] sm:$0xff] %v2081_v47  ;;  %v2083_v48 = vld [vmem:[%s10424_s28 + $0x1b00] sm:$0xff]  ;;  %v2085_v49 = vld [vmem:[%s10424_s28 + $0x1b10] sm:$0xff] }
  0xec   : > { %v2087_v50 = vld [vmem:[%s10424_s28 + $0x1b20] sm:$0xff]  ;;  %2084 = vst [vmem:[%s10429_s29 + $0xd80] sm:$0xff] %v2083_v48  ;;  %2086 = vst [vmem:[%s10429_s29 + $0xd88] sm:$0xff] %v2085_v49  ;;  %v2089_v51 = vld [vmem:[%s10424_s28 + $0x1b30] sm:$0xff] }
  0xed   : > { %2088 = vst [vmem:[%s10429_s29 + $0xd90] sm:$0xff] %v2087_v50  ;;  %v2091_v52 = vld [vmem:[%s10424_s28 + $0x1b40] sm:$0xff]  ;;  %v2093_v53 = vld [vmem:[%s10424_s28 + $0x1b50] sm:$0xff]  ;;  %2090 = vst [vmem:[%s10429_s29 + $0xd98] sm:$0xff] %v2089_v51 }
  0xee   : > { %2092 = vst [vmem:[%s10429_s29 + $0xda0] sm:$0xff] %v2091_v52  ;;  %2094 = vst [vmem:[%s10429_s29 + $0xda8] sm:$0xff] %v2093_v53  ;;  %v2095_v54 = vld [vmem:[%s10424_s28 + $0x1b60] sm:$0xff]  ;;  %v2097_v55 = vld [vmem:[%s10424_s28 + $0x1b70] sm:$0xff] }
  0xef   : > { %v2099_v56 = vld [vmem:[%s10424_s28 + $0x1b80] sm:$0xff]  ;;  %2096 = vst [vmem:[%s10429_s29 + $0xdb0] sm:$0xff] %v2095_v54  ;;  %2098 = vst [vmem:[%s10429_s29 + $0xdb8] sm:$0xff] %v2097_v55  ;;  %v2101_v57 = vld [vmem:[%s10424_s28 + $0x1b90] sm:$0xff] }
  0xf0   : > { %2100 = vst [vmem:[%s10429_s29 + $0xdc0] sm:$0xff] %v2099_v56  ;;  %v2103_v58 = vld [vmem:[%s10424_s28 + $0x1ba0] sm:$0xff]  ;;  %v2105_v59 = vld [vmem:[%s10424_s28 + $0x1bb0] sm:$0xff]  ;;  %2102 = vst [vmem:[%s10429_s29 + $0xdc8] sm:$0xff] %v2101_v57 }
  0xf1   : > { %2104 = vst [vmem:[%s10429_s29 + $0xdd0] sm:$0xff] %v2103_v58  ;;  %2106 = vst [vmem:[%s10429_s29 + $0xdd8] sm:$0xff] %v2105_v59  ;;  %v2107_v60 = vld [vmem:[%s10424_s28 + $0x1bc0] sm:$0xff]  ;;  %v2109_v61 = vld [vmem:[%s10424_s28 + $0x1bd0] sm:$0xff] }
  0xf2   : > { %v2111_v62 = vld [vmem:[%s10424_s28 + $0x1be0] sm:$0xff]  ;;  %2108 = vst [vmem:[%s10429_s29 + $0xde0] sm:$0xff] %v2107_v60  ;;  %2110 = vst [vmem:[%s10429_s29 + $0xde8] sm:$0xff] %v2109_v61  ;;  %v2113_v63 = vld [vmem:[%s10424_s28 + $0x1bf0] sm:$0xff] }
  0xf3   : > { %2112 = vst [vmem:[%s10429_s29 + $0xdf0] sm:$0xff] %v2111_v62  ;;  %v2115_v0 = vld [vmem:[%s10424_s28 + $0x1c00] sm:$0xff]  ;;  %v2117_v1 = vld [vmem:[%s10424_s28 + $0x1c10] sm:$0xff]  ;;  %2114 = vst [vmem:[%s10429_s29 + $0xdf8] sm:$0xff] %v2113_v63 }
  0xf4   : > { %2116 = vst [vmem:[%s10429_s29 + $0xe00] sm:$0xff] %v2115_v0  ;;  %2118 = vst [vmem:[%s10429_s29 + $0xe08] sm:$0xff] %v2117_v1  ;;  %v2119_v2 = vld [vmem:[%s10424_s28 + $0x1c20] sm:$0xff]  ;;  %v2121_v3 = vld [vmem:[%s10424_s28 + $0x1c30] sm:$0xff] }
  0xf5   : > { %v2123_v4 = vld [vmem:[%s10424_s28 + $0x1c40] sm:$0xff]  ;;  %2120 = vst [vmem:[%s10429_s29 + $0xe10] sm:$0xff] %v2119_v2  ;;  %2122 = vst [vmem:[%s10429_s29 + $0xe18] sm:$0xff] %v2121_v3  ;;  %v2125_v5 = vld [vmem:[%s10424_s28 + $0x1c50] sm:$0xff] }
  0xf6   : > { %2124 = vst [vmem:[%s10429_s29 + $0xe20] sm:$0xff] %v2123_v4  ;;  %v2127_v6 = vld [vmem:[%s10424_s28 + $0x1c60] sm:$0xff]  ;;  %v2129_v7 = vld [vmem:[%s10424_s28 + $0x1c70] sm:$0xff]  ;;  %2126 = vst [vmem:[%s10429_s29 + $0xe28] sm:$0xff] %v2125_v5 }
  0xf7   : > { %2128 = vst [vmem:[%s10429_s29 + $0xe30] sm:$0xff] %v2127_v6  ;;  %2130 = vst [vmem:[%s10429_s29 + $0xe38] sm:$0xff] %v2129_v7  ;;  %v2131_v8 = vld [vmem:[%s10424_s28 + $0x1c80] sm:$0xff]  ;;  %v2133_v9 = vld [vmem:[%s10424_s28 + $0x1c90] sm:$0xff] }
  0xf8   : > { %v2135_v10 = vld [vmem:[%s10424_s28 + $0x1ca0] sm:$0xff]  ;;  %2132 = vst [vmem:[%s10429_s29 + $0xe40] sm:$0xff] %v2131_v8  ;;  %2134 = vst [vmem:[%s10429_s29 + $0xe48] sm:$0xff] %v2133_v9  ;;  %v2137_v11 = vld [vmem:[%s10424_s28 + $0x1cb0] sm:$0xff] }
  0xf9   : > { %2136 = vst [vmem:[%s10429_s29 + $0xe50] sm:$0xff] %v2135_v10  ;;  %v2139_v12 = vld [vmem:[%s10424_s28 + $0x1cc0] sm:$0xff]  ;;  %v2141_v13 = vld [vmem:[%s10424_s28 + $0x1cd0] sm:$0xff]  ;;  %2138 = vst [vmem:[%s10429_s29 + $0xe58] sm:$0xff] %v2137_v11 }
  0xfa   : > { %2140 = vst [vmem:[%s10429_s29 + $0xe60] sm:$0xff] %v2139_v12  ;;  %2142 = vst [vmem:[%s10429_s29 + $0xe68] sm:$0xff] %v2141_v13  ;;  %v2143_v14 = vld [vmem:[%s10424_s28 + $0x1ce0] sm:$0xff]  ;;  %v2145_v15 = vld [vmem:[%s10424_s28 + $0x1cf0] sm:$0xff] }
  0xfb   : > { %v2147_v16 = vld [vmem:[%s10424_s28 + $0x1d00] sm:$0xff]  ;;  %2144 = vst [vmem:[%s10429_s29 + $0xe70] sm:$0xff] %v2143_v14  ;;  %2146 = vst [vmem:[%s10429_s29 + $0xe78] sm:$0xff] %v2145_v15  ;;  %v2149_v17 = vld [vmem:[%s10424_s28 + $0x1d10] sm:$0xff] }
  0xfc   : > { %2148 = vst [vmem:[%s10429_s29 + $0xe80] sm:$0xff] %v2147_v16  ;;  %v2151_v18 = vld [vmem:[%s10424_s28 + $0x1d20] sm:$0xff]  ;;  %v2153_v19 = vld [vmem:[%s10424_s28 + $0x1d30] sm:$0xff]  ;;  %2150 = vst [vmem:[%s10429_s29 + $0xe88] sm:$0xff] %v2149_v17 }
  0xfd   : > { %2152 = vst [vmem:[%s10429_s29 + $0xe90] sm:$0xff] %v2151_v18  ;;  %2154 = vst [vmem:[%s10429_s29 + $0xe98] sm:$0xff] %v2153_v19  ;;  %v2155_v20 = vld [vmem:[%s10424_s28 + $0x1d40] sm:$0xff]  ;;  %v2157_v21 = vld [vmem:[%s10424_s28 + $0x1d50] sm:$0xff] }
  0xfe   : > { %v2159_v22 = vld [vmem:[%s10424_s28 + $0x1d60] sm:$0xff]  ;;  %2156 = vst [vmem:[%s10429_s29 + $0xea0] sm:$0xff] %v2155_v20  ;;  %2158 = vst [vmem:[%s10429_s29 + $0xea8] sm:$0xff] %v2157_v21  ;;  %v2161_v23 = vld [vmem:[%s10424_s28 + $0x1d70] sm:$0xff] }
  0xff   : > { %2160 = vst [vmem:[%s10429_s29 + $0xeb0] sm:$0xff] %v2159_v22  ;;  %v2163_v24 = vld [vmem:[%s10424_s28 + $0x1d80] sm:$0xff]  ;;  %v2165_v25 = vld [vmem:[%s10424_s28 + $0x1d90] sm:$0xff]  ;;  %2162 = vst [vmem:[%s10429_s29 + $0xeb8] sm:$0xff] %v2161_v23 }
 0x100   : > { %2164 = vst [vmem:[%s10429_s29 + $0xec0] sm:$0xff] %v2163_v24  ;;  %2166 = vst [vmem:[%s10429_s29 + $0xec8] sm:$0xff] %v2165_v25  ;;  %v2167_v26 = vld [vmem:[%s10424_s28 + $0x1da0] sm:$0xff]  ;;  %v2169_v27 = vld [vmem:[%s10424_s28 + $0x1db0] sm:$0xff] }
 0x101   : > { %v2171_v28 = vld [vmem:[%s10424_s28 + $0x1dc0] sm:$0xff]  ;;  %2168 = vst [vmem:[%s10429_s29 + $0xed0] sm:$0xff] %v2167_v26  ;;  %2170 = vst [vmem:[%s10429_s29 + $0xed8] sm:$0xff] %v2169_v27  ;;  %v2173_v29 = vld [vmem:[%s10424_s28 + $0x1dd0] sm:$0xff] }
 0x102   : > { %2172 = vst [vmem:[%s10429_s29 + $0xee0] sm:$0xff] %v2171_v28  ;;  %v2175_v30 = vld [vmem:[%s10424_s28 + $0x1de0] sm:$0xff]  ;;  %v2177_v31 = vld [vmem:[%s10424_s28 + $0x1df0] sm:$0xff]  ;;  %2174 = vst [vmem:[%s10429_s29 + $0xee8] sm:$0xff] %v2173_v29 }
 0x103   : > { %2176 = vst [vmem:[%s10429_s29 + $0xef0] sm:$0xff] %v2175_v30  ;;  %2178 = vst [vmem:[%s10429_s29 + $0xef8] sm:$0xff] %v2177_v31  ;;  %v2179_v32 = vld [vmem:[%s10424_s28 + $0x1e00] sm:$0xff]  ;;  %v2181_v33 = vld [vmem:[%s10424_s28 + $0x1e10] sm:$0xff] }
 0x104   : > { %v2183_v34 = vld [vmem:[%s10424_s28 + $0x1e20] sm:$0xff]  ;;  %2180 = vst [vmem:[%s10429_s29 + $0xf00] sm:$0xff] %v2179_v32  ;;  %2182 = vst [vmem:[%s10429_s29 + $0xf08] sm:$0xff] %v2181_v33  ;;  %v2185_v35 = vld [vmem:[%s10424_s28 + $0x1e30] sm:$0xff] }
 0x105   : > { %2184 = vst [vmem:[%s10429_s29 + $0xf10] sm:$0xff] %v2183_v34  ;;  %v2187_v36 = vld [vmem:[%s10424_s28 + $0x1e40] sm:$0xff]  ;;  %v2189_v37 = vld [vmem:[%s10424_s28 + $0x1e50] sm:$0xff]  ;;  %2186 = vst [vmem:[%s10429_s29 + $0xf18] sm:$0xff] %v2185_v35 }
 0x106   : > { %2188 = vst [vmem:[%s10429_s29 + $0xf20] sm:$0xff] %v2187_v36  ;;  %2190 = vst [vmem:[%s10429_s29 + $0xf28] sm:$0xff] %v2189_v37  ;;  %v2191_v38 = vld [vmem:[%s10424_s28 + $0x1e60] sm:$0xff]  ;;  %v2193_v39 = vld [vmem:[%s10424_s28 + $0x1e70] sm:$0xff] }
 0x107   : > { %v2195_v40 = vld [vmem:[%s10424_s28 + $0x1e80] sm:$0xff]  ;;  %2192 = vst [vmem:[%s10429_s29 + $0xf30] sm:$0xff] %v2191_v38  ;;  %2194 = vst [vmem:[%s10429_s29 + $0xf38] sm:$0xff] %v2193_v39  ;;  %v2197_v41 = vld [vmem:[%s10424_s28 + $0x1e90] sm:$0xff] }
 0x108   : > { %2196 = vst [vmem:[%s10429_s29 + $0xf40] sm:$0xff] %v2195_v40  ;;  %v2199_v42 = vld [vmem:[%s10424_s28 + $0x1ea0] sm:$0xff]  ;;  %v2201_v43 = vld [vmem:[%s10424_s28 + $0x1eb0] sm:$0xff]  ;;  %2198 = vst [vmem:[%s10429_s29 + $0xf48] sm:$0xff] %v2197_v41 }
 0x109   : > { %2200 = vst [vmem:[%s10429_s29 + $0xf50] sm:$0xff] %v2199_v42  ;;  %2202 = vst [vmem:[%s10429_s29 + $0xf58] sm:$0xff] %v2201_v43  ;;  %v2203_v44 = vld [vmem:[%s10424_s28 + $0x1ec0] sm:$0xff]  ;;  %v2205_v45 = vld [vmem:[%s10424_s28 + $0x1ed0] sm:$0xff] }
 0x10a   : > { %v2207_v46 = vld [vmem:[%s10424_s28 + $0x1ee0] sm:$0xff]  ;;  %2204 = vst [vmem:[%s10429_s29 + $0xf60] sm:$0xff] %v2203_v44  ;;  %2206 = vst [vmem:[%s10429_s29 + $0xf68] sm:$0xff] %v2205_v45  ;;  %v2209_v47 = vld [vmem:[%s10424_s28 + $0x1ef0] sm:$0xff] }
 0x10b   : > { %2208 = vst [vmem:[%s10429_s29 + $0xf70] sm:$0xff] %v2207_v46  ;;  %v2211_v48 = vld [vmem:[%s10424_s28 + $0x1f00] sm:$0xff]  ;;  %v2213_v49 = vld [vmem:[%s10424_s28 + $0x1f10] sm:$0xff]  ;;  %2210 = vst [vmem:[%s10429_s29 + $0xf78] sm:$0xff] %v2209_v47 }
 0x10c   : > { %2212 = vst [vmem:[%s10429_s29 + $0xf80] sm:$0xff] %v2211_v48  ;;  %2214 = vst [vmem:[%s10429_s29 + $0xf88] sm:$0xff] %v2213_v49  ;;  %v2215_v50 = vld [vmem:[%s10424_s28 + $0x1f20] sm:$0xff]  ;;  %v2217_v51 = vld [vmem:[%s10424_s28 + $0x1f30] sm:$0xff] }
 0x10d   : > { %v2219_v52 = vld [vmem:[%s10424_s28 + $0x1f40] sm:$0xff]  ;;  %2216 = vst [vmem:[%s10429_s29 + $0xf90] sm:$0xff] %v2215_v50  ;;  %2218 = vst [vmem:[%s10429_s29 + $0xf98] sm:$0xff] %v2217_v51  ;;  %v2221_v53 = vld [vmem:[%s10424_s28 + $0x1f50] sm:$0xff] }
 0x10e   : > { %2220 = vst [vmem:[%s10429_s29 + $0xfa0] sm:$0xff] %v2219_v52  ;;  %v2223_v54 = vld [vmem:[%s10424_s28 + $0x1f60] sm:$0xff]  ;;  %v2225_v55 = vld [vmem:[%s10424_s28 + $0x1f70] sm:$0xff]  ;;  %2222 = vst [vmem:[%s10429_s29 + $0xfa8] sm:$0xff] %v2221_v53 }
 0x10f   : > { %2224 = vst [vmem:[%s10429_s29 + $0xfb0] sm:$0xff] %v2223_v54  ;;  %2226 = vst [vmem:[%s10429_s29 + $0xfb8] sm:$0xff] %v2225_v55  ;;  %v2227_v56 = vld [vmem:[%s10424_s28 + $0x1f80] sm:$0xff]  ;;  %v2229_v57 = vld [vmem:[%s10424_s28 + $0x1f90] sm:$0xff] }
 0x110   : > { %v2231_v58 = vld [vmem:[%s10424_s28 + $0x1fa0] sm:$0xff]  ;;  %2228 = vst [vmem:[%s10429_s29 + $0xfc0] sm:$0xff] %v2227_v56  ;;  %2230 = vst [vmem:[%s10429_s29 + $0xfc8] sm:$0xff] %v2229_v57  ;;  %v2233_v59 = vld [vmem:[%s10424_s28 + $0x1fb0] sm:$0xff] }
 0x111   : > { %2232 = vst [vmem:[%s10429_s29 + $0xfd0] sm:$0xff] %v2231_v58  ;;  %v2235_v60 = vld [vmem:[%s10424_s28 + $0x1fc0] sm:$0xff]  ;;  %v2237_v61 = vld [vmem:[%s10424_s28 + $0x1fd0] sm:$0xff]  ;;  %2234 = vst [vmem:[%s10429_s29 + $0xfd8] sm:$0xff] %v2233_v59 }
 0x112   : > { %2236 = vst [vmem:[%s10429_s29 + $0xfe0] sm:$0xff] %v2235_v60  ;;  %2238 = vst [vmem:[%s10429_s29 + $0xfe8] sm:$0xff] %v2237_v61  ;;  %v2239_v62 = vld [vmem:[%s10424_s28 + $0x1fe0] sm:$0xff]  ;;  %v2241_v63 = vld [vmem:[%s10424_s28 + $0x1ff0] sm:$0xff] }
 0x113   : > { %2240 = vst [vmem:[%s10429_s29 + $0xff0] sm:$0xff] %v2239_v62  ;;  %2242 = vst [vmem:[%s10429_s29 + $0xff8] sm:$0xff] %v2241_v63 }
 0x114 PF: > { %p8913_p8 = scmp.ge.s32.totalorder %s10354_s16, 1  ;;  %p4340_p9 = scmp.lt.s32.totalorder %s10354_s16, 3 }
 0x116   : > { %p4341_p10 = pnand %p8913_p8, %p4340_p9 }
 0x118   : > { %4344 = sbr.rel (%p4341_p10) target bundleno = 1026 (0x402), region = 80 }
 0x11d   : > { %s4347_s30 = sand.u32 1, %s10338_s12   ;;  %v11458_v0 = vld [vmem:[%s12595_s0] sm:$0xff]  ;;  %v11468_v2 = vld [vmem:[%s12595_s0 + $0x8] sm:$0xff] }
 0x11e   : > { %v11463_v1 = vld [vmem:[%s12595_s0 + $0x80] sm:$0xff]  ;;  %s8914_s10 = sshll.u32 %s4347_s30, 12  ;;  %v11479_v5 = vld [vmem:[%s12595_s0 + $0x88] sm:$0xff] }
 0x11f   : > { %v8917_v3 = vcombine.low %v11458_v0, %v11463_v1  ;;  %v8918_v4 = vcombine.high %v11458_v0, %v11463_v1  ;;  %v8919_v6 = vcombine.low %v11468_v2, %v11479_v5  ;;  %v8920_v7 = vcombine.high %v11468_v2, %v11479_v5  ;;  %s11485_s19 = scalar_lea.vmem [#allocation2], %s8914_s10  ;;  %s8916_s10 = sshll.u32 %s10346_s14, 1 }
 0x120   : > { %v9548_v8 = vld [vmem:[%s11485_s19 + $0x74] ss:$8 sps:$4 sm:$0xff]   ;;  %v9552_v10 = vld [vmem:[%s11485_s19 + $0x70] ss:$8 sps:$4 sm:$0xff]   ;;  %v9554_v12 = vld [vmem:[%s11485_s19 + $0x64] ss:$8 sps:$4 sm:$0xff]  }
 0x121   : > { %7894 = vmatprep.mubr.bf16.mxu0 %v8918_v4  ;;  %v9550_v9 = vld [vmem:[%s11485_s19 + $0x174] ss:$8 sps:$4 sm:$0xff]   ;;  %7947 = vmatprep.mubr.bf16.mxu1 %v8920_v7  ;;  %v9553_v11 = vld [vmem:[%s11485_s19 + $0x170] ss:$8 sps:$4 sm:$0xff]   ;;  %v9556_v13 = vld [vmem:[%s11485_s19 + $0x164] ss:$8 sps:$4 sm:$0xff]  }
 0x122   : > { %7862 = vmatprep.subr.bf16.mxu0 %v9548_v8  ;;  %7915 = vmatprep.subr.bf16.mxu1 %v9550_v9  ;;  %v9558_v14 = vld [vmem:[%s11485_s19 + $0x60] ss:$8 sps:$4 sm:$0xff]   ;;  %v9560_v16 = vld [vmem:[%s11485_s19 + $0x54] ss:$8 sps:$4 sm:$0xff]   ;;  %v9564_v18 = vld [vmem:[%s11485_s19 + $0x50] ss:$8 sps:$4 sm:$0xff]  }
 0x123   : > { %7863 = vmatpush1.bf16.msra.mxu0 %v9552_v10  ;;  %7916 = vmatpush1.bf16.msra.mxu1 %v9553_v11  ;;  %v9559_v15 = vld [vmem:[%s11485_s19 + $0x160] ss:$8 sps:$4 sm:$0xff]   ;;  %v9562_v17 = vld [vmem:[%s11485_s19 + $0x154] ss:$8 sps:$4 sm:$0xff]   ;;  %v9565_v19 = vld [vmem:[%s11485_s19 + $0x150] ss:$8 sps:$4 sm:$0xff]  }
 0x124   : > { %7864 = vmatprep.subr.bf16.mxu0 %v9554_v12  ;;  %7917 = vmatprep.subr.bf16.mxu1 %v9556_v13  ;;  %v9566_v20 = vld [vmem:[%s11485_s19 + $0x44] ss:$8 sps:$4 sm:$0xff]   ;;  %v9570_v22 = vld [vmem:[%s11485_s19 + $0x40] ss:$8 sps:$4 sm:$0xff]   ;;  %v9572_v24 = vld [vmem:[%s11485_s19 + $0x34] ss:$8 sps:$4 sm:$0xff]  }
 0x125   : > { %v9568_v21 = vld [vmem:[%s11485_s19 + $0x144] ss:$8 sps:$4 sm:$0xff]   ;;  %v9571_v23 = vld [vmem:[%s11485_s19 + $0x140] ss:$8 sps:$4 sm:$0xff]   ;;  %v9574_v25 = vld [vmem:[%s11485_s19 + $0x134] ss:$8 sps:$4 sm:$0xff]  }
 0x126   : > { %v9576_v26 = vld [vmem:[%s11485_s19 + $0x30] ss:$8 sps:$4 sm:$0xff]   ;;  %v9578_v28 = vld [vmem:[%s11485_s19 + $0x24] ss:$8 sps:$4 sm:$0xff]   ;;  %v9582_v30 = vld [vmem:[%s11485_s19 + $0x20] ss:$8 sps:$4 sm:$0xff]  }
 0x127   : > { %7865 = vmatpush1.bf16.msra.mxu0 %v9558_v14  ;;  %7918 = vmatpush1.bf16.msra.mxu1 %v9559_v15  ;;  %v9577_v27 = vld [vmem:[%s11485_s19 + $0x130] ss:$8 sps:$4 sm:$0xff]   ;;  %v9580_v29 = vld [vmem:[%s11485_s19 + $0x124] ss:$8 sps:$4 sm:$0xff]   ;;  %v9583_v31 = vld [vmem:[%s11485_s19 + $0x120] ss:$8 sps:$4 sm:$0xff]  }
 0x128   : > { %7866 = vmatprep.subr.bf16.mxu0 %v9560_v16  ;;  %7919 = vmatprep.subr.bf16.mxu1 %v9562_v17  ;;  %v9584_v32 = vld [vmem:[%s11485_s19 + $0x14] ss:$8 sps:$4 sm:$0xff]   ;;  %v9588_v34 = vld [vmem:[%s11485_s19 + $0x10] ss:$8 sps:$4 sm:$0xff]   ;;  %v9590_v36 = vld [vmem:[%s11485_s19 + $0x4] ss:$8 sps:$4 sm:$0xff]  }
 0x129   : > { %v9586_v33 = vld [vmem:[%s11485_s19 + $0x114] ss:$8 sps:$4 sm:$0xff]   ;;  %v9589_v35 = vld [vmem:[%s11485_s19 + $0x110] ss:$8 sps:$4 sm:$0xff]   ;;  %v9592_v37 = vld [vmem:[%s11485_s19 + $0x104] ss:$8 sps:$4 sm:$0xff]  }
 0x12a   : > { %v9594_v38 = vld [vmem:[%s11485_s19] ss:$8 sps:$4 sm:$0xff]   ;;  %v9596_v40 = vld [vmem:[%s11485_s19 + $0xf4] ss:$8 sps:$4 sm:$0xff]   ;;  %v9600_v42 = vld [vmem:[%s11485_s19 + $0xf0] ss:$8 sps:$4 sm:$0xff]  }
 0x12b   : > { %7867 = vmatpush1.bf16.msra.mxu0 %v9564_v18  ;;  %7920 = vmatpush1.bf16.msra.mxu1 %v9565_v19  ;;  %v9595_v39 = vld [vmem:[%s11485_s19 + $0x100] ss:$8 sps:$4 sm:$0xff]   ;;  %v9598_v41 = vld [vmem:[%s11485_s19 + $0x1f4] ss:$8 sps:$4 sm:$0xff]   ;;  %v9601_v43 = vld [vmem:[%s11485_s19 + $0x1f0] ss:$8 sps:$4 sm:$0xff]  }
 0x12c   : > { %7868 = vmatprep.subr.bf16.mxu0 %v9566_v20  ;;  %7921 = vmatprep.subr.bf16.mxu1 %v9568_v21  ;;  %v9602_v44 = vld [vmem:[%s11485_s19 + $0xe4] ss:$8 sps:$4 sm:$0xff]   ;;  %v9606_v46 = vld [vmem:[%s11485_s19 + $0xe0] ss:$8 sps:$4 sm:$0xff]   ;;  %v9608_v48 = vld [vmem:[%s11485_s19 + $0xd4] ss:$8 sps:$4 sm:$0xff]  }
 0x12d   : > { %v9604_v45 = vld [vmem:[%s11485_s19 + $0x1e4] ss:$8 sps:$4 sm:$0xff]   ;;  %v9607_v47 = vld [vmem:[%s11485_s19 + $0x1e0] ss:$8 sps:$4 sm:$0xff]   ;;  %v9610_v49 = vld [vmem:[%s11485_s19 + $0x1d4] ss:$8 sps:$4 sm:$0xff]  }
 0x12e   : > { %v9612_v50 = vld [vmem:[%s11485_s19 + $0xd0] ss:$8 sps:$4 sm:$0xff]   ;;  %v9614_v52 = vld [vmem:[%s11485_s19 + $0xc4] ss:$8 sps:$4 sm:$0xff]   ;;  %v9618_v54 = vld [vmem:[%s11485_s19 + $0xc0] ss:$8 sps:$4 sm:$0xff]  }
 0x12f   : > { %7869 = vmatpush1.bf16.msra.mxu0 %v9570_v22  ;;  %7922 = vmatpush1.bf16.msra.mxu1 %v9571_v23  ;;  %v9613_v51 = vld [vmem:[%s11485_s19 + $0x1d0] ss:$8 sps:$4 sm:$0xff]   ;;  %v9616_v53 = vld [vmem:[%s11485_s19 + $0x1c4] ss:$8 sps:$4 sm:$0xff]   ;;  %v9619_v55 = vld [vmem:[%s11485_s19 + $0x1c0] ss:$8 sps:$4 sm:$0xff]  }
 0x130   : > { %7870 = vmatprep.subr.bf16.mxu0 %v9572_v24  ;;  %7923 = vmatprep.subr.bf16.mxu1 %v9574_v25  ;;  %v9620_v56 = vld [vmem:[%s11485_s19 + $0xb4] ss:$8 sps:$4 sm:$0xff]   ;;  %v9624_v58 = vld [vmem:[%s11485_s19 + $0xb0] ss:$8 sps:$4 sm:$0xff]   ;;  %v9626_v60 = vld [vmem:[%s11485_s19 + $0xa4] ss:$8 sps:$4 sm:$0xff]  }
 0x131   : > { %v9622_v57 = vld [vmem:[%s11485_s19 + $0x1b4] ss:$8 sps:$4 sm:$0xff]   ;;  %v9625_v59 = vld [vmem:[%s11485_s19 + $0x1b0] ss:$8 sps:$4 sm:$0xff]   ;;  %v9628_v61 = vld [vmem:[%s11485_s19 + $0x1a4] ss:$8 sps:$4 sm:$0xff]  }
 0x132   : > { %v9630_v62 = vld [vmem:[%s11485_s19 + $0xa0] ss:$8 sps:$4 sm:$0xff]   ;;  %v9632_v4 = vld [vmem:[%s11485_s19 + $0x94] ss:$8 sps:$4 sm:$0xff]   ;;  %v9636_v8 = vld [vmem:[%s11485_s19 + $0x90] ss:$8 sps:$4 sm:$0xff]  }
 0x133   : > { %7871 = vmatpush1.bf16.msra.mxu0 %v9576_v26  ;;  %7924 = vmatpush1.bf16.msra.mxu1 %v9577_v27  ;;  %v9631_v63 = vld [vmem:[%s11485_s19 + $0x1a0] ss:$8 sps:$4 sm:$0xff]   ;;  %v9634_v7 = vld [vmem:[%s11485_s19 + $0x194] ss:$8 sps:$4 sm:$0xff]   ;;  %v9637_v9 = vld [vmem:[%s11485_s19 + $0x190] ss:$8 sps:$4 sm:$0xff]  }
 0x134   : > { %7872 = vmatprep.subr.bf16.mxu0 %v9578_v28  ;;  %7925 = vmatprep.subr.bf16.mxu1 %v9580_v29  ;;  %v9638_v10 = vld [vmem:[%s11485_s19 + $0x84] ss:$8 sps:$4 sm:$0xff]   ;;  %v9642_v12 = vld [vmem:[%s11485_s19 + $0x80] ss:$8 sps:$4 sm:$0xff]   ;;  %v9646_v14 = vld [vmem:[%s11485_s19 + $0x274] ss:$8 sps:$4 sm:$0xff]  }
 0x135   : > { %v9640_v11 = vld [vmem:[%s11485_s19 + $0x184] ss:$8 sps:$4 sm:$0xff]   ;;  %v9643_v13 = vld [vmem:[%s11485_s19 + $0x180] ss:$8 sps:$4 sm:$0xff]   ;;  %v9649_v15 = vld [vmem:[%s11485_s19 + $0x374] ss:$8 sps:$4 sm:$0xff]  }
 0x136   : > { %v4426_v16 = vld [vmem:[%s12595_s0 + $0x100] sm:$0xff]  ;;  %v4427_v18 = vld [vmem:[%s12595_s0 + $0x108] sm:$0xff]  ;;  %v9644_v20 = vld [vmem:[%s11485_s19 + $0x270] ss:$8 sps:$4 sm:$0xff]   ;;  %p4388_p11 = scmp.lt.s32.totalorder %s8916_s10, 3 }
 0x137   : > { %7873 = vmatpush1.bf16.msra.mxu0 %v9582_v30  ;;  %7926 = vmatpush1.bf16.msra.mxu1 %v9583_v31  ;;  %v4442_v17 = vld [vmem:[%s12595_s0 + $0x180] sm:$0xff]  ;;  %v4443_v19 = vld [vmem:[%s12595_s0 + $0x188] sm:$0xff]  ;;  %v9647_v21 = vld [vmem:[%s11485_s19 + $0x370] ss:$8 sps:$4 sm:$0xff]  }
 0x138   : > { %7874 = vmatprep.subr.bf16.mxu0 %v9584_v32  ;;  %7927 = vmatprep.subr.bf16.mxu1 %v9586_v33  ;;  %v9652_v22 = vld [vmem:[%s11485_s19 + $0x264] ss:$8 sps:$4 sm:$0xff]   ;;  %v8950_v24 = vcombine.high %v4426_v16, %v4442_v17  ;;  %v8952_v25 = vcombine.high %v4427_v18, %v4443_v19  ;;  %v9650_v26 = vld [vmem:[%s11485_s19 + $0x260] ss:$8 sps:$4 sm:$0xff]   ;;  %v9658_v28 = vld [vmem:[%s11485_s19 + $0x254] ss:$8 sps:$4 sm:$0xff]   ;;  %v8951_v2 = vcombine.low %v4427_v18, %v4443_v19 }
 0x139   : > { %v9655_v23 = vld [vmem:[%s11485_s19 + $0x364] ss:$8 sps:$4 sm:$0xff]   ;;  %v9653_v27 = vld [vmem:[%s11485_s19 + $0x360] ss:$8 sps:$4 sm:$0xff]   ;;  %v9661_v29 = vld [vmem:[%s11485_s19 + $0x354] ss:$8 sps:$4 sm:$0xff]  }
 0x13a   : > { %v9656_v0 = vld [vmem:[%s11485_s19 + $0x250] ss:$8 sps:$4 sm:$0xff]   ;;  %v9664_v5 = vld [vmem:[%s11485_s19 + $0x244] ss:$8 sps:$4 sm:$0xff]   ;;  %v9662_v30 = vld [vmem:[%s11485_s19 + $0x240] ss:$8 sps:$4 sm:$0xff]  }
 0x13b   : > { %7875 = vmatpush1.bf16.msra.mxu0 %v9588_v34  ;;  %7928 = vmatpush1.bf16.msra.mxu1 %v9589_v35  ;;  %v9659_v1 = vld [vmem:[%s11485_s19 + $0x350] ss:$8 sps:$4 sm:$0xff]   ;;  %v9665_v31 = vld [vmem:[%s11485_s19 + $0x340] ss:$8 sps:$4 sm:$0xff]   ;;  %v9670_v32 = vld [vmem:[%s11485_s19 + $0x234] ss:$8 sps:$4 sm:$0xff]  }
 0x13c   : > { %7876 = vmatprep.subr.bf16.mxu0 %v9590_v36  ;;  %7929 = vmatprep.subr.bf16.mxu1 %v9592_v37  ;;  %v9673_v33 = vld [vmem:[%s11485_s19 + $0x334] ss:$8 sps:$4 sm:$0xff]   ;;  %v9668_v34 = vld [vmem:[%s11485_s19 + $0x230] ss:$8 sps:$4 sm:$0xff]   ;;  %v9676_v36 = vld [vmem:[%s11485_s19 + $0x224] ss:$8 sps:$4 sm:$0xff]  }
 0x13d   : > { %v9671_v35 = vld [vmem:[%s11485_s19 + $0x330] ss:$8 sps:$4 sm:$0xff]   ;;  %v9679_v37 = vld [vmem:[%s11485_s19 + $0x324] ss:$8 sps:$4 sm:$0xff]   ;;  %v9722_v18 = vld [vmem:[%s11485_s19 + $0x2a0] ss:$8 sps:$4 sm:$0xff]  }
 0x13e   : > { %v9725_v19 = vld [vmem:[%s11485_s19 + $0x3a0] ss:$8 sps:$4 sm:$0xff]   ;;  %s12645_s10 = smov (!%p4388_p11, %s8916_s10), 3 }
 0x13f   : > { %7877 = vmatpush1.bf16.msra.mxu0 %v9594_v38  ;;  %7930 = vmatpush1.bf16.msra.mxu1 %v9595_v39  ;;  %v11594_v38 = vld [vmem:[%s12595_s0 + $0x10] sm:$0xff]  ;;  %v9674_v39 = vld [vmem:[%s11485_s19 + $0x220] ss:$8 sps:$4 sm:$0xff]   ;;  %s4390_s20 = scalar_lea.vmem %s12597_s2, %s12645_s10 }
 0x140   : > { %7878 = vmatprep.subr.bf16.mxu0 %v9596_v40  ;;  %7931 = vmatprep.subr.bf16.mxu1 %v9598_v41  ;;  %v9677_v40 = vld [vmem:[%s11485_s19 + $0x320] ss:$8 sps:$4 sm:$0xff]   ;;  %v9682_v41 = vld [vmem:[%s11485_s19 + $0x214] ss:$8 sps:$4 sm:$0xff]  }
 0x143   : > { %7879 = vmatpush2.bf16.msra.mxu0 %v9600_v42  ;;  %7932 = vmatpush2.bf16.msra.mxu1 %v9601_v43  ;;  %v9685_v42 = vld [vmem:[%s11485_s19 + $0x314] ss:$8 sps:$4 sm:$0xff]  }
 0x144   : > { %7880 = vmatprep.subr.bf16.mxu0 %v9602_v44  ;;  %7933 = vmatprep.subr.bf16.mxu1 %v9604_v45  ;;  %v11603_v43 = vld [vmem:[%s12595_s0 + $0x90] sm:$0xff]  ;;  %v11608_v44 = vld [vmem:[%s12595_s0 + $0x18] sm:$0xff] }
 0x145   : > { %v8922_v45 = vcombine.high %v11594_v38, %v11603_v43 }
 0x147   : > { %7881 = vmatpush2.bf16.msra.mxu0 %v9606_v46  ;;  %7934 = vmatpush2.bf16.msra.mxu1 %v9607_v47  ;;  %v11615_v46 = vld [vmem:[%s12595_s0 + $0x98] sm:$0xff] }
 0x148   : > { %7882 = vmatprep.subr.bf16.mxu0 %v9608_v48  ;;  %7935 = vmatprep.subr.bf16.mxu1 %v9610_v49  ;;  %v9680_v47 = vld [vmem:[%s11485_s19 + $0x210] ss:$8 sps:$4 sm:$0xff]   ;;  %v8924_v48 = vcombine.high %v11608_v44, %v11615_v46 }
 0x149   : > { %v9683_v49 = vld [vmem:[%s11485_s19 + $0x310] ss:$8 sps:$4 sm:$0xff]  }
 0x14b   : > { %7883 = vmatpush2.bf16.msra.mxu0 %v9612_v50  ;;  %7936 = vmatpush2.bf16.msra.mxu1 %v9613_v51  ;;  %v9688_v50 = vld [vmem:[%s11485_s19 + $0x204] ss:$8 sps:$4 sm:$0xff]  }
 0x14c   : > { %7884 = vmatprep.subr.bf16.mxu0 %v9614_v52  ;;  %7937 = vmatprep.subr.bf16.mxu1 %v9616_v53  ;;  %v9691_v51 = vld [vmem:[%s11485_s19 + $0x304] ss:$8 sps:$4 sm:$0xff]   ;;  %v9686_v52 = vld [vmem:[%s11485_s19 + $0x200] ss:$8 sps:$4 sm:$0xff]  }
 0x14d   : > { %v9689_v53 = vld [vmem:[%s11485_s19 + $0x300] ss:$8 sps:$4 sm:$0xff]  }
 0x14f   : > { %7885 = vmatpush2.bf16.msra.mxu0 %v9618_v54  ;;  %7938 = vmatpush2.bf16.msra.mxu1 %v9619_v55  ;;  %v9694_v54 = vld [vmem:[%s11485_s19 + $0x2f4] ss:$8 sps:$4 sm:$0xff]  }
 0x150   : > { %7886 = vmatprep.subr.bf16.mxu0 %v9620_v56  ;;  %7939 = vmatprep.subr.bf16.mxu1 %v9622_v57  ;;  %v9697_v55 = vld [vmem:[%s11485_s19 + $0x3f4] ss:$8 sps:$4 sm:$0xff]   ;;  %v9692_v56 = vld [vmem:[%s11485_s19 + $0x2f0] ss:$8 sps:$4 sm:$0xff]  }
 0x151   : > { %v9695_v57 = vld [vmem:[%s11485_s19 + $0x3f0] ss:$8 sps:$4 sm:$0xff]  }
 0x153   : > { %7887 = vmatpush2.bf16.msra.mxu0 %v9624_v58  ;;  %7940 = vmatpush2.bf16.msra.mxu1 %v9625_v59  ;;  %v9700_v58 = vld [vmem:[%s11485_s19 + $0x2e4] ss:$8 sps:$4 sm:$0xff]  }
 0x154   : > { %7888 = vmatprep.subr.bf16.mxu0 %v9626_v60  ;;  %7941 = vmatprep.subr.bf16.mxu1 %v9628_v61  ;;  %v9703_v59 = vld [vmem:[%s11485_s19 + $0x3e4] ss:$8 sps:$4 sm:$0xff]   ;;  %v9698_v60 = vld [vmem:[%s11485_s19 + $0x2e0] ss:$8 sps:$4 sm:$0xff]  }
 0x155   : > { %v9701_v61 = vld [vmem:[%s11485_s19 + $0x3e0] ss:$8 sps:$4 sm:$0xff]  }
 0x157   : > { %7889 = vmatpush2.bf16.msra.mxu0 %v9630_v62  ;;  %7942 = vmatpush2.bf16.msra.mxu1 %v9631_v63  ;;  %v9706_v62 = vld [vmem:[%s11485_s19 + $0x2d4] ss:$8 sps:$4 sm:$0xff]  }
 0x158   : > { %7890 = vmatprep.subr.bf16.mxu0 %v9632_v4  ;;  %7943 = vmatprep.subr.bf16.mxu1 %v9634_v7  ;;  %v9709_v63 = vld [vmem:[%s11485_s19 + $0x3d4] ss:$8 sps:$4 sm:$0xff]   ;;  %v9704_v4 = vld [vmem:[%s11485_s19 + $0x2d0] ss:$8 sps:$4 sm:$0xff]  }
 0x159   : > { %v9707_v7 = vld [vmem:[%s11485_s19 + $0x3d0] ss:$8 sps:$4 sm:$0xff]  }
 0x15b   : > { %7891 = vmatpush2.bf16.msra.mxu0 %v9636_v8  ;;  %7944 = vmatpush2.bf16.msra.mxu1 %v9637_v9  ;;  %v9712_v8 = vld [vmem:[%s11485_s19 + $0x2c4] ss:$8 sps:$4 sm:$0xff]  }
 0x15c   : > { %7892 = vmatprep.subr.bf16.mxu0 %v9638_v10  ;;  %7945 = vmatprep.subr.bf16.mxu1 %v9640_v11  ;;  %v9715_v9 = vld [vmem:[%s11485_s19 + $0x3c4] ss:$8 sps:$4 sm:$0xff]   ;;  %v9710_v10 = vld [vmem:[%s11485_s19 + $0x2c0] ss:$8 sps:$4 sm:$0xff]  }
 0x15d   : > { %v9713_v11 = vld [vmem:[%s11485_s19 + $0x3c0] ss:$8 sps:$4 sm:$0xff]  }
 0x15f   : > { %7893 = vmatpush2.bf16.msra.mxu0 %v9642_v12  ;;  %7946 = vmatpush2.bf16.msra.mxu1 %v9643_v13  ;;  %v9718_v12 = vld [vmem:[%s11485_s19 + $0x2b4] ss:$8 sps:$4 sm:$0xff]  }
 0x160   : > { %7968 = vmatprep.subr.bf16.mxu0 %v9646_v14  ;;  %8021 = vmatprep.subr.bf16.mxu1 %v9649_v15  ;;  %v9721_v13 = vld [vmem:[%s11485_s19 + $0x3b4] ss:$8 sps:$4 sm:$0xff]   ;;  %v9716_v14 = vld [vmem:[%s11485_s19 + $0x2b0] ss:$8 sps:$4 sm:$0xff]  }
 0x161   : > { %v9719_v15 = vld [vmem:[%s11485_s19 + $0x3b0] ss:$8 sps:$4 sm:$0xff]  }
 0x162   : > { %7895 = vmatmul.mubr.bf16.vlgmr.msra.gmra.mxu0 %v8917_v3  ;;  %7948 = vmatmul.mubr.bf16.vlgmr.msra.gmra.mxu1 %v8919_v6  ;;  %v8949_v3 = vcombine.low %v4426_v16, %v4442_v17  ;;  %v9667_v6 = vld [vmem:[%s11485_s19 + $0x344] ss:$8 sps:$4 sm:$0xff]  }
 0x163   : > { %7969 = vmatpush1.bf16.msra.mxu0 %v9644_v20  ;;  %8022 = vmatpush1.bf16.msra.mxu1 %v9647_v21  ;;  %v9724_v16 = vld [vmem:[%s11485_s19 + $0x2a4] ss:$8 sps:$4 sm:$0xff]   ;;  %v9730_v20 = vld [vmem:[%s11485_s19 + $0x294] ss:$8 sps:$4 sm:$0xff]  }
 0x164   : > { %7970 = vmatprep.subr.bf16.mxu0 %v9652_v22  ;;  %8023 = vmatprep.subr.bf16.mxu1 %v9655_v23  ;;  %v9727_v17 = vld [vmem:[%s11485_s19 + $0x3a4] ss:$8 sps:$4 sm:$0xff]   ;;  %v9733_v21 = vld [vmem:[%s11485_s19 + $0x394] ss:$8 sps:$4 sm:$0xff]   ;;  %v9728_v22 = vld [vmem:[%s11485_s19 + $0x290] ss:$8 sps:$4 sm:$0xff]  }
 0x165   : > { %7904 = vmatprep.mubr.bf16.mxu0 %v8950_v24  ;;  %7957 = vmatprep.mubr.bf16.mxu1 %v8952_v25  ;;  %v9731_v23 = vld [vmem:[%s11485_s19 + $0x390] ss:$8 sps:$4 sm:$0xff]   ;;  %v9736_v24 = vld [vmem:[%s11485_s19 + $0x284] ss:$8 sps:$4 sm:$0xff]  }
 0x166   : > { %v9739_v25 = vld [vmem:[%s11485_s19 + $0x384] ss:$8 sps:$4 sm:$0xff]  }
 0x167   : > { %7971 = vmatpush1.bf16.msra.mxu0 %v9650_v26  ;;  %8024 = vmatpush1.bf16.msra.mxu1 %v9653_v27  ;;  %v9734_v26 = vld [vmem:[%s11485_s19 + $0x280] ss:$8 sps:$4 sm:$0xff]  }
 0x168   : > { %7972 = vmatprep.subr.bf16.mxu0 %v9658_v28  ;;  %8025 = vmatprep.subr.bf16.mxu1 %v9661_v29  ;;  %v9737_v27 = vld [vmem:[%s11485_s19 + $0x380] ss:$8 sps:$4 sm:$0xff]   ;;  %v9742_v28 = vld [vmem:[%s11485_s19 + $0x474] ss:$8 sps:$4 sm:$0xff]  }
 0x169   : > { %v9745_v29 = vld [vmem:[%s11485_s19 + $0x574] ss:$8 sps:$4 sm:$0xff]  }
 0x16a   : > { %7905 = vmatmul.mubr.bf16.gmra.mxu0 %v8949_v3  ;;  %7958 = vmatmul.mubr.bf16.gmra.mxu1 %v8951_v2  ;;  %v4444_v3 = vld [vmem:[%s12595_s0 + $0x190] sm:$0xff]  ;;  %v8921_v2 = vcombine.low %v11594_v38, %v11603_v43 }
 0x16b   : > { %7973 = vmatpush1.bf16.msra.mxu0 %v9656_v0  ;;  %8026 = vmatpush1.bf16.msra.mxu1 %v9659_v1  ;;  %v4428_v0 = vld [vmem:[%s12595_s0 + $0x110] sm:$0xff] }
 0x16c   : > { %7974 = vmatprep.subr.bf16.mxu0 %v9664_v5  ;;  %8027 = vmatprep.subr.bf16.mxu1 %v9667_v6  ;;  %v9740_v1 = vld [vmem:[%s11485_s19 + $0x470] ss:$8 sps:$4 sm:$0xff]   ;;  %v8923_v5 = vcombine.low %v11608_v44, %v11615_v46  ;;  %v9754_v38 = vld [vmem:[%s11485_s19 + $0x454] ss:$8 sps:$4 sm:$0xff]   ;;  %v11696_v44 = vld [vmem:[%s12595_s0 + $0x28] sm:$0xff] }
 0x16d   : > { %8000 = vmatprep.mubr.bf16.mxu0 %v8922_v45  ;;  %8053 = vmatprep.mubr.bf16.mxu1 %v8924_v48  ;;  %v4429_v6 = vld [vmem:[%s12595_s0 + $0x118] sm:$0xff]  ;;  %v11701_v45 = vld [vmem:[%s12595_s0 + $0xa8] sm:$0xff] }
 0x16e   : > { %v9752_v46 = vld [vmem:[%s11485_s19 + $0x450] ss:$8 sps:$4 sm:$0xff]   ;;  %v9760_v48 = vld [vmem:[%s11485_s19 + $0x444] ss:$8 sps:$4 sm:$0xff]  }
 0x16f   : > { %7975 = vmatpush1.bf16.msra.mxu0 %v9662_v30  ;;  %8028 = vmatpush1.bf16.msra.mxu1 %v9665_v31  ;;  %v4445_v30 = vld [vmem:[%s12595_s0 + $0x198] sm:$0xff] }
 0x170   : > { %7976 = vmatprep.subr.bf16.mxu0 %v9670_v32  ;;  %8029 = vmatprep.subr.bf16.mxu1 %v9673_v33  ;;  %v9743_v31 = vld [vmem:[%s11485_s19 + $0x570] ss:$8 sps:$4 sm:$0xff]   ;;  %v9748_v32 = vld [vmem:[%s11485_s19 + $0x464] ss:$8 sps:$4 sm:$0xff]   ;;  %v8955_v43 = vcombine.low %v4429_v6, %v4445_v30 }
 0x171   : > { %v9751_v33 = vld [vmem:[%s11485_s19 + $0x564] ss:$8 sps:$4 sm:$0xff]  }
 0x173   : > { %7977 = vmatpush1.bf16.msra.mxu0 %v9668_v34  ;;  %8030 = vmatpush1.bf16.msra.mxu1 %v9671_v35  ;;  %v8954_v34 = vcombine.high %v4428_v0, %v4444_v3  ;;  %v8956_v35 = vcombine.high %v4429_v6, %v4445_v30  ;;  %v9821_v6 = vld [vmem:[%s11485_s19 + $0x5a0] ss:$8 sps:$4 sm:$0xff]   ;;  %v9826_v30 = vld [vmem:[%s11485_s19 + $0x494] ss:$8 sps:$4 sm:$0xff]  }
 0x174   : > { %7978 = vmatprep.subr.bf16.mxu0 %v9676_v36  ;;  %8031 = vmatprep.subr.bf16.mxu1 %v9679_v37  ;;  %v9746_v36 = vld [vmem:[%s11485_s19 + $0x460] ss:$8 sps:$4 sm:$0xff]  }
 0x175   : > { %v9749_v37 = vld [vmem:[%s11485_s19 + $0x560] ss:$8 sps:$4 sm:$0xff]  }
 0x177   : > { %7979 = vmatpush1.bf16.msra.mxu0 %v9674_v39  ;;  %8032 = vmatpush1.bf16.msra.mxu1 %v9677_v40  ;;  %v9757_v39 = vld [vmem:[%s11485_s19 + $0x554] ss:$8 sps:$4 sm:$0xff]   ;;  %v11686_v40 = vld [vmem:[%s12595_s0 + $0x20] sm:$0xff] }
 0x178   : > { %7980 = vmatprep.subr.bf16.mxu0 %v9682_v41  ;;  %8033 = vmatprep.subr.bf16.mxu1 %v9685_v42  ;;  %v11691_v41 = vld [vmem:[%s12595_s0 + $0xa0] sm:$0xff]  ;;  %v8953_v42 = vcombine.low %v4428_v0, %v4444_v3  ;;  %v9812_v0 = vld [vmem:[%s11485_s19 + $0x4b0] ss:$8 sps:$4 sm:$0xff]  }
 0x179   : > { %v9820_v3 = vld [vmem:[%s11485_s19 + $0x4a4] ss:$8 sps:$4 sm:$0xff]  }
 0x17b   : > { %7981 = vmatpush1.bf16.msra.mxu0 %v9680_v47  ;;  %8034 = vmatpush1.bf16.msra.mxu1 %v9683_v49  ;;  %v9755_v47 = vld [vmem:[%s11485_s19 + $0x550] ss:$8 sps:$4 sm:$0xff]   ;;  %v9763_v49 = vld [vmem:[%s11485_s19 + $0x544] ss:$8 sps:$4 sm:$0xff]  }
 0x17c   : > { %7982 = vmatprep.subr.bf16.mxu0 %v9688_v50  ;;  %8035 = vmatprep.subr.bf16.mxu1 %v9691_v51  ;;  %v8926_v50 = vcombine.high %v11686_v40, %v11691_v41  ;;  %v8928_v51 = vcombine.high %v11696_v44, %v11701_v45 }
 0x17f   : > { %7983 = vmatpush1.bf16.msra.mxu0 %v9686_v52  ;;  %8036 = vmatpush1.bf16.msra.mxu1 %v9689_v53  ;;  %v9758_v52 = vld [vmem:[%s11485_s19 + $0x440] ss:$8 sps:$4 sm:$0xff]  }
 0x180   : > { %7984 = vmatprep.subr.bf16.mxu0 %v9694_v54  ;;  %8037 = vmatprep.subr.bf16.mxu1 %v9697_v55  ;;  %v9761_v53 = vld [vmem:[%s11485_s19 + $0x540] ss:$8 sps:$4 sm:$0xff]   ;;  %v9766_v54 = vld [vmem:[%s11485_s19 + $0x434] ss:$8 sps:$4 sm:$0xff]  }
 0x181   : > { %v9769_v55 = vld [vmem:[%s11485_s19 + $0x534] ss:$8 sps:$4 sm:$0xff]  }
 0x183   : > { %7985 = vmatpush2.bf16.msra.mxu0 %v9692_v56  ;;  %8038 = vmatpush2.bf16.msra.mxu1 %v9695_v57  ;;  %v9764_v56 = vld [vmem:[%s11485_s19 + $0x430] ss:$8 sps:$4 sm:$0xff]  }
 0x184   : > { %7986 = vmatprep.subr.bf16.mxu0 %v9700_v58  ;;  %8039 = vmatprep.subr.bf16.mxu1 %v9703_v59  ;;  %v9767_v57 = vld [vmem:[%s11485_s19 + $0x530] ss:$8 sps:$4 sm:$0xff]   ;;  %v9772_v58 = vld [vmem:[%s11485_s19 + $0x424] ss:$8 sps:$4 sm:$0xff]  }
 0x185   : > { %v9775_v59 = vld [vmem:[%s11485_s19 + $0x524] ss:$8 sps:$4 sm:$0xff]  }
 0x187   : > { %7987 = vmatpush2.bf16.msra.mxu0 %v9698_v60  ;;  %8040 = vmatpush2.bf16.msra.mxu1 %v9701_v61  ;;  %v9770_v60 = vld [vmem:[%s11485_s19 + $0x420] ss:$8 sps:$4 sm:$0xff]  }
 0x188   : > { %7988 = vmatprep.subr.bf16.mxu0 %v9706_v62  ;;  %8041 = vmatprep.subr.bf16.mxu1 %v9709_v63  ;;  %v9773_v61 = vld [vmem:[%s11485_s19 + $0x520] ss:$8 sps:$4 sm:$0xff]   ;;  %v9778_v62 = vld [vmem:[%s11485_s19 + $0x414] ss:$8 sps:$4 sm:$0xff]  }
 0x189   : > { %v9781_v63 = vld [vmem:[%s11485_s19 + $0x514] ss:$8 sps:$4 sm:$0xff]  }
 0x18b   : > { %7989 = vmatpush2.bf16.msra.mxu0 %v9704_v4  ;;  %8042 = vmatpush2.bf16.msra.mxu1 %v9707_v7  ;;  %v9776_v4 = vld [vmem:[%s11485_s19 + $0x410] ss:$8 sps:$4 sm:$0xff]  }
 0x18c   : > { %7990 = vmatprep.subr.bf16.mxu0 %v9712_v8  ;;  %8043 = vmatprep.subr.bf16.mxu1 %v9715_v9  ;;  %v9779_v7 = vld [vmem:[%s11485_s19 + $0x510] ss:$8 sps:$4 sm:$0xff]   ;;  %v9784_v8 = vld [vmem:[%s11485_s19 + $0x404] ss:$8 sps:$4 sm:$0xff]  }
 0x18d   : > { %v9787_v9 = vld [vmem:[%s11485_s19 + $0x504] ss:$8 sps:$4 sm:$0xff]  }
 0x18f   : > { %7991 = vmatpush2.bf16.msra.mxu0 %v9710_v10  ;;  %8044 = vmatpush2.bf16.msra.mxu1 %v9713_v11  ;;  %v9782_v10 = vld [vmem:[%s11485_s19 + $0x400] ss:$8 sps:$4 sm:$0xff]  }
 0x190   : > { %7992 = vmatprep.subr.bf16.mxu0 %v9718_v12  ;;  %8045 = vmatprep.subr.bf16.mxu1 %v9721_v13  ;;  %v9785_v11 = vld [vmem:[%s11485_s19 + $0x500] ss:$8 sps:$4 sm:$0xff]   ;;  %v9790_v12 = vld [vmem:[%s11485_s19 + $0x4f4] ss:$8 sps:$4 sm:$0xff]  }
 0x191   : > { %v9793_v13 = vld [vmem:[%s11485_s19 + $0x5f4] ss:$8 sps:$4 sm:$0xff]  }
 0x193   : > { %7993 = vmatpush2.bf16.msra.mxu0 %v9716_v14  ;;  %8046 = vmatpush2.bf16.msra.mxu1 %v9719_v15  ;;  %v9788_v14 = vld [vmem:[%s11485_s19 + $0x4f0] ss:$8 sps:$4 sm:$0xff]  }
 0x194   : > { %7994 = vmatprep.subr.bf16.mxu0 %v9724_v16  ;;  %8047 = vmatprep.subr.bf16.mxu1 %v9727_v17  ;;  %v9791_v15 = vld [vmem:[%s11485_s19 + $0x5f0] ss:$8 sps:$4 sm:$0xff]   ;;  %v9796_v16 = vld [vmem:[%s11485_s19 + $0x4e4] ss:$8 sps:$4 sm:$0xff]  }
 0x195   : > { %v9799_v17 = vld [vmem:[%s11485_s19 + $0x5e4] ss:$8 sps:$4 sm:$0xff]  }
 0x197   : > { %7995 = vmatpush2.bf16.msra.mxu0 %v9722_v18  ;;  %8048 = vmatpush2.bf16.msra.mxu1 %v9725_v19  ;;  %v9794_v18 = vld [vmem:[%s11485_s19 + $0x4e0] ss:$8 sps:$4 sm:$0xff]  }
 0x198   : > { %7996 = vmatprep.subr.bf16.mxu0 %v9730_v20  ;;  %8049 = vmatprep.subr.bf16.mxu1 %v9733_v21  ;;  %v9797_v19 = vld [vmem:[%s11485_s19 + $0x5e0] ss:$8 sps:$4 sm:$0xff]   ;;  %v9802_v20 = vld [vmem:[%s11485_s19 + $0x4d4] ss:$8 sps:$4 sm:$0xff]  }
 0x199   : > { %v9805_v21 = vld [vmem:[%s11485_s19 + $0x5d4] ss:$8 sps:$4 sm:$0xff]  }
 0x19b   : > { %7997 = vmatpush2.bf16.msra.mxu0 %v9728_v22  ;;  %8050 = vmatpush2.bf16.msra.mxu1 %v9731_v23  ;;  %v9800_v22 = vld [vmem:[%s11485_s19 + $0x4d0] ss:$8 sps:$4 sm:$0xff]  }
 0x19c   : > { %7998 = vmatprep.subr.bf16.mxu0 %v9736_v24  ;;  %8051 = vmatprep.subr.bf16.mxu1 %v9739_v25  ;;  %v9803_v23 = vld [vmem:[%s11485_s19 + $0x5d0] ss:$8 sps:$4 sm:$0xff]   ;;  %v9808_v24 = vld [vmem:[%s11485_s19 + $0x4c4] ss:$8 sps:$4 sm:$0xff]  }
 0x19d   : > { %v9811_v25 = vld [vmem:[%s11485_s19 + $0x5c4] ss:$8 sps:$4 sm:$0xff]  }
 0x19f   : > { %7999 = vmatpush2.bf16.msra.mxu0 %v9734_v26  ;;  %8052 = vmatpush2.bf16.msra.mxu1 %v9737_v27  ;;  %v9806_v26 = vld [vmem:[%s11485_s19 + $0x4c0] ss:$8 sps:$4 sm:$0xff]  }
 0x1a0   : > { %8074 = vmatprep.subr.bf16.mxu0 %v9742_v28  ;;  %8127 = vmatprep.subr.bf16.mxu1 %v9745_v29  ;;  %v9809_v27 = vld [vmem:[%s11485_s19 + $0x5c0] ss:$8 sps:$4 sm:$0xff]   ;;  %v9814_v28 = vld [vmem:[%s11485_s19 + $0x4b4] ss:$8 sps:$4 sm:$0xff]  }
 0x1a1   : > { %v9817_v29 = vld [vmem:[%s11485_s19 + $0x5b4] ss:$8 sps:$4 sm:$0xff]  }
 0x1a2   : > { %8001 = vmatmul.mubr.bf16.vlgmr.msra.gmra.mxu0 %v8921_v2  ;;  %8054 = vmatmul.mubr.bf16.vlgmr.msra.gmra.mxu1 %v8923_v5  ;;  %v9823_v2 = vld [vmem:[%s11485_s19 + $0x5a4] ss:$8 sps:$4 sm:$0xff]   ;;  %v9818_v5 = vld [vmem:[%s11485_s19 + $0x4a0] ss:$8 sps:$4 sm:$0xff]  }
 0x1a3   : > { %8075 = vmatpush1.bf16.msra.mxu0 %v9740_v1  ;;  %8128 = vmatpush1.bf16.msra.mxu1 %v9743_v31  ;;  %v9815_v1 = vld [vmem:[%s11485_s19 + $0x5b0] ss:$8 sps:$4 sm:$0xff]   ;;  %v9829_v31 = vld [vmem:[%s11485_s19 + $0x594] ss:$8 sps:$4 sm:$0xff]  }
 0x1a4   : > { %8076 = vmatprep.subr.bf16.mxu0 %v9748_v32  ;;  %8129 = vmatprep.subr.bf16.mxu1 %v9751_v33  ;;  %v9824_v32 = vld [vmem:[%s11485_s19 + $0x490] ss:$8 sps:$4 sm:$0xff]  }
 0x1a5   : > { %8010 = vmatprep.mubr.bf16.mxu0 %v8954_v34  ;;  %8063 = vmatprep.mubr.bf16.mxu1 %v8956_v35  ;;  %v9827_v33 = vld [vmem:[%s11485_s19 + $0x590] ss:$8 sps:$4 sm:$0xff]   ;;  %v9832_v34 = vld [vmem:[%s11485_s19 + $0x484] ss:$8 sps:$4 sm:$0xff]  }
 0x1a6   : > { %v9835_v35 = vld [vmem:[%s11485_s19 + $0x584] ss:$8 sps:$4 sm:$0xff]  }
 0x1a7   : > { %8077 = vmatpush1.bf16.msra.mxu0 %v9746_v36  ;;  %8130 = vmatpush1.bf16.msra.mxu1 %v9749_v37  ;;  %v9830_v36 = vld [vmem:[%s11485_s19 + $0x480] ss:$8 sps:$4 sm:$0xff]  }
 0x1a8   : > { %8078 = vmatprep.subr.bf16.mxu0 %v9754_v38  ;;  %8131 = vmatprep.subr.bf16.mxu1 %v9757_v39  ;;  %v9833_v37 = vld [vmem:[%s11485_s19 + $0x580] ss:$8 sps:$4 sm:$0xff]   ;;  %v9838_v38 = vld [vmem:[%s11485_s19 + $0x674] ss:$8 sps:$4 sm:$0xff]  }
 0x1a9   : > { %v9841_v39 = vld [vmem:[%s11485_s19 + $0x774] ss:$8 sps:$4 sm:$0xff]  }
 0x1aa   : > { %8011 = vmatmul.mubr.bf16.gmra.mxu0 %v8953_v42  ;;  %8064 = vmatmul.mubr.bf16.gmra.mxu1 %v8955_v43  ;;  %v9836_v42 = vld [vmem:[%s11485_s19 + $0x670] ss:$8 sps:$4 sm:$0xff]  }
 0x1ab   : > { %8079 = vmatpush1.bf16.msra.mxu0 %v9752_v46  ;;  %8132 = vmatpush1.bf16.msra.mxu1 %v9755_v47  ;;  %v9839_v43 = vld [vmem:[%s11485_s19 + $0x770] ss:$8 sps:$4 sm:$0xff]   ;;  %v4430_v46 = vld [vmem:[%s12595_s0 + $0x120] sm:$0xff] }
 0x1ac   : > { %8080 = vmatprep.subr.bf16.mxu0 %v9760_v48  ;;  %8133 = vmatprep.subr.bf16.mxu1 %v9763_v49  ;;  %v4446_v47 = vld [vmem:[%s12595_s0 + $0x1a0] sm:$0xff]  ;;  %v8925_v48 = vcombine.low %v11686_v40, %v11691_v41  ;;  %v8927_v49 = vcombine.low %v11696_v44, %v11701_v45 }
 0x1ad   : > { %8106 = vmatprep.mubr.bf16.mxu0 %v8926_v50  ;;  %8159 = vmatprep.mubr.bf16.mxu1 %v8928_v51  ;;  %v4431_v50 = vld [vmem:[%s12595_s0 + $0x128] sm:$0xff]  ;;  %v8958_v41 = vcombine.high %v4430_v46, %v4446_v47 }
 0x1ae   : > { %v4447_v51 = vld [vmem:[%s12595_s0 + $0x1a8] sm:$0xff] }
 0x1af   : > { %8081 = vmatpush1.bf16.msra.mxu0 %v9758_v52  ;;  %8134 = vmatpush1.bf16.msra.mxu1 %v9761_v53  ;;  %v9844_v52 = vld [vmem:[%s11485_s19 + $0x664] ss:$8 sps:$4 sm:$0xff]   ;;  %v8960_v44 = vcombine.high %v4431_v50, %v4447_v51  ;;  %v9842_v45 = vld [vmem:[%s11485_s19 + $0x660] ss:$8 sps:$4 sm:$0xff]  }
 0x1b0   : > { %8082 = vmatprep.subr.bf16.mxu0 %v9766_v54  ;;  %8135 = vmatprep.subr.bf16.mxu1 %v9769_v55  ;;  %v9847_v40 = vld [vmem:[%s11485_s19 + $0x764] ss:$8 sps:$4 sm:$0xff]   ;;  %v9845_v53 = vld [vmem:[%s11485_s19 + $0x760] ss:$8 sps:$4 sm:$0xff]   ;;  %v9850_v54 = vld [vmem:[%s11485_s19 + $0x654] ss:$8 sps:$4 sm:$0xff]  }
 0x1b1   : > { %v9853_v55 = vld [vmem:[%s11485_s19 + $0x754] ss:$8 sps:$4 sm:$0xff]  }
 0x1b3   : > { %8083 = vmatpush1.bf16.msra.mxu0 %v9764_v56  ;;  %8136 = vmatpush1.bf16.msra.mxu1 %v9767_v57  ;;  %v9848_v56 = vld [vmem:[%s11485_s19 + $0x650] ss:$8 sps:$4 sm:$0xff]  }
 0x1b4   : > { %8084 = vmatprep.subr.bf16.mxu0 %v9772_v58  ;;  %8137 = vmatprep.subr.bf16.mxu1 %v9775_v59  ;;  %v9851_v57 = vld [vmem:[%s11485_s19 + $0x750] ss:$8 sps:$4 sm:$0xff]  }
 0x1b5   : > { %v11792_v58 = vld [vmem:[%s12595_s0 + $0x30] sm:$0xff] }
 0x1b6   : > { %v11797_v59 = vld [vmem:[%s12595_s0 + $0xb0] sm:$0xff] }
 0x1b7   : > { %8085 = vmatpush1.bf16.msra.mxu0 %v9770_v60  ;;  %8138 = vmatpush1.bf16.msra.mxu1 %v9773_v61  ;;  %v8957_v60 = vcombine.low %v4430_v46, %v4446_v47  ;;  %v8959_v61 = vcombine.low %v4431_v50, %v4447_v51  ;;  %v9916_v46 = vld [vmem:[%s11485_s19 + $0x6a4] ss:$8 sps:$4 sm:$0xff]   ;;  %v9922_v50 = vld [vmem:[%s11485_s19 + $0x694] ss:$8 sps:$4 sm:$0xff]   ;;  %v4972_v51 = vlaneseq }
 0x1b8   : > { %8086 = vmatprep.subr.bf16.mxu0 %v9778_v62  ;;  %8139 = vmatprep.subr.bf16.mxu1 %v9781_v63  ;;  %v11802_v62 = vld [vmem:[%s12595_s0 + $0x38] sm:$0xff]  ;;  %v9919_v47 = vld [vmem:[%s11485_s19 + $0x7a4] ss:$8 sps:$4 sm:$0xff]  }
 0x1b9   : > { %v11807_v63 = vld [vmem:[%s12595_s0 + $0xb8] sm:$0xff] }
 0x1bb   : > { %8087 = vmatpush1.bf16.msra.mxu0 %v9776_v4  ;;  %8140 = vmatpush1.bf16.msra.mxu1 %v9779_v7  ;;  %v9856_v4 = vld [vmem:[%s11485_s19 + $0x644] ss:$8 sps:$4 sm:$0xff]  }
 0x1bc   : > { %8088 = vmatprep.subr.bf16.mxu0 %v9784_v8  ;;  %8141 = vmatprep.subr.bf16.mxu1 %v9787_v9  ;;  %v9859_v7 = vld [vmem:[%s11485_s19 + $0x744] ss:$8 sps:$4 sm:$0xff]   ;;  %v8930_v8 = vcombine.high %v11792_v58, %v11797_v59  ;;  %v8932_v9 = vcombine.high %v11802_v62, %v11807_v63 }
 0x1bf   : > { %8089 = vmatpush1.bf16.msra.mxu0 %v9782_v10  ;;  %8142 = vmatpush1.bf16.msra.mxu1 %v9785_v11  ;;  %v9854_v10 = vld [vmem:[%s11485_s19 + $0x640] ss:$8 sps:$4 sm:$0xff]  }
 0x1c0   : > { %8090 = vmatprep.subr.bf16.mxu0 %v9790_v12  ;;  %8143 = vmatprep.subr.bf16.mxu1 %v9793_v13  ;;  %v9857_v11 = vld [vmem:[%s11485_s19 + $0x740] ss:$8 sps:$4 sm:$0xff]   ;;  %v9862_v12 = vld [vmem:[%s11485_s19 + $0x634] ss:$8 sps:$4 sm:$0xff]  }
 0x1c1   : > { %v9865_v13 = vld [vmem:[%s11485_s19 + $0x734] ss:$8 sps:$4 sm:$0xff]  }
 0x1c3   : > { %8091 = vmatpush2.bf16.msra.mxu0 %v9788_v14  ;;  %8144 = vmatpush2.bf16.msra.mxu1 %v9791_v15  ;;  %v9860_v14 = vld [vmem:[%s11485_s19 + $0x630] ss:$8 sps:$4 sm:$0xff]  }
 0x1c4   : > { %8092 = vmatprep.subr.bf16.mxu0 %v9796_v16  ;;  %8145 = vmatprep.subr.bf16.mxu1 %v9799_v17  ;;  %v9863_v15 = vld [vmem:[%s11485_s19 + $0x730] ss:$8 sps:$4 sm:$0xff]   ;;  %v9868_v16 = vld [vmem:[%s11485_s19 + $0x624] ss:$8 sps:$4 sm:$0xff]  }
 0x1c5   : > { %v9871_v17 = vld [vmem:[%s11485_s19 + $0x724] ss:$8 sps:$4 sm:$0xff]  }
 0x1c7   : > { %8093 = vmatpush2.bf16.msra.mxu0 %v9794_v18  ;;  %8146 = vmatpush2.bf16.msra.mxu1 %v9797_v19  ;;  %v9866_v18 = vld [vmem:[%s11485_s19 + $0x620] ss:$8 sps:$4 sm:$0xff]  }
 0x1c8   : > { %8094 = vmatprep.subr.bf16.mxu0 %v9802_v20  ;;  %8147 = vmatprep.subr.bf16.mxu1 %v9805_v21  ;;  %v9869_v19 = vld [vmem:[%s11485_s19 + $0x720] ss:$8 sps:$4 sm:$0xff]   ;;  %v9874_v20 = vld [vmem:[%s11485_s19 + $0x614] ss:$8 sps:$4 sm:$0xff]  }
 0x1c9   : > { %v9877_v21 = vld [vmem:[%s11485_s19 + $0x714] ss:$8 sps:$4 sm:$0xff]  }
 0x1cb   : > { %8095 = vmatpush2.bf16.msra.mxu0 %v9800_v22  ;;  %8148 = vmatpush2.bf16.msra.mxu1 %v9803_v23  ;;  %v9872_v22 = vld [vmem:[%s11485_s19 + $0x610] ss:$8 sps:$4 sm:$0xff]  }
 0x1cc   : > { %8096 = vmatprep.subr.bf16.mxu0 %v9808_v24  ;;  %8149 = vmatprep.subr.bf16.mxu1 %v9811_v25  ;;  %v9875_v23 = vld [vmem:[%s11485_s19 + $0x710] ss:$8 sps:$4 sm:$0xff]   ;;  %v9880_v24 = vld [vmem:[%s11485_s19 + $0x604] ss:$8 sps:$4 sm:$0xff]  }
 0x1cd   : > { %v9883_v25 = vld [vmem:[%s11485_s19 + $0x704] ss:$8 sps:$4 sm:$0xff]  }
 0x1cf   : > { %8097 = vmatpush2.bf16.msra.mxu0 %v9806_v26  ;;  %8150 = vmatpush2.bf16.msra.mxu1 %v9809_v27  ;;  %v9878_v26 = vld [vmem:[%s11485_s19 + $0x600] ss:$8 sps:$4 sm:$0xff]  }
 0x1d0   : > { %8098 = vmatprep.subr.bf16.mxu0 %v9814_v28  ;;  %8151 = vmatprep.subr.bf16.mxu1 %v9817_v29  ;;  %v9881_v27 = vld [vmem:[%s11485_s19 + $0x700] ss:$8 sps:$4 sm:$0xff]   ;;  %v9886_v28 = vld [vmem:[%s11485_s19 + $0x6f4] ss:$8 sps:$4 sm:$0xff]  }
 0x1d1   : > { %v9889_v29 = vld [vmem:[%s11485_s19 + $0x7f4] ss:$8 sps:$4 sm:$0xff]  }
 0x1d3   : > { %8099 = vmatpush2.bf16.msra.mxu0 %v9812_v0  ;;  %8152 = vmatpush2.bf16.msra.mxu1 %v9815_v1  ;;  %v9884_v0 = vld [vmem:[%s11485_s19 + $0x6f0] ss:$8 sps:$4 sm:$0xff]  }
 0x1d4   : > { %8100 = vmatprep.subr.bf16.mxu0 %v9820_v3  ;;  %8153 = vmatprep.subr.bf16.mxu1 %v9823_v2  ;;  %v9887_v1 = vld [vmem:[%s11485_s19 + $0x7f0] ss:$8 sps:$4 sm:$0xff]   ;;  %v9892_v3 = vld [vmem:[%s11485_s19 + $0x6e4] ss:$8 sps:$4 sm:$0xff]  }
 0x1d5   : > { %v9895_v2 = vld [vmem:[%s11485_s19 + $0x7e4] ss:$8 sps:$4 sm:$0xff]  }
 0x1d7   : > { %8101 = vmatpush2.bf16.msra.mxu0 %v9818_v5  ;;  %8154 = vmatpush2.bf16.msra.mxu1 %v9821_v6  ;;  %v9890_v5 = vld [vmem:[%s11485_s19 + $0x6e0] ss:$8 sps:$4 sm:$0xff]  }
 0x1d8   : > { %8102 = vmatprep.subr.bf16.mxu0 %v9826_v30  ;;  %8155 = vmatprep.subr.bf16.mxu1 %v9829_v31  ;;  %v9893_v6 = vld [vmem:[%s11485_s19 + $0x7e0] ss:$8 sps:$4 sm:$0xff]   ;;  %v9898_v30 = vld [vmem:[%s11485_s19 + $0x6d4] ss:$8 sps:$4 sm:$0xff]  }
 0x1d9   : > { %v9901_v31 = vld [vmem:[%s11485_s19 + $0x7d4] ss:$8 sps:$4 sm:$0xff]  }
 0x1db   : > { %8103 = vmatpush2.bf16.msra.mxu0 %v9824_v32  ;;  %8156 = vmatpush2.bf16.msra.mxu1 %v9827_v33  ;;  %v9896_v32 = vld [vmem:[%s11485_s19 + $0x6d0] ss:$8 sps:$4 sm:$0xff]  }
 0x1dc   : > { %8104 = vmatprep.subr.bf16.mxu0 %v9832_v34  ;;  %8157 = vmatprep.subr.bf16.mxu1 %v9835_v35  ;;  %v9899_v33 = vld [vmem:[%s11485_s19 + $0x7d0] ss:$8 sps:$4 sm:$0xff]   ;;  %v9904_v34 = vld [vmem:[%s11485_s19 + $0x6c4] ss:$8 sps:$4 sm:$0xff]  }
 0x1dd   : > { %v9907_v35 = vld [vmem:[%s11485_s19 + $0x7c4] ss:$8 sps:$4 sm:$0xff]  }
 0x1df   : > { %8105 = vmatpush2.bf16.msra.mxu0 %v9830_v36  ;;  %8158 = vmatpush2.bf16.msra.mxu1 %v9833_v37  ;;  %v9902_v36 = vld [vmem:[%s11485_s19 + $0x6c0] ss:$8 sps:$4 sm:$0xff]  }
 0x1e0   : > { %8180 = vmatprep.subr.bf16.mxu0 %v9838_v38  ;;  %8233 = vmatprep.subr.bf16.mxu1 %v9841_v39  ;;  %v9905_v37 = vld [vmem:[%s11485_s19 + $0x7c0] ss:$8 sps:$4 sm:$0xff]   ;;  %v9910_v38 = vld [vmem:[%s11485_s19 + $0x6b4] ss:$8 sps:$4 sm:$0xff]  }
 0x1e1   : > { %v9913_v39 = vld [vmem:[%s11485_s19 + $0x7b4] ss:$8 sps:$4 sm:$0xff]  }
 0x1e2   : > { %8107 = vmatmul.mubr.bf16.vlgmr.msra.gmra.mxu0 %v8925_v48  ;;  %8160 = vmatmul.mubr.bf16.vlgmr.msra.gmra.mxu1 %v8927_v49  ;;  %v9914_v48 = vld [vmem:[%s11485_s19 + $0x6a0] ss:$8 sps:$4 sm:$0xff]  }
 0x1e3   : > { %8181 = vmatpush1.bf16.msra.mxu0 %v9836_v42  ;;  %8234 = vmatpush1.bf16.msra.mxu1 %v9839_v43  ;;  %v9908_v42 = vld [vmem:[%s11485_s19 + $0x6b0] ss:$8 sps:$4 sm:$0xff]   ;;  %v9917_v49 = vld [vmem:[%s11485_s19 + $0x7a0] ss:$8 sps:$4 sm:$0xff]  }
 0x1e4   : > { %8182 = vmatprep.subr.bf16.mxu0 %v9844_v52  ;;  %8235 = vmatprep.subr.bf16.mxu1 %v9847_v40  ;;  %v9911_v43 = vld [vmem:[%s11485_s19 + $0x7b0] ss:$8 sps:$4 sm:$0xff]   ;;  %v9925_v52 = vld [vmem:[%s11485_s19 + $0x794] ss:$8 sps:$4 sm:$0xff]  }
 0x1e5   : > { %8116 = vmatprep.mubr.bf16.mxu0 %v8958_v41  ;;  %8169 = vmatprep.mubr.bf16.mxu1 %v8960_v44  ;;  %v9920_v40 = vld [vmem:[%s11485_s19 + $0x690] ss:$8 sps:$4 sm:$0xff]   ;;  %v9928_v44 = vld [vmem:[%s11485_s19 + $0x684] ss:$8 sps:$4 sm:$0xff]  }
 0x1e6   : > { %v9923_v41 = vld [vmem:[%s11485_s19 + $0x790] ss:$8 sps:$4 sm:$0xff]  }
 0x1e7   : > { %8183 = vmatpush1.bf16.msra.mxu0 %v9842_v45  ;;  %8236 = vmatpush1.bf16.msra.mxu1 %v9845_v53  ;;  %v4973_v45 = vshrl.u32 %v4972_v51, 7  ;;  %v9931_v53 = vld [vmem:[%s11485_s19 + $0x784] ss:$8 sps:$4 sm:$0xff]   ;;  %v9958_v51 = vld [vmem:[%s11485_s19 + $0x834] ss:$8 sps:$4 sm:$0xff]  }
 0x1e8   : > { %8184 = vmatprep.subr.bf16.mxu0 %v9850_v54  ;;  %8237 = vmatprep.subr.bf16.mxu1 %v9853_v55  ;;  %v9926_v54 = vld [vmem:[%s11485_s19 + $0x680] ss:$8 sps:$4 sm:$0xff]  }
 0x1e9   : > { %v9929_v55 = vld [vmem:[%s11485_s19 + $0x780] ss:$8 sps:$4 sm:$0xff]  }
 0x1ea   : > { %8117 = vmatmul.mubr.bf16.gmra.mxu0 %v8957_v60  ;;  %8170 = vmatmul.mubr.bf16.gmra.mxu1 %v8959_v61  ;;  %v9934_v60 = vld [vmem:[%s11485_s19 + $0x874] ss:$8 sps:$4 sm:$0xff]  }
 0x1eb   : > { %8185 = vmatpush1.bf16.msra.mxu0 %v9848_v56  ;;  %8238 = vmatpush1.bf16.msra.mxu1 %v9851_v57  ;;  %v4970_v56 = vld [vmem:[%s4390_s20] sm:$0x3]  ;;  %v4974_v57 = vsub.s32 0, %v4973_v45  ;;  %v9937_v61 = vld [vmem:[%s11485_s19 + $0x974] ss:$8 sps:$4 sm:$0xff]  }
 0x1ec   : > { %8186 = vmatprep.subr.bf16.mxu0 %v9856_v4  ;;  %8239 = vmatprep.subr.bf16.mxu1 %v9859_v7  ;;  %v9932_v4 = vld [vmem:[%s11485_s19 + $0x870] ss:$8 sps:$4 sm:$0xff]  }
 0x1ed   : > { %8212 = vmatprep.mubr.bf16.mxu0 %v8930_v8  ;;  %8265 = vmatprep.mubr.bf16.mxu1 %v8932_v9  ;;  %v9935_v7 = vld [vmem:[%s11485_s19 + $0x970] ss:$8 sps:$4 sm:$0xff]   ;;  %v4978_v8 = vsub.s32 1, %v4973_v45 }
 0x1ee   : > { %v4432_v9 = vld [vmem:[%s12595_s0 + $0x130] sm:$0xff] }
 0x1ef   : > { %8187 = vmatpush1.bf16.msra.mxu0 %v9854_v10  ;;  %8240 = vmatpush1.bf16.msra.mxu1 %v9857_v11  ;;  %v4448_v10 = vld [vmem:[%s12595_s0 + $0x1b0] sm:$0xff]  ;;  %v8929_v11 = vcombine.low %v11792_v58, %v11797_v59  ;;  %v9943_v58 = vld [vmem:[%s11485_s19 + $0x964] ss:$8 sps:$4 sm:$0xff]   ;;  %v11893_v59 = vrot.slane %v4970_v56, %v4978_v8 }
 0x1f0   : > { %8188 = vmatprep.subr.bf16.mxu0 %v9862_v12  ;;  %8241 = vmatprep.subr.bf16.mxu1 %v9865_v13  ;;  %v8931_v12 = vcombine.low %v11802_v62, %v11807_v63  ;;  %v4433_v13 = vld [vmem:[%s12595_s0 + $0x138] sm:$0xff]  ;;  %v8962_v62 = vcombine.high %v4432_v9, %v4448_v10 }
 0x1f3   : > { %8189 = vmatpush1.bf16.msra.mxu0 %v9860_v14  ;;  %8242 = vmatpush1.bf16.msra.mxu1 %v9863_v15  ;;  %v4449_v14 = vld [vmem:[%s12595_s0 + $0x1b8] sm:$0xff]  ;;  %v11889_v15 = vrot.slane %v4970_v56, %v4974_v57 }
 0x1f4   : > { %8190 = vmatprep.subr.bf16.mxu0 %v9868_v16  ;;  %8243 = vmatprep.subr.bf16.mxu1 %v9871_v17  ;;  %v9940_v16 = vld [vmem:[%s11485_s19 + $0x864] ss:$8 sps:$4 sm:$0xff]   ;;  %v8964_v63 = vcombine.high %v4433_v13, %v4449_v14  ;;  %v9959_v57 = vld [vmem:[%s11485_s19 + $0x930] ss:$8 sps:$4 sm:$0xff]  }
 0x1f7   : > { %8191 = vmatpush1.bf16.msra.mxu0 %v9866_v18  ;;  %8244 = vmatpush1.bf16.msra.mxu1 %v9869_v19  ;;  %v9938_v19 = vld [vmem:[%s11485_s19 + $0x860] ss:$8 sps:$4 sm:$0xff]  }
 0x1f8   : > { %8192 = vmatprep.subr.bf16.mxu0 %v9874_v20  ;;  %8245 = vmatprep.subr.bf16.mxu1 %v9877_v21  ;;  %v9941_v20 = vld [vmem:[%s11485_s19 + $0x960] ss:$8 sps:$4 sm:$0xff]  }
 0x1fb   : > { %8193 = vmatpush1.bf16.msra.mxu0 %v9872_v22  ;;  %8246 = vmatpush1.bf16.msra.mxu1 %v9875_v23  ;;  %v9946_v22 = vld [vmem:[%s11485_s19 + $0x854] ss:$8 sps:$4 sm:$0xff]  }
 0x1fc   : > { %8194 = vmatprep.subr.bf16.mxu0 %v9880_v24  ;;  %8247 = vmatprep.subr.bf16.mxu1 %v9883_v25  ;;  %v9949_v25 = vld [vmem:[%s11485_s19 + $0x954] ss:$8 sps:$4 sm:$0xff]  }
 0x1ff   : > { %8195 = vmatpush1.bf16.msra.mxu0 %v9878_v26  ;;  %8248 = vmatpush1.bf16.msra.mxu1 %v9881_v27 }
 0x200   : > { %8196 = vmatprep.subr.bf16.mxu0 %v9886_v28  ;;  %8249 = vmatprep.subr.bf16.mxu1 %v9889_v29  ;;  %v9944_v28 = vld [vmem:[%s11485_s19 + $0x850] ss:$8 sps:$4 sm:$0xff]  }
 0x201   : > { %v9947_v29 = vld [vmem:[%s11485_s19 + $0x950] ss:$8 sps:$4 sm:$0xff]  }
 0x203   : > { %8197 = vmatpush2.bf16.msra.mxu0 %v9884_v0  ;;  %8250 = vmatpush2.bf16.msra.mxu1 %v9887_v1  ;;  %v11908_v0 = vld [vmem:[%s12595_s0 + $0x40] sm:$0xff] }
 0x204   : > { %8198 = vmatprep.subr.bf16.mxu0 %v9892_v3  ;;  %8251 = vmatprep.subr.bf16.mxu1 %v9895_v2  ;;  %v11913_v1 = vld [vmem:[%s12595_s0 + $0xc0] sm:$0xff] }
 0x207   : > { %8199 = vmatpush2.bf16.msra.mxu0 %v9890_v5  ;;  %8252 = vmatpush2.bf16.msra.mxu1 %v9893_v6  ;;  %v8961_v5 = vcombine.low %v4432_v9, %v4448_v10  ;;  %v8963_v6 = vcombine.low %v4433_v13, %v4449_v14  ;;  %v9965_v13 = vld [vmem:[%s11485_s19 + $0x920] ss:$8 sps:$4 sm:$0xff]   ;;  %v9970_v14 = vld [vmem:[%s11485_s19 + $0x814] ss:$8 sps:$4 sm:$0xff]  }
 0x208   : > { %8200 = vmatprep.subr.bf16.mxu0 %v9898_v30  ;;  %8253 = vmatprep.subr.bf16.mxu1 %v9901_v31  ;;  %v11918_v30 = vld [vmem:[%s12595_s0 + $0x48] sm:$0xff] }
 0x209   : > { %v11923_v31 = vld [vmem:[%s12595_s0 + $0xc8] sm:$0xff] }
 0x20b   : > { %8201 = vmatpush2.bf16.msra.mxu0 %v9896_v32  ;;  %8254 = vmatpush2.bf16.msra.mxu1 %v9899_v33 }
 0x20c   : > { %8202 = vmatprep.subr.bf16.mxu0 %v9904_v34  ;;  %8255 = vmatprep.subr.bf16.mxu1 %v9907_v35  ;;  %v9952_v34 = vld [vmem:[%s11485_s19 + $0x844] ss:$8 sps:$4 sm:$0xff]  }
 0x20f   : > { %8203 = vmatpush2.bf16.msra.mxu0 %v9902_v36  ;;  %8256 = vmatpush2.bf16.msra.mxu1 %v9905_v37  ;;  %v9955_v37 = vld [vmem:[%s11485_s19 + $0x944] ss:$8 sps:$4 sm:$0xff]  }
 0x210   : > { %8204 = vmatprep.subr.bf16.mxu0 %v9910_v38  ;;  %8257 = vmatprep.subr.bf16.mxu1 %v9913_v39 }
 0x213   : > { %8205 = vmatpush2.bf16.msra.mxu0 %v9908_v42  ;;  %8258 = vmatpush2.bf16.msra.mxu1 %v9911_v43  ;;  %v8934_v42 = vcombine.high %v11908_v0, %v11913_v1  ;;  %v8936_v43 = vcombine.high %v11918_v30, %v11923_v31 }
 0x214   : > { %8206 = vmatprep.subr.bf16.mxu0 %v9916_v46  ;;  %8259 = vmatprep.subr.bf16.mxu1 %v9919_v47  ;;  %v9950_v46 = vld [vmem:[%s11485_s19 + $0x840] ss:$8 sps:$4 sm:$0xff]  }
 0x215   : > { %v9953_v47 = vld [vmem:[%s11485_s19 + $0x940] ss:$8 sps:$4 sm:$0xff]  }
 0x217   : > { %8207 = vmatpush2.bf16.msra.mxu0 %v9914_v48  ;;  %8260 = vmatpush2.bf16.msra.mxu1 %v9917_v49 }
 0x218   : > { %8208 = vmatprep.subr.bf16.mxu0 %v9922_v50  ;;  %8261 = vmatprep.subr.bf16.mxu1 %v9925_v52 }
 0x21b   : > { %8209 = vmatpush2.bf16.msra.mxu0 %v9920_v40  ;;  %8262 = vmatpush2.bf16.msra.mxu1 %v9923_v41  ;;  %v9961_v40 = vld [vmem:[%s11485_s19 + $0x934] ss:$8 sps:$4 sm:$0xff]  }
 0x21c   : > { %8210 = vmatprep.subr.bf16.mxu0 %v9928_v44  ;;  %8263 = vmatprep.subr.bf16.mxu1 %v9931_v53 }
 0x21f   : > { %8211 = vmatpush2.bf16.msra.mxu0 %v9926_v54  ;;  %8264 = vmatpush2.bf16.msra.mxu1 %v9929_v55  ;;  %v9956_v54 = vld [vmem:[%s11485_s19 + $0x830] ss:$8 sps:$4 sm:$0xff]  }
 0x220   : > { %8286 = vmatprep.subr.bf16.mxu0 %v9934_v60  ;;  %8339 = vmatprep.subr.bf16.mxu1 %v9937_v61 }
 0x222   : > { %v7896_v17 = vpop.f32.mrf.mxu0  ;;  %v7949_v18 = vpop.f32.mrf.mxu1  ;;  %8213 = vmatmul.mubr.bf16.vlgmr.msra.gmra.mxu0 %v8929_v11  ;;  %8266 = vmatmul.mubr.bf16.vlgmr.msra.gmra.mxu1 %v8931_v12  ;;  %v9962_v12 = vld [vmem:[%s11485_s19 + $0x820] ss:$8 sps:$4 sm:$0xff]  }
 0x223   : > { %v7897_v21 = vadd.f32 %v7896_v17, %v11889_v15  ;;  %8287 = vmatpush1.bf16.msra.mxu0 %v9932_v4  ;;  %8340 = vmatpush1.bf16.msra.mxu1 %v9935_v7  ;;  %v9964_v4 = vld [vmem:[%s11485_s19 + $0x824] ss:$8 sps:$4 sm:$0xff]   ;;  %v9974_v17 = vld [vmem:[%s11485_s19 + $0x800] ss:$8 sps:$4 sm:$0xff]  }
 0x224   : > { %v7898_v23 = vpop.f32.mrf.mxu0  ;;  %v7951_v24 = vpop.f32.mrf.mxu1  ;;  %8288 = vmatprep.subr.bf16.mxu0 %v9940_v16  ;;  %8341 = vmatprep.subr.bf16.mxu1 %v9943_v58  ;;  %v9967_v7 = vld [vmem:[%s11485_s19 + $0x924] ss:$8 sps:$4 sm:$0xff]   ;;  %v9973_v16 = vld [vmem:[%s11485_s19 + $0x914] ss:$8 sps:$4 sm:$0xff]   ;;  %v9968_v58 = vld [vmem:[%s11485_s19 + $0x810] ss:$8 sps:$4 sm:$0xff]  }
 0x225   : > { %v11900_v26 = vadd.f32 %v7949_v18, %v7897_v21  ;;  %v7899_v27 = vadd.f32 %v7898_v23, %v11893_v59  ;;  %8222 = vmatprep.mubr.bf16.mxu0 %v8962_v62  ;;  %8275 = vmatprep.mubr.bf16.mxu1 %v8964_v63  ;;  %v9976_v62 = vld [vmem:[%s11485_s19 + $0x804] ss:$8 sps:$4 sm:$0xff]   ;;  %v9977_v18 = vld [vmem:[%s11485_s19 + $0x900] ss:$8 sps:$4 sm:$0xff]   ;;  %v9980_v21 = vld [vmem:[%s11485_s19 + $0x8f0] ss:$8 sps:$4 sm:$0xff]  }
 0x226   : > { %v7900_v3 = vpop.f32.mrf.mxu0  ;;  %v7953_v2 = vpop.f32.mrf.mxu1  ;;  %v9979_v63 = vld [vmem:[%s11485_s19 + $0x904] ss:$8 sps:$4 sm:$0xff]  }
 0x227   : > { %v11925_v32 = vadd.f32 %v7951_v24, %v7899_v27  ;;  %v7901_v33 = vadd.f32 %v7900_v3, %v11889_v15  ;;  %8289 = vmatpush1.bf16.msra.mxu0 %v9938_v19  ;;  %8342 = vmatpush1.bf16.msra.mxu1 %v9941_v20  ;;  %v9982_v19 = vld [vmem:[%s11485_s19 + $0x8f4] ss:$8 sps:$4 sm:$0xff]   ;;  %v9988_v23 = vld [vmem:[%s11485_s19 + $0x8e4] ss:$8 sps:$4 sm:$0xff]   ;;  %v9989_v27 = vld [vmem:[%s11485_s19 + $0x9e0] ss:$8 sps:$4 sm:$0xff]  }
 0x228   : > { %v7902_v35 = vpop.f32.mrf.mxu0  ;;  %v7955_v36 = vpop.f32.mrf.mxu1  ;;  %8290 = vmatprep.subr.bf16.mxu0 %v9946_v22  ;;  %8343 = vmatprep.subr.bf16.mxu1 %v9949_v25  ;;  %v9985_v20 = vld [vmem:[%s11485_s19 + $0x9f4] ss:$8 sps:$4 sm:$0xff]   ;;  %v9983_v22 = vld [vmem:[%s11485_s19 + $0x9f0] ss:$8 sps:$4 sm:$0xff]   ;;  %v9991_v24 = vld [vmem:[%s11485_s19 + $0x9e4] ss:$8 sps:$4 sm:$0xff]  }
 0x229   : > { %v11930_v38 = vadd.f32 %v7953_v2, %v7901_v33  ;;  %v7903_v39 = vadd.f32 %v7902_v35, %v11893_v59  ;;  %v9986_v25 = vld [vmem:[%s11485_s19 + $0x8e0] ss:$8 sps:$4 sm:$0xff]   ;;  %v9992_v3 = vld [vmem:[%s11485_s19 + $0x8d0] ss:$8 sps:$4 sm:$0xff]   ;;  %v10006_v35 = vld [vmem:[%s11485_s19 + $0x8b4] ss:$8 sps:$4 sm:$0xff]  }
 0x22a   : > { %8223 = vmatmul.mubr.bf16.gmra.mxu0 %v8961_v5  ;;  %8276 = vmatmul.mubr.bf16.gmra.mxu1 %v8963_v6  ;;  %v7906_v48 = vpop.f32.mrf.mxu0  ;;  %v7959_v49 = vpop.f32.mrf.mxu1  ;;  %v9995_v2 = vld [vmem:[%s11485_s19 + $0x9d0] ss:$8 sps:$4 sm:$0xff]   ;;  %v10000_v5 = vld [vmem:[%s11485_s19 + $0x8c4] ss:$8 sps:$4 sm:$0xff]   ;;  %v9998_v33 = vld [vmem:[%s11485_s19 + $0x8c0] ss:$8 sps:$4 sm:$0xff]  }
 0x22b   : > { %v11939_v50 = vadd.f32 %v7955_v36, %v7903_v39  ;;  %8291 = vmatpush1.bf16.msra.mxu0 %v9944_v28  ;;  %8344 = vmatpush1.bf16.msra.mxu1 %v9947_v29  ;;  %v7907_v52 = vadd.f32 %v7906_v48, %v11889_v15  ;;  %v9994_v28 = vld [vmem:[%s11485_s19 + $0x8d4] ss:$8 sps:$4 sm:$0xff]   ;;  %v10003_v6 = vld [vmem:[%s11485_s19 + $0x9c4] ss:$8 sps:$4 sm:$0xff]   ;;  %v10007_v39 = vld [vmem:[%s11485_s19 + $0x9b0] ss:$8 sps:$4 sm:$0xff]  }
 0x22c   : > { %8292 = vmatprep.subr.bf16.mxu0 %v9952_v34  ;;  %8345 = vmatprep.subr.bf16.mxu1 %v9955_v37  ;;  %v7908_v41 = vpop.f32.mrf.mxu0  ;;  %v7961_v44 = vpop.f32.mrf.mxu1  ;;  %v9997_v29 = vld [vmem:[%s11485_s19 + $0x9d4] ss:$8 sps:$4 sm:$0xff]   ;;  %v10001_v34 = vld [vmem:[%s11485_s19 + $0x9c0] ss:$8 sps:$4 sm:$0xff]   ;;  %v10004_v37 = vld [vmem:[%s11485_s19 + $0x8b0] ss:$8 sps:$4 sm:$0xff]  }
 0x22d   : > { %v7909_v45 = vadd.f32 %v7908_v41, %v11893_v59  ;;  %v11945_v53 = vadd.f32 %v7959_v49, %v7907_v52  ;;  %8318 = vmatprep.mubr.bf16.mxu0 %v8934_v42  ;;  %8371 = vmatprep.mubr.bf16.mxu1 %v8936_v43  ;;  %v10009_v36 = vld [vmem:[%s11485_s19 + $0x9b4] ss:$8 sps:$4 sm:$0xff]   ;;  %v10012_v42 = vld [vmem:[%s11485_s19 + $0x8a4] ss:$8 sps:$4 sm:$0xff]   ;;  %v10019_v52 = vld [vmem:[%s11485_s19 + $0x990] ss:$8 sps:$4 sm:$0xff]  }
 0x22e   : > { %v7910_v55 = vpop.f32.mrf.mxu0  ;;  %v7963_v56 = vpop.f32.mrf.mxu1  ;;  %v10015_v43 = vld [vmem:[%s11485_s19 + $0x9a4] ss:$8 sps:$4 sm:$0xff]   ;;  %v10018_v48 = vld [vmem:[%s11485_s19 + $0x894] ss:$8 sps:$4 sm:$0xff]  }
 0x22f   : > { %8293 = vmatpush1.bf16.msra.mxu0 %v9950_v46  ;;  %8346 = vmatpush1.bf16.msra.mxu1 %v9953_v47  ;;  %v7911_v60 = vadd.f32 %v7910_v55, %v11889_v15  ;;  %v11950_v61 = vadd.f32 %v7961_v44, %v7909_v45  ;;  %v10010_v46 = vld [vmem:[%s11485_s19 + $0x8a0] ss:$8 sps:$4 sm:$0xff]   ;;  %v10021_v49 = vld [vmem:[%s11485_s19 + $0x994] ss:$8 sps:$4 sm:$0xff]   ;;  %v10027_v41 = vld [vmem:[%s11485_s19 + $0x984] ss:$8 sps:$4 sm:$0xff]  }
 0x230   : > { %8294 = vmatprep.subr.bf16.mxu0 %v9958_v51  ;;  %8347 = vmatprep.subr.bf16.mxu1 %v9961_v40  ;;  %v7912_v8 = vpop.f32.mrf.mxu0  ;;  %v7965_v9 = vpop.f32.mrf.mxu1  ;;  %v10013_v47 = vld [vmem:[%s11485_s19 + $0x9a0] ss:$8 sps:$4 sm:$0xff]   ;;  %v10016_v51 = vld [vmem:[%s11485_s19 + $0x890] ss:$8 sps:$4 sm:$0xff]   ;;  %v10024_v40 = vld [vmem:[%s11485_s19 + $0x884] ss:$8 sps:$4 sm:$0xff]  }
 0x231   : > { %v7913_v10 = vadd.f32 %v7912_v8, %v11893_v59  ;;  %v11955_v11 = vadd.f32 %v7963_v56, %v7911_v60  ;;  %v9971_v59 = vld [vmem:[%s11485_s19 + $0x910] ss:$8 sps:$4 sm:$0xff]   ;;  %v10022_v44 = vld [vmem:[%s11485_s19 + $0x880] ss:$8 sps:$4 sm:$0xff]   ;;  %v10033_v55 = vld [vmem:[%s11485_s19 + $0xb74] ss:$8 sps:$4 sm:$0xff]   ;;  %v8933_v60 = vcombine.low %v11908_v0, %v11913_v1 }
 0x232   : > { %v10025_v45 = vld [vmem:[%s11485_s19 + $0x980] ss:$8 sps:$4 sm:$0xff]   ;;  %v10036_v0 = vld [vmem:[%s11485_s19 + $0xa64] ss:$8 sps:$4 sm:$0xff]  }
 0x233   : > { %8295 = vmatpush1.bf16.msra.mxu0 %v9956_v54  ;;  %8348 = vmatpush1.bf16.msra.mxu1 %v9959_v57  ;;  %v11960_v15 = vadd.f32 %v7965_v9, %v7913_v10  ;;  %v10030_v54 = vld [vmem:[%s11485_s19 + $0xa74] ss:$8 sps:$4 sm:$0xff]   ;;  %v4434_v56 = vld [vmem:[%s12595_s0 + $0x140] sm:$0xff]  ;;  %v10028_v57 = vld [vmem:[%s11485_s19 + $0xa70] ss:$8 sps:$4 sm:$0xff]  }
 0x234   : > { %8296 = vmatprep.subr.bf16.mxu0 %v9964_v4  ;;  %8349 = vmatprep.subr.bf16.mxu1 %v9967_v7  ;;  %v8935_v4 = vcombine.low %v11918_v30, %v11923_v31  ;;  %v4450_v7 = vld [vmem:[%s12595_s0 + $0x1c0] sm:$0xff]  ;;  %v4435_v8 = vld [vmem:[%s12595_s0 + $0x148] sm:$0xff]  ;;  %v10031_v10 = vld [vmem:[%s11485_s19 + $0xb70] ss:$8 sps:$4 sm:$0xff]  }
 0x235   : > { %v4451_v9 = vld [vmem:[%s12595_s0 + $0x1c8] sm:$0xff] }
 0x236   : > { %v10039_v1 = vld [vmem:[%s11485_s19 + $0xb64] ss:$8 sps:$4 sm:$0xff]   ;;  %v10034_v30 = vld [vmem:[%s11485_s19 + $0xa60] ss:$8 sps:$4 sm:$0xff]  }
 0x237   : > { %8297 = vmatpush1.bf16.msra.mxu0 %v9962_v12  ;;  %8350 = vmatpush1.bf16.msra.mxu1 %v9965_v13  ;;  %v10037_v31 = vld [vmem:[%s11485_s19 + $0xb60] ss:$8 sps:$4 sm:$0xff]   ;;  %v8966_v12 = vcombine.high %v4434_v56, %v4450_v7  ;;  %v8968_v13 = vcombine.high %v4435_v8, %v4451_v9 }
 0x238   : > { %8298 = vmatprep.subr.bf16.mxu0 %v9970_v14  ;;  %8351 = vmatprep.subr.bf16.mxu1 %v9973_v16 }
 0x23b   : > { %8299 = vmatpush1.bf16.msra.mxu0 %v9968_v58  ;;  %8352 = vmatpush1.bf16.msra.mxu1 %v9971_v59 }
 0x23c   : > { %8300 = vmatprep.subr.bf16.mxu0 %v9976_v62  ;;  %8353 = vmatprep.subr.bf16.mxu1 %v9979_v63  ;;  %v10042_v63 = vld [vmem:[%s11485_s19 + $0xa54] ss:$8 sps:$4 sm:$0xff]  }
 0x23f   : > { %8301 = vmatpush1.bf16.msra.mxu0 %v9974_v17  ;;  %8354 = vmatpush1.bf16.msra.mxu1 %v9977_v18  ;;  %v10045_v17 = vld [vmem:[%s11485_s19 + $0xb54] ss:$8 sps:$4 sm:$0xff]  }
 0x240   : > { %8302 = vmatprep.subr.bf16.mxu0 %v9982_v19  ;;  %8355 = vmatprep.subr.bf16.mxu1 %v9985_v20  ;;  %v10040_v20 = vld [vmem:[%s11485_s19 + $0xa50] ss:$8 sps:$4 sm:$0xff]  }
 0x243   : > { %8303 = vmatpush2.bf16.msra.mxu0 %v9980_v21  ;;  %8356 = vmatpush2.bf16.msra.mxu1 %v9983_v22  ;;  %v10043_v21 = vld [vmem:[%s11485_s19 + $0xb50] ss:$8 sps:$4 sm:$0xff]  }
 0x244   : > { %8304 = vmatprep.subr.bf16.mxu0 %v9988_v23  ;;  %8357 = vmatprep.subr.bf16.mxu1 %v9991_v24  ;;  %v12041_v22 = vld [vmem:[%s12595_s0 + $0xd0] sm:$0xff] }
 0x247   : > { %8305 = vmatpush2.bf16.msra.mxu0 %v9986_v25  ;;  %8358 = vmatpush2.bf16.msra.mxu1 %v9989_v27  ;;  %v8965_v25 = vcombine.low %v4434_v56, %v4450_v7  ;;  %v12046_v27 = vld [vmem:[%s12595_s0 + $0x58] sm:$0xff] }
 0x248   : > { %8306 = vmatprep.subr.bf16.mxu0 %v9994_v28  ;;  %8359 = vmatprep.subr.bf16.mxu1 %v9997_v29  ;;  %v12051_v28 = vld [vmem:[%s12595_s0 + $0xd8] sm:$0xff] }
 0x24b   : > { %8307 = vmatpush2.bf16.msra.mxu0 %v9992_v3  ;;  %8360 = vmatpush2.bf16.msra.mxu1 %v9995_v2 }
 0x24c   : > { %8308 = vmatprep.subr.bf16.mxu0 %v10000_v5  ;;  %8361 = vmatprep.subr.bf16.mxu1 %v10003_v6  ;;  %v10048_v6 = vld [vmem:[%s11485_s19 + $0xa44] ss:$8 sps:$4 sm:$0xff]  }
 0x24f   : > { %8309 = vmatpush2.bf16.msra.mxu0 %v9998_v33  ;;  %8362 = vmatpush2.bf16.msra.mxu1 %v10001_v34  ;;  %v10051_v33 = vld [vmem:[%s11485_s19 + $0xb44] ss:$8 sps:$4 sm:$0xff]  }
 0x250   : > { %8310 = vmatprep.subr.bf16.mxu0 %v10006_v35  ;;  %8363 = vmatprep.subr.bf16.mxu1 %v10009_v36  ;;  %v10046_v36 = vld [vmem:[%s11485_s19 + $0xa40] ss:$8 sps:$4 sm:$0xff]  }
 0x253   : > { %8311 = vmatpush2.bf16.msra.mxu0 %v10004_v37  ;;  %8364 = vmatpush2.bf16.msra.mxu1 %v10007_v39  ;;  %v10049_v37 = vld [vmem:[%s11485_s19 + $0xb40] ss:$8 sps:$4 sm:$0xff]  }
 0x254   : > { %8312 = vmatprep.subr.bf16.mxu0 %v10012_v42  ;;  %8365 = vmatprep.subr.bf16.mxu1 %v10015_v43 }
 0x257   : > { %8313 = vmatpush2.bf16.msra.mxu0 %v10010_v46  ;;  %8366 = vmatpush2.bf16.msra.mxu1 %v10013_v47 }
 0x258   : > { %8314 = vmatprep.subr.bf16.mxu0 %v10018_v48  ;;  %8367 = vmatprep.subr.bf16.mxu1 %v10021_v49  ;;  %v10054_v49 = vld [vmem:[%s11485_s19 + $0xa34] ss:$8 sps:$4 sm:$0xff]  }
 0x25b   : > { %8315 = vmatpush2.bf16.msra.mxu0 %v10016_v51  ;;  %8368 = vmatpush2.bf16.msra.mxu1 %v10019_v52  ;;  %v10057_v51 = vld [vmem:[%s11485_s19 + $0xb34] ss:$8 sps:$4 sm:$0xff]  }
 0x25c   : > { %8316 = vmatprep.subr.bf16.mxu0 %v10024_v40  ;;  %8369 = vmatprep.subr.bf16.mxu1 %v10027_v41  ;;  %v10052_v41 = vld [vmem:[%s11485_s19 + $0xa30] ss:$8 sps:$4 sm:$0xff]  }
 0x25f   : > { %8317 = vmatpush2.bf16.msra.mxu0 %v10022_v44  ;;  %8370 = vmatpush2.bf16.msra.mxu1 %v10025_v45  ;;  %v10055_v44 = vld [vmem:[%s11485_s19 + $0xb30] ss:$8 sps:$4 sm:$0xff]  }
 0x260   : > { %8392 = vmatprep.subr.bf16.mxu0 %v10030_v54  ;;  %8445 = vmatprep.subr.bf16.mxu1 %v10033_v55 }
 0x262   : > { %v8002_v14 = vpop.f32.mrf.mxu0  ;;  %v8055_v16 = vpop.f32.mrf.mxu1  ;;  %8319 = vmatmul.mubr.bf16.vlgmr.msra.gmra.mxu0 %v8933_v60  ;;  %8372 = vmatmul.mubr.bf16.vlgmr.msra.gmra.mxu1 %v8935_v4  ;;  %v10063_v60 = vld [vmem:[%s11485_s19 + $0xb24] ss:$8 sps:$4 sm:$0xff]  }
 0x263   : > { %v8003_v58 = vadd.f32 %v8002_v14, %v11900_v26  ;;  %8393 = vmatpush1.bf16.msra.mxu0 %v10028_v57  ;;  %8446 = vmatpush1.bf16.msra.mxu1 %v10031_v10  ;;  %v12036_v26 = vld [vmem:[%s12595_s0 + $0x50] sm:$0xff]  ;;  %v10060_v57 = vld [vmem:[%s11485_s19 + $0xa24] ss:$8 sps:$4 sm:$0xff]  }
 0x264   : > { %v8004_v59 = vpop.f32.mrf.mxu0  ;;  %v8057_v62 = vpop.f32.mrf.mxu1  ;;  %8394 = vmatprep.subr.bf16.mxu0 %v10036_v0  ;;  %8447 = vmatprep.subr.bf16.mxu1 %v10039_v1  ;;  %v8938_v39 = vcombine.high %v12036_v26, %v12041_v22  ;;  %v10066_v10 = vld [vmem:[%s11485_s19 + $0xa14] ss:$8 sps:$4 sm:$0xff]   ;;  %v10067_v1 = vld [vmem:[%s11485_s19 + $0xb10] ss:$8 sps:$4 sm:$0xff]  }
 0x265   : > { %v12028_v18 = vadd.f32 %v8055_v16, %v8003_v58  ;;  %v8005_v19 = vadd.f32 %v8004_v59, %v11925_v32  ;;  %8328 = vmatprep.mubr.bf16.mxu0 %v8966_v12  ;;  %8381 = vmatprep.mubr.bf16.mxu1 %v8968_v13  ;;  %v8967_v32 = vcombine.low %v4435_v8, %v4451_v9  ;;  %v10058_v8 = vld [vmem:[%s11485_s19 + $0xa20] ss:$8 sps:$4 sm:$0xff]   ;;  %v10069_v0 = vld [vmem:[%s11485_s19 + $0xb14] ss:$8 sps:$4 sm:$0xff]   ;;  %v10076_v58 = vld [vmem:[%s11485_s19 + $0xaf0] ss:$8 sps:$4 sm:$0xff]  }
 0x266   : > { %v8006_v23 = vpop.f32.mrf.mxu0  ;;  %v8059_v24 = vpop.f32.mrf.mxu1  ;;  %v10061_v9 = vld [vmem:[%s11485_s19 + $0xb20] ss:$8 sps:$4 sm:$0xff]   ;;  %v10078_v14 = vld [vmem:[%s11485_s19 + $0xaf4] ss:$8 sps:$4 sm:$0xff]   ;;  %v10079_v59 = vld [vmem:[%s11485_s19 + $0xbf0] ss:$8 sps:$4 sm:$0xff]  }
 0x267   : > { %v12053_v29 = vadd.f32 %v8057_v62, %v8005_v19  ;;  %v8007_v3 = vadd.f32 %v8006_v23, %v11930_v38  ;;  %8395 = vmatpush1.bf16.msra.mxu0 %v10034_v30  ;;  %8448 = vmatpush1.bf16.msra.mxu1 %v10037_v31  ;;  %v8940_v38 = vcombine.high %v12046_v27, %v12051_v28  ;;  %v10072_v30 = vld [vmem:[%s11485_s19 + $0xa04] ss:$8 sps:$4 sm:$0xff]   ;;  %v10070_v12 = vld [vmem:[%s11485_s19 + $0xa00] ss:$8 sps:$4 sm:$0xff]   ;;  %v10081_v16 = vld [vmem:[%s11485_s19 + $0xbf4] ss:$8 sps:$4 sm:$0xff]  }
 0x268   : > { %v8008_v2 = vpop.f32.mrf.mxu0  ;;  %v8061_v5 = vpop.f32.mrf.mxu1  ;;  %8396 = vmatprep.subr.bf16.mxu0 %v10042_v63  ;;  %8449 = vmatprep.subr.bf16.mxu1 %v10045_v17  ;;  %v10075_v31 = vld [vmem:[%s11485_s19 + $0xb04] ss:$8 sps:$4 sm:$0xff]   ;;  %v10073_v13 = vld [vmem:[%s11485_s19 + $0xb00] ss:$8 sps:$4 sm:$0xff]   ;;  %v10088_v23 = vld [vmem:[%s11485_s19 + $0xad0] ss:$8 sps:$4 sm:$0xff]  }
 0x269   : > { %v12058_v34 = vadd.f32 %v8059_v24, %v8007_v3  ;;  %v8009_v35 = vadd.f32 %v8008_v2, %v11939_v50  ;;  %v10084_v62 = vld [vmem:[%s11485_s19 + $0xae4] ss:$8 sps:$4 sm:$0xff]   ;;  %v10082_v17 = vld [vmem:[%s11485_s19 + $0xae0] ss:$8 sps:$4 sm:$0xff]   ;;  %v10091_v24 = vld [vmem:[%s11485_s19 + $0xbd0] ss:$8 sps:$4 sm:$0xff]  }
 0x26a   : > { %v8012_v42 = vpop.f32.mrf.mxu0  ;;  %8329 = vmatmul.mubr.bf16.gmra.mxu0 %v8965_v25  ;;  %v8065_v43 = vpop.f32.mrf.mxu1  ;;  %8382 = vmatmul.mubr.bf16.gmra.mxu1 %v8967_v32  ;;  %v10087_v63 = vld [vmem:[%s11485_s19 + $0xbe4] ss:$8 sps:$4 sm:$0xff]   ;;  %v10085_v19 = vld [vmem:[%s11485_s19 + $0xbe0] ss:$8 sps:$4 sm:$0xff]  }
 0x26b   : > { %v12067_v46 = vadd.f32 %v8061_v5, %v8009_v35  ;;  %v8013_v50 = vadd.f32 %v8012_v42, %v11945_v53  ;;  %8397 = vmatpush1.bf16.msra.mxu0 %v10040_v20  ;;  %8450 = vmatpush1.bf16.msra.mxu1 %v10043_v21  ;;  %v10090_v20 = vld [vmem:[%s11485_s19 + $0xad4] ss:$8 sps:$4 sm:$0xff]   ;;  %v10096_v25 = vld [vmem:[%s11485_s19 + $0xac4] ss:$8 sps:$4 sm:$0xff]   ;;  %v10094_v3 = vld [vmem:[%s11485_s19 + $0xac0] ss:$8 sps:$4 sm:$0xff]  }
 0x26c   : > { %v8014_v47 = vpop.f32.mrf.mxu0  ;;  %v8067_v48 = vpop.f32.mrf.mxu1  ;;  %8398 = vmatprep.subr.bf16.mxu0 %v10048_v6  ;;  %8451 = vmatprep.subr.bf16.mxu1 %v10051_v33  ;;  %v10093_v21 = vld [vmem:[%s11485_s19 + $0xbd4] ss:$8 sps:$4 sm:$0xff]   ;;  %v10099_v32 = vld [vmem:[%s11485_s19 + $0xbc4] ss:$8 sps:$4 sm:$0xff]   ;;  %v10097_v2 = vld [vmem:[%s11485_s19 + $0xbc0] ss:$8 sps:$4 sm:$0xff]  }
 0x26d   : > { %v8015_v52 = vadd.f32 %v8014_v47, %v11950_v61  ;;  %v12073_v40 = vadd.f32 %v8065_v43, %v8013_v50  ;;  %8424 = vmatprep.mubr.bf16.mxu0 %v8938_v39  ;;  %8477 = vmatprep.mubr.bf16.mxu1 %v8940_v38  ;;  %v10102_v5 = vld [vmem:[%s11485_s19 + $0xab4] ss:$8 sps:$4 sm:$0xff]   ;;  %v10100_v33 = vld [vmem:[%s11485_s19 + $0xab0] ss:$8 sps:$4 sm:$0xff]   ;;  %v10106_v39 = vld [vmem:[%s11485_s19 + $0xaa0] ss:$8 sps:$4 sm:$0xff]  }
 0x26e   : > { %v8016_v45 = vpop.f32.mrf.mxu0  ;;  %v8069_v53 = vpop.f32.mrf.mxu1  ;;  %v10105_v6 = vld [vmem:[%s11485_s19 + $0xbb4] ss:$8 sps:$4 sm:$0xff]   ;;  %v10103_v35 = vld [vmem:[%s11485_s19 + $0xbb0] ss:$8 sps:$4 sm:$0xff]   ;;  %v10109_v38 = vld [vmem:[%s11485_s19 + $0xba0] ss:$8 sps:$4 sm:$0xff]  }
 0x26f   : > { %v8017_v54 = vadd.f32 %v8016_v45, %v11955_v11  ;;  %v12078_v55 = vadd.f32 %v8067_v48, %v8015_v52  ;;  %8399 = vmatpush1.bf16.msra.mxu0 %v10046_v36  ;;  %8452 = vmatpush1.bf16.msra.mxu1 %v10049_v37  ;;  %v10108_v36 = vld [vmem:[%s11485_s19 + $0xaa4] ss:$8 sps:$4 sm:$0xff]   ;;  %v10114_v42 = vld [vmem:[%s11485_s19 + $0xa94] ss:$8 sps:$4 sm:$0xff]   ;;  %v10112_v50 = vld [vmem:[%s11485_s19 + $0xa90] ss:$8 sps:$4 sm:$0xff]  }
 0x270   : > { %v8018_v61 = vpop.f32.mrf.mxu0  ;;  %v8071_v56 = vpop.f32.mrf.mxu1  ;;  %8400 = vmatprep.subr.bf16.mxu0 %v10054_v49  ;;  %8453 = vmatprep.subr.bf16.mxu1 %v10057_v51  ;;  %v10111_v37 = vld [vmem:[%s11485_s19 + $0xba4] ss:$8 sps:$4 sm:$0xff]   ;;  %v10117_v43 = vld [vmem:[%s11485_s19 + $0xb94] ss:$8 sps:$4 sm:$0xff]   ;;  %v10115_v47 = vld [vmem:[%s11485_s19 + $0xb90] ss:$8 sps:$4 sm:$0xff]  }
 0x271   : > { %v8019_v4 = vadd.f32 %v8018_v61, %v11960_v15  ;;  %v12083_v7 = vadd.f32 %v8069_v53, %v8017_v54  ;;  %v10064_v15 = vld [vmem:[%s11485_s19 + $0xa10] ss:$8 sps:$4 sm:$0xff]   ;;  %v10120_v48 = vld [vmem:[%s11485_s19 + $0xa84] ss:$8 sps:$4 sm:$0xff]   ;;  %v10118_v51 = vld [vmem:[%s11485_s19 + $0xa80] ss:$8 sps:$4 sm:$0xff]   ;;  %v8937_v53 = vcombine.low %v12036_v26, %v12041_v22  ;;  %v8939_v54 = vcombine.low %v12046_v27, %v12051_v28 }
 0x272   : > { %v10123_v49 = vld [vmem:[%s11485_s19 + $0xb84] ss:$8 sps:$4 sm:$0xff]   ;;  %v10121_v52 = vld [vmem:[%s11485_s19 + $0xb80] ss:$8 sps:$4 sm:$0xff]   ;;  %v4436_v45 = vld [vmem:[%s12595_s0 + $0x150] sm:$0xff] }
 0x273   : > { %v12085_v11 = vadd.f32 %v8071_v56, %v8019_v4  ;;  %8401 = vmatpush1.bf16.msra.mxu0 %v10052_v41  ;;  %8454 = vmatpush1.bf16.msra.mxu1 %v10055_v44  ;;  %v10126_v41 = vld [vmem:[%s11485_s19 + $0xc74] ss:$8 sps:$4 sm:$0xff]   ;;  %v10124_v26 = vld [vmem:[%s11485_s19 + $0xc70] ss:$8 sps:$4 sm:$0xff]   ;;  %v10132_v27 = vld [vmem:[%s11485_s19 + $0xc64] ss:$8 sps:$4 sm:$0xff]  }
 0x274   : > { %8402 = vmatprep.subr.bf16.mxu0 %v10060_v57  ;;  %8455 = vmatprep.subr.bf16.mxu1 %v10063_v60  ;;  %v10129_v44 = vld [vmem:[%s11485_s19 + $0xd74] ss:$8 sps:$4 sm:$0xff]   ;;  %v10127_v22 = vld [vmem:[%s11485_s19 + $0xd70] ss:$8 sps:$4 sm:$0xff]   ;;  %v10135_v28 = vld [vmem:[%s11485_s19 + $0xd64] ss:$8 sps:$4 sm:$0xff]  }
 0x275   : > { %v4452_v61 = vld [vmem:[%s12595_s0 + $0x1d0] sm:$0xff]  ;;  %v4437_v56 = vld [vmem:[%s12595_s0 + $0x158] sm:$0xff] }
 0x276   : > { %v4453_v57 = vld [vmem:[%s12595_s0 + $0x1d8] sm:$0xff]  ;;  %v8970_v60 = vcombine.high %v4436_v45, %v4452_v61 }
 0x277   : > { %8403 = vmatpush1.bf16.msra.mxu0 %v10058_v8  ;;  %8456 = vmatpush1.bf16.msra.mxu1 %v10061_v9  ;;  %v8972_v4 = vcombine.high %v4437_v56, %v4453_v57  ;;  %v10130_v8 = vld [vmem:[%s11485_s19 + $0xc60] ss:$8 sps:$4 sm:$0xff]  }
 0x278   : > { %8404 = vmatprep.subr.bf16.mxu0 %v10066_v10  ;;  %8457 = vmatprep.subr.bf16.mxu1 %v10069_v0  ;;  %v10133_v9 = vld [vmem:[%s11485_s19 + $0xd60] ss:$8 sps:$4 sm:$0xff]   ;;  %v10138_v10 = vld [vmem:[%s11485_s19 + $0xc54] ss:$8 sps:$4 sm:$0xff]  }
 0x279   : > { %v10141_v0 = vld [vmem:[%s11485_s19 + $0xd54] ss:$8 sps:$4 sm:$0xff]  }
 0x27b   : > { %8405 = vmatpush1.bf16.msra.mxu0 %v10064_v15  ;;  %8458 = vmatpush1.bf16.msra.mxu1 %v10067_v1  ;;  %v12158_v15 = vld [vmem:[%s12595_s0 + $0x60] sm:$0xff]  ;;  %v8969_v1 = vcombine.low %v4436_v45, %v4452_v61  ;;  %v10184_v45 = vld [vmem:[%s11485_s19 + $0xcd0] ss:$8 sps:$4 sm:$0xff]  }
 0x27c   : > { %8406 = vmatprep.subr.bf16.mxu0 %v10072_v30  ;;  %8459 = vmatprep.subr.bf16.mxu1 %v10075_v31  ;;  %v8971_v30 = vcombine.low %v4437_v56, %v4453_v57  ;;  %v12163_v31 = vld [vmem:[%s12595_s0 + $0xe0] sm:$0xff] }
 0x27d   : > { %v10195_v61 = vld [vmem:[%s11485_s19 + $0xdc4] ss:$8 sps:$4 sm:$0xff]   ;;  %v10190_v56 = vld [vmem:[%s11485_s19 + $0xcc0] ss:$8 sps:$4 sm:$0xff]  }
 0x27e   : > { %v10193_v57 = vld [vmem:[%s11485_s19 + $0xdc0] ss:$8 sps:$4 sm:$0xff]  }
 0x27f   : > { %8407 = vmatpush1.bf16.msra.mxu0 %v10070_v12  ;;  %8460 = vmatpush1.bf16.msra.mxu1 %v10073_v13  ;;  %v12168_v12 = vld [vmem:[%s12595_s0 + $0x68] sm:$0xff] }
 0x280   : > { %8408 = vmatprep.subr.bf16.mxu0 %v10078_v14  ;;  %8461 = vmatprep.subr.bf16.mxu1 %v10081_v16  ;;  %v12173_v13 = vld [vmem:[%s12595_s0 + $0xe8] sm:$0xff]  ;;  %v10136_v14 = vld [vmem:[%s11485_s19 + $0xc50] ss:$8 sps:$4 sm:$0xff]  }
 0x281   : > { %v10139_v16 = vld [vmem:[%s11485_s19 + $0xd50] ss:$8 sps:$4 sm:$0xff]  }
 0x283   : > { %8409 = vmatpush2.bf16.msra.mxu0 %v10076_v58  ;;  %8462 = vmatpush2.bf16.msra.mxu1 %v10079_v59  ;;  %v10144_v58 = vld [vmem:[%s11485_s19 + $0xc44] ss:$8 sps:$4 sm:$0xff]  }
 0x284   : > { %8410 = vmatprep.subr.bf16.mxu0 %v10084_v62  ;;  %8463 = vmatprep.subr.bf16.mxu1 %v10087_v63  ;;  %v10147_v59 = vld [vmem:[%s11485_s19 + $0xd44] ss:$8 sps:$4 sm:$0xff]   ;;  %v8942_v62 = vcombine.high %v12158_v15, %v12163_v31  ;;  %v8944_v63 = vcombine.high %v12168_v12, %v12173_v13 }
 0x287   : > { %8411 = vmatpush2.bf16.msra.mxu0 %v10082_v17  ;;  %8464 = vmatpush2.bf16.msra.mxu1 %v10085_v19  ;;  %v10142_v17 = vld [vmem:[%s11485_s19 + $0xc40] ss:$8 sps:$4 sm:$0xff]  }
 0x288   : > { %8412 = vmatprep.subr.bf16.mxu0 %v10090_v20  ;;  %8465 = vmatprep.subr.bf16.mxu1 %v10093_v21  ;;  %v10145_v19 = vld [vmem:[%s11485_s19 + $0xd40] ss:$8 sps:$4 sm:$0xff]   ;;  %v10150_v20 = vld [vmem:[%s11485_s19 + $0xc34] ss:$8 sps:$4 sm:$0xff]  }
 0x289   : > { %v10153_v21 = vld [vmem:[%s11485_s19 + $0xd34] ss:$8 sps:$4 sm:$0xff]  }
 0x28b   : > { %8413 = vmatpush2.bf16.msra.mxu0 %v10088_v23  ;;  %8466 = vmatpush2.bf16.msra.mxu1 %v10091_v24  ;;  %v10148_v23 = vld [vmem:[%s11485_s19 + $0xc30] ss:$8 sps:$4 sm:$0xff]  }
 0x28c   : > { %8414 = vmatprep.subr.bf16.mxu0 %v10096_v25  ;;  %8467 = vmatprep.subr.bf16.mxu1 %v10099_v32  ;;  %v10151_v24 = vld [vmem:[%s11485_s19 + $0xd30] ss:$8 sps:$4 sm:$0xff]   ;;  %v10156_v25 = vld [vmem:[%s11485_s19 + $0xc24] ss:$8 sps:$4 sm:$0xff]  }
 0x28d   : > { %v10159_v32 = vld [vmem:[%s11485_s19 + $0xd24] ss:$8 sps:$4 sm:$0xff]  }
 0x28f   : > { %8415 = vmatpush2.bf16.msra.mxu0 %v10094_v3  ;;  %8468 = vmatpush2.bf16.msra.mxu1 %v10097_v2  ;;  %v10154_v3 = vld [vmem:[%s11485_s19 + $0xc20] ss:$8 sps:$4 sm:$0xff]  }
 0x290   : > { %8416 = vmatprep.subr.bf16.mxu0 %v10102_v5  ;;  %8469 = vmatprep.subr.bf16.mxu1 %v10105_v6  ;;  %v10157_v2 = vld [vmem:[%s11485_s19 + $0xd20] ss:$8 sps:$4 sm:$0xff]   ;;  %v10162_v5 = vld [vmem:[%s11485_s19 + $0xc14] ss:$8 sps:$4 sm:$0xff]  }
 0x291   : > { %v10165_v6 = vld [vmem:[%s11485_s19 + $0xd14] ss:$8 sps:$4 sm:$0xff]  }
 0x293   : > { %8417 = vmatpush2.bf16.msra.mxu0 %v10100_v33  ;;  %8470 = vmatpush2.bf16.msra.mxu1 %v10103_v35  ;;  %v10160_v33 = vld [vmem:[%s11485_s19 + $0xc10] ss:$8 sps:$4 sm:$0xff]  }
 0x294   : > { %8418 = vmatprep.subr.bf16.mxu0 %v10108_v36  ;;  %8471 = vmatprep.subr.bf16.mxu1 %v10111_v37  ;;  %v10163_v35 = vld [vmem:[%s11485_s19 + $0xd10] ss:$8 sps:$4 sm:$0xff]   ;;  %v10168_v36 = vld [vmem:[%s11485_s19 + $0xc04] ss:$8 sps:$4 sm:$0xff]  }
 0x295   : > { %v10171_v37 = vld [vmem:[%s11485_s19 + $0xd04] ss:$8 sps:$4 sm:$0xff]  }
 0x297   : > { %8419 = vmatpush2.bf16.msra.mxu0 %v10106_v39  ;;  %8472 = vmatpush2.bf16.msra.mxu1 %v10109_v38  ;;  %v10166_v39 = vld [vmem:[%s11485_s19 + $0xc00] ss:$8 sps:$4 sm:$0xff]  }
 0x298   : > { %8420 = vmatprep.subr.bf16.mxu0 %v10114_v42  ;;  %8473 = vmatprep.subr.bf16.mxu1 %v10117_v43  ;;  %v10169_v38 = vld [vmem:[%s11485_s19 + $0xd00] ss:$8 sps:$4 sm:$0xff]   ;;  %v10174_v42 = vld [vmem:[%s11485_s19 + $0xcf4] ss:$8 sps:$4 sm:$0xff]  }
 0x299   : > { %v10177_v43 = vld [vmem:[%s11485_s19 + $0xdf4] ss:$8 sps:$4 sm:$0xff]  }
 0x29b   : > { %8421 = vmatpush2.bf16.msra.mxu0 %v10112_v50  ;;  %8474 = vmatpush2.bf16.msra.mxu1 %v10115_v47  ;;  %v10172_v50 = vld [vmem:[%s11485_s19 + $0xcf0] ss:$8 sps:$4 sm:$0xff]  }
 0x29c   : > { %8422 = vmatprep.subr.bf16.mxu0 %v10120_v48  ;;  %8475 = vmatprep.subr.bf16.mxu1 %v10123_v49  ;;  %v10175_v47 = vld [vmem:[%s11485_s19 + $0xdf0] ss:$8 sps:$4 sm:$0xff]   ;;  %v10180_v48 = vld [vmem:[%s11485_s19 + $0xce4] ss:$8 sps:$4 sm:$0xff]  }
 0x29d   : > { %v10183_v49 = vld [vmem:[%s11485_s19 + $0xde4] ss:$8 sps:$4 sm:$0xff]  }
 0x29f   : > { %8423 = vmatpush2.bf16.msra.mxu0 %v10118_v51  ;;  %8476 = vmatpush2.bf16.msra.mxu1 %v10121_v52  ;;  %v10178_v51 = vld [vmem:[%s11485_s19 + $0xce0] ss:$8 sps:$4 sm:$0xff]  }
 0x2a0   : > { %8498 = vmatprep.subr.bf16.mxu0 %v10126_v41  ;;  %8551 = vmatprep.subr.bf16.mxu1 %v10129_v44  ;;  %v10181_v52 = vld [vmem:[%s11485_s19 + $0xde0] ss:$8 sps:$4 sm:$0xff]   ;;  %v10186_v41 = vld [vmem:[%s11485_s19 + $0xcd4] ss:$8 sps:$4 sm:$0xff]  }
 0x2a1   : > { %v10189_v44 = vld [vmem:[%s11485_s19 + $0xdd4] ss:$8 sps:$4 sm:$0xff]  }
 0x2a2   : > { %8425 = vmatmul.mubr.bf16.vlgmr.msra.gmra.mxu0 %v8937_v53  ;;  %8478 = vmatmul.mubr.bf16.vlgmr.msra.gmra.mxu1 %v8939_v54  ;;  %v10187_v53 = vld [vmem:[%s11485_s19 + $0xdd0] ss:$8 sps:$4 sm:$0xff]   ;;  %v10192_v54 = vld [vmem:[%s11485_s19 + $0xcc4] ss:$8 sps:$4 sm:$0xff]  }
 0x2a3   : > { %8499 = vmatpush1.bf16.msra.mxu0 %v10124_v26  ;;  %8552 = vmatpush1.bf16.msra.mxu1 %v10127_v22  ;;  %v10198_v26 = vld [vmem:[%s11485_s19 + $0xcb4] ss:$8 sps:$4 sm:$0xff]  }
 0x2a4   : > { %8500 = vmatprep.subr.bf16.mxu0 %v10132_v27  ;;  %8553 = vmatprep.subr.bf16.mxu1 %v10135_v28  ;;  %v10201_v22 = vld [vmem:[%s11485_s19 + $0xdb4] ss:$8 sps:$4 sm:$0xff]   ;;  %v10196_v27 = vld [vmem:[%s11485_s19 + $0xcb0] ss:$8 sps:$4 sm:$0xff]  }
 0x2a5   : > { %8434 = vmatprep.mubr.bf16.mxu0 %v8970_v60  ;;  %8487 = vmatprep.mubr.bf16.mxu1 %v8972_v4  ;;  %v10199_v28 = vld [vmem:[%s11485_s19 + $0xdb0] ss:$8 sps:$4 sm:$0xff]   ;;  %v10204_v60 = vld [vmem:[%s11485_s19 + $0xca4] ss:$8 sps:$4 sm:$0xff]  }
 0x2a6   : > { %v10207_v4 = vld [vmem:[%s11485_s19 + $0xda4] ss:$8 sps:$4 sm:$0xff]  }
 0x2a7   : > { %8501 = vmatpush1.bf16.msra.mxu0 %v10130_v8  ;;  %8554 = vmatpush1.bf16.msra.mxu1 %v10133_v9  ;;  %v10202_v8 = vld [vmem:[%s11485_s19 + $0xca0] ss:$8 sps:$4 sm:$0xff]  }
 0x2a8   : > { %8502 = vmatprep.subr.bf16.mxu0 %v10138_v10  ;;  %8555 = vmatprep.subr.bf16.mxu1 %v10141_v0  ;;  %v10205_v9 = vld [vmem:[%s11485_s19 + $0xda0] ss:$8 sps:$4 sm:$0xff]   ;;  %v10210_v10 = vld [vmem:[%s11485_s19 + $0xc94] ss:$8 sps:$4 sm:$0xff]  }
 0x2a9   : > { %v10213_v0 = vld [vmem:[%s11485_s19 + $0xd94] ss:$8 sps:$4 sm:$0xff]  }
 0x2aa   : > { %8435 = vmatmul.mubr.bf16.gmra.mxu0 %v8969_v1  ;;  %8488 = vmatmul.mubr.bf16.gmra.mxu1 %v8971_v30  ;;  %v10208_v1 = vld [vmem:[%s11485_s19 + $0xc90] ss:$8 sps:$4 sm:$0xff]  }
 0x2ab   : > { %8503 = vmatpush1.bf16.msra.mxu0 %v10136_v14  ;;  %8556 = vmatpush1.bf16.msra.mxu1 %v10139_v16  ;;  %v10211_v30 = vld [vmem:[%s11485_s19 + $0xd90] ss:$8 sps:$4 sm:$0xff]   ;;  %v10216_v14 = vld [vmem:[%s11485_s19 + $0xc84] ss:$8 sps:$4 sm:$0xff]  }
 0x2ac   : > { %8504 = vmatprep.subr.bf16.mxu0 %v10144_v58  ;;  %8557 = vmatprep.subr.bf16.mxu1 %v10147_v59  ;;  %v10219_v16 = vld [vmem:[%s11485_s19 + $0xd84] ss:$8 sps:$4 sm:$0xff]   ;;  %v10214_v58 = vld [vmem:[%s11485_s19 + $0xc80] ss:$8 sps:$4 sm:$0xff]  }
 0x2ad   : > { %8530 = vmatprep.mubr.bf16.mxu0 %v8942_v62  ;;  %8583 = vmatprep.mubr.bf16.mxu1 %v8944_v63  ;;  %v10217_v59 = vld [vmem:[%s11485_s19 + $0xd80] ss:$8 sps:$4 sm:$0xff]   ;;  %v10222_v62 = vld [vmem:[%s11485_s19 + $0xe74] ss:$8 sps:$4 sm:$0xff]  }
 0x2ae   : > { %v10225_v63 = vld [vmem:[%s11485_s19 + $0xf74] ss:$8 sps:$4 sm:$0xff]  }
 0x2af   : > { %8505 = vmatpush1.bf16.msra.mxu0 %v10142_v17  ;;  %8558 = vmatpush1.bf16.msra.mxu1 %v10145_v19  ;;  %v4438_v17 = vld [vmem:[%s12595_s0 + $0x160] sm:$0xff]  ;;  %v8941_v19 = vcombine.low %v12158_v15, %v12163_v31  ;;  %v10220_v15 = vld [vmem:[%s11485_s19 + $0xe70] ss:$8 sps:$4 sm:$0xff]  }
 0x2b0   : > { %8506 = vmatprep.subr.bf16.mxu0 %v10150_v20  ;;  %8559 = vmatprep.subr.bf16.mxu1 %v10153_v21  ;;  %v8943_v20 = vcombine.low %v12168_v12, %v12173_v13  ;;  %v4454_v21 = vld [vmem:[%s12595_s0 + $0x1e0] sm:$0xff]  ;;  %v10223_v31 = vld [vmem:[%s11485_s19 + $0xf70] ss:$8 sps:$4 sm:$0xff]  }
 0x2b1   : > { %v10228_v12 = vld [vmem:[%s11485_s19 + $0xe64] ss:$8 sps:$4 sm:$0xff]  }
 0x2b2   : > { %v10231_v13 = vld [vmem:[%s11485_s19 + $0xf64] ss:$8 sps:$4 sm:$0xff]  }
 0x2b3   : > { %8507 = vmatpush1.bf16.msra.mxu0 %v10148_v23  ;;  %8560 = vmatpush1.bf16.msra.mxu1 %v10151_v24  ;;  %v4439_v23 = vld [vmem:[%s12595_s0 + $0x168] sm:$0xff] }
 0x2b4   : > { %8508 = vmatprep.subr.bf16.mxu0 %v10156_v25  ;;  %8561 = vmatprep.subr.bf16.mxu1 %v10159_v32  ;;  %v4455_v24 = vld [vmem:[%s12595_s0 + $0x1e8] sm:$0xff]  ;;  %v8974_v25 = vcombine.high %v4438_v17, %v4454_v21 }
 0x2b5   : > { %v8976_v32 = vcombine.high %v4439_v23, %v4455_v24 }
 0x2b7   : > { %8509 = vmatpush1.bf16.msra.mxu0 %v10154_v3  ;;  %8562 = vmatpush1.bf16.msra.mxu1 %v10157_v2  ;;  %v10226_v3 = vld [vmem:[%s11485_s19 + $0xe60] ss:$8 sps:$4 sm:$0xff]  }
 0x2b8   : > { %8510 = vmatprep.subr.bf16.mxu0 %v10162_v5  ;;  %8563 = vmatprep.subr.bf16.mxu1 %v10165_v6  ;;  %v10229_v2 = vld [vmem:[%s11485_s19 + $0xf60] ss:$8 sps:$4 sm:$0xff]   ;;  %v10234_v5 = vld [vmem:[%s11485_s19 + $0xe54] ss:$8 sps:$4 sm:$0xff]  }
 0x2b9   : > { %v10237_v6 = vld [vmem:[%s11485_s19 + $0xf54] ss:$8 sps:$4 sm:$0xff]  }
 0x2bb   : > { %8511 = vmatpush1.bf16.msra.mxu0 %v10160_v33  ;;  %8564 = vmatpush1.bf16.msra.mxu1 %v10163_v35  ;;  %v12262_v33 = vld [vmem:[%s12595_s0 + $0x70] sm:$0xff]  ;;  %v8973_v35 = vcombine.low %v4438_v17, %v4454_v21  ;;  %v10291_v21 = vld [vmem:[%s11485_s19 + $0xfc4] ss:$8 sps:$4 sm:$0xff]  }
 0x2bc   : > { %8512 = vmatprep.subr.bf16.mxu0 %v10168_v36  ;;  %8565 = vmatprep.subr.bf16.mxu1 %v10171_v37  ;;  %v8975_v36 = vcombine.low %v4439_v23, %v4455_v24  ;;  %v12267_v37 = vld [vmem:[%s12595_s0 + $0xf0] sm:$0xff]  ;;  %v10286_v23 = vld [vmem:[%s11485_s19 + $0xec0] ss:$8 sps:$4 sm:$0xff]  }
 0x2bd   : > { %v10280_v17 = vld [vmem:[%s11485_s19 + $0xed0] ss:$8 sps:$4 sm:$0xff]   ;;  %v10289_v24 = vld [vmem:[%s11485_s19 + $0xfc0] ss:$8 sps:$4 sm:$0xff]  }
 0x2bf   : > { %8513 = vmatpush1.bf16.msra.mxu0 %v10166_v39  ;;  %8566 = vmatpush1.bf16.msra.mxu1 %v10169_v38  ;;  %v12272_v39 = vld [vmem:[%s12595_s0 + $0x78] sm:$0xff] }
 0x2c0   : > { %8514 = vmatprep.subr.bf16.mxu0 %v10174_v42  ;;  %8567 = vmatprep.subr.bf16.mxu1 %v10177_v43  ;;  %v12277_v38 = vld [vmem:[%s12595_s0 + $0xf8] sm:$0xff] }
 0x2c1   : > { %v10232_v42 = vld [vmem:[%s11485_s19 + $0xe50] ss:$8 sps:$4 sm:$0xff]  }
 0x2c2   : > { %v10235_v43 = vld [vmem:[%s11485_s19 + $0xf50] ss:$8 sps:$4 sm:$0xff]  }
 0x2c3   : > { %8515 = vmatpush2.bf16.msra.mxu0 %v10172_v50  ;;  %8568 = vmatpush2.bf16.msra.mxu1 %v10175_v47  ;;  %v10240_v50 = vld [vmem:[%s11485_s19 + $0xe44] ss:$8 sps:$4 sm:$0xff]  }
 0x2c4   : > { %8516 = vmatprep.subr.bf16.mxu0 %v10180_v48  ;;  %8569 = vmatprep.subr.bf16.mxu1 %v10183_v49  ;;  %v10243_v47 = vld [vmem:[%s11485_s19 + $0xf44] ss:$8 sps:$4 sm:$0xff]   ;;  %v8946_v48 = vcombine.high %v12262_v33, %v12267_v37  ;;  %v8948_v49 = vcombine.high %v12272_v39, %v12277_v38 }
 0x2c7   : > { %8517 = vmatpush2.bf16.msra.mxu0 %v10178_v51  ;;  %8570 = vmatpush2.bf16.msra.mxu1 %v10181_v52  ;;  %v10238_v51 = vld [vmem:[%s11485_s19 + $0xe40] ss:$8 sps:$4 sm:$0xff]  }
 0x2c8   : > { %8518 = vmatprep.subr.bf16.mxu0 %v10186_v41  ;;  %8571 = vmatprep.subr.bf16.mxu1 %v10189_v44  ;;  %v10241_v52 = vld [vmem:[%s11485_s19 + $0xf40] ss:$8 sps:$4 sm:$0xff]   ;;  %v10246_v41 = vld [vmem:[%s11485_s19 + $0xe34] ss:$8 sps:$4 sm:$0xff]  }
 0x2c9   : > { %v10249_v44 = vld [vmem:[%s11485_s19 + $0xf34] ss:$8 sps:$4 sm:$0xff]  }
 0x2cb   : > { %8519 = vmatpush2.bf16.msra.mxu0 %v10184_v45  ;;  %8572 = vmatpush2.bf16.msra.mxu1 %v10187_v53  ;;  %v10244_v45 = vld [vmem:[%s11485_s19 + $0xe30] ss:$8 sps:$4 sm:$0xff]  }
 0x2cc   : > { %8520 = vmatprep.subr.bf16.mxu0 %v10192_v54  ;;  %8573 = vmatprep.subr.bf16.mxu1 %v10195_v61  ;;  %v10247_v53 = vld [vmem:[%s11485_s19 + $0xf30] ss:$8 sps:$4 sm:$0xff]   ;;  %v10252_v54 = vld [vmem:[%s11485_s19 + $0xe24] ss:$8 sps:$4 sm:$0xff]  }
 0x2cd   : > { %v10255_v61 = vld [vmem:[%s11485_s19 + $0xf24] ss:$8 sps:$4 sm:$0xff]  }
 0x2cf   : > { %8521 = vmatpush2.bf16.msra.mxu0 %v10190_v56  ;;  %8574 = vmatpush2.bf16.msra.mxu1 %v10193_v57  ;;  %v10250_v56 = vld [vmem:[%s11485_s19 + $0xe20] ss:$8 sps:$4 sm:$0xff]  }
 0x2d0   : > { %8522 = vmatprep.subr.bf16.mxu0 %v10198_v26  ;;  %8575 = vmatprep.subr.bf16.mxu1 %v10201_v22  ;;  %v10253_v57 = vld [vmem:[%s11485_s19 + $0xf20] ss:$8 sps:$4 sm:$0xff]   ;;  %v10258_v26 = vld [vmem:[%s11485_s19 + $0xe14] ss:$8 sps:$4 sm:$0xff]  }
 0x2d1   : > { %v10261_v22 = vld [vmem:[%s11485_s19 + $0xf14] ss:$8 sps:$4 sm:$0xff]  }
 0x2d3   : > { %8523 = vmatpush2.bf16.msra.mxu0 %v10196_v27  ;;  %8576 = vmatpush2.bf16.msra.mxu1 %v10199_v28  ;;  %v10256_v27 = vld [vmem:[%s11485_s19 + $0xe10] ss:$8 sps:$4 sm:$0xff]  }
 0x2d4   : > { %8524 = vmatprep.subr.bf16.mxu0 %v10204_v60  ;;  %8577 = vmatprep.subr.bf16.mxu1 %v10207_v4  ;;  %v10259_v28 = vld [vmem:[%s11485_s19 + $0xf10] ss:$8 sps:$4 sm:$0xff]   ;;  %v10264_v60 = vld [vmem:[%s11485_s19 + $0xe04] ss:$8 sps:$4 sm:$0xff]  }
 0x2d5   : > { %v10267_v4 = vld [vmem:[%s11485_s19 + $0xf04] ss:$8 sps:$4 sm:$0xff]  }
 0x2d7   : > { %8525 = vmatpush2.bf16.msra.mxu0 %v10202_v8  ;;  %8578 = vmatpush2.bf16.msra.mxu1 %v10205_v9  ;;  %v10262_v8 = vld [vmem:[%s11485_s19 + $0xe00] ss:$8 sps:$4 sm:$0xff]  }
 0x2d8   : > { %8526 = vmatprep.subr.bf16.mxu0 %v10210_v10  ;;  %8579 = vmatprep.subr.bf16.mxu1 %v10213_v0  ;;  %v10265_v9 = vld [vmem:[%s11485_s19 + $0xf00] ss:$8 sps:$4 sm:$0xff]   ;;  %v10270_v10 = vld [vmem:[%s11485_s19 + $0xef4] ss:$8 sps:$4 sm:$0xff]  }
 0x2d9   : > { %v10273_v0 = vld [vmem:[%s11485_s19 + $0xff4] ss:$8 sps:$4 sm:$0xff]  }
 0x2db   : > { %8527 = vmatpush2.bf16.msra.mxu0 %v10208_v1  ;;  %8580 = vmatpush2.bf16.msra.mxu1 %v10211_v30  ;;  %v10268_v1 = vld [vmem:[%s11485_s19 + $0xef0] ss:$8 sps:$4 sm:$0xff]  }
 0x2dc   : > { %8528 = vmatprep.subr.bf16.mxu0 %v10216_v14  ;;  %8581 = vmatprep.subr.bf16.mxu1 %v10219_v16  ;;  %v10271_v30 = vld [vmem:[%s11485_s19 + $0xff0] ss:$8 sps:$4 sm:$0xff]   ;;  %v10276_v14 = vld [vmem:[%s11485_s19 + $0xee4] ss:$8 sps:$4 sm:$0xff]  }
 0x2dd   : > { %v10279_v16 = vld [vmem:[%s11485_s19 + $0xfe4] ss:$8 sps:$4 sm:$0xff]  }
 0x2df   : > { %8529 = vmatpush2.bf16.msra.mxu0 %v10214_v58  ;;  %8582 = vmatpush2.bf16.msra.mxu1 %v10217_v59  ;;  %v10274_v58 = vld [vmem:[%s11485_s19 + $0xee0] ss:$8 sps:$4 sm:$0xff]  }
 0x2e0   : > { %8604 = vmatprep.subr.bf16.mxu0 %v10222_v62  ;;  %8657 = vmatprep.subr.bf16.mxu1 %v10225_v63  ;;  %v10277_v59 = vld [vmem:[%s11485_s19 + $0xfe0] ss:$8 sps:$4 sm:$0xff]   ;;  %v10282_v62 = vld [vmem:[%s11485_s19 + $0xed4] ss:$8 sps:$4 sm:$0xff]  }
 0x2e1   : > { %v10285_v63 = vld [vmem:[%s11485_s19 + $0xfd4] ss:$8 sps:$4 sm:$0xff]  }
 0x2e2   : > { %8531 = vmatmul.mubr.bf16.vlgmr.msra.gmra.mxu0 %v8941_v19  ;;  %8584 = vmatmul.mubr.bf16.vlgmr.msra.gmra.mxu1 %v8943_v20  ;;  %v10283_v19 = vld [vmem:[%s11485_s19 + $0xfd0] ss:$8 sps:$4 sm:$0xff]   ;;  %v10288_v20 = vld [vmem:[%s11485_s19 + $0xec4] ss:$8 sps:$4 sm:$0xff]  }
 0x2e3   : > { %8605 = vmatpush1.bf16.msra.mxu0 %v10220_v15  ;;  %8658 = vmatpush1.bf16.msra.mxu1 %v10223_v31  ;;  %v10294_v15 = vld [vmem:[%s11485_s19 + $0xeb4] ss:$8 sps:$4 sm:$0xff]  }
 0x2e4   : > { %8606 = vmatprep.subr.bf16.mxu0 %v10228_v12  ;;  %8659 = vmatprep.subr.bf16.mxu1 %v10231_v13  ;;  %v10297_v31 = vld [vmem:[%s11485_s19 + $0xfb4] ss:$8 sps:$4 sm:$0xff]   ;;  %v10292_v12 = vld [vmem:[%s11485_s19 + $0xeb0] ss:$8 sps:$4 sm:$0xff]  }
 0x2e5   : > { %8540 = vmatprep.mubr.bf16.mxu0 %v8974_v25  ;;  %8593 = vmatprep.mubr.bf16.mxu1 %v8976_v32  ;;  %v10295_v13 = vld [vmem:[%s11485_s19 + $0xfb0] ss:$8 sps:$4 sm:$0xff]   ;;  %v10300_v25 = vld [vmem:[%s11485_s19 + $0xea4] ss:$8 sps:$4 sm:$0xff]  }
 0x2e6   : > { %v10303_v32 = vld [vmem:[%s11485_s19 + $0xfa4] ss:$8 sps:$4 sm:$0xff]  }
 0x2e7   : > { %8607 = vmatpush1.bf16.msra.mxu0 %v10226_v3  ;;  %8660 = vmatpush1.bf16.msra.mxu1 %v10229_v2  ;;  %v10298_v3 = vld [vmem:[%s11485_s19 + $0xea0] ss:$8 sps:$4 sm:$0xff]  }
 0x2e8   : > { %8608 = vmatprep.subr.bf16.mxu0 %v10234_v5  ;;  %8661 = vmatprep.subr.bf16.mxu1 %v10237_v6  ;;  %v10301_v2 = vld [vmem:[%s11485_s19 + $0xfa0] ss:$8 sps:$4 sm:$0xff]   ;;  %v10306_v5 = vld [vmem:[%s11485_s19 + $0xe94] ss:$8 sps:$4 sm:$0xff]  }
 0x2e9   : > { %v10309_v6 = vld [vmem:[%s11485_s19 + $0xf94] ss:$8 sps:$4 sm:$0xff]  }
 0x2ea   : > { %8541 = vmatmul.mubr.bf16.gmra.mxu0 %v8973_v35  ;;  %8594 = vmatmul.mubr.bf16.gmra.mxu1 %v8975_v36  ;;  %v10304_v35 = vld [vmem:[%s11485_s19 + $0xe90] ss:$8 sps:$4 sm:$0xff]  }
 0x2eb   : > { %8609 = vmatpush1.bf16.msra.mxu0 %v10232_v42  ;;  %8662 = vmatpush1.bf16.msra.mxu1 %v10235_v43  ;;  %v10307_v36 = vld [vmem:[%s11485_s19 + $0xf90] ss:$8 sps:$4 sm:$0xff]   ;;  %v10312_v42 = vld [vmem:[%s11485_s19 + $0xe84] ss:$8 sps:$4 sm:$0xff]  }
 0x2ec   : > { %8610 = vmatprep.subr.bf16.mxu0 %v10240_v50  ;;  %8663 = vmatprep.subr.bf16.mxu1 %v10243_v47  ;;  %v10315_v43 = vld [vmem:[%s11485_s19 + $0xf84] ss:$8 sps:$4 sm:$0xff]   ;;  %v10310_v50 = vld [vmem:[%s11485_s19 + $0xe80] ss:$8 sps:$4 sm:$0xff]  }
 0x2ed   : > { %8636 = vmatprep.mubr.bf16.mxu0 %v8946_v48  ;;  %8689 = vmatprep.mubr.bf16.mxu1 %v8948_v49  ;;  %v10313_v47 = vld [vmem:[%s11485_s19 + $0xf80] ss:$8 sps:$4 sm:$0xff]   ;;  %v4440_v48 = vld [vmem:[%s12595_s0 + $0x170] sm:$0xff]  ;;  %s8915_s19 = sshll.u32 %s4347_s30, 5  ;;  %s9507_s30 = sshll.u32 (%p10411_p6), %s10346_s14, 3 }
 0x2ee   : > { %v4456_v49 = vld [vmem:[%s12595_s0 + $0x1f0] sm:$0xff]  ;;  %s12564_s12 = scalar_lea.vmem [#allocation3], %s8915_s19  ;;  %s8758_s29 = scalar_lea.vmem (%p10411_p6), %s12598_s3, %s9507_s30 }
 0x2ef   : > { %8611 = vmatpush1.bf16.msra.mxu0 %v10238_v51  ;;  %8664 = vmatpush1.bf16.msra.mxu1 %v10241_v52  ;;  %v4441_v51 = vld [vmem:[%s12595_s0 + $0x178] sm:$0xff] }
 0x2f0   : > { %8612 = vmatprep.subr.bf16.mxu0 %v10246_v41  ;;  %8665 = vmatprep.subr.bf16.mxu1 %v10249_v44  ;;  %v4457_v52 = vld [vmem:[%s12595_s0 + $0x1f8] sm:$0xff]  ;;  %v8945_v41 = vcombine.low %v12262_v33, %v12267_v37  ;;  %v8947_v44 = vcombine.low %v12272_v39, %v12277_v38  ;;  %v12359_v37 = vpop.f32.mrf.mxu1 }
 0x2f2   : > { %v12363_v38 = vpop.f32.mrf.mxu1 }
 0x2f3   : > { %8613 = vmatpush1.bf16.msra.mxu0 %v10244_v45  ;;  %8666 = vmatpush1.bf16.msra.mxu1 %v10247_v53  ;;  %v8978_v45 = vcombine.high %v4440_v48, %v4456_v49  ;;  %v8980_v53 = vcombine.high %v4441_v51, %v4457_v52 }
 0x2f4   : > { %8614 = vmatprep.subr.bf16.mxu0 %v10252_v54  ;;  %8667 = vmatprep.subr.bf16.mxu1 %v10255_v61  ;;  %v8977_v54 = vcombine.low %v4440_v48, %v4456_v49  ;;  %v8979_v61 = vcombine.low %v4441_v51, %v4457_v52 }
 0x2f7   : > { %8615 = vmatpush1.bf16.msra.mxu0 %v10250_v56  ;;  %8668 = vmatpush1.bf16.msra.mxu1 %v10253_v57  ;;  %v12353_v56 = vpop.f32.mrf.mxu0 }
 0x2f8   : > { %8616 = vmatprep.subr.bf16.mxu0 %v10258_v26  ;;  %8669 = vmatprep.subr.bf16.mxu1 %v10261_v22  ;;  %v12367_v22 = vpop.f32.mrf.mxu1 }
 0x2f9   : > { %v12355_v57 = vpop.f32.mrf.mxu0 }
 0x2fb   : > { %8617 = vmatpush1.bf16.msra.mxu0 %v10256_v27  ;;  %8670 = vmatpush1.bf16.msra.mxu1 %v10259_v28  ;;  %v12357_v33 = vpop.f32.mrf.mxu0  ;;  %v12371_v28 = vpop.f32.mrf.mxu1 }
 0x2fc   : > { %8618 = vmatprep.subr.bf16.mxu0 %v10264_v60  ;;  %8671 = vmatprep.subr.bf16.mxu1 %v10267_v4 }
 0x2fd   : > { %v12361_v39 = vpop.f32.mrf.mxu0  ;;  %v12373_v60 = vpop.f32.mrf.mxu1 }
 0x2ff   : > { %8619 = vmatpush1.bf16.msra.mxu0 %v10262_v8  ;;  %8672 = vmatpush1.bf16.msra.mxu1 %v10265_v9  ;;  %v12365_v26 = vpop.f32.mrf.mxu0  ;;  %v12377_v8 = vpop.f32.mrf.mxu1 }
 0x300   : > { %8620 = vmatprep.subr.bf16.mxu0 %v10270_v10  ;;  %8673 = vmatprep.subr.bf16.mxu1 %v10273_v0 }
 0x301   : > { %v12369_v27 = vpop.f32.mrf.mxu0  ;;  %v12381_v0 = vpop.f32.mrf.mxu1 }
 0x303   : > { %8621 = vmatpush2.bf16.msra.mxu0 %v10268_v1  ;;  %8674 = vmatpush2.bf16.msra.mxu1 %v10271_v30  ;;  %v12375_v4 = vpop.f32.mrf.mxu0  ;;  %v12383_v30 = vpop.f32.mrf.mxu1 }
 0x304   : > { %8622 = vmatprep.subr.bf16.mxu0 %v10276_v14  ;;  %8675 = vmatprep.subr.bf16.mxu1 %v10279_v16 }
 0x305   : > { %v12379_v9 = vpop.f32.mrf.mxu0  ;;  %v12385_v14 = vpop.f32.mrf.mxu1 }
 0x307   : > { %8623 = vmatpush2.bf16.msra.mxu0 %v10274_v58  ;;  %8676 = vmatpush2.bf16.msra.mxu1 %v10277_v59  ;;  %v8214_v10 = vpop.f32.mrf.mxu0  ;;  %v12389_v58 = vpop.f32.mrf.mxu1 }
 0x308   : > { %8624 = vmatprep.subr.bf16.mxu0 %v10282_v62  ;;  %8677 = vmatprep.subr.bf16.mxu1 %v10285_v63 }
 0x309   : > { %v8216_v1 = vpop.f32.mrf.mxu0  ;;  %v12393_v62 = vpop.f32.mrf.mxu1 }
 0x30b   : > { %8625 = vmatpush2.bf16.msra.mxu0 %v10280_v17  ;;  %8678 = vmatpush2.bf16.msra.mxu1 %v10283_v19  ;;  %v12387_v16 = vpop.f32.mrf.mxu0  ;;  %v12397_v17 = vpop.f32.mrf.mxu1 }
 0x30c   : > { %8626 = vmatprep.subr.bf16.mxu0 %v10288_v20  ;;  %8679 = vmatprep.subr.bf16.mxu1 %v10291_v21 }
 0x30d   : > { %v12391_v59 = vpop.f32.mrf.mxu0  ;;  %v12401_v20 = vpop.f32.mrf.mxu1 }
 0x30f   : > { %8627 = vmatpush2.bf16.msra.mxu0 %v10286_v23  ;;  %8680 = vmatpush2.bf16.msra.mxu1 %v10289_v24  ;;  %v12395_v63 = vpop.f32.mrf.mxu0  ;;  %v12405_v23 = vpop.f32.mrf.mxu1 }
 0x310   : > { %8628 = vmatprep.subr.bf16.mxu0 %v10294_v15  ;;  %8681 = vmatprep.subr.bf16.mxu1 %v10297_v31 }
 0x311   : > { %v12399_v19 = vpop.f32.mrf.mxu0  ;;  %v12409_v15 = vpop.f32.mrf.mxu1 }
 0x313   : > { %8629 = vmatpush2.bf16.msra.mxu0 %v10292_v12  ;;  %8682 = vmatpush2.bf16.msra.mxu1 %v10295_v13  ;;  %v12403_v21 = vpop.f32.mrf.mxu0  ;;  %v12411_v12 = vpop.f32.mrf.mxu1 }
 0x314   : > { %8630 = vmatprep.subr.bf16.mxu0 %v10300_v25  ;;  %8683 = vmatprep.subr.bf16.mxu1 %v10303_v32  ;;  %12600 = vst [vmem:[#allocation4_spill] sm:$0xff] %v12411_v12 }
 0x315   : > { %v12407_v24 = vpop.f32.mrf.mxu0 }
 0x317   : > { %8631 = vmatpush2.bf16.msra.mxu0 %v10298_v3  ;;  %8684 = vmatpush2.bf16.msra.mxu1 %v10301_v2 }
 0x318   : > { %8632 = vmatprep.subr.bf16.mxu0 %v10306_v5  ;;  %8685 = vmatprep.subr.bf16.mxu1 %v10309_v6 }
 0x31b   : > { %8633 = vmatpush2.bf16.msra.mxu0 %v10304_v35  ;;  %8686 = vmatpush2.bf16.msra.mxu1 %v10307_v36 }
 0x31c   : > { %8634 = vmatprep.subr.bf16.mxu0 %v10312_v42  ;;  %8687 = vmatprep.subr.bf16.mxu1 %v10315_v43 }
 0x31f   : > { %8635 = vmatpush2.bf16.msra.mxu0 %v10310_v50  ;;  %8688 = vmatpush2.bf16.msra.mxu1 %v10313_v47 }
 0x322   : > { %8637 = vmatmul.mubr.bf16.vlgmr.msra.gmra.mxu0 %v8945_v41  ;;  %8690 = vmatmul.mubr.bf16.vlgmr.msra.gmra.mxu1 %v8947_v44  ;;  %v8320_v31 = vpop.f32.mrf.mxu0  ;;  %v12413_v25 = vpop.f32.mrf.mxu1 }
 0x323   : > { %8646 = vmatprep.mubr.bf16.mxu0 %v8978_v45  ;;  %8699 = vmatprep.mubr.bf16.mxu1 %v8980_v53 }
 0x324   : > { %v8322_v13 = vpop.f32.mrf.mxu0  ;;  %v12417_v3 = vpop.f32.mrf.mxu1 }
 0x326   : > { %v12415_v32 = vpop.f32.mrf.mxu0  ;;  %v12421_v5 = vpop.f32.mrf.mxu1 }
 0x328   : > { %v12419_v2 = vpop.f32.mrf.mxu0  ;;  %v12425_v35 = vpop.f32.mrf.mxu1 }
 0x32a   : > { %8647 = vmatmul.mubr.bf16.gmra.mxu0 %v8977_v54  ;;  %8700 = vmatmul.mubr.bf16.gmra.mxu1 %v8979_v61  ;;  %v12423_v6 = vpop.f32.mrf.mxu0  ;;  %v12429_v42 = vpop.f32.mrf.mxu1 }
 0x32b   : > { %12601 = vst [vmem:[#allocation5_spill] sm:$0xff] %v12429_v42 }
 0x32c   : > { %v12427_v36 = vpop.f32.mrf.mxu0  ;;  %v12433_v50 = vpop.f32.mrf.mxu1 }
 0x32d   : > { %12603 = vst [vmem:[#allocation7_spill] sm:$0xff] %v12433_v50 }
 0x32e   : > { %v12431_v43 = vpop.f32.mrf.mxu0  ;;  %v12437_v48 = vpop.f32.mrf.mxu1 }
 0x32f   : > { %12602 = vst [vmem:[#allocation6_spill] sm:$0xff] %v12431_v43  ;;  %12605 = vst [vmem:[#allocation9_spill] sm:$0xff] %v12437_v48 }
 0x330   : > { %v12435_v47 = vpop.f32.mrf.mxu0  ;;  %v12439_v51 = vpop.f32.mrf.mxu1 }
 0x331   : > { %12604 = vst [vmem:[#allocation8_spill] sm:$0xff] %v12435_v47  ;;  %12606 = vst [vmem:[#allocation10_spill] sm:$0xff] %v12439_v51 }
 0x362   : > { %v8426_v49 = vpop.f32.mrf.mxu0  ;;  %v12441_v52 = vpop.f32.mrf.mxu1 }
 0x364   : > { %v12443_v41 = vpop.f32.mrf.mxu0  ;;  %v12445_v44 = vpop.f32.mrf.mxu1 }
 0x365   : > { %12607 = vst [vmem:[#allocation11_spill] sm:$0xff] %v12445_v44 }
 0x366   : > { %v12447_v45 = vpop.f32.mrf.mxu0  ;;  %v12449_v53 = vpop.f32.mrf.mxu1 }
 0x367   : > { %12608 = vst [vmem:[#allocation12_spill] sm:$0xff] %v12449_v53 }
 0x368   : > { %v12451_v54 = vpop.f32.mrf.mxu0  ;;  %v12453_v61 = vpop.f32.mrf.mxu1 }
 0x369   : > { %12609 = vst [vmem:[#allocation13_spill] sm:$0xff] %v12453_v61  ;;  %v8109_v61 = vadd.f32 %v12353_v56, %v12028_v18  ;;  %v8119_v56 = vadd.f32 %v12365_v26, %v12073_v40  ;;  %v8123_v40 = vadd.f32 %v12375_v4, %v12083_v7 }
 0x36a   : > { %v12455_v47 = vpop.f32.mrf.mxu0  ;;  %v12457_v48 = vpop.f32.mrf.mxu1 }
 0x36b   : > { %12610 = vst [vmem:[#allocation14_spill] sm:$0xff] %v12455_v47  ;;  %12611 = vst [vmem:[#allocation15_spill] sm:$0xff] %v12457_v48  ;;  %v8111_v48 = vadd.f32 %v12355_v57, %v12053_v29  ;;  %v8176_v7 = vadd.f32 %v12381_v0, %v8123_v40 }
 0x36c   : > { %v12459_v50 = vpop.f32.mrf.mxu0  ;;  %v12461_v51 = vpop.f32.mrf.mxu1 }
 0x36d   : > { %12612 = vst [vmem:[#allocation16_spill] sm:$0xff] %v12459_v50  ;;  %12613 = vst [vmem:[#allocation17_spill] sm:$0xff] %v12461_v51  ;;  %v8162_v51 = vadd.f32 %v12359_v37, %v8109_v61  ;;  %v8121_v37 = vadd.f32 %v12369_v27, %v12078_v55  ;;  %v8125_v27 = vadd.f32 %v12379_v9, %v12085_v11 }
 0x36e   : > { %v12463_v43 = vpop.f32.mrf.mxu0  ;;  %v12465_v42 = vpop.f32.mrf.mxu1 }
 0x36f   : > { %12614 = vst [vmem:[#allocation18_spill] sm:$0xff] %v12463_v43  ;;  %12615 = vst [vmem:[#allocation19_spill] sm:$0xff] %v12465_v42  ;;  %v8113_v42 = vadd.f32 %v12357_v33, %v12058_v34  ;;  %v8115_v43 = vadd.f32 %v12361_v39, %v12067_v46  ;;  %v8215_v18 = vadd.f32 %v8214_v10, %v8162_v51  ;;  %v12621_v51 = vld [vmem:[#allocation6_spill] sm:$0xff] }
 0x370   : > { %v12467_v44 = vpop.f32.mrf.mxu0  ;;  %v12469_v12 = vpop.f32.mrf.mxu1  ;;  %v8172_v39 = vadd.f32 %v12373_v60, %v8119_v56  ;;  %v8174_v55 = vadd.f32 %v12377_v8, %v8121_v37  ;;  %v8178_v9 = vadd.f32 %v12383_v30, %v8125_v27  ;;  %v12622_v56 = vld [vmem:[#allocation11_spill] sm:$0xff]  ;;  %v12629_v27 = vld [vmem:[#allocation13_spill] sm:$0xff] }
 0x371   : > { %12616 = vst [vmem:[#allocation20_spill] sm:$0xff] %v12467_v44  ;;  %12617 = vst [vmem:[#allocation21_spill] sm:$0xff] %v12469_v12  ;;  %v8164_v12 = vadd.f32 %v12363_v38, %v8111_v48  ;;  %v8166_v29 = vadd.f32 %v12367_v22, %v8113_v42  ;;  %v8168_v33 = vadd.f32 %v12371_v28, %v8115_v43  ;;  %v12619_v48 = vld [vmem:[#allocation4_spill] sm:$0xff] }
 0x372   : > { %v8268_v38 = vadd.f32 %v12385_v14, %v8215_v18  ;;  %v8225_v28 = vadd.f32 %v12395_v63, %v8172_v39  ;;  %v8227_v4 = vadd.f32 %v12399_v19, %v8174_v55  ;;  %v8231_v42 = vadd.f32 %v12407_v24, %v8178_v9  ;;  %v12625_v37 = vld [vmem:[#allocation14_spill] sm:$0xff]  ;;  %v12627_v39 = vld [vmem:[#allocation9_spill] sm:$0xff] }
 0x373   : > { %v8217_v57 = vadd.f32 %v8216_v1, %v8164_v12  ;;  %v8219_v46 = vadd.f32 %v12387_v16, %v8166_v29  ;;  %v8221_v10 = vadd.f32 %v12391_v59, %v8168_v33  ;;  %v12623_v29 = vld [vmem:[#allocation7_spill] sm:$0xff]  ;;  %v12626_v33 = vld [vmem:[#allocation12_spill] sm:$0xff] }
 0x374   : > { %v8321_v1 = vadd.f32 %v8320_v31, %v8268_v38  ;;  %v8278_v63 = vadd.f32 %v12401_v20, %v8225_v28  ;;  %v8284_v24 = vadd.f32 %v12619_v48, %v8231_v42 }
 0x375   : > { %v8270_v22 = vadd.f32 %v12389_v58, %v8217_v57  ;;  %v8272_v60 = vadd.f32 %v12393_v62, %v8219_v46  ;;  %v8274_v59 = vadd.f32 %v12397_v17, %v8221_v10  ;;  %v8229_v62 = vadd.f32 %v12403_v21, %v8176_v7  ;;  %v12624_v57 = vld [vmem:[#allocation8_spill] sm:$0xff] }
 0x376   : > { %v8374_v8 = vadd.f32 %v12413_v25, %v8321_v1  ;;  %v8331_v17 = vadd.f32 %v12423_v6, %v8278_v63 }
 0x377   : > { %v8323_v16 = vadd.f32 %v8322_v13, %v8270_v22  ;;  %v8325_v11 = vadd.f32 %v12415_v32, %v8272_v60  ;;  %v8327_v0 = vadd.f32 %v12419_v2, %v8274_v59  ;;  %v8280_v13 = vadd.f32 %v12405_v23, %v8227_v4  ;;  %v12628_v22 = vld [vmem:[#allocation16_spill] sm:$0xff]  ;;  %v12632_v4 = vld [vmem:[#allocation15_spill] sm:$0xff] }
 0x378   : > { %v8427_v19 = vadd.f32 %v8426_v49, %v8374_v8  ;;  %v8282_v20 = vadd.f32 %v12409_v15, %v8229_v62  ;;  %v12620_v49 = vld [vmem:[#allocation5_spill] sm:$0xff]  ;;  %v12633_v8 = vld [vmem:[#allocation18_spill] sm:$0xff] }
 0x379   : > { %v8376_v31 = vadd.f32 %v12417_v3, %v8323_v16  ;;  %v8378_v32 = vadd.f32 %v12421_v5, %v8325_v11  ;;  %v8333_v21 = vadd.f32 %v12427_v36, %v8280_v13  ;;  %v8380_v3 = vadd.f32 %v12425_v35, %v8327_v0  ;;  %v12631_v16 = vld [vmem:[#allocation10_spill] sm:$0xff]  ;;  %v12634_v0 = vld [vmem:[#allocation17_spill] sm:$0xff]  ;;  %v12635_v13 = vld [vmem:[#allocation20_spill] sm:$0xff] }
 0x37a   : > { %v8480_v2 = vadd.f32 %v12441_v52, %v8427_v19  ;;  %v8384_v6 = vadd.f32 %v12620_v49, %v8331_v17  ;;  %v8335_v61 = vadd.f32 %v12621_v51, %v8282_v20  ;;  %v8337_v52 = vadd.f32 %v12624_v57, %v8284_v24 }
 0x37b   : > { %v8429_v30 = vadd.f32 %v12443_v41, %v8376_v31  ;;  %v8431_v23 = vadd.f32 %v12447_v45, %v8378_v32  ;;  %v8433_v15 = vadd.f32 %v12451_v54, %v8380_v3  ;;  %v8386_v35 = vadd.f32 %v12623_v29, %v8333_v21  ;;  %v12636_v3 = vld [vmem:[#allocation19_spill] sm:$0xff] }
 0x37c   : > { %v8437_v45 = vadd.f32 %v12625_v37, %v8384_v6  ;;  %v8388_v40 = vadd.f32 %v12627_v39, %v8335_v61  ;;  %v8390_v7 = vadd.f32 %v12631_v16, %v8337_v52  ;;  %v12637_v6 = vld [vmem:[#allocation21_spill] sm:$0xff] }
 0x37d   : > { %v8482_v41 = vadd.f32 %v12622_v56, %v8429_v30  ;;  %v8484_v38 = vadd.f32 %v12626_v33, %v8431_v23  ;;  %v8439_v10 = vadd.f32 %v12628_v22, %v8386_v35  ;;  %v8486_v54 = vadd.f32 %v12629_v27, %v8433_v15 }
 0x37e   : > { %v8490_v59 = vadd.f32 %v12632_v4, %v8437_v45  ;;  %v8441_v11 = vadd.f32 %v12633_v8, %v8388_v40  ;;  %v8443_v42 = vadd.f32 %v12635_v13, %v8390_v7 }
 0x37f   : > { %v8492_v19 = vadd.f32 %v12634_v0, %v8439_v10 }
 0x380   : > { %v8496_v51 = vadd.f32 %v12637_v6, %v8443_v42 }
 0x3a2   : > { %v12471_v53 = vpop.f32.mrf.mxu0  ;;  %v12475_v47 = vpop.f32.mrf.mxu1 }
 0x3a3   : > { %12618 = vst [vmem:[#allocation22_spill] sm:$0xff] %v12475_v47  ;;  %v8533_v36 = vadd.f32 %v12471_v53, %v8480_v2  ;;  %v8494_v2 = vadd.f32 %v12636_v3, %v8441_v11 }
 0x3a4   : > { %v12479_v50 = vpop.f32.mrf.mxu0  ;;  %v12484_v44 = vpop.f32.mrf.mxu1 }
 0x3a5   : > { %v8535_v46 = vadd.f32 %v12479_v50, %v8482_v41 }
 0x3a6   : > { %v12491_v47 = vpop.f32.mrf.mxu0  ;;  %v12496_v34 = vpop.f32.mrf.mxu1 }
 0x3a7   : > { %v8537_v60 = vadd.f32 %v12491_v47, %v8484_v38  ;;  %v8588_v63 = vadd.f32 %v12484_v44, %v8535_v46 }
 0x3a8   : > { %v8538_v26 = vpop.f32.mrf.mxu0  ;;  %v12510_v14 = vpop.f32.mrf.mxu1 }
 0x3a9   : > { %v8539_v62 = vadd.f32 %v8538_v26, %v8486_v54  ;;  %v8590_v30 = vadd.f32 %v12496_v34, %v8537_v60 }
 0x3aa   : > { %v8542_v58 = vpop.f32.mrf.mxu0  ;;  %v12515_v12 = vpop.f32.mrf.mxu1  ;;  %v12630_v28 = vld [vmem:[#allocation22_spill] sm:$0xff] }
 0x3ab   : > { %v8586_v53 = vadd.f32 %v12630_v28, %v8533_v36  ;;  %v8543_v17 = vadd.f32 %v8542_v58, %v8490_v59  ;;  %v8592_v44 = vadd.f32 %v12510_v14, %v8539_v62 }
 0x3ac   : > { %v8544_v25 = vpop.f32.mrf.mxu0  ;;  %v8597_v43 = vpop.f32.mrf.mxu1 }
 0x3ad   : > { %v8545_v23 = vadd.f32 %v8544_v25, %v8492_v19  ;;  %v8596_v58 = vadd.f32 %v12515_v12, %v8543_v17 }
 0x3ae   : > { %v8546_v18 = vpop.f32.mrf.mxu0  ;;  %v8599_v5 = vpop.f32.mrf.mxu1 }
 0x3af   : > { %v8547_v61 = vadd.f32 %v8546_v18, %v8494_v2  ;;  %v8598_v25 = vadd.f32 %v8597_v43, %v8545_v23 }
 0x3b0   : > { %v8548_v1 = vpop.f32.mrf.mxu0  ;;  %v8601_v55 = vpop.f32.mrf.mxu1 }
 0x3b1   : > { %v8549_v52 = vadd.f32 %v8548_v1, %v8496_v51  ;;  %v8600_v33 = vadd.f32 %v8599_v5, %v8547_v61 }
 0x3b3   : > { %v8602_v10 = vadd.f32 %v8601_v55, %v8549_v52 }
 0x3e2   : > { %v8638_v9 = vpop.f32.mrf.mxu0  ;;  %v8691_v50 = vpop.f32.mrf.mxu1 }
 0x3e3   : > { %v8639_v31 = vadd.f32 %v8638_v9, %v8586_v53 }
 0x3e4   : > { %v8640_v32 = vpop.f32.mrf.mxu0  ;;  %v8693_v47 = vpop.f32.mrf.mxu1 }
 0x3e5   : > { %v8692_v20 = vadd.f32 %v8691_v50, %v8639_v31  ;;  %v8641_v21 = vadd.f32 %v8640_v32, %v8588_v63 }
 0x3e6   : > { %v8642_v48 = vpop.f32.mrf.mxu0  ;;  %v8695_v24 = vpop.f32.mrf.mxu1 }
 0x3e7   : > { %v8694_v26 = vadd.f32 %v8693_v47, %v8641_v21  ;;  %v8643_v49 = vadd.f32 %v8642_v48, %v8590_v30  ;;  %v8710_v41 = vmax.f32 %v8692_v20, 0.0 }
 0x3e8   : > { %v8644_v56 = vpop.f32.mrf.mxu0  ;;  %v8697_v34 = vpop.f32.mrf.mxu1 }
 0x3e9   : > { %v8711_v15 = vmax.f32 %v8694_v26, 0.0  ;;  %v8696_v36 = vadd.f32 %v8695_v24, %v8643_v49  ;;  %v8645_v29 = vadd.f32 %v8644_v56, %v8592_v44 }
 0x3ea   : > { %v8648_v35 = vpop.f32.mrf.mxu0  ;;  %v8701_v57 = vpop.f32.mrf.mxu1 }
 0x3eb   : > { %v9503_v14 = vpack.c.bf16 %v8711_v15, %v8710_v41  ;;  %v8698_v37 = vadd.f32 %v8697_v34, %v8645_v29  ;;  %v8649_v45 = vadd.f32 %v8648_v35, %v8596_v58  ;;  %v8712_v12 = vmax.f32 %v8696_v36, 0.0 }
 0x3ec   : > { %v8650_v38 = vpop.f32.mrf.mxu0  ;;  %v8703_v46 = vpop.f32.mrf.mxu1 }
 0x3ed   : > { %8742 = vst [vmem:[%s12564_s12] sm:$0xff] %v9503_v14  ;;  %v8713_v18 = vmax.f32 %v8698_v37, 0.0  ;;  %v8702_v39 = vadd.f32 %v8701_v57, %v8649_v45  ;;  %v8651_v40 = vadd.f32 %v8650_v38, %v8598_v25 }
 0x3ee   : > { %v8652_v43 = vpop.f32.mrf.mxu0  ;;  %v8705_v22 = vpop.f32.mrf.mxu1 }
 0x3ef   : > { %v9504_v1 = vpack.c.bf16 %v8713_v18, %v8712_v12  ;;  %v8704_v27 = vadd.f32 %v8703_v46, %v8651_v40  ;;  %v8653_v54 = vadd.f32 %v8652_v43, %v8600_v33  ;;  %v8714_v28 = vmax.f32 %v8702_v39, 0.0 }
 0x3f0   : > { %v8654_v5 = vpop.f32.mrf.mxu0  ;;  %v8707_v7 = vpop.f32.mrf.mxu1 }
 0x3f1   : > { %8743 = vst [vmem:[%s12564_s12 + $0x8] sm:$0xff] %v9504_v1  ;;  %v8715_v53 = vmax.f32 %v8704_v27, 0.0  ;;  %v8706_v60 = vadd.f32 %v8705_v22, %v8653_v54  ;;  %v8655_v16 = vadd.f32 %v8654_v5, %v8602_v10 }
 0x3f3   : > { %v9505_v4 = vpack.c.bf16 %v8715_v53, %v8714_v28  ;;  %v8708_v59 = vadd.f32 %v8707_v7, %v8655_v16  ;;  %v8716_v8 = vmax.f32 %v8706_v60, 0.0 }
 0x3f4   : > { %v8793_v55 = vld [vmem:[%s12564_s12] sm:$0xff] (%p10411_p6) }
 0x3f5   : > { %8744 = vst [vmem:[%s12564_s12 + $0x10] sm:$0xff] %v9505_v4  ;;  %v8717_v11 = vmax.f32 %v8708_v59, 0.0  ;;  %8752 = sbr.rel (!%p10411_p6) target bundleno = 1026 (0x402), region = 88  ;;  %8794 = vst [vmem:[%s8758_s29] sm:$0xff] (%p10411_p6), %v8793_v55 }
 0x3f7   : > { %v9506_v9 = vpack.c.bf16 %v8717_v11, %v8716_v8 }
 0x3f8   : > { %v8795_v50 = vld [vmem:[%s12564_s12 + $0x8] sm:$0xff] (%p10411_p6) }
 0x3f9   : > { %8745 = vst [vmem:[%s12564_s12 + $0x18] sm:$0xff] %v9506_v9  ;;  %8796 = vst [vmem:[%s8758_s29 + $0x10] sm:$0xff] (%p10411_p6), %v8795_v50 }
 0x3fc   : > { %v8797_v63 = vld [vmem:[%s12564_s12 + $0x10] sm:$0xff] }
 0x3fd   : > { %8798 = vst [vmem:[%s8758_s29 + $0x20] sm:$0xff] %v8797_v63 }
 0x400   : > { %v8799_v62 = vld [vmem:[%s12564_s12 + $0x18] sm:$0xff] }
 0x401   : > { %8800 = vst [vmem:[%s8758_s29 + $0x30] sm:$0xff] %v8799_v62 }
 0x402 PF: > { %s13_s16 = sadd.s32 1, %s10354_s16   ;;  %s12638_s12 = smov %s10342_s13 }
 0x403   : > { %p10_p12 = scmp.ge.s32.totalorder %s13_s16, 4   ;;  %s12639_s13 = smov %s10416_s22 }
 0x404   : > { %s12640_s14 = smov %s10350_s15  ;;  %s12641_s15 = smov %s12643_s17 }
 0x405   :  { %12 = sbr.rel (!%p10_p12) target bundleno = 3 (0x3), region = 169 }

</bundles_post_ra>
